<compile_context>
chip_gen: v7x
topology: tpu7x:2x2x1
jax: 0.10.0
libtpu: 0.0.40
codegen_flags: <defaults>
</compile_context>

<pallas_src>
import functools

import jax
import jax.numpy as jnp
from jax.experimental import pallas as pl
from jax.experimental.pallas import tpu as pltpu

_HIGHEST = jax.lax.Precision.HIGHEST


def _slicing_kernel(g_ref, gx_ref, ky_ref, o_ref, wz_ref, *, depth, tile_c):
    """One (batch, column-tile, row-tile) block.

    g_ref  : (TR, TC)          guidance values (f32) for this pixel tile
    gx_ref : (C, H, D*TC)      x-interpolated grid for this (batch, column tile);
                               resident across row tiles
    ky_ref : (TR, H)           y bilinear tent weights for this row tile
    o_ref  : (C, TR, TC)       sliced affine coefficients (f32)
    wz_ref : (D, TR, TC) VMEM  scratch holding the depth tent weights of this tile
    """
    f32 = jnp.float32
    g = g_ref[...].astype(f32)
    # unnormalize z (align_corners=True): iz = (z + 1)/2 * (D - 1)
    iz = (g + 1.0) * (0.5 * (depth - 1))
    # depth tent weights == trilinear z weights with 'zeros' padding
    # (they vanish for out-of-range iz, matching grid_sample's zero padding).
    for dd in range(depth):
        wz_ref[dd] = jnp.maximum(1.0 - jnp.abs(iz - float(dd)), 0.0)

    ky = ky_ref[...]
    n_chan = o_ref.shape[0]
    for c in range(n_chan):
        # one well-shaped MXU matmul per channel:
        #   (TR, H) @ (H, D*TC) -> (TR, D*TC)   (y-interp of every depth at once)
        yx = jnp.dot(ky, gx_ref[c], preferred_element_type=f32)
        # z tent-weighted accumulation on the VPU; depth slices are lane-aligned
        # (TC multiple of 128), so slicing is free vreg selection.
        acc = wz_ref[0] * yx[:, :tile_c]
        for dd in range(1, depth):
            acc = acc + wz_ref[dd] * yx[:, dd * tile_c:(dd + 1) * tile_c]
        o_ref[c] = acc.astype(o_ref.dtype)


def _interp_matrices(gh, gw, h, w):
    """Dense bilinear (tent) interpolation matrices for align_corners=True."""
    f32 = jnp.float32
    # pixel index -> grid coordinate; guard gh/gw == 1 (PyTorch would produce NaN here)
    iy = jnp.arange(gh, dtype=f32) * ((h - 1) / max(gh - 1, 1))
    ix = jnp.arange(gw, dtype=f32) * ((w - 1) / max(gw - 1, 1))
    ky = jnp.maximum(1.0 - jnp.abs(iy[:, None] - jnp.arange(h, dtype=f32)[None, :]), 0.0)   # (gh, H)
    kxt = jnp.maximum(1.0 - jnp.abs(jnp.arange(w, dtype=f32)[:, None] - ix[None, :]), 0.0)  # (W, gw)
    return ky, kxt


def _pick_tile(extent, target, quantum):
    """Largest divisor of `extent` that is <= target and a multiple of `quantum`
    (falls back to the full extent, which always satisfies the (8,128) rule)."""
    for cand in range(min(target, extent), 0, -1):
        if extent % cand == 0 and (cand % quantum == 0 or cand == extent):
            return cand
    return extent


@functools.partial(jax.jit, static_argnames=("tile_r", "tile_c", "compute_dtype"))
def slicing_layer(bilateral_grid, guidance_map, *, tile_r=128, tile_c=512,
                  compute_dtype=jnp.float32):
    """bilateral_grid: (N, 12, D, H, W), guidance_map: (N, 1, gh, gw) -> (N, 12, gh, gw)."""
    n, n_chan, d, h, w = bilateral_grid.shape
    nb, gc, gh, gw = guidance_map.shape
    assert n == nb and gc == 1

    tile_r = _pick_tile(gh, tile_r, 8)      # rows:    multiple of 8 (or full)
    tile_c = _pick_tile(gw, tile_c, 128)    # columns: multiple of 128 (or full)
    n_rt = gh // tile_r
    n_ct = gw // tile_c

    f32 = jnp.float32
    ky, kxt = _interp_matrices(gh, gw, h, w)

    # --- x-interp hoisted to XLA (data-independent; done once, not per row tile) ---
    #   gx[n, c, h, dd, x] = sum_w grid[n, c, dd, h, w] * kxt[w, x]
    gx = jnp.einsum('ncdhw,wj->nchdj', bilateral_grid.astype(f32), kxt,
                    precision=_HIGHEST)                           # (N, C, H, D, gw)
    # Pre-split column tiles so every kernel block is a contiguous 2-D (H, D*TC)
    # matmul operand (no in-kernel reshape/relayout).
    gx = gx.reshape(n, n_chan, h, d, n_ct, tile_c)
    gx = gx.transpose(0, 4, 1, 2, 3, 5).reshape(n, n_ct, n_chan, h, d * tile_c)
    gx = gx.astype(compute_dtype)
    ky = ky.astype(compute_dtype)

    guide = guidance_map.astype(f32).reshape(n, gh, gw)

    kernel = functools.partial(_slicing_kernel, depth=d, tile_c=tile_c)

    # explicit VMEM budget (double-buffered blocks + scratch + intermediates + slack)
    isz = jnp.dtype(compute_dtype).itemsize
    est_vmem = (2 * (tile_r * tile_c * 4                  # guide blocks
                     + n_chan * h * d * tile_c * isz      # gx blocks
                     + tile_r * h * isz                   # ky blocks
                     + n_chan * tile_r * tile_c * 4)      # output blocks
                + d * tile_r * tile_c * 4                 # wz scratch
                + 2 * tile_r * d * tile_c * 4             # yx intermediate / acc
                + (4 << 20))                              # headroom
    vmem_limit = int(min(max(est_vmem, 32 << 20), 60 << 20))   # stay under v7x's 64 MiB

    out = pl.pallas_call(
        kernel,
        out_shape=jax.ShapeDtypeStruct((n, n_chan, gh, gw), f32),
        grid_spec=pltpu.PrefetchScalarGridSpec(
            num_scalar_prefetch=0,
            # row tiles innermost ("arbitrary") -> gx block index unchanged across
            # row tiles, so the x-interpolated grid is not re-DMA'd per row tile.
            grid=(n, n_ct, n_rt),
            in_specs=[
                # guidance tile: pixels lane-dense
                pl.BlockSpec((None, tile_r, tile_c), lambda b, j, i: (b, i, j)),
                # x-interpolated grid for this (batch, column tile)
                pl.BlockSpec((None, None, n_chan, h, d * tile_c),
                             lambda b, j, i: (b, j, 0, 0, 0)),
                # y-interp tent weights for this row tile
                pl.BlockSpec((tile_r, h), lambda b, j, i: (i, 0)),
            ],
            out_specs=pl.BlockSpec((None, n_chan, tile_r, tile_c),
                                   lambda b, j, i: (b, 0, i, j)),
            scratch_shapes=[pltpu.VMEM((d, tile_r, tile_c), f32)],
        ),
        compiler_params=pltpu.CompilerParams(
            dimension_semantics=("parallel", "parallel", "arbitrary"),
            vmem_limit_bytes=vmem_limit),
    )(guide, gx, ky)
    return out


def slicing_reference(bilateral_grid, guidance_map):
    """Pure-JAX reference of the same trilinear slicing (zeros padding, align_corners=True)."""
    n, c, d, h, w = bilateral_grid.shape
    _, _, gh, gw = guidance_map.shape
    f32 = jnp.float32
    ky, kxt = _interp_matrices(gh, gw, h, w)
    iz = (guidance_map[:, 0].astype(f32) + 1.0) * 0.5 * (d - 1)                      # (N, gh, gw)
    wz = jnp.maximum(
        1.0 - jnp.abs(iz[:, None] - jnp.arange(d, dtype=f32)[None, :, None, None]), 0.0)  # (N, D, gh, gw)
    gx = jnp.einsum('bcdhw,wj->bcdhj', bilateral_grid.astype(f32), kxt, precision=_HIGHEST)
    gxy = jnp.einsum('ih,bcdhj->bcdij', ky, gx, precision=_HIGHEST)
    return jnp.einsum('bdij,bcdij->bcij', wz, gxy, precision=_HIGHEST)


if __name__ == "__main__":
    key = jax.random.PRNGKey(0)
    k1, k2 = jax.random.split(key)

    # bilateral grid: (batch, 12 affine coeffs, depth, grid_h, grid_w)
    N, C, D, H, W = 2, 12, 8, 16, 16
    # guidance map: (batch, 1, full-res rows, full-res cols)
    GH, GW = 32, 256

    bilateral_grid = jax.random.normal(k1, (N, C, D, H, W), jnp.float32)
    # guidance values ~ normalized z; include out-of-range values to exercise the
    # zeros-padding path of grid_sample.
    guidance_map = jax.random.uniform(k2, (N, 1, GH, GW), jnp.float32, -1.2, 1.2)

    ref = slicing_reference(bilateral_grid, guidance_map)

    # default f32 path (matches PyTorch f32 semantics)
    out = slicing_layer(bilateral_grid, guidance_map)
    jax.block_until_ready(out)
    assert out.shape == (N, C, GH, GW)
    assert jnp.allclose(out, ref, atol=1e-4, rtol=1e-4), float(jnp.max(jnp.abs(out - ref)))

    # bf16 MXU-operand path (smaller VMEM footprint / faster MXU); f32 accumulation,
    # so it stays within bf16-operand tolerance of the f32 reference.
    out_bf16 = slicing_layer(bilateral_grid, guidance_map, compute_dtype=jnp.bfloat16)
    jax.block_until_ready(out_bf16)
    assert jnp.allclose(out_bf16, ref, atol=5e-2, rtol=5e-2), \
        float(jnp.max(jnp.abs(out_bf16 - ref)))

    print("KERNEL_OK")
</pallas_src>

<mosaic_0001>
module attributes {stable_mosaic.version = 11 : i64} {
  func.func @_slicing_kernel(%arg0: i32, %arg1: i32, %arg2: i32, %arg3: memref<1x32x256xf32, #tpu.memory_space<vmem>>, %arg4: memref<1x1x12x16x2048xf32, #tpu.memory_space<vmem>>, %arg5: memref<32x16xf32, #tpu.memory_space<vmem>>, %arg6: memref<1x12x32x256xf32, #tpu.memory_space<vmem>>, %arg7: memref<8x32x256xf32, #tpu.memory_space<vmem>>) attributes {dimension_semantics = [#tpu.dimension_semantics<parallel>, #tpu.dimension_semantics<parallel>, #tpu.dimension_semantics<arbitrary>], iteration_bounds = array<i64: 2, 1, 1>, scalar_prefetch = 0 : i64, scratch_operands = 1 : i64, tpu.core_type = #tpu.core_type<tc>, window_params = [{transform_indices = @transform_0, window_bounds = array<i64: 1, 32, 256>}, {transform_indices = @transform_1, window_bounds = array<i64: 1, 1, 12, 16, 2048>}, {transform_indices = @transform_2, window_bounds = array<i64: 32, 16>}, {transform_indices = @transform_3, window_bounds = array<i64: 1, 12, 32, 256>}]} {
    %c0 = arith.constant 0 : index
    %c0_0 = arith.constant 0 : index
    %c0_1 = arith.constant 0 : index
    %0 = vector.load %arg3[%c0, %c0_0, %c0_1] : memref<1x32x256xf32, #tpu.memory_space<vmem>>, vector<1x32x256xf32>
    %1 = vector.shape_cast %0 : vector<1x32x256xf32> to vector<32x256xf32>
    %cst = arith.constant 1.000000e+00 : f32
    %2 = vector.broadcast %cst : f32 to vector<32x256xf32>
    %3 = arith.addf %1, %2 : vector<32x256xf32>
    %cst_2 = arith.constant 3.500000e+00 : f32
    %4 = vector.broadcast %cst_2 : f32 to vector<32x256xf32>
    %5 = arith.mulf %3, %4 : vector<32x256xf32>
    %cst_3 = arith.constant 0.000000e+00 : f32
    %6 = vector.broadcast %cst_3 : f32 to vector<32x256xf32>
    %7 = arith.subf %5, %6 : vector<32x256xf32>
    %8 = math.absf %7 : vector<32x256xf32>
    %cst_4 = arith.constant 1.000000e+00 : f32
    %9 = vector.broadcast %cst_4 : f32 to vector<32x256xf32>
    %10 = arith.subf %9, %8 : vector<32x256xf32>
    %cst_5 = arith.constant 0.000000e+00 : f32
    %11 = vector.broadcast %cst_5 : f32 to vector<32x256xf32>
    %12 = arith.maximumf %10, %11 : vector<32x256xf32>
    %c0_6 = arith.constant 0 : index
    %c0_7 = arith.constant 0 : index
    %c0_8 = arith.constant 0 : index
    %13 = vector.load %arg7[%c0_6, %c0_7, %c0_8] : memref<8x32x256xf32, #tpu.memory_space<vmem>>, vector<1x32x256xf32>
    %14 = vector.shape_cast %13 : vector<1x32x256xf32> to vector<32x256xf32>
    %15 = vector.shape_cast %12 : vector<32x256xf32> to vector<1x32x256xf32>
    tpu.vector_store %arg7[%c0_6, %c0_7, %c0_8], %15 {strides = array<i32>} : memref<8x32x256xf32, #tpu.memory_space<vmem>>, vector<1x32x256xf32>,
    %cst_9 = arith.constant 1.000000e+00 : f32
    %16 = vector.broadcast %cst_9 : f32 to vector<32x256xf32>
    %17 = arith.subf %5, %16 : vector<32x256xf32>
    %18 = math.absf %17 : vector<32x256xf32>
    %cst_10 = arith.constant 1.000000e+00 : f32
    %19 = vector.broadcast %cst_10 : f32 to vector<32x256xf32>
    %20 = arith.subf %19, %18 : vector<32x256xf32>
    %cst_11 = arith.constant 0.000000e+00 : f32
    %21 = vector.broadcast %cst_11 : f32 to vector<32x256xf32>
    %22 = arith.maximumf %20, %21 : vector<32x256xf32>
    %c1 = arith.constant 1 : index
    %c0_12 = arith.constant 0 : index
    %c0_13 = arith.constant 0 : index
    %23 = vector.load %arg7[%c1, %c0_12, %c0_13] : memref<8x32x256xf32, #tpu.memory_space<vmem>>, vector<1x32x256xf32>
    %24 = vector.shape_cast %23 : vector<1x32x256xf32> to vector<32x256xf32>
    %25 = vector.shape_cast %22 : vector<32x256xf32> to vector<1x32x256xf32>
    tpu.vector_store %arg7[%c1, %c0_12, %c0_13], %25 {strides = array<i32>} : memref<8x32x256xf32, #tpu.memory_space<vmem>>, vector<1x32x256xf32>,
    %cst_14 = arith.constant 2.000000e+00 : f32
    %26 = vector.broadcast %cst_14 : f32 to vector<32x256xf32>
    %27 = arith.subf %5, %26 : vector<32x256xf32>
    %28 = math.absf %27 : vector<32x256xf32>
    %cst_15 = arith.constant 1.000000e+00 : f32
    %29 = vector.broadcast %cst_15 : f32 to vector<32x256xf32>
    %30 = arith.subf %29, %28 : vector<32x256xf32>
    %cst_16 = arith.constant 0.000000e+00 : f32
    %31 = vector.broadcast %cst_16 : f32 to vector<32x256xf32>
    %32 = arith.maximumf %30, %31 : vector<32x256xf32>
    %c2 = arith.constant 2 : index
    %c0_17 = arith.constant 0 : index
    %c0_18 = arith.constant 0 : index
    %33 = vector.load %arg7[%c2, %c0_17, %c0_18] : memref<8x32x256xf32, #tpu.memory_space<vmem>>, vector<1x32x256xf32>
    %34 = vector.shape_cast %33 : vector<1x32x256xf32> to vector<32x256xf32>
    %35 = vector.shape_cast %32 : vector<32x256xf32> to vector<1x32x256xf32>
    tpu.vector_store %arg7[%c2, %c0_17, %c0_18], %35 {strides = array<i32>} : memref<8x32x256xf32, #tpu.memory_space<vmem>>, vector<1x32x256xf32>,
    %cst_19 = arith.constant 3.000000e+00 : f32
    %36 = vector.broadcast %cst_19 : f32 to vector<32x256xf32>
    %37 = arith.subf %5, %36 : vector<32x256xf32>
    %38 = math.absf %37 : vector<32x256xf32>
    %cst_20 = arith.constant 1.000000e+00 : f32
    %39 = vector.broadcast %cst_20 : f32 to vector<32x256xf32>
    %40 = arith.subf %39, %38 : vector<32x256xf32>
    %cst_21 = arith.constant 0.000000e+00 : f32
    %41 = vector.broadcast %cst_21 : f32 to vector<32x256xf32>
    %42 = arith.maximumf %40, %41 : vector<32x256xf32>
    %c3 = arith.constant 3 : index
    %c0_22 = arith.constant 0 : index
    %c0_23 = arith.constant 0 : index
    %43 = vector.load %arg7[%c3, %c0_22, %c0_23] : memref<8x32x256xf32, #tpu.memory_space<vmem>>, vector<1x32x256xf32>
    %44 = vector.shape_cast %43 : vector<1x32x256xf32> to vector<32x256xf32>
    %45 = vector.shape_cast %42 : vector<32x256xf32> to vector<1x32x256xf32>
    tpu.vector_store %arg7[%c3, %c0_22, %c0_23], %45 {strides = array<i32>} : memref<8x32x256xf32, #tpu.memory_space<vmem>>, vector<1x32x256xf32>,
    %cst_24 = arith.constant 4.000000e+00 : f32
    %46 = vector.broadcast %cst_24 : f32 to vector<32x256xf32>
    %47 = arith.subf %5, %46 : vector<32x256xf32>
    %48 = math.absf %47 : vector<32x256xf32>
    %cst_25 = arith.constant 1.000000e+00 : f32
    %49 = vector.broadcast %cst_25 : f32 to vector<32x256xf32>
    %50 = arith.subf %49, %48 : vector<32x256xf32>
    %cst_26 = arith.constant 0.000000e+00 : f32
    %51 = vector.broadcast %cst_26 : f32 to vector<32x256xf32>
    %52 = arith.maximumf %50, %51 : vector<32x256xf32>
    %c4 = arith.constant 4 : index
    %c0_27 = arith.constant 0 : index
    %c0_28 = arith.constant 0 : index
    %53 = vector.load %arg7[%c4, %c0_27, %c0_28] : memref<8x32x256xf32, #tpu.memory_space<vmem>>, vector<1x32x256xf32>
    %54 = vector.shape_cast %53 : vector<1x32x256xf32> to vector<32x256xf32>
    %55 = vector.shape_cast %52 : vector<32x256xf32> to vector<1x32x256xf32>
    tpu.vector_store %arg7[%c4, %c0_27, %c0_28], %55 {strides = array<i32>} : memref<8x32x256xf32, #tpu.memory_space<vmem>>, vector<1x32x256xf32>,
    %cst_29 = arith.constant 5.000000e+00 : f32
    %56 = vector.broadcast %cst_29 : f32 to vector<32x256xf32>
    %57 = arith.subf %5, %56 : vector<32x256xf32>
    %58 = math.absf %57 : vector<32x256xf32>
    %cst_30 = arith.constant 1.000000e+00 : f32
    %59 = vector.broadcast %cst_30 : f32 to vector<32x256xf32>
    %60 = arith.subf %59, %58 : vector<32x256xf32>
    %cst_31 = arith.constant 0.000000e+00 : f32
    %61 = vector.broadcast %cst_31 : f32 to vector<32x256xf32>
    %62 = arith.maximumf %60, %61 : vector<32x256xf32>
    %c5 = arith.constant 5 : index
    %c0_32 = arith.constant 0 : index
    %c0_33 = arith.constant 0 : index
    %63 = vector.load %arg7[%c5, %c0_32, %c0_33] : memref<8x32x256xf32, #tpu.memory_space<vmem>>, vector<1x32x256xf32>
    %64 = vector.shape_cast %63 : vector<1x32x256xf32> to vector<32x256xf32>
    %65 = vector.shape_cast %62 : vector<32x256xf32> to vector<1x32x256xf32>
    tpu.vector_store %arg7[%c5, %c0_32, %c0_33], %65 {strides = array<i32>} : memref<8x32x256xf32, #tpu.memory_space<vmem>>, vector<1x32x256xf32>,
    %cst_34 = arith.constant 6.000000e+00 : f32
    %66 = vector.broadcast %cst_34 : f32 to vector<32x256xf32>
    %67 = arith.subf %5, %66 : vector<32x256xf32>
    %68 = math.absf %67 : vector<32x256xf32>
    %cst_35 = arith.constant 1.000000e+00 : f32
    %69 = vector.broadcast %cst_35 : f32 to vector<32x256xf32>
    %70 = arith.subf %69, %68 : vector<32x256xf32>
    %cst_36 = arith.constant 0.000000e+00 : f32
    %71 = vector.broadcast %cst_36 : f32 to vector<32x256xf32>
    %72 = arith.maximumf %70, %71 : vector<32x256xf32>
    %c6 = arith.constant 6 : index
    %c0_37 = arith.constant 0 : index
    %c0_38 = arith.constant 0 : index
    %73 = vector.load %arg7[%c6, %c0_37, %c0_38] : memref<8x32x256xf32, #tpu.memory_space<vmem>>, vector<1x32x256xf32>
    %74 = vector.shape_cast %73 : vector<1x32x256xf32> to vector<32x256xf32>
    %75 = vector.shape_cast %72 : vector<32x256xf32> to vector<1x32x256xf32>
    tpu.vector_store %arg7[%c6, %c0_37, %c0_38], %75 {strides = array<i32>} : memref<8x32x256xf32, #tpu.memory_space<vmem>>, vector<1x32x256xf32>,
    %cst_39 = arith.constant 7.000000e+00 : f32
    %76 = vector.broadcast %cst_39 : f32 to vector<32x256xf32>
    %77 = arith.subf %5, %76 : vector<32x256xf32>
    %78 = math.absf %77 : vector<32x256xf32>
    %cst_40 = arith.constant 1.000000e+00 : f32
    %79 = vector.broadcast %cst_40 : f32 to vector<32x256xf32>
    %80 = arith.subf %79, %78 : vector<32x256xf32>
    %cst_41 = arith.constant 0.000000e+00 : f32
    %81 = vector.broadcast %cst_41 : f32 to vector<32x256xf32>
    %82 = arith.maximumf %80, %81 : vector<32x256xf32>
    %c7 = arith.constant 7 : index
    %c0_42 = arith.constant 0 : index
    %c0_43 = arith.constant 0 : index
    %83 = vector.load %arg7[%c7, %c0_42, %c0_43] : memref<8x32x256xf32, #tpu.memory_space<vmem>>, vector<1x32x256xf32>
    %84 = vector.shape_cast %83 : vector<1x32x256xf32> to vector<32x256xf32>
    %85 = vector.shape_cast %82 : vector<32x256xf32> to vector<1x32x256xf32>
    tpu.vector_store %arg7[%c7, %c0_42, %c0_43], %85 {strides = array<i32>} : memref<8x32x256xf32, #tpu.memory_space<vmem>>, vector<1x32x256xf32>,
    %c0_44 = arith.constant 0 : index
    %c0_45 = arith.constant 0 : index
    %86 = vector.load %arg5[%c0_44, %c0_45] : memref<32x16xf32, #tpu.memory_space<vmem>>, vector<32x16xf32>
    %c0_46 = arith.constant 0 : index
    %c0_47 = arith.constant 0 : index
    %c0_48 = arith.constant 0 : index
    %c0_49 = arith.constant 0 : index
    %c0_50 = arith.constant 0 : index
    %87 = vector.load %arg4[%c0_46, %c0_47, %c0_48, %c0_49, %c0_50] : memref<1x1x12x16x2048xf32, #tpu.memory_space<vmem>>, vector<1x1x1x16x2048xf32>
    %88 = vector.shape_cast %87 : vector<1x1x1x16x2048xf32> to vector<16x2048xf32>
    %cst_51 = arith.constant dense<0.000000e+00> : vector<32x2048xf32>
    %89 = tpu.matmul %86, %88, %cst_51 {dimension_numbers = #tpu.dot_dimension_numbers<[1], [0], [0], [1], [0, 0, 1, 1], [], []>} : vector<32x16xf32>, vector<16x2048xf32>, vector<32x2048xf32> -> vector<32x2048xf32>
    %c0_52 = arith.constant 0 : index
    %c0_53 = arith.constant 0 : index
    %c0_54 = arith.constant 0 : index
    %90 = vector.load %arg7[%c0_52, %c0_53, %c0_54] : memref<8x32x256xf32, #tpu.memory_space<vmem>>, vector<1x32x256xf32>
    %91 = vector.shape_cast %90 : vector<1x32x256xf32> to vector<32x256xf32>
    %92 = vector.extract_strided_slice %89 {offsets = [0, 0], sizes = [32, 256], strides = [1, 1]} : vector<32x2048xf32> to vector<32x256xf32>
    %93 = arith.mulf %91, %92 : vector<32x256xf32>
    %c1_55 = arith.constant 1 : index
    %c0_56 = arith.constant 0 : index
    %c0_57 = arith.constant 0 : index
    %94 = vector.load %arg7[%c1_55, %c0_56, %c0_57] : memref<8x32x256xf32, #tpu.memory_space<vmem>>, vector<1x32x256xf32>
    %95 = vector.shape_cast %94 : vector<1x32x256xf32> to vector<32x256xf32>
    %96 = vector.extract_strided_slice %89 {offsets = [0, 256], sizes = [32, 256], strides = [1, 1]} : vector<32x2048xf32> to vector<32x256xf32>
    %97 = arith.mulf %95, %96 : vector<32x256xf32>
    %98 = arith.addf %93, %97 : vector<32x256xf32>
    %c2_58 = arith.constant 2 : index
    %c0_59 = arith.constant 0 : index
    %c0_60 = arith.constant 0 : index
    %99 = vector.load %arg7[%c2_58, %c0_59, %c0_60] : memref<8x32x256xf32, #tpu.memory_space<vmem>>, vector<1x32x256xf32>
    %100 = vector.shape_cast %99 : vector<1x32x256xf32> to vector<32x256xf32>
    %101 = vector.extract_strided_slice %89 {offsets = [0, 512], sizes = [32, 256], strides = [1, 1]} : vector<32x2048xf32> to vector<32x256xf32>
    %102 = arith.mulf %100, %101 : vector<32x256xf32>
    %103 = arith.addf %98, %102 : vector<32x256xf32>
    %c3_61 = arith.constant 3 : index
    %c0_62 = arith.constant 0 : index
    %c0_63 = arith.constant 0 : index
    %104 = vector.load %arg7[%c3_61, %c0_62, %c0_63] : memref<8x32x256xf32, #tpu.memory_space<vmem>>, vector<1x32x256xf32>
    %105 = vector.shape_cast %104 : vector<1x32x256xf32> to vector<32x256xf32>
    %106 = vector.extract_strided_slice %89 {offsets = [0, 768], sizes = [32, 256], strides = [1, 1]} : vector<32x2048xf32> to vector<32x256xf32>
    %107 = arith.mulf %105, %106 : vector<32x256xf32>
    %108 = arith.addf %103, %107 : vector<32x256xf32>
    %c4_64 = arith.constant 4 : index
    %c0_65 = arith.constant 0 : index
    %c0_66 = arith.constant 0 : index
    %109 = vector.load %arg7[%c4_64, %c0_65, %c0_66] : memref<8x32x256xf32, #tpu.memory_space<vmem>>, vector<1x32x256xf32>
    %110 = vector.shape_cast %109 : vector<1x32x256xf32> to vector<32x256xf32>
    %111 = vector.extract_strided_slice %89 {offsets = [0, 1024], sizes = [32, 256], strides = [1, 1]} : vector<32x2048xf32> to vector<32x256xf32>
    %112 = arith.mulf %110, %111 : vector<32x256xf32>
    %113 = arith.addf %108, %112 : vector<32x256xf32>
    %c5_67 = arith.constant 5 : index
    %c0_68 = arith.constant 0 : index
    %c0_69 = arith.constant 0 : index
    %114 = vector.load %arg7[%c5_67, %c0_68, %c0_69] : memref<8x32x256xf32, #tpu.memory_space<vmem>>, vector<1x32x256xf32>
    %115 = vector.shape_cast %114 : vector<1x32x256xf32> to vector<32x256xf32>
    %116 = vector.extract_strided_slice %89 {offsets = [0, 1280], sizes = [32, 256], strides = [1, 1]} : vector<32x2048xf32> to vector<32x256xf32>
    %117 = arith.mulf %115, %116 : vector<32x256xf32>
    %118 = arith.addf %113, %117 : vector<32x256xf32>
    %c6_70 = arith.constant 6 : index
    %c0_71 = arith.constant 0 : index
    %c0_72 = arith.constant 0 : index
    %119 = vector.load %arg7[%c6_70, %c0_71, %c0_72] : memref<8x32x256xf32, #tpu.memory_space<vmem>>, vector<1x32x256xf32>
    %120 = vector.shape_cast %119 : vector<1x32x256xf32> to vector<32x256xf32>
    %121 = vector.extract_strided_slice %89 {offsets = [0, 1536], sizes = [32, 256], strides = [1, 1]} : vector<32x2048xf32> to vector<32x256xf32>
    %122 = arith.mulf %120, %121 : vector<32x256xf32>
    %123 = arith.addf %118, %122 : vector<32x256xf32>
    %c7_73 = arith.constant 7 : index
    %c0_74 = arith.constant 0 : index
    %c0_75 = arith.constant 0 : index
    %124 = vector.load %arg7[%c7_73, %c0_74, %c0_75] : memref<8x32x256xf32, #tpu.memory_space<vmem>>, vector<1x32x256xf32>
    %125 = vector.shape_cast %124 : vector<1x32x256xf32> to vector<32x256xf32>
    %126 = vector.extract_strided_slice %89 {offsets = [0, 1792], sizes = [32, 256], strides = [1, 1]} : vector<32x2048xf32> to vector<32x256xf32>
    %127 = arith.mulf %125, %126 : vector<32x256xf32>
    %128 = arith.addf %123, %127 : vector<32x256xf32>
    %c0_76 = arith.constant 0 : index
    %c0_77 = arith.constant 0 : index
    %c0_78 = arith.constant 0 : index
    %c0_79 = arith.constant 0 : index
    %129 = vector.load %arg6[%c0_76, %c0_77, %c0_78, %c0_79] : memref<1x12x32x256xf32, #tpu.memory_space<vmem>>, vector<1x1x32x256xf32>
    %130 = vector.shape_cast %129 : vector<1x1x32x256xf32> to vector<32x256xf32>
    %131 = vector.shape_cast %128 : vector<32x256xf32> to vector<1x1x32x256xf32>
    tpu.vector_store %arg6[%c0_76, %c0_77, %c0_78, %c0_79], %131 {strides = array<i32>} : memref<1x12x32x256xf32, #tpu.memory_space<vmem>>, vector<1x1x32x256xf32>,
    %c0_80 = arith.constant 0 : index
    %c0_81 = arith.constant 0 : index
    %c1_82 = arith.constant 1 : index
    %c0_83 = arith.constant 0 : index
    %c0_84 = arith.constant 0 : index
    %132 = vector.load %arg4[%c0_80, %c0_81, %c1_82, %c0_83, %c0_84] : memref<1x1x12x16x2048xf32, #tpu.memory_space<vmem>>, vector<1x1x1x16x2048xf32>
    %133 = vector.shape_cast %132 : vector<1x1x1x16x2048xf32> to vector<16x2048xf32>
    %cst_85 = arith.constant dense<0.000000e+00> : vector<32x2048xf32>
    %134 = tpu.matmul %86, %133, %cst_85 {dimension_numbers = #tpu.dot_dimension_numbers<[1], [0], [0], [1], [0, 0, 1, 1], [], []>} : vector<32x16xf32>, vector<16x2048xf32>, vector<32x2048xf32> -> vector<32x2048xf32>
    %c0_86 = arith.constant 0 : index
    %c0_87 = arith.constant 0 : index
    %c0_88 = arith.constant 0 : index
    %135 = vector.load %arg7[%c0_86, %c0_87, %c0_88] : memref<8x32x256xf32, #tpu.memory_space<vmem>>, vector<1x32x256xf32>
    %136 = vector.shape_cast %135 : vector<1x32x256xf32> to vector<32x256xf32>
    %137 = vector.extract_strided_slice %134 {offsets = [0, 0], sizes = [32, 256], strides = [1, 1]} : vector<32x2048xf32> to vector<32x256xf32>
    %138 = arith.mulf %136, %137 : vector<32x256xf32>
    %c1_89 = arith.constant 1 : index
    %c0_90 = arith.constant 0 : index
    %c0_91 = arith.constant 0 : index
    %139 = vector.load %arg7[%c1_89, %c0_90, %c0_91] : memref<8x32x256xf32, #tpu.memory_space<vmem>>, vector<1x32x256xf32>
    %140 = vector.shape_cast %139 : vector<1x32x256xf32> to vector<32x256xf32>
    %141 = vector.extract_strided_slice %134 {offsets = [0, 256], sizes = [32, 256], strides = [1, 1]} : vector<32x2048xf32> to vector<32x256xf32>
    %142 = arith.mulf %140, %141 : vector<32x256xf32>
    %143 = arith.addf %138, %142 : vector<32x256xf32>
    %c2_92 = arith.constant 2 : index
    %c0_93 = arith.constant 0 : index
    %c0_94 = arith.constant 0 : index
    %144 = vector.load %arg7[%c2_92, %c0_93, %c0_94] : memref<8x32x256xf32, #tpu.memory_space<vmem>>, vector<1x32x256xf32>
    %145 = vector.shape_cast %144 : vector<1x32x256xf32> to vector<32x256xf32>
    %146 = vector.extract_strided_slice %134 {offsets = [0, 512], sizes = [32, 256], strides = [1, 1]} : vector<32x2048xf32> to vector<32x256xf32>
    %147 = arith.mulf %145, %146 : vector<32x256xf32>
    %148 = arith.addf %143, %147 : vector<32x256xf32>
    %c3_95 = arith.constant 3 : index
    %c0_96 = arith.constant 0 : index
    %c0_97 = arith.constant 0 : index
    %149 = vector.load %arg7[%c3_95, %c0_96, %c0_97] : memref<8x32x256xf32, #tpu.memory_space<vmem>>, vector<1x32x256xf32>
    %150 = vector.shape_cast %149 : vector<1x32x256xf32> to vector<32x256xf32>
    %151 = vector.extract_strided_slice %134 {offsets = [0, 768], sizes = [32, 256], strides = [1, 1]} : vector<32x2048xf32> to vector<32x256xf32>
    %152 = arith.mulf %150, %151 : vector<32x256xf32>
    %153 = arith.addf %148, %152 : vector<32x256xf32>
    %c4_98 = arith.constant 4 : index
    %c0_99 = arith.constant 0 : index
    %c0_100 = arith.constant 0 : index
    %154 = vector.load %arg7[%c4_98, %c0_99, %c0_100] : memref<8x32x256xf32, #tpu.memory_space<vmem>>, vector<1x32x256xf32>
    %155 = vector.shape_cast %154 : vector<1x32x256xf32> to vector<32x256xf32>
    %156 = vector.extract_strided_slice %134 {offsets = [0, 1024], sizes = [32, 256], strides = [1, 1]} : vector<32x2048xf32> to vector<32x256xf32>
    %157 = arith.mulf %155, %156 : vector<32x256xf32>
    %158 = arith.addf %153, %157 : vector<32x256xf32>
    %c5_101 = arith.constant 5 : index
    %c0_102 = arith.constant 0 : index
    %c0_103 = arith.constant 0 : index
    %159 = vector.load %arg7[%c5_101, %c0_102, %c0_103] : memref<8x32x256xf32, #tpu.memory_space<vmem>>, vector<1x32x256xf32>
    %160 = vector.shape_cast %159 : vector<1x32x256xf32> to vector<32x256xf32>
    %161 = vector.extract_strided_slice %134 {offsets = [0, 1280], sizes = [32, 256], strides = [1, 1]} : vector<32x2048xf32> to vector<32x256xf32>
    %162 = arith.mulf %160, %161 : vector<32x256xf32>
    %163 = arith.addf %158, %162 : vector<32x256xf32>
    %c6_104 = arith.constant 6 : index
    %c0_105 = arith.constant 0 : index
    %c0_106 = arith.constant 0 : index
    %164 = vector.load %arg7[%c6_104, %c0_105, %c0_106] : memref<8x32x256xf32, #tpu.memory_space<vmem>>, vector<1x32x256xf32>
    %165 = vector.shape_cast %164 : vector<1x32x256xf32> to vector<32x256xf32>
    %166 = vector.extract_strided_slice %134 {offsets = [0, 1536], sizes = [32, 256], strides = [1, 1]} : vector<32x2048xf32> to vector<32x256xf32>
    %167 = arith.mulf %165, %166 : vector<32x256xf32>
    %168 = arith.addf %163, %167 : vector<32x256xf32>
    %c7_107 = arith.constant 7 : index
    %c0_108 = arith.constant 0 : index
    %c0_109 = arith.constant 0 : index
    %169 = vector.load %arg7[%c7_107, %c0_108, %c0_109] : memref<8x32x256xf32, #tpu.memory_space<vmem>>, vector<1x32x256xf32>
    %170 = vector.shape_cast %169 : vector<1x32x256xf32> to vector<32x256xf32>
    %171 = vector.extract_strided_slice %134 {offsets = [0, 1792], sizes = [32, 256], strides = [1, 1]} : vector<32x2048xf32> to vector<32x256xf32>
    %172 = arith.mulf %170, %171 : vector<32x256xf32>
    %173 = arith.addf %168, %172 : vector<32x256xf32>
    %c0_110 = arith.constant 0 : index
    %c1_111 = arith.constant 1 : index
    %c0_112 = arith.constant 0 : index
    %c0_113 = arith.constant 0 : index
    %174 = vector.load %arg6[%c0_110, %c1_111, %c0_112, %c0_113] : memref<1x12x32x256xf32, #tpu.memory_space<vmem>>, vector<1x1x32x256xf32>
    %175 = vector.shape_cast %174 : vector<1x1x32x256xf32> to vector<32x256xf32>
    %176 = vector.shape_cast %173 : vector<32x256xf32> to vector<1x1x32x256xf32>
    tpu.vector_store %arg6[%c0_110, %c1_111, %c0_112, %c0_113], %176 {strides = array<i32>} : memref<1x12x32x256xf32, #tpu.memory_space<vmem>>, vector<1x1x32x256xf32>,
    %c0_114 = arith.constant 0 : index
    %c0_115 = arith.constant 0 : index
    %c2_116 = arith.constant 2 : index
    %c0_117 = arith.constant 0 : index
    %c0_118 = arith.constant 0 : index
    %177 = vector.load %arg4[%c0_114, %c0_115, %c2_116, %c0_117, %c0_118] : memref<1x1x12x16x2048xf32, #tpu.memory_space<vmem>>, vector<1x1x1x16x2048xf32>
    %178 = vector.shape_cast %177 : vector<1x1x1x16x2048xf32> to vector<16x2048xf32>
    %cst_119 = arith.constant dense<0.000000e+00> : vector<32x2048xf32>
    %179 = tpu.matmul %86, %178, %cst_119 {dimension_numbers = #tpu.dot_dimension_numbers<[1], [0], [0], [1], [0, 0, 1, 1], [], []>} : vector<32x16xf32>, vector<16x2048xf32>, vector<32x2048xf32> -> vector<32x2048xf32>
    %c0_120 = arith.constant 0 : index
    %c0_121 = arith.constant 0 : index
    %c0_122 = arith.constant 0 : index
    %180 = vector.load %arg7[%c0_120, %c0_121, %c0_122] : memref<8x32x256xf32, #tpu.memory_space<vmem>>, vector<1x32x256xf32>
    %181 = vector.shape_cast %180 : vector<1x32x256xf32> to vector<32x256xf32>
    %182 = vector.extract_strided_slice %179 {offsets = [0, 0], sizes = [32, 256], strides = [1, 1]} : vector<32x2048xf32> to vector<32x256xf32>
    %183 = arith.mulf %181, %182 : vector<32x256xf32>
    %c1_123 = arith.constant 1 : index
    %c0_124 = arith.constant 0 : index
    %c0_125 = arith.constant 0 : index
    %184 = vector.load %arg7[%c1_123, %c0_124, %c0_125] : memref<8x32x256xf32, #tpu.memory_space<vmem>>, vector<1x32x256xf32>
    %185 = vector.shape_cast %184 : vector<1x32x256xf32> to vector<32x256xf32>
    %186 = vector.extract_strided_slice %179 {offsets = [0, 256], sizes = [32, 256], strides = [1, 1]} : vector<32x2048xf32> to vector<32x256xf32>
    %187 = arith.mulf %185, %186 : vector<32x256xf32>
    %188 = arith.addf %183, %187 : vector<32x256xf32>
    %c2_126 = arith.constant 2 : index
    %c0_127 = arith.constant 0 : index
    %c0_128 = arith.constant 0 : index
    %189 = vector.load %arg7[%c2_126, %c0_127, %c0_128] : memref<8x32x256xf32, #tpu.memory_space<vmem>>, vector<1x32x256xf32>
    %190 = vector.shape_cast %189 : vector<1x32x256xf32> to vector<32x256xf32>
    %191 = vector.extract_strided_slice %179 {offsets = [0, 512], sizes = [32, 256], strides = [1, 1]} : vector<32x2048xf32> to vector<32x256xf32>
    %192 = arith.mulf %190, %191 : vector<32x256xf32>
    %193 = arith.addf %188, %192 : vector<32x256xf32>
    %c3_129 = arith.constant 3 : index
    %c0_130 = arith.constant 0 : index
    %c0_131 = arith.constant 0 : index
    %194 = vector.load %arg7[%c3_129, %c0_130, %c0_131] : memref<8x32x256xf32, #tpu.memory_space<vmem>>, vector<1x32x256xf32>
    %195 = vector.shape_cast %194 : vector<1x32x256xf32> to vector<32x256xf32>
    %196 = vector.extract_strided_slice %179 {offsets = [0, 768], sizes = [32, 256], strides = [1, 1]} : vector<32x2048xf32> to vector<32x256xf32>
    %197 = arith.mulf %195, %196 : vector<32x256xf32>
    %198 = arith.addf %193, %197 : vector<32x256xf32>
    %c4_132 = arith.constant 4 : index
    %c0_133 = arith.constant 0 : index
    %c0_134 = arith.constant 0 : index
    %199 = vector.load %arg7[%c4_132, %c0_133, %c0_134] : memref<8x32x256xf32, #tpu.memory_space<vmem>>, vector<1x32x256xf32>
    %200 = vector.shape_cast %199 : vector<1x32x256xf32> to vector<32x256xf32>
    %201 = vector.extract_strided_slice %179 {offsets = [0, 1024], sizes = [32, 256], strides = [1, 1]} : vector<32x2048xf32> to vector<32x256xf32>
    %202 = arith.mulf %200, %201 : vector<32x256xf32>
    %203 = arith.addf %198, %202 : vector<32x256xf32>
    %c5_135 = arith.constant 5 : index
    %c0_136 = arith.constant 0 : index
    %c0_137 = arith.constant 0 : index
    %204 = vector.load %arg7[%c5_135, %c0_136, %c0_137] : memref<8x32x256xf32, #tpu.memory_space<vmem>>, vector<1x32x256xf32>
    %205 = vector.shape_cast %204 : vector<1x32x256xf32> to vector<32x256xf32>
    %206 = vector.extract_strided_slice %179 {offsets = [0, 1280], sizes = [32, 256], strides = [1, 1]} : vector<32x2048xf32> to vector<32x256xf32>
    %207 = arith.mulf %205, %206 : vector<32x256xf32>
    %208 = arith.addf %203, %207 : vector<32x256xf32>
    %c6_138 = arith.constant 6 : index
    %c0_139 = arith.constant 0 : index
    %c0_140 = arith.constant 0 : index
    %209 = vector.load %arg7[%c6_138, %c0_139, %c0_140] : memref<8x32x256xf32, #tpu.memory_space<vmem>>, vector<1x32x256xf32>
    %210 = vector.shape_cast %209 : vector<1x32x256xf32> to vector<32x256xf32>
    %211 = vector.extract_strided_slice %179 {offsets = [0, 1536], sizes = [32, 256], strides = [1, 1]} : vector<32x2048xf32> to vector<32x256xf32>
    %212 = arith.mulf %210, %211 : vector<32x256xf32>
    %213 = arith.addf %208, %212 : vector<32x256xf32>
    %c7_141 = arith.constant 7 : index
    %c0_142 = arith.constant 0 : index
    %c0_143 = arith.constant 0 : index
    %214 = vector.load %arg7[%c7_141, %c0_142, %c0_143] : memref<8x32x256xf32, #tpu.memory_space<vmem>>, vector<1x32x256xf32>
    %215 = vector.shape_cast %214 : vector<1x32x256xf32> to vector<32x256xf32>
    %216 = vector.extract_strided_slice %179 {offsets = [0, 1792], sizes = [32, 256], strides = [1, 1]} : vector<32x2048xf32> to vector<32x256xf32>
    %217 = arith.mulf %215, %216 : vector<32x256xf32>
    %218 = arith.addf %213, %217 : vector<32x256xf32>
    %c0_144 = arith.constant 0 : index
    %c2_145 = arith.constant 2 : index
    %c0_146 = arith.constant 0 : index
    %c0_147 = arith.constant 0 : index
    %219 = vector.load %arg6[%c0_144, %c2_145, %c0_146, %c0_147] : memref<1x12x32x256xf32, #tpu.memory_space<vmem>>, vector<1x1x32x256xf32>
    %220 = vector.shape_cast %219 : vector<1x1x32x256xf32> to vector<32x256xf32>
    %221 = vector.shape_cast %218 : vector<32x256xf32> to vector<1x1x32x256xf32>
    tpu.vector_store %arg6[%c0_144, %c2_145, %c0_146, %c0_147], %221 {strides = array<i32>} : memref<1x12x32x256xf32, #tpu.memory_space<vmem>>, vector<1x1x32x256xf32>,
    %c0_148 = arith.constant 0 : index
    %c0_149 = arith.constant 0 : index
    %c3_150 = arith.constant 3 : index
    %c0_151 = arith.constant 0 : index
    %c0_152 = arith.constant 0 : index
    %222 = vector.load %arg4[%c0_148, %c0_149, %c3_150, %c0_151, %c0_152] : memref<1x1x12x16x2048xf32, #tpu.memory_space<vmem>>, vector<1x1x1x16x2048xf32>
    %223 = vector.shape_cast %222 : vector<1x1x1x16x2048xf32> to vector<16x2048xf32>
    %cst_153 = arith.constant dense<0.000000e+00> : vector<32x2048xf32>
    %224 = tpu.matmul %86, %223, %cst_153 {dimension_numbers = #tpu.dot_dimension_numbers<[1], [0], [0], [1], [0, 0, 1, 1], [], []>} : vector<32x16xf32>, vector<16x2048xf32>, vector<32x2048xf32> -> vector<32x2048xf32>
    %c0_154 = arith.constant 0 : index
    %c0_155 = arith.constant 0 : index
    %c0_156 = arith.constant 0 : index
    %225 = vector.load %arg7[%c0_154, %c0_155, %c0_156] : memref<8x32x256xf32, #tpu.memory_space<vmem>>, vector<1x32x256xf32>
    %226 = vector.shape_cast %225 : vector<1x32x256xf32> to vector<32x256xf32>
    %227 = vector.extract_strided_slice %224 {offsets = [0, 0], sizes = [32, 256], strides = [1, 1]} : vector<32x2048xf32> to vector<32x256xf32>
    %228 = arith.mulf %226, %227 : vector<32x256xf32>
    %c1_157 = arith.constant 1 : index
    %c0_158 = arith.constant 0 : index
    %c0_159 = arith.constant 0 : index
    %229 = vector.load %arg7[%c1_157, %c0_158, %c0_159] : memref<8x32x256xf32, #tpu.memory_space<vmem>>, vector<1x32x256xf32>
    %230 = vector.shape_cast %229 : vector<1x32x256xf32> to vector<32x256xf32>
    %231 = vector.extract_strided_slice %224 {offsets = [0, 256], sizes = [32, 256], strides = [1, 1]} : vector<32x2048xf32> to vector<32x256xf32>
    %232 = arith.mulf %230, %231 : vector<32x256xf32>
    %233 = arith.addf %228, %232 : vector<32x256xf32>
    %c2_160 = arith.constant 2 : index
    %c0_161 = arith.constant 0 : index
    %c0_162 = arith.constant 0 : index
    %234 = vector.load %arg7[%c2_160, %c0_161, %c0_162] : memref<8x32x256xf32, #tpu.memory_space<vmem>>, vector<1x32x256xf32>
    %235 = vector.shape_cast %234 : vector<1x32x256xf32> to vector<32x256xf32>
    %236 = vector.extract_strided_slice %224 {offsets = [0, 512], sizes = [32, 256], strides = [1, 1]} : vector<32x2048xf32> to vector<32x256xf32>
    %237 = arith.mulf %235, %236 : vector<32x256xf32>
    %238 = arith.addf %233, %237 : vector<32x256xf32>
    %c3_163 = arith.constant 3 : index
    %c0_164 = arith.constant 0 : index
    %c0_165 = arith.constant 0 : index
    %239 = vector.load %arg7[%c3_163, %c0_164, %c0_165] : memref<8x32x256xf32, #tpu.memory_space<vmem>>, vector<1x32x256xf32>
    %240 = vector.shape_cast %239 : vector<1x32x256xf32> to vector<32x256xf32>
    %241 = vector.extract_strided_slice %224 {offsets = [0, 768], sizes = [32, 256], strides = [1, 1]} : vector<32x2048xf32> to vector<32x256xf32>
    %242 = arith.mulf %240, %241 : vector<32x256xf32>
    %243 = arith.addf %238, %242 : vector<32x256xf32>
    %c4_166 = arith.constant 4 : index
    %c0_167 = arith.constant 0 : index
    %c0_168 = arith.constant 0 : index
    %244 = vector.load %arg7[%c4_166, %c0_167, %c0_168] : memref<8x32x256xf32, #tpu.memory_space<vmem>>, vector<1x32x256xf32>
    %245 = vector.shape_cast %244 : vector<1x32x256xf32> to vector<32x256xf32>
    %246 = vector.extract_strided_slice %224 {offsets = [0, 1024], sizes = [32, 256], strides = [1, 1]} : vector<32x2048xf32> to vector<32x256xf32>
    %247 = arith.mulf %245, %246 : vector<32x256xf32>
    %248 = arith.addf %243, %247 : vector<32x256xf32>
    %c5_169 = arith.constant 5 : index
    %c0_170 = arith.constant 0 : index
    %c0_171 = arith.constant 0 : index
    %249 = vector.load %arg7[%c5_169, %c0_170, %c0_171] : memref<8x32x256xf32, #tpu.memory_space<vmem>>, vector<1x32x256xf32>
    %250 = vector.shape_cast %249 : vector<1x32x256xf32> to vector<32x256xf32>
    %251 = vector.extract_strided_slice %224 {offsets = [0, 1280], sizes = [32, 256], strides = [1, 1]} : vector<32x2048xf32> to vector<32x256xf32>
    %252 = arith.mulf %250, %251 : vector<32x256xf32>
    %253 = arith.addf %248, %252 : vector<32x256xf32>
    %c6_172 = arith.constant 6 : index
    %c0_173 = arith.constant 0 : index
    %c0_174 = arith.constant 0 : index
    %254 = vector.load %arg7[%c6_172, %c0_173, %c0_174] : memref<8x32x256xf32, #tpu.memory_space<vmem>>, vector<1x32x256xf32>
    %255 = vector.shape_cast %254 : vector<1x32x256xf32> to vector<32x256xf32>
    %256 = vector.extract_strided_slice %224 {offsets = [0, 1536], sizes = [32, 256], strides = [1, 1]} : vector<32x2048xf32> to vector<32x256xf32>
    %257 = arith.mulf %255, %256 : vector<32x256xf32>
    %258 = arith.addf %253, %257 : vector<32x256xf32>
    %c7_175 = arith.constant 7 : index
    %c0_176 = arith.constant 0 : index
    %c0_177 = arith.constant 0 : index
    %259 = vector.load %arg7[%c7_175, %c0_176, %c0_177] : memref<8x32x256xf32, #tpu.memory_space<vmem>>, vector<1x32x256xf32>
    %260 = vector.shape_cast %259 : vector<1x32x256xf32> to vector<32x256xf32>
    %261 = vector.extract_strided_slice %224 {offsets = [0, 1792], sizes = [32, 256], strides = [1, 1]} : vector<32x2048xf32> to vector<32x256xf32>
    %262 = arith.mulf %260, %261 : vector<32x256xf32>
    %263 = arith.addf %258, %262 : vector<32x256xf32>
    %c0_178 = arith.constant 0 : index
    %c3_179 = arith.constant 3 : index
    %c0_180 = arith.constant 0 : index
    %c0_181 = arith.constant 0 : index
    %264 = vector.load %arg6[%c0_178, %c3_179, %c0_180, %c0_181] : memref<1x12x32x256xf32, #tpu.memory_space<vmem>>, vector<1x1x32x256xf32>
    %265 = vector.shape_cast %264 : vector<1x1x32x256xf32> to vector<32x256xf32>
    %266 = vector.shape_cast %263 : vector<32x256xf32> to vector<1x1x32x256xf32>
    tpu.vector_store %arg6[%c0_178, %c3_179, %c0_180, %c0_181], %266 {strides = array<i32>} : memref<1x12x32x256xf32, #tpu.memory_space<vmem>>, vector<1x1x32x256xf32>,
    %c0_182 = arith.constant 0 : index
    %c0_183 = arith.constant 0 : index
    %c4_184 = arith.constant 4 : index
    %c0_185 = arith.constant 0 : index
    %c0_186 = arith.constant 0 : index
    %267 = vector.load %arg4[%c0_182, %c0_183, %c4_184, %c0_185, %c0_186] : memref<1x1x12x16x2048xf32, #tpu.memory_space<vmem>>, vector<1x1x1x16x2048xf32>
    %268 = vector.shape_cast %267 : vector<1x1x1x16x2048xf32> to vector<16x2048xf32>
    %cst_187 = arith.constant dense<0.000000e+00> : vector<32x2048xf32>
    %269 = tpu.matmul %86, %268, %cst_187 {dimension_numbers = #tpu.dot_dimension_numbers<[1], [0], [0], [1], [0, 0, 1, 1], [], []>} : vector<32x16xf32>, vector<16x2048xf32>, vector<32x2048xf32> -> vector<32x2048xf32>
    %c0_188 = arith.constant 0 : index
    %c0_189 = arith.constant 0 : index
    %c0_190 = arith.constant 0 : index
    %270 = vector.load %arg7[%c0_188, %c0_189, %c0_190] : memref<8x32x256xf32, #tpu.memory_space<vmem>>, vector<1x32x256xf32>
    %271 = vector.shape_cast %270 : vector<1x32x256xf32> to vector<32x256xf32>
    %272 = vector.extract_strided_slice %269 {offsets = [0, 0], sizes = [32, 256], strides = [1, 1]} : vector<32x2048xf32> to vector<32x256xf32>
    %273 = arith.mulf %271, %272 : vector<32x256xf32>
    %c1_191 = arith.constant 1 : index
    %c0_192 = arith.constant 0 : index
    %c0_193 = arith.constant 0 : index
    %274 = vector.load %arg7[%c1_191, %c0_192, %c0_193] : memref<8x32x256xf32, #tpu.memory_space<vmem>>, vector<1x32x256xf32>
    %275 = vector.shape_cast %274 : vector<1x32x256xf32> to vector<32x256xf32>
    %276 = vector.extract_strided_slice %269 {offsets = [0, 256], sizes = [32, 256], strides = [1, 1]} : vector<32x2048xf32> to vector<32x256xf32>
    %277 = arith.mulf %275, %276 : vector<32x256xf32>
    %278 = arith.addf %273, %277 : vector<32x256xf32>
    %c2_194 = arith.constant 2 : index
    %c0_195 = arith.constant 0 : index
    %c0_196 = arith.constant 0 : index
    %279 = vector.load %arg7[%c2_194, %c0_195, %c0_196] : memref<8x32x256xf32, #tpu.memory_space<vmem>>, vector<1x32x256xf32>
    %280 = vector.shape_cast %279 : vector<1x32x256xf32> to vector<32x256xf32>
    %281 = vector.extract_strided_slice %269 {offsets = [0, 512], sizes = [32, 256], strides = [1, 1]} : vector<32x2048xf32> to vector<32x256xf32>
    %282 = arith.mulf %280, %281 : vector<32x256xf32>
    %283 = arith.addf %278, %282 : vector<32x256xf32>
    %c3_197 = arith.constant 3 : index
    %c0_198 = arith.constant 0 : index
    %c0_199 = arith.constant 0 : index
    %284 = vector.load %arg7[%c3_197, %c0_198, %c0_199] : memref<8x32x256xf32, #tpu.memory_space<vmem>>, vector<1x32x256xf32>
    %285 = vector.shape_cast %284 : vector<1x32x256xf32> to vector<32x256xf32>
    %286 = vector.extract_strided_slice %269 {offsets = [0, 768], sizes = [32, 256], strides = [1, 1]} : vector<32x2048xf32> to vector<32x256xf32>
    %287 = arith.mulf %285, %286 : vector<32x256xf32>
    %288 = arith.addf %283, %287 : vector<32x256xf32>
    %c4_200 = arith.constant 4 : index
    %c0_201 = arith.constant 0 : index
    %c0_202 = arith.constant 0 : index
    %289 = vector.load %arg7[%c4_200, %c0_201, %c0_202] : memref<8x32x256xf32, #tpu.memory_space<vmem>>, vector<1x32x256xf32>
    %290 = vector.shape_cast %289 : vector<1x32x256xf32> to vector<32x256xf32>
    %291 = vector.extract_strided_slice %269 {offsets = [0, 1024], sizes = [32, 256], strides = [1, 1]} : vector<32x2048xf32> to vector<32x256xf32>
    %292 = arith.mulf %290, %291 : vector<32x256xf32>
    %293 = arith.addf %288, %292 : vector<32x256xf32>
    %c5_203 = arith.constant 5 : index
    %c0_204 = arith.constant 0 : index
    %c0_205 = arith.constant 0 : index
    %294 = vector.load %arg7[%c5_203, %c0_204, %c0_205] : memref<8x32x256xf32, #tpu.memory_space<vmem>>, vector<1x32x256xf32>
    %295 = vector.shape_cast %294 : vector<1x32x256xf32> to vector<32x256xf32>
    %296 = vector.extract_strided_slice %269 {offsets = [0, 1280], sizes = [32, 256], strides = [1, 1]} : vector<32x2048xf32> to vector<32x256xf32>
    %297 = arith.mulf %295, %296 : vector<32x256xf32>
    %298 = arith.addf %293, %297 : vector<32x256xf32>
    %c6_206 = arith.constant 6 : index
    %c0_207 = arith.constant 0 : index
    %c0_208 = arith.constant 0 : index
    %299 = vector.load %arg7[%c6_206, %c0_207, %c0_208] : memref<8x32x256xf32, #tpu.memory_space<vmem>>, vector<1x32x256xf32>
    %300 = vector.shape_cast %299 : vector<1x32x256xf32> to vector<32x256xf32>
    %301 = vector.extract_strided_slice %269 {offsets = [0, 1536], sizes = [32, 256], strides = [1, 1]} : vector<32x2048xf32> to vector<32x256xf32>
    %302 = arith.mulf %300, %301 : vector<32x256xf32>
    %303 = arith.addf %298, %302 : vector<32x256xf32>
    %c7_209 = arith.constant 7 : index
    %c0_210 = arith.constant 0 : index
    %c0_211 = arith.constant 0 : index
    %304 = vector.load %arg7[%c7_209, %c0_210, %c0_211] : memref<8x32x256xf32, #tpu.memory_space<vmem>>, vector<1x32x256xf32>
    %305 = vector.shape_cast %304 : vector<1x32x256xf32> to vector<32x256xf32>
    %306 = vector.extract_strided_slice %269 {offsets = [0, 1792], sizes = [32, 256], strides = [1, 1]} : vector<32x2048xf32> to vector<32x256xf32>
    %307 = arith.mulf %305, %306 : vector<32x256xf32>
    %308 = arith.addf %303, %307 : vector<32x256xf32>
    %c0_212 = arith.constant 0 : index
    %c4_213 = arith.constant 4 : index
    %c0_214 = arith.constant 0 : index
    %c0_215 = arith.constant 0 : index
    %309 = vector.load %arg6[%c0_212, %c4_213, %c0_214, %c0_215] : memref<1x12x32x256xf32, #tpu.memory_space<vmem>>, vector<1x1x32x256xf32>
    %310 = vector.shape_cast %309 : vector<1x1x32x256xf32> to vector<32x256xf32>
    %311 = vector.shape_cast %308 : vector<32x256xf32> to vector<1x1x32x256xf32>
    tpu.vector_store %arg6[%c0_212, %c4_213, %c0_214, %c0_215], %311 {strides = array<i32>} : memref<1x12x32x256xf32, #tpu.memory_space<vmem>>, vector<1x1x32x256xf32>,
    %c0_216 = arith.constant 0 : index
    %c0_217 = arith.constant 0 : index
    %c5_218 = arith.constant 5 : index
    %c0_219 = arith.constant 0 : index
    %c0_220 = arith.constant 0 : index
    %312 = vector.load %arg4[%c0_216, %c0_217, %c5_218, %c0_219, %c0_220] : memref<1x1x12x16x2048xf32, #tpu.memory_space<vmem>>, vector<1x1x1x16x2048xf32>
    %313 = vector.shape_cast %312 : vector<1x1x1x16x2048xf32> to vector<16x2048xf32>
    %cst_221 = arith.constant dense<0.000000e+00> : vector<32x2048xf32>
    %314 = tpu.matmul %86, %313, %cst_221 {dimension_numbers = #tpu.dot_dimension_numbers<[1], [0], [0], [1], [0, 0, 1, 1], [], []>} : vector<32x16xf32>, vector<16x2048xf32>, vector<32x2048xf32> -> vector<32x2048xf32>
    %c0_222 = arith.constant 0 : index
    %c0_223 = arith.constant 0 : index
    %c0_224 = arith.constant 0 : index
    %315 = vector.load %arg7[%c0_222, %c0_223, %c0_224] : memref<8x32x256xf32, #tpu.memory_space<vmem>>, vector<1x32x256xf32>
    %316 = vector.shape_cast %315 : vector<1x32x256xf32> to vector<32x256xf32>
    %317 = vector.extract_strided_slice %314 {offsets = [0, 0], sizes = [32, 256], strides = [1, 1]} : vector<32x2048xf32> to vector<32x256xf32>
    %318 = arith.mulf %316, %317 : vector<32x256xf32>
    %c1_225 = arith.constant 1 : index
    %c0_226 = arith.constant 0 : index
    %c0_227 = arith.constant 0 : index
    %319 = vector.load %arg7[%c1_225, %c0_226, %c0_227] : memref<8x32x256xf32, #tpu.memory_space<vmem>>, vector<1x32x256xf32>
    %320 = vector.shape_cast %319 : vector<1x32x256xf32> to vector<32x256xf32>
    %321 = vector.extract_strided_slice %314 {offsets = [0, 256], sizes = [32, 256], strides = [1, 1]} : vector<32x2048xf32> to vector<32x256xf32>
    %322 = arith.mulf %320, %321 : vector<32x256xf32>
    %323 = arith.addf %318, %322 : vector<32x256xf32>
    %c2_228 = arith.constant 2 : index
    %c0_229 = arith.constant 0 : index
    %c0_230 = arith.constant 0 : index
    %324 = vector.load %arg7[%c2_228, %c0_229, %c0_230] : memref<8x32x256xf32, #tpu.memory_space<vmem>>, vector<1x32x256xf32>
    %325 = vector.shape_cast %324 : vector<1x32x256xf32> to vector<32x256xf32>
    %326 = vector.extract_strided_slice %314 {offsets = [0, 512], sizes = [32, 256], strides = [1, 1]} : vector<32x2048xf32> to vector<32x256xf32>
    %327 = arith.mulf %325, %326 : vector<32x256xf32>
    %328 = arith.addf %323, %327 : vector<32x256xf32>
    %c3_231 = arith.constant 3 : index
    %c0_232 = arith.constant 0 : index
    %c0_233 = arith.constant 0 : index
    %329 = vector.load %arg7[%c3_231, %c0_232, %c0_233] : memref<8x32x256xf32, #tpu.memory_space<vmem>>, vector<1x32x256xf32>
    %330 = vector.shape_cast %329 : vector<1x32x256xf32> to vector<32x256xf32>
    %331 = vector.extract_strided_slice %314 {offsets = [0, 768], sizes = [32, 256], strides = [1, 1]} : vector<32x2048xf32> to vector<32x256xf32>
    %332 = arith.mulf %330, %331 : vector<32x256xf32>
    %333 = arith.addf %328, %332 : vector<32x256xf32>
    %c4_234 = arith.constant 4 : index
    %c0_235 = arith.constant 0 : index
    %c0_236 = arith.constant 0 : index
    %334 = vector.load %arg7[%c4_234, %c0_235, %c0_236] : memref<8x32x256xf32, #tpu.memory_space<vmem>>, vector<1x32x256xf32>
    %335 = vector.shape_cast %334 : vector<1x32x256xf32> to vector<32x256xf32>
    %336 = vector.extract_strided_slice %314 {offsets = [0, 1024], sizes = [32, 256], strides = [1, 1]} : vector<32x2048xf32> to vector<32x256xf32>
    %337 = arith.mulf %335, %336 : vector<32x256xf32>
    %338 = arith.addf %333, %337 : vector<32x256xf32>
    %c5_237 = arith.constant 5 : index
    %c0_238 = arith.constant 0 : index
    %c0_239 = arith.constant 0 : index
    %339 = vector.load %arg7[%c5_237, %c0_238, %c0_239] : memref<8x32x256xf32, #tpu.memory_space<vmem>>, vector<1x32x256xf32>
    %340 = vector.shape_cast %339 : vector<1x32x256xf32> to vector<32x256xf32>
    %341 = vector.extract_strided_slice %314 {offsets = [0, 1280], sizes = [32, 256], strides = [1, 1]} : vector<32x2048xf32> to vector<32x256xf32>
    %342 = arith.mulf %340, %341 : vector<32x256xf32>
    %343 = arith.addf %338, %342 : vector<32x256xf32>
    %c6_240 = arith.constant 6 : index
    %c0_241 = arith.constant 0 : index
    %c0_242 = arith.constant 0 : index
    %344 = vector.load %arg7[%c6_240, %c0_241, %c0_242] : memref<8x32x256xf32, #tpu.memory_space<vmem>>, vector<1x32x256xf32>
    %345 = vector.shape_cast %344 : vector<1x32x256xf32> to vector<32x256xf32>
    %346 = vector.extract_strided_slice %314 {offsets = [0, 1536], sizes = [32, 256], strides = [1, 1]} : vector<32x2048xf32> to vector<32x256xf32>
    %347 = arith.mulf %345, %346 : vector<32x256xf32>
    %348 = arith.addf %343, %347 : vector<32x256xf32>
    %c7_243 = arith.constant 7 : index
    %c0_244 = arith.constant 0 : index
    %c0_245 = arith.constant 0 : index
    %349 = vector.load %arg7[%c7_243, %c0_244, %c0_245] : memref<8x32x256xf32, #tpu.memory_space<vmem>>, vector<1x32x256xf32>
    %350 = vector.shape_cast %349 : vector<1x32x256xf32> to vector<32x256xf32>
    %351 = vector.extract_strided_slice %314 {offsets = [0, 1792], sizes = [32, 256], strides = [1, 1]} : vector<32x2048xf32> to vector<32x256xf32>
    %352 = arith.mulf %350, %351 : vector<32x256xf32>
    %353 = arith.addf %348, %352 : vector<32x256xf32>
    %c0_246 = arith.constant 0 : index
    %c5_247 = arith.constant 5 : index
    %c0_248 = arith.constant 0 : index
    %c0_249 = arith.constant 0 : index
    %354 = vector.load %arg6[%c0_246, %c5_247, %c0_248, %c0_249] : memref<1x12x32x256xf32, #tpu.memory_space<vmem>>, vector<1x1x32x256xf32>
    %355 = vector.shape_cast %354 : vector<1x1x32x256xf32> to vector<32x256xf32>
    %356 = vector.shape_cast %353 : vector<32x256xf32> to vector<1x1x32x256xf32>
    tpu.vector_store %arg6[%c0_246, %c5_247, %c0_248, %c0_249], %356 {strides = array<i32>} : memref<1x12x32x256xf32, #tpu.memory_space<vmem>>, vector<1x1x32x256xf32>,
    %c0_250 = arith.constant 0 : index
    %c0_251 = arith.constant 0 : index
    %c6_252 = arith.constant 6 : index
    %c0_253 = arith.constant 0 : index
    %c0_254 = arith.constant 0 : index
    %357 = vector.load %arg4[%c0_250, %c0_251, %c6_252, %c0_253, %c0_254] : memref<1x1x12x16x2048xf32, #tpu.memory_space<vmem>>, vector<1x1x1x16x2048xf32>
    %358 = vector.shape_cast %357 : vector<1x1x1x16x2048xf32> to vector<16x2048xf32>
    %cst_255 = arith.constant dense<0.000000e+00> : vector<32x2048xf32>
    %359 = tpu.matmul %86, %358, %cst_255 {dimension_numbers = #tpu.dot_dimension_numbers<[1], [0], [0], [1], [0, 0, 1, 1], [], []>} : vector<32x16xf32>, vector<16x2048xf32>, vector<32x2048xf32> -> vector<32x2048xf32>
    %c0_256 = arith.constant 0 : index
    %c0_257 = arith.constant 0 : index
    %c0_258 = arith.constant 0 : index
    %360 = vector.load %arg7[%c0_256, %c0_257, %c0_258] : memref<8x32x256xf32, #tpu.memory_space<vmem>>, vector<1x32x256xf32>
    %361 = vector.shape_cast %360 : vector<1x32x256xf32> to vector<32x256xf32>
    %362 = vector.extract_strided_slice %359 {offsets = [0, 0], sizes = [32, 256], strides = [1, 1]} : vector<32x2048xf32> to vector<32x256xf32>
    %363 = arith.mulf %361, %362 : vector<32x256xf32>
    %c1_259 = arith.constant 1 : index
    %c0_260 = arith.constant 0 : index
    %c0_261 = arith.constant 0 : index
    %364 = vector.load %arg7[%c1_259, %c0_260, %c0_261] : memref<8x32x256xf32, #tpu.memory_space<vmem>>, vector<1x32x256xf32>
    %365 = vector.shape_cast %364 : vector<1x32x256xf32> to vector<32x256xf32>
    %366 = vector.extract_strided_slice %359 {offsets = [0, 256], sizes = [32, 256], strides = [1, 1]} : vector<32x2048xf32> to vector<32x256xf32>
    %367 = arith.mulf %365, %366 : vector<32x256xf32>
    %368 = arith.addf %363, %367 : vector<32x256xf32>
    %c2_262 = arith.constant 2 : index
    %c0_263 = arith.constant 0 : index
    %c0_264 = arith.constant 0 : index
    %369 = vector.load %arg7[%c2_262, %c0_263, %c0_264] : memref<8x32x256xf32, #tpu.memory_space<vmem>>, vector<1x32x256xf32>
    %370 = vector.shape_cast %369 : vector<1x32x256xf32> to vector<32x256xf32>
    %371 = vector.extract_strided_slice %359 {offsets = [0, 512], sizes = [32, 256], strides = [1, 1]} : vector<32x2048xf32> to vector<32x256xf32>
    %372 = arith.mulf %370, %371 : vector<32x256xf32>
    %373 = arith.addf %368, %372 : vector<32x256xf32>
    %c3_265 = arith.constant 3 : index
    %c0_266 = arith.constant 0 : index
    %c0_267 = arith.constant 0 : index
    %374 = vector.load %arg7[%c3_265, %c0_266, %c0_267] : memref<8x32x256xf32, #tpu.memory_space<vmem>>, vector<1x32x256xf32>
    %375 = vector.shape_cast %374 : vector<1x32x256xf32> to vector<32x256xf32>
    %376 = vector.extract_strided_slice %359 {offsets = [0, 768], sizes = [32, 256], strides = [1, 1]} : vector<32x2048xf32> to vector<32x256xf32>
    %377 = arith.mulf %375, %376 : vector<32x256xf32>
    %378 = arith.addf %373, %377 : vector<32x256xf32>
    %c4_268 = arith.constant 4 : index
    %c0_269 = arith.constant 0 : index
    %c0_270 = arith.constant 0 : index
    %379 = vector.load %arg7[%c4_268, %c0_269, %c0_270] : memref<8x32x256xf32, #tpu.memory_space<vmem>>, vector<1x32x256xf32>
    %380 = vector.shape_cast %379 : vector<1x32x256xf32> to vector<32x256xf32>
    %381 = vector.extract_strided_slice %359 {offsets = [0, 1024], sizes = [32, 256], strides = [1, 1]} : vector<32x2048xf32> to vector<32x256xf32>
    %382 = arith.mulf %380, %381 : vector<32x256xf32>
    %383 = arith.addf %378, %382 : vector<32x256xf32>
    %c5_271 = arith.constant 5 : index
    %c0_272 = arith.constant 0 : index
    %c0_273 = arith.constant 0 : index
    %384 = vector.load %arg7[%c5_271, %c0_272, %c0_273] : memref<8x32x256xf32, #tpu.memory_space<vmem>>, vector<1x32x256xf32>
    %385 = vector.shape_cast %384 : vector<1x32x256xf32> to vector<32x256xf32>
    %386 = vector.extract_strided_slice %359 {offsets = [0, 1280], sizes = [32, 256], strides = [1, 1]} : vector<32x2048xf32> to vector<32x256xf32>
    %387 = arith.mulf %385, %386 : vector<32x256xf32>
    %388 = arith.addf %383, %387 : vector<32x256xf32>
    %c6_274 = arith.constant 6 : index
    %c0_275 = arith.constant 0 : index
    %c0_276 = arith.constant 0 : index
    %389 = vector.load %arg7[%c6_274, %c0_275, %c0_276] : memref<8x32x256xf32, #tpu.memory_space<vmem>>, vector<1x32x256xf32>
    %390 = vector.shape_cast %389 : vector<1x32x256xf32> to vector<32x256xf32>
    %391 = vector.extract_strided_slice %359 {offsets = [0, 1536], sizes = [32, 256], strides = [1, 1]} : vector<32x2048xf32> to vector<32x256xf32>
    %392 = arith.mulf %390, %391 : vector<32x256xf32>
    %393 = arith.addf %388, %392 : vector<32x256xf32>
    %c7_277 = arith.constant 7 : index
    %c0_278 = arith.constant 0 : index
    %c0_279 = arith.constant 0 : index
    %394 = vector.load %arg7[%c7_277, %c0_278, %c0_279] : memref<8x32x256xf32, #tpu.memory_space<vmem>>, vector<1x32x256xf32>
    %395 = vector.shape_cast %394 : vector<1x32x256xf32> to vector<32x256xf32>
    %396 = vector.extract_strided_slice %359 {offsets = [0, 1792], sizes = [32, 256], strides = [1, 1]} : vector<32x2048xf32> to vector<32x256xf32>
    %397 = arith.mulf %395, %396 : vector<32x256xf32>
    %398 = arith.addf %393, %397 : vector<32x256xf32>
    %c0_280 = arith.constant 0 : index
    %c6_281 = arith.constant 6 : index
    %c0_282 = arith.constant 0 : index
    %c0_283 = arith.constant 0 : index
    %399 = vector.load %arg6[%c0_280, %c6_281, %c0_282, %c0_283] : memref<1x12x32x256xf32, #tpu.memory_space<vmem>>, vector<1x1x32x256xf32>
    %400 = vector.shape_cast %399 : vector<1x1x32x256xf32> to vector<32x256xf32>
    %401 = vector.shape_cast %398 : vector<32x256xf32> to vector<1x1x32x256xf32>
    tpu.vector_store %arg6[%c0_280, %c6_281, %c0_282, %c0_283], %401 {strides = array<i32>} : memref<1x12x32x256xf32, #tpu.memory_space<vmem>>, vector<1x1x32x256xf32>,
    %c0_284 = arith.constant 0 : index
    %c0_285 = arith.constant 0 : index
    %c7_286 = arith.constant 7 : index
    %c0_287 = arith.constant 0 : index
    %c0_288 = arith.constant 0 : index
    %402 = vector.load %arg4[%c0_284, %c0_285, %c7_286, %c0_287, %c0_288] : memref<1x1x12x16x2048xf32, #tpu.memory_space<vmem>>, vector<1x1x1x16x2048xf32>
    %403 = vector.shape_cast %402 : vector<1x1x1x16x2048xf32> to vector<16x2048xf32>
    %cst_289 = arith.constant dense<0.000000e+00> : vector<32x2048xf32>
    %404 = tpu.matmul %86, %403, %cst_289 {dimension_numbers = #tpu.dot_dimension_numbers<[1], [0], [0], [1], [0, 0, 1, 1], [], []>} : vector<32x16xf32>, vector<16x2048xf32>, vector<32x2048xf32> -> vector<32x2048xf32>
    %c0_290 = arith.constant 0 : index
    %c0_291 = arith.constant 0 : index
    %c0_292 = arith.constant 0 : index
    %405 = vector.load %arg7[%c0_290, %c0_291, %c0_292] : memref<8x32x256xf32, #tpu.memory_space<vmem>>, vector<1x32x256xf32>
    %406 = vector.shape_cast %405 : vector<1x32x256xf32> to vector<32x256xf32>
    %407 = vector.extract_strided_slice %404 {offsets = [0, 0], sizes = [32, 256], strides = [1, 1]} : vector<32x2048xf32> to vector<32x256xf32>
    %408 = arith.mulf %406, %407 : vector<32x256xf32>
    %c1_293 = arith.constant 1 : index
    %c0_294 = arith.constant 0 : index
    %c0_295 = arith.constant 0 : index
    %409 = vector.load %arg7[%c1_293, %c0_294, %c0_295] : memref<8x32x256xf32, #tpu.memory_space<vmem>>, vector<1x32x256xf32>
    %410 = vector.shape_cast %409 : vector<1x32x256xf32> to vector<32x256xf32>
    %411 = vector.extract_strided_slice %404 {offsets = [0, 256], sizes = [32, 256], strides = [1, 1]} : vector<32x2048xf32> to vector<32x256xf32>
    %412 = arith.mulf %410, %411 : vector<32x256xf32>
    %413 = arith.addf %408, %412 : vector<32x256xf32>
    %c2_296 = arith.constant 2 : index
    %c0_297 = arith.constant 0 : index
    %c0_298 = arith.constant 0 : index
    %414 = vector.load %arg7[%c2_296, %c0_297, %c0_298] : memref<8x32x256xf32, #tpu.memory_space<vmem>>, vector<1x32x256xf32>
    %415 = vector.shape_cast %414 : vector<1x32x256xf32> to vector<32x256xf32>
    %416 = vector.extract_strided_slice %404 {offsets = [0, 512], sizes = [32, 256], strides = [1, 1]} : vector<32x2048xf32> to vector<32x256xf32>
    %417 = arith.mulf %415, %416 : vector<32x256xf32>
    %418 = arith.addf %413, %417 : vector<32x256xf32>
    %c3_299 = arith.constant 3 : index
    %c0_300 = arith.constant 0 : index
    %c0_301 = arith.constant 0 : index
    %419 = vector.load %arg7[%c3_299, %c0_300, %c0_301] : memref<8x32x256xf32, #tpu.memory_space<vmem>>, vector<1x32x256xf32>
    %420 = vector.shape_cast %419 : vector<1x32x256xf32> to vector<32x256xf32>
    %421 = vector.extract_strided_slice %404 {offsets = [0, 768], sizes = [32, 256], strides = [1, 1]} : vector<32x2048xf32> to vector<32x256xf32>
    %422 = arith.mulf %420, %421 : vector<32x256xf32>
    %423 = arith.addf %418, %422 : vector<32x256xf32>
    %c4_302 = arith.constant 4 : index
    %c0_303 = arith.constant 0 : index
    %c0_304 = arith.constant 0 : index
    %424 = vector.load %arg7[%c4_302, %c0_303, %c0_304] : memref<8x32x256xf32, #tpu.memory_space<vmem>>, vector<1x32x256xf32>
    %425 = vector.shape_cast %424 : vector<1x32x256xf32> to vector<32x256xf32>
    %426 = vector.extract_strided_slice %404 {offsets = [0, 1024], sizes = [32, 256], strides = [1, 1]} : vector<32x2048xf32> to vector<32x256xf32>
    %427 = arith.mulf %425, %426 : vector<32x256xf32>
    %428 = arith.addf %423, %427 : vector<32x256xf32>
    %c5_305 = arith.constant 5 : index
    %c0_306 = arith.constant 0 : index
    %c0_307 = arith.constant 0 : index
    %429 = vector.load %arg7[%c5_305, %c0_306, %c0_307] : memref<8x32x256xf32, #tpu.memory_space<vmem>>, vector<1x32x256xf32>
    %430 = vector.shape_cast %429 : vector<1x32x256xf32> to vector<32x256xf32>
    %431 = vector.extract_strided_slice %404 {offsets = [0, 1280], sizes = [32, 256], strides = [1, 1]} : vector<32x2048xf32> to vector<32x256xf32>
    %432 = arith.mulf %430, %431 : vector<32x256xf32>
    %433 = arith.addf %428, %432 : vector<32x256xf32>
    %c6_308 = arith.constant 6 : index
    %c0_309 = arith.constant 0 : index
    %c0_310 = arith.constant 0 : index
    %434 = vector.load %arg7[%c6_308, %c0_309, %c0_310] : memref<8x32x256xf32, #tpu.memory_space<vmem>>, vector<1x32x256xf32>
    %435 = vector.shape_cast %434 : vector<1x32x256xf32> to vector<32x256xf32>
    %436 = vector.extract_strided_slice %404 {offsets = [0, 1536], sizes = [32, 256], strides = [1, 1]} : vector<32x2048xf32> to vector<32x256xf32>
    %437 = arith.mulf %435, %436 : vector<32x256xf32>
    %438 = arith.addf %433, %437 : vector<32x256xf32>
    %c7_311 = arith.constant 7 : index
    %c0_312 = arith.constant 0 : index
    %c0_313 = arith.constant 0 : index
    %439 = vector.load %arg7[%c7_311, %c0_312, %c0_313] : memref<8x32x256xf32, #tpu.memory_space<vmem>>, vector<1x32x256xf32>
    %440 = vector.shape_cast %439 : vector<1x32x256xf32> to vector<32x256xf32>
    %441 = vector.extract_strided_slice %404 {offsets = [0, 1792], sizes = [32, 256], strides = [1, 1]} : vector<32x2048xf32> to vector<32x256xf32>
    %442 = arith.mulf %440, %441 : vector<32x256xf32>
    %443 = arith.addf %438, %442 : vector<32x256xf32>
    %c0_314 = arith.constant 0 : index
    %c7_315 = arith.constant 7 : index
    %c0_316 = arith.constant 0 : index
    %c0_317 = arith.constant 0 : index
    %444 = vector.load %arg6[%c0_314, %c7_315, %c0_316, %c0_317] : memref<1x12x32x256xf32, #tpu.memory_space<vmem>>, vector<1x1x32x256xf32>
    %445 = vector.shape_cast %444 : vector<1x1x32x256xf32> to vector<32x256xf32>
    %446 = vector.shape_cast %443 : vector<32x256xf32> to vector<1x1x32x256xf32>
    tpu.vector_store %arg6[%c0_314, %c7_315, %c0_316, %c0_317], %446 {strides = array<i32>} : memref<1x12x32x256xf32, #tpu.memory_space<vmem>>, vector<1x1x32x256xf32>,
    %c0_318 = arith.constant 0 : index
    %c0_319 = arith.constant 0 : index
    %c8 = arith.constant 8 : index
    %c0_320 = arith.constant 0 : index
    %c0_321 = arith.constant 0 : index
    %447 = vector.load %arg4[%c0_318, %c0_319, %c8, %c0_320, %c0_321] : memref<1x1x12x16x2048xf32, #tpu.memory_space<vmem>>, vector<1x1x1x16x2048xf32>
    %448 = vector.shape_cast %447 : vector<1x1x1x16x2048xf32> to vector<16x2048xf32>
    %cst_322 = arith.constant dense<0.000000e+00> : vector<32x2048xf32>
    %449 = tpu.matmul %86, %448, %cst_322 {dimension_numbers = #tpu.dot_dimension_numbers<[1], [0], [0], [1], [0, 0, 1, 1], [], []>} : vector<32x16xf32>, vector<16x2048xf32>, vector<32x2048xf32> -> vector<32x2048xf32>
    %c0_323 = arith.constant 0 : index
    %c0_324 = arith.constant 0 : index
    %c0_325 = arith.constant 0 : index
    %450 = vector.load %arg7[%c0_323, %c0_324, %c0_325] : memref<8x32x256xf32, #tpu.memory_space<vmem>>, vector<1x32x256xf32>
    %451 = vector.shape_cast %450 : vector<1x32x256xf32> to vector<32x256xf32>
    %452 = vector.extract_strided_slice %449 {offsets = [0, 0], sizes = [32, 256], strides = [1, 1]} : vector<32x2048xf32> to vector<32x256xf32>
    %453 = arith.mulf %451, %452 : vector<32x256xf32>
    %c1_326 = arith.constant 1 : index
    %c0_327 = arith.constant 0 : index
    %c0_328 = arith.constant 0 : index
    %454 = vector.load %arg7[%c1_326, %c0_327, %c0_328] : memref<8x32x256xf32, #tpu.memory_space<vmem>>, vector<1x32x256xf32>
    %455 = vector.shape_cast %454 : vector<1x32x256xf32> to vector<32x256xf32>
    %456 = vector.extract_strided_slice %449 {offsets = [0, 256], sizes = [32, 256], strides = [1, 1]} : vector<32x2048xf32> to vector<32x256xf32>
    %457 = arith.mulf %455, %456 : vector<32x256xf32>
    %458 = arith.addf %453, %457 : vector<32x256xf32>
    %c2_329 = arith.constant 2 : index
    %c0_330 = arith.constant 0 : index
    %c0_331 = arith.constant 0 : index
    %459 = vector.load %arg7[%c2_329, %c0_330, %c0_331] : memref<8x32x256xf32, #tpu.memory_space<vmem>>, vector<1x32x256xf32>
    %460 = vector.shape_cast %459 : vector<1x32x256xf32> to vector<32x256xf32>
    %461 = vector.extract_strided_slice %449 {offsets = [0, 512], sizes = [32, 256], strides = [1, 1]} : vector<32x2048xf32> to vector<32x256xf32>
    %462 = arith.mulf %460, %461 : vector<32x256xf32>
    %463 = arith.addf %458, %462 : vector<32x256xf32>
    %c3_332 = arith.constant 3 : index
    %c0_333 = arith.constant 0 : index
    %c0_334 = arith.constant 0 : index
    %464 = vector.load %arg7[%c3_332, %c0_333, %c0_334] : memref<8x32x256xf32, #tpu.memory_space<vmem>>, vector<1x32x256xf32>
    %465 = vector.shape_cast %464 : vector<1x32x256xf32> to vector<32x256xf32>
    %466 = vector.extract_strided_slice %449 {offsets = [0, 768], sizes = [32, 256], strides = [1, 1]} : vector<32x2048xf32> to vector<32x256xf32>
    %467 = arith.mulf %465, %466 : vector<32x256xf32>
    %468 = arith.addf %463, %467 : vector<32x256xf32>
    %c4_335 = arith.constant 4 : index
    %c0_336 = arith.constant 0 : index
    %c0_337 = arith.constant 0 : index
    %469 = vector.load %arg7[%c4_335, %c0_336, %c0_337] : memref<8x32x256xf32, #tpu.memory_space<vmem>>, vector<1x32x256xf32>
    %470 = vector.shape_cast %469 : vector<1x32x256xf32> to vector<32x256xf32>
    %471 = vector.extract_strided_slice %449 {offsets = [0, 1024], sizes = [32, 256], strides = [1, 1]} : vector<32x2048xf32> to vector<32x256xf32>
    %472 = arith.mulf %470, %471 : vector<32x256xf32>
    %473 = arith.addf %468, %472 : vector<32x256xf32>
    %c5_338 = arith.constant 5 : index
    %c0_339 = arith.constant 0 : index
    %c0_340 = arith.constant 0 : index
    %474 = vector.load %arg7[%c5_338, %c0_339, %c0_340] : memref<8x32x256xf32, #tpu.memory_space<vmem>>, vector<1x32x256xf32>
    %475 = vector.shape_cast %474 : vector<1x32x256xf32> to vector<32x256xf32>
    %476 = vector.extract_strided_slice %449 {offsets = [0, 1280], sizes = [32, 256], strides = [1, 1]} : vector<32x2048xf32> to vector<32x256xf32>
    %477 = arith.mulf %475, %476 : vector<32x256xf32>
    %478 = arith.addf %473, %477 : vector<32x256xf32>
    %c6_341 = arith.constant 6 : index
    %c0_342 = arith.constant 0 : index
    %c0_343 = arith.constant 0 : index
    %479 = vector.load %arg7[%c6_341, %c0_342, %c0_343] : memref<8x32x256xf32, #tpu.memory_space<vmem>>, vector<1x32x256xf32>
    %480 = vector.shape_cast %479 : vector<1x32x256xf32> to vector<32x256xf32>
    %481 = vector.extract_strided_slice %449 {offsets = [0, 1536], sizes = [32, 256], strides = [1, 1]} : vector<32x2048xf32> to vector<32x256xf32>
    %482 = arith.mulf %480, %481 : vector<32x256xf32>
    %483 = arith.addf %478, %482 : vector<32x256xf32>
    %c7_344 = arith.constant 7 : index
    %c0_345 = arith.constant 0 : index
    %c0_346 = arith.constant 0 : index
    %484 = vector.load %arg7[%c7_344, %c0_345, %c0_346] : memref<8x32x256xf32, #tpu.memory_space<vmem>>, vector<1x32x256xf32>
    %485 = vector.shape_cast %484 : vector<1x32x256xf32> to vector<32x256xf32>
    %486 = vector.extract_strided_slice %449 {offsets = [0, 1792], sizes = [32, 256], strides = [1, 1]} : vector<32x2048xf32> to vector<32x256xf32>
    %487 = arith.mulf %485, %486 : vector<32x256xf32>
    %488 = arith.addf %483, %487 : vector<32x256xf32>
    %c0_347 = arith.constant 0 : index
    %c8_348 = arith.constant 8 : index
    %c0_349 = arith.constant 0 : index
    %c0_350 = arith.constant 0 : index
    %489 = vector.load %arg6[%c0_347, %c8_348, %c0_349, %c0_350] : memref<1x12x32x256xf32, #tpu.memory_space<vmem>>, vector<1x1x32x256xf32>
    %490 = vector.shape_cast %489 : vector<1x1x32x256xf32> to vector<32x256xf32>
    %491 = vector.shape_cast %488 : vector<32x256xf32> to vector<1x1x32x256xf32>
    tpu.vector_store %arg6[%c0_347, %c8_348, %c0_349, %c0_350], %491 {strides = array<i32>} : memref<1x12x32x256xf32, #tpu.memory_space<vmem>>, vector<1x1x32x256xf32>,
    %c0_351 = arith.constant 0 : index
    %c0_352 = arith.constant 0 : index
    %c9 = arith.constant 9 : index
    %c0_353 = arith.constant 0 : index
    %c0_354 = arith.constant 0 : index
    %492 = vector.load %arg4[%c0_351, %c0_352, %c9, %c0_353, %c0_354] : memref<1x1x12x16x2048xf32, #tpu.memory_space<vmem>>, vector<1x1x1x16x2048xf32>
    %493 = vector.shape_cast %492 : vector<1x1x1x16x2048xf32> to vector<16x2048xf32>
    %cst_355 = arith.constant dense<0.000000e+00> : vector<32x2048xf32>
    %494 = tpu.matmul %86, %493, %cst_355 {dimension_numbers = #tpu.dot_dimension_numbers<[1], [0], [0], [1], [0, 0, 1, 1], [], []>} : vector<32x16xf32>, vector<16x2048xf32>, vector<32x2048xf32> -> vector<32x2048xf32>
    %c0_356 = arith.constant 0 : index
    %c0_357 = arith.constant 0 : index
    %c0_358 = arith.constant 0 : index
    %495 = vector.load %arg7[%c0_356, %c0_357, %c0_358] : memref<8x32x256xf32, #tpu.memory_space<vmem>>, vector<1x32x256xf32>
    %496 = vector.shape_cast %495 : vector<1x32x256xf32> to vector<32x256xf32>
    %497 = vector.extract_strided_slice %494 {offsets = [0, 0], sizes = [32, 256], strides = [1, 1]} : vector<32x2048xf32> to vector<32x256xf32>
    %498 = arith.mulf %496, %497 : vector<32x256xf32>
    %c1_359 = arith.constant 1 : index
    %c0_360 = arith.constant 0 : index
    %c0_361 = arith.constant 0 : index
    %499 = vector.load %arg7[%c1_359, %c0_360, %c0_361] : memref<8x32x256xf32, #tpu.memory_space<vmem>>, vector<1x32x256xf32>
    %500 = vector.shape_cast %499 : vector<1x32x256xf32> to vector<32x256xf32>
    %501 = vector.extract_strided_slice %494 {offsets = [0, 256], sizes = [32, 256], strides = [1, 1]} : vector<32x2048xf32> to vector<32x256xf32>
    %502 = arith.mulf %500, %501 : vector<32x256xf32>
    %503 = arith.addf %498, %502 : vector<32x256xf32>
    %c2_362 = arith.constant 2 : index
    %c0_363 = arith.constant 0 : index
    %c0_364 = arith.constant 0 : index
    %504 = vector.load %arg7[%c2_362, %c0_363, %c0_364] : memref<8x32x256xf32, #tpu.memory_space<vmem>>, vector<1x32x256xf32>
    %505 = vector.shape_cast %504 : vector<1x32x256xf32> to vector<32x256xf32>
    %506 = vector.extract_strided_slice %494 {offsets = [0, 512], sizes = [32, 256], strides = [1, 1]} : vector<32x2048xf32> to vector<32x256xf32>
    %507 = arith.mulf %505, %506 : vector<32x256xf32>
    %508 = arith.addf %503, %507 : vector<32x256xf32>
    %c3_365 = arith.constant 3 : index
    %c0_366 = arith.constant 0 : index
    %c0_367 = arith.constant 0 : index
    %509 = vector.load %arg7[%c3_365, %c0_366, %c0_367] : memref<8x32x256xf32, #tpu.memory_space<vmem>>, vector<1x32x256xf32>
    %510 = vector.shape_cast %509 : vector<1x32x256xf32> to vector<32x256xf32>
    %511 = vector.extract_strided_slice %494 {offsets = [0, 768], sizes = [32, 256], strides = [1, 1]} : vector<32x2048xf32> to vector<32x256xf32>
    %512 = arith.mulf %510, %511 : vector<32x256xf32>
    %513 = arith.addf %508, %512 : vector<32x256xf32>
    %c4_368 = arith.constant 4 : index
    %c0_369 = arith.constant 0 : index
    %c0_370 = arith.constant 0 : index
    %514 = vector.load %arg7[%c4_368, %c0_369, %c0_370] : memref<8x32x256xf32, #tpu.memory_space<vmem>>, vector<1x32x256xf32>
    %515 = vector.shape_cast %514 : vector<1x32x256xf32> to vector<32x256xf32>
    %516 = vector.extract_strided_slice %494 {offsets = [0, 1024], sizes = [32, 256], strides = [1, 1]} : vector<32x2048xf32> to vector<32x256xf32>
    %517 = arith.mulf %515, %516 : vector<32x256xf32>
    %518 = arith.addf %513, %517 : vector<32x256xf32>
    %c5_371 = arith.constant 5 : index
    %c0_372 = arith.constant 0 : index
    %c0_373 = arith.constant 0 : index
    %519 = vector.load %arg7[%c5_371, %c0_372, %c0_373] : memref<8x32x256xf32, #tpu.memory_space<vmem>>, vector<1x32x256xf32>
    %520 = vector.shape_cast %519 : vector<1x32x256xf32> to vector<32x256xf32>
    %521 = vector.extract_strided_slice %494 {offsets = [0, 1280], sizes = [32, 256], strides = [1, 1]} : vector<32x2048xf32> to vector<32x256xf32>
    %522 = arith.mulf %520, %521 : vector<32x256xf32>
    %523 = arith.addf %518, %522 : vector<32x256xf32>
    %c6_374 = arith.constant 6 : index
    %c0_375 = arith.constant 0 : index
    %c0_376 = arith.constant 0 : index
    %524 = vector.load %arg7[%c6_374, %c0_375, %c0_376] : memref<8x32x256xf32, #tpu.memory_space<vmem>>, vector<1x32x256xf32>
    %525 = vector.shape_cast %524 : vector<1x32x256xf32> to vector<32x256xf32>
    %526 = vector.extract_strided_slice %494 {offsets = [0, 1536], sizes = [32, 256], strides = [1, 1]} : vector<32x2048xf32> to vector<32x256xf32>
    %527 = arith.mulf %525, %526 : vector<32x256xf32>
    %528 = arith.addf %523, %527 : vector<32x256xf32>
    %c7_377 = arith.constant 7 : index
    %c0_378 = arith.constant 0 : index
    %c0_379 = arith.constant 0 : index
    %529 = vector.load %arg7[%c7_377, %c0_378, %c0_379] : memref<8x32x256xf32, #tpu.memory_space<vmem>>, vector<1x32x256xf32>
    %530 = vector.shape_cast %529 : vector<1x32x256xf32> to vector<32x256xf32>
    %531 = vector.extract_strided_slice %494 {offsets = [0, 1792], sizes = [32, 256], strides = [1, 1]} : vector<32x2048xf32> to vector<32x256xf32>
    %532 = arith.mulf %530, %531 : vector<32x256xf32>
    %533 = arith.addf %528, %532 : vector<32x256xf32>
    %c0_380 = arith.constant 0 : index
    %c9_381 = arith.constant 9 : index
    %c0_382 = arith.constant 0 : index
    %c0_383 = arith.constant 0 : index
    %534 = vector.load %arg6[%c0_380, %c9_381, %c0_382, %c0_383] : memref<1x12x32x256xf32, #tpu.memory_space<vmem>>, vector<1x1x32x256xf32>
    %535 = vector.shape_cast %534 : vector<1x1x32x256xf32> to vector<32x256xf32>
    %536 = vector.shape_cast %533 : vector<32x256xf32> to vector<1x1x32x256xf32>
    tpu.vector_store %arg6[%c0_380, %c9_381, %c0_382, %c0_383], %536 {strides = array<i32>} : memref<1x12x32x256xf32, #tpu.memory_space<vmem>>, vector<1x1x32x256xf32>,
    %c0_384 = arith.constant 0 : index
    %c0_385 = arith.constant 0 : index
    %c10 = arith.constant 10 : index
    %c0_386 = arith.constant 0 : index
    %c0_387 = arith.constant 0 : index
    %537 = vector.load %arg4[%c0_384, %c0_385, %c10, %c0_386, %c0_387] : memref<1x1x12x16x2048xf32, #tpu.memory_space<vmem>>, vector<1x1x1x16x2048xf32>
    %538 = vector.shape_cast %537 : vector<1x1x1x16x2048xf32> to vector<16x2048xf32>
    %cst_388 = arith.constant dense<0.000000e+00> : vector<32x2048xf32>
    %539 = tpu.matmul %86, %538, %cst_388 {dimension_numbers = #tpu.dot_dimension_numbers<[1], [0], [0], [1], [0, 0, 1, 1], [], []>} : vector<32x16xf32>, vector<16x2048xf32>, vector<32x2048xf32> -> vector<32x2048xf32>
    %c0_389 = arith.constant 0 : index
    %c0_390 = arith.constant 0 : index
    %c0_391 = arith.constant 0 : index
    %540 = vector.load %arg7[%c0_389, %c0_390, %c0_391] : memref<8x32x256xf32, #tpu.memory_space<vmem>>, vector<1x32x256xf32>
    %541 = vector.shape_cast %540 : vector<1x32x256xf32> to vector<32x256xf32>
    %542 = vector.extract_strided_slice %539 {offsets = [0, 0], sizes = [32, 256], strides = [1, 1]} : vector<32x2048xf32> to vector<32x256xf32>
    %543 = arith.mulf %541, %542 : vector<32x256xf32>
    %c1_392 = arith.constant 1 : index
    %c0_393 = arith.constant 0 : index
    %c0_394 = arith.constant 0 : index
    %544 = vector.load %arg7[%c1_392, %c0_393, %c0_394] : memref<8x32x256xf32, #tpu.memory_space<vmem>>, vector<1x32x256xf32>
    %545 = vector.shape_cast %544 : vector<1x32x256xf32> to vector<32x256xf32>
    %546 = vector.extract_strided_slice %539 {offsets = [0, 256], sizes = [32, 256], strides = [1, 1]} : vector<32x2048xf32> to vector<32x256xf32>
    %547 = arith.mulf %545, %546 : vector<32x256xf32>
    %548 = arith.addf %543, %547 : vector<32x256xf32>
    %c2_395 = arith.constant 2 : index
    %c0_396 = arith.constant 0 : index
    %c0_397 = arith.constant 0 : index
    %549 = vector.load %arg7[%c2_395, %c0_396, %c0_397] : memref<8x32x256xf32, #tpu.memory_space<vmem>>, vector<1x32x256xf32>
    %550 = vector.shape_cast %549 : vector<1x32x256xf32> to vector<32x256xf32>
    %551 = vector.extract_strided_slice %539 {offsets = [0, 512], sizes = [32, 256], strides = [1, 1]} : vector<32x2048xf32> to vector<32x256xf32>
    %552 = arith.mulf %550, %551 : vector<32x256xf32>
    %553 = arith.addf %548, %552 : vector<32x256xf32>
    %c3_398 = arith.constant 3 : index
    %c0_399 = arith.constant 0 : index
    %c0_400 = arith.constant 0 : index
    %554 = vector.load %arg7[%c3_398, %c0_399, %c0_400] : memref<8x32x256xf32, #tpu.memory_space<vmem>>, vector<1x32x256xf32>
    %555 = vector.shape_cast %554 : vector<1x32x256xf32> to vector<32x256xf32>
    %556 = vector.extract_strided_slice %539 {offsets = [0, 768], sizes = [32, 256], strides = [1, 1]} : vector<32x2048xf32> to vector<32x256xf32>
    %557 = arith.mulf %555, %556 : vector<32x256xf32>
    %558 = arith.addf %553, %557 : vector<32x256xf32>
    %c4_401 = arith.constant 4 : index
    %c0_402 = arith.constant 0 : index
    %c0_403 = arith.constant 0 : index
    %559 = vector.load %arg7[%c4_401, %c0_402, %c0_403] : memref<8x32x256xf32, #tpu.memory_space<vmem>>, vector<1x32x256xf32>
    %560 = vector.shape_cast %559 : vector<1x32x256xf32> to vector<32x256xf32>
    %561 = vector.extract_strided_slice %539 {offsets = [0, 1024], sizes = [32, 256], strides = [1, 1]} : vector<32x2048xf32> to vector<32x256xf32>
    %562 = arith.mulf %560, %561 : vector<32x256xf32>
    %563 = arith.addf %558, %562 : vector<32x256xf32>
    %c5_404 = arith.constant 5 : index
    %c0_405 = arith.constant 0 : index
    %c0_406 = arith.constant 0 : index
    %564 = vector.load %arg7[%c5_404, %c0_405, %c0_406] : memref<8x32x256xf32, #tpu.memory_space<vmem>>, vector<1x32x256xf32>
    %565 = vector.shape_cast %564 : vector<1x32x256xf32> to vector<32x256xf32>
    %566 = vector.extract_strided_slice %539 {offsets = [0, 1280], sizes = [32, 256], strides = [1, 1]} : vector<32x2048xf32> to vector<32x256xf32>
    %567 = arith.mulf %565, %566 : vector<32x256xf32>
    %568 = arith.addf %563, %567 : vector<32x256xf32>
    %c6_407 = arith.constant 6 : index
    %c0_408 = arith.constant 0 : index
    %c0_409 = arith.constant 0 : index
    %569 = vector.load %arg7[%c6_407, %c0_408, %c0_409] : memref<8x32x256xf32, #tpu.memory_space<vmem>>, vector<1x32x256xf32>
    %570 = vector.shape_cast %569 : vector<1x32x256xf32> to vector<32x256xf32>
    %571 = vector.extract_strided_slice %539 {offsets = [0, 1536], sizes = [32, 256], strides = [1, 1]} : vector<32x2048xf32> to vector<32x256xf32>
    %572 = arith.mulf %570, %571 : vector<32x256xf32>
    %573 = arith.addf %568, %572 : vector<32x256xf32>
    %c7_410 = arith.constant 7 : index
    %c0_411 = arith.constant 0 : index
    %c0_412 = arith.constant 0 : index
    %574 = vector.load %arg7[%c7_410, %c0_411, %c0_412] : memref<8x32x256xf32, #tpu.memory_space<vmem>>, vector<1x32x256xf32>
    %575 = vector.shape_cast %574 : vector<1x32x256xf32> to vector<32x256xf32>
    %576 = vector.extract_strided_slice %539 {offsets = [0, 1792], sizes = [32, 256], strides = [1, 1]} : vector<32x2048xf32> to vector<32x256xf32>
    %577 = arith.mulf %575, %576 : vector<32x256xf32>
    %578 = arith.addf %573, %577 : vector<32x256xf32>
    %c0_413 = arith.constant 0 : index
    %c10_414 = arith.constant 10 : index
    %c0_415 = arith.constant 0 : index
    %c0_416 = arith.constant 0 : index
    %579 = vector.load %arg6[%c0_413, %c10_414, %c0_415, %c0_416] : memref<1x12x32x256xf32, #tpu.memory_space<vmem>>, vector<1x1x32x256xf32>
    %580 = vector.shape_cast %579 : vector<1x1x32x256xf32> to vector<32x256xf32>
    %581 = vector.shape_cast %578 : vector<32x256xf32> to vector<1x1x32x256xf32>
    tpu.vector_store %arg6[%c0_413, %c10_414, %c0_415, %c0_416], %581 {strides = array<i32>} : memref<1x12x32x256xf32, #tpu.memory_space<vmem>>, vector<1x1x32x256xf32>,
    %c0_417 = arith.constant 0 : index
    %c0_418 = arith.constant 0 : index
    %c11 = arith.constant 11 : index
    %c0_419 = arith.constant 0 : index
    %c0_420 = arith.constant 0 : index
    %582 = vector.load %arg4[%c0_417, %c0_418, %c11, %c0_419, %c0_420] : memref<1x1x12x16x2048xf32, #tpu.memory_space<vmem>>, vector<1x1x1x16x2048xf32>
    %583 = vector.shape_cast %582 : vector<1x1x1x16x2048xf32> to vector<16x2048xf32>
    %cst_421 = arith.constant dense<0.000000e+00> : vector<32x2048xf32>
    %584 = tpu.matmul %86, %583, %cst_421 {dimension_numbers = #tpu.dot_dimension_numbers<[1], [0], [0], [1], [0, 0, 1, 1], [], []>} : vector<32x16xf32>, vector<16x2048xf32>, vector<32x2048xf32> -> vector<32x2048xf32>
    %c0_422 = arith.constant 0 : index
    %c0_423 = arith.constant 0 : index
    %c0_424 = arith.constant 0 : index
    %585 = vector.load %arg7[%c0_422, %c0_423, %c0_424] : memref<8x32x256xf32, #tpu.memory_space<vmem>>, vector<1x32x256xf32>
    %586 = vector.shape_cast %585 : vector<1x32x256xf32> to vector<32x256xf32>
    %587 = vector.extract_strided_slice %584 {offsets = [0, 0], sizes = [32, 256], strides = [1, 1]} : vector<32x2048xf32> to vector<32x256xf32>
    %588 = arith.mulf %586, %587 : vector<32x256xf32>
    %c1_425 = arith.constant 1 : index
    %c0_426 = arith.constant 0 : index
    %c0_427 = arith.constant 0 : index
    %589 = vector.load %arg7[%c1_425, %c0_426, %c0_427] : memref<8x32x256xf32, #tpu.memory_space<vmem>>, vector<1x32x256xf32>
    %590 = vector.shape_cast %589 : vector<1x32x256xf32> to vector<32x256xf32>
    %591 = vector.extract_strided_slice %584 {offsets = [0, 256], sizes = [32, 256], strides = [1, 1]} : vector<32x2048xf32> to vector<32x256xf32>
    %592 = arith.mulf %590, %591 : vector<32x256xf32>
    %593 = arith.addf %588, %592 : vector<32x256xf32>
    %c2_428 = arith.constant 2 : index
    %c0_429 = arith.constant 0 : index
    %c0_430 = arith.constant 0 : index
    %594 = vector.load %arg7[%c2_428, %c0_429, %c0_430] : memref<8x32x256xf32, #tpu.memory_space<vmem>>, vector<1x32x256xf32>
    %595 = vector.shape_cast %594 : vector<1x32x256xf32> to vector<32x256xf32>
    %596 = vector.extract_strided_slice %584 {offsets = [0, 512], sizes = [32, 256], strides = [1, 1]} : vector<32x2048xf32> to vector<32x256xf32>
    %597 = arith.mulf %595, %596 : vector<32x256xf32>
    %598 = arith.addf %593, %597 : vector<32x256xf32>
    %c3_431 = arith.constant 3 : index
    %c0_432 = arith.constant 0 : index
    %c0_433 = arith.constant 0 : index
    %599 = vector.load %arg7[%c3_431, %c0_432, %c0_433] : memref<8x32x256xf32, #tpu.memory_space<vmem>>, vector<1x32x256xf32>
    %600 = vector.shape_cast %599 : vector<1x32x256xf32> to vector<32x256xf32>
    %601 = vector.extract_strided_slice %584 {offsets = [0, 768], sizes = [32, 256], strides = [1, 1]} : vector<32x2048xf32> to vector<32x256xf32>
    %602 = arith.mulf %600, %601 : vector<32x256xf32>
    %603 = arith.addf %598, %602 : vector<32x256xf32>
    %c4_434 = arith.constant 4 : index
    %c0_435 = arith.constant 0 : index
    %c0_436 = arith.constant 0 : index
    %604 = vector.load %arg7[%c4_434, %c0_435, %c0_436] : memref<8x32x256xf32, #tpu.memory_space<vmem>>, vector<1x32x256xf32>
    %605 = vector.shape_cast %604 : vector<1x32x256xf32> to vector<32x256xf32>
    %606 = vector.extract_strided_slice %584 {offsets = [0, 1024], sizes = [32, 256], strides = [1, 1]} : vector<32x2048xf32> to vector<32x256xf32>
    %607 = arith.mulf %605, %606 : vector<32x256xf32>
    %608 = arith.addf %603, %607 : vector<32x256xf32>
    %c5_437 = arith.constant 5 : index
    %c0_438 = arith.constant 0 : index
    %c0_439 = arith.constant 0 : index
    %609 = vector.load %arg7[%c5_437, %c0_438, %c0_439] : memref<8x32x256xf32, #tpu.memory_space<vmem>>, vector<1x32x256xf32>
    %610 = vector.shape_cast %609 : vector<1x32x256xf32> to vector<32x256xf32>
    %611 = vector.extract_strided_slice %584 {offsets = [0, 1280], sizes = [32, 256], strides = [1, 1]} : vector<32x2048xf32> to vector<32x256xf32>
    %612 = arith.mulf %610, %611 : vector<32x256xf32>
    %613 = arith.addf %608, %612 : vector<32x256xf32>
    %c6_440 = arith.constant 6 : index
    %c0_441 = arith.constant 0 : index
    %c0_442 = arith.constant 0 : index
    %614 = vector.load %arg7[%c6_440, %c0_441, %c0_442] : memref<8x32x256xf32, #tpu.memory_space<vmem>>, vector<1x32x256xf32>
    %615 = vector.shape_cast %614 : vector<1x32x256xf32> to vector<32x256xf32>
    %616 = vector.extract_strided_slice %584 {offsets = [0, 1536], sizes = [32, 256], strides = [1, 1]} : vector<32x2048xf32> to vector<32x256xf32>
    %617 = arith.mulf %615, %616 : vector<32x256xf32>
    %618 = arith.addf %613, %617 : vector<32x256xf32>
    %c7_443 = arith.constant 7 : index
    %c0_444 = arith.constant 0 : index
    %c0_445 = arith.constant 0 : index
    %619 = vector.load %arg7[%c7_443, %c0_444, %c0_445] : memref<8x32x256xf32, #tpu.memory_space<vmem>>, vector<1x32x256xf32>
    %620 = vector.shape_cast %619 : vector<1x32x256xf32> to vector<32x256xf32>
    %621 = vector.extract_strided_slice %584 {offsets = [0, 1792], sizes = [32, 256], strides = [1, 1]} : vector<32x2048xf32> to vector<32x256xf32>
    %622 = arith.mulf %620, %621 : vector<32x256xf32>
    %623 = arith.addf %618, %622 : vector<32x256xf32>
    %c0_446 = arith.constant 0 : index
    %c11_447 = arith.constant 11 : index
    %c0_448 = arith.constant 0 : index
    %c0_449 = arith.constant 0 : index
    %624 = vector.load %arg6[%c0_446, %c11_447, %c0_448, %c0_449] : memref<1x12x32x256xf32, #tpu.memory_space<vmem>>, vector<1x1x32x256xf32>
    %625 = vector.shape_cast %624 : vector<1x1x32x256xf32> to vector<32x256xf32>
    %626 = vector.shape_cast %623 : vector<32x256xf32> to vector<1x1x32x256xf32>
    tpu.vector_store %arg6[%c0_446, %c11_447, %c0_448, %c0_449], %626 {strides = array<i32>} : memref<1x12x32x256xf32, #tpu.memory_space<vmem>>, vector<1x1x32x256xf32>,
    return
  }
  func.func @transform_0(%arg0: i32, %arg1: i32, %arg2: i32) -> (i32, i32, i32) {
    %c0_i32 = arith.constant 0 : i32
    return %arg0, %arg2, %arg1 : i32, i32, i32
  }
  func.func @transform_1(%arg0: i32, %arg1: i32, %arg2: i32) -> (i32, i32, i32, i32, i32) {
    %c0_i32 = arith.constant 0 : i32
    %c0_i32_0 = arith.constant 0 : i32
    %c0_i32_1 = arith.constant 0 : i32
    %c0_i32_2 = arith.constant 0 : i32
    return %arg0, %arg1, %c0_i32, %c0_i32_0, %c0_i32_1 : i32, i32, i32, i32, i32
  }
  func.func @transform_2(%arg0: i32, %arg1: i32, %arg2: i32) -> (i32, i32) {
    %c0_i32 = arith.constant 0 : i32
    %c0_i32_0 = arith.constant 0 : i32
    return %arg2, %c0_i32 : i32, i32
  }
  func.func @transform_3(%arg0: i32, %arg1: i32, %arg2: i32) -> (i32, i32, i32, i32) {
    %c0_i32 = arith.constant 0 : i32
    %c0_i32_0 = arith.constant 0 : i32
    return %arg0, %c0_i32, %arg2, %arg1 : i32, i32, i32, i32
  }
}

</mosaic_0001>

<bundles_post_ra>
// kernel: slicing_layer.1
= control target key start
LH: loop header
LB: loop body
LE: loop exit
PB: predicated region body
PF: predicated region fallthrough
CT: control target
= control target key end

     0   :  { %8 = vsyncpa [#allocation4], 0  ;;  %s17157_s0 = inlined_call_operand.vmem [shape: f32[2,32,256], index: 0, kind: input, shape index: {}]   ;;  %s17158_s1 = inlined_call_operand.vmem [shape: f32[2,1,12,16,2048], index: 1, kind: input, shape index: {}]   ;;  %s17159_s2 = inlined_call_operand.vmem [shape: f32[32,16], index: 2, kind: input, shape index: {}]   ;;  %s17160_s3 = inlined_call_operand.hbm [shape: f32[2,12,32,256], index: 3, kind: output, shape index: {}]  }
   0x1   :  { %10 = vsyncpa [#allocation4 + $0x1], 0  ;;  %s13510_s12 = smov 0   ;;  %s13512_s13 = smov 0  }
   0x2   :  { %s13514_s14 = smov 0   ;;  %s13516_s15 = smov 0  }
   0x3   :  { %s13518_s16 = smov 0   ;;  %s13520_s17 = smov 0  }
   0x4 LB: > { %s12044_s18 = sadd.s32 4294967295, %s13484_s17   ;;  %s12045_s19 = sadd.s32 4294967294, %s13484_s17   ;;  %s13484_s17 = sphi %s13520_s17, %s16_s17   ;;  %s13480_s16 = sphi %s13518_s16, %s17714_s16   ;;  %s13476_s15 = sphi %s13516_s15, %s17713_s15   ;;  %s13472_s14 = sphi %s13514_s14, %s17712_s14   ;;  %s13468_s13 = sphi %s13512_s13, %s17711_s13   ;;  %s13464_s12 = sphi %s13510_s12, %s17710_s12  }
   0x5   : > { %s35_s20 = sadd.s32 1, %s13480_s16  ;;  %s130_s21 = sadd.s32 1, %s13472_s14 }
   0x6   : > { %p37_p0 = scmp.ge.s32.totalorder %s35_s20, 2  ;;  %p140_p1 = scmp.ne.s32.totalorder %s13472_s14, %s13468_s13 }
   0x7   : > { %p141_p2 = scmp.eq.s32.totalorder %s12044_s18, 1  ;;  %p146_p3 = scmp.ne.s32.totalorder %s13468_s13, %s13464_s12 }
   0x8   : > { %s17716_s20 = smov (%p37_p0, %s35_s20), 0  ;;  %p147_p5 = scmp.eq.s32.totalorder %s12045_s19, 1 }
   0x9   : > { %p13550_p4 = por %p141_p2, %p140_p1  ;;  %s123_s23 = ssub.s32 %s13480_s16, %s17716_s20 }
   0xa   : > { %p12049_p6 = scmp.ge.s32.totalorder %s13484_s17, 1  ;;  %p128_p7 = scmp.eq.s32.totalorder %s123_s23, 0 }
   0xb   : > { %p13557_p8 = por %p147_p5, %p146_p3  ;;  %p205_p9 = scmp.lt.s32.totalorder %s13484_s17, 3 }
   0xc   : > { %s13563_s25 = scalar_select %p128_p7, %s13472_s14, %s130_s21  }
   0xd   : > { %p206_p10 = pnand %p12049_p6, %p205_p9 }
   0xf   : > { %209 = sbr.rel (%p206_p10) target bundleno = 1036 (0x40c), region = 32 }
  0x16   : > { %p254_p11 = scmp.lt.s32.totalorder %s13476_s15, 1  ;;  %v17164_v0 = vmov 0.0   ;;  %v13588_v12 = vld [vmem:[%s17159_s2] sm:$0xff]  ;;  %vm664_vm0 = vcmask 130048   ;;  %v13609_v31 = vld [vmem:[%s17159_s2 + $0x8] sm:$0xff]  ;;  %v13621_v33 = vld [vmem:[%s17159_s2 + $0x10] sm:$0xff] }
  0x17   : > { %741 = vmatprep.mubr.f32.mxu0 %v17164_v0  ;;  %830 = vmatprep.mubr.f32.mxu1 %v17164_v0  ;;  %v13632_v34 = vld [vmem:[%s17159_s2 + $0x18] sm:$0xff]  ;;  %s249_s8 = sand.u32 1, %s13468_s13   ;;  %s13323_s6 = smul.u32 12288, %s13476_s15 }
  0x18   : > { %s13569_s26 = scalar_select %p254_p11, %s13476_s15, 1 }
  0x19   : > { %s14640_s9 = smul.u32 768, %s249_s8  ;;  %s17103_s15 = scalar_lea.hbm %s17160_s3, %s13323_s6 }
  0x1a   : > { %s13322_s27 = smul.u32 3072, %s13569_s26  ;;  %s12936_s18 = sshll.u32 %s13569_s26, 6 }
  0x1b   : > { %s13935_s23 = scalar_lea.vmem %s17157_s0, %s12936_s18  ;;  %s14678_s10 = scalar_lea.vmem [#allocation3], %s14640_s9 }
  0x1c   : > { %s13575_s30 = scalar_lea.vmem %s17158_s1, %s13322_s27  ;;  %s11918_s7 = sshll.u32 %s14678_s10, 4  ;;  %s17105_s7 = int_to_ptr.vmem [resolvable:$true] %s11918_s7 }
  0x1d   : > { %v633_v1 = vld [vmem:[%s13575_s30 + $0x8] sm:$0xff]  ;;  %v635_v3 = vld [vmem:[%s13575_s30 + $0x18] sm:$0xff]  ;;  %v632_v6 = vld [vmem:[%s13575_s30] sm:$0xff]  ;;  %s17111_s18 = scalar_lea.sflag [#allocation4], %s249_s8  ;;  %s13406_s19 = scalar_lea.vmem %s17105_s7, 12288 }
  0x1e   : > { %v649_v2 = vld [vmem:[%s13575_s30 + $0x88] sm:$0xff]  ;;  %v651_v5 = vld [vmem:[%s13575_s30 + $0x98] sm:$0xff]  ;;  %v648_v7 = vld [vmem:[%s13575_s30 + $0x80] sm:$0xff]  ;;  %p13407_p12 = scmp.ne.s32.totalorder %s17105_s7, %s13406_s19  ;;  %s13487_s21 = smov [#allocation3]  }
  0x1f   : > { %v12937_v4 = vpack.c.bf16 %v649_v2, %v633_v1  ;;  %v12941_v8 = vpack.c.bf16 %v651_v5, %v635_v3  ;;  %v12939_v9 = vpack.c.bf16 %v648_v7, %v632_v6  ;;  %v634_v10 = vld [vmem:[%s13575_s30 + $0x10] sm:$0xff]  ;;  %v637_v13 = vld [vmem:[%s13575_s30 + $0x28] sm:$0xff]  ;;  %v636_v16 = vld [vmem:[%s13575_s30 + $0x20] sm:$0xff] }
  0x20   : > { %v650_v11 = vld [vmem:[%s13575_s30 + $0x90] sm:$0xff]  ;;  %v653_v15 = vld [vmem:[%s13575_s30 + $0xa8] sm:$0xff]  ;;  %v652_v17 = vld [vmem:[%s13575_s30 + $0xa0] sm:$0xff]  ;;  %p13408_p13 = pnand %p13407_p12, %p13550_p4 }
  0x21   : > { %12938 = vmatprep.subr.bf16.mxu0 %v12937_v4  ;;  %v12943_v14 = vpack.c.bf16 %v650_v11, %v634_v10  ;;  %12942 = vmatprep.subr.bf16.mxu1 %v12941_v8  ;;  %v12945_v18 = vpack.c.bf16 %v653_v15, %v637_v13  ;;  %v12947_v19 = vpack.c.bf16 %v652_v17, %v636_v16  ;;  %v639_v20 = vld [vmem:[%s13575_s30 + $0x38] sm:$0xff]  ;;  %v638_v22 = vld [vmem:[%s13575_s30 + $0x30] sm:$0xff]  ;;  %v641_v25 = vld [vmem:[%s13575_s30 + $0x48] sm:$0xff] }
  0x22   : > { %12940 = vmatpush1.bf16.msra.mxu0 %v12939_v9  ;;  %v655_v21 = vld [vmem:[%s13575_s30 + $0xb8] sm:$0xff]  ;;  %v654_v24 = vld [vmem:[%s13575_s30 + $0xb0] sm:$0xff]  ;;  %v657_v26 = vld [vmem:[%s13575_s30 + $0xc8] sm:$0xff]  ;;  %p13409_p0 = pneg %p13408_p13 }
  0x23   : > { %12944 = vmatpush1.bf16.msra.mxu1 %v12943_v14  ;;  %v12949_v23 = vpack.c.bf16 %v655_v21, %v639_v20  ;;  %12946 = vmatprep.subr.bf16.mxu0 %v12945_v18  ;;  %v12951_v27 = vpack.c.bf16 %v654_v24, %v638_v22  ;;  %v12953_v28 = vpack.c.bf16 %v657_v26, %v641_v25  ;;  %v643_v29 = vld [vmem:[%s13575_s30 + $0x58] sm:$0xff]  ;;  %v640_v35 = vld [vmem:[%s13575_s30 + $0x40] sm:$0xff]  ;;  %v642_v37 = vld [vmem:[%s13575_s30 + $0x50] sm:$0xff] }
  0x24   : > { %v659_v30 = vld [vmem:[%s13575_s30 + $0xd8] sm:$0xff]  ;;  %v656_v36 = vld [vmem:[%s13575_s30 + $0xc0] sm:$0xff]  ;;  %v658_v38 = vld [vmem:[%s13575_s30 + $0xd0] sm:$0xff] }
  0x25   : > { %12109 = vmatmul.mubr.msk.f32.vlgmr.msra.gmra.mrb[0].mxu0 %vm664_vm0, %v13588_v12  ;;  %12950 = vmatprep.subr.bf16.mxu1 %v12949_v23  ;;  %v12957_v32 = vpack.c.bf16 %v659_v30, %v643_v29  ;;  %v645_v39 = vld [vmem:[%s13575_s30 + $0x68] sm:$0xff]  ;;  %v12955_v41 = vpack.c.bf16 %v656_v36, %v640_v35  ;;  %v647_v42 = vld [vmem:[%s13575_s30 + $0x78] sm:$0xff]  ;;  %v12959_v44 = vpack.c.bf16 %v658_v38, %v642_v37  ;;  %v644_v47 = vld [vmem:[%s13575_s30 + $0x60] sm:$0xff] }
  0x26   : > { %12113 = vmatmul.mubr.msk.f32.vlgmr.msra.gmra.mrb[0].mxu1 %vm664_vm0, %v13588_v12  ;;  %12948 = vmatpush1.bf16.msra.mxu0 %v12947_v19  ;;  %v661_v40 = vld [vmem:[%s13575_s30 + $0xe8] sm:$0xff]  ;;  %v663_v43 = vld [vmem:[%s13575_s30 + $0xf8] sm:$0xff]  ;;  %v660_v48 = vld [vmem:[%s13575_s30 + $0xe0] sm:$0xff] }
  0x27   : > { %747 = vmatprep.mubr.f32.mxu0 %v17164_v0  ;;  %836 = vmatprep.mubr.f32.mxu1 %v17164_v0  ;;  %v12961_v45 = vpack.c.bf16 %v661_v40, %v645_v39  ;;  %v12965_v46 = vpack.c.bf16 %v663_v43, %v647_v42  ;;  %v646_v49 = vld [vmem:[%s13575_s30 + $0x70] sm:$0xff]  ;;  %v12142_v51 = vld [vmem:[%s13575_s30 + $0x108] sm:$0xff]  ;;  %v12963_v53 = vpack.c.bf16 %v660_v48, %v644_v47  ;;  %v12144_v54 = vld [vmem:[%s13575_s30 + $0x118] sm:$0xff] }
  0x28   : > { %12952 = vmatpush1.bf16.msra.mxu1 %v12951_v27  ;;  %12954 = vmatprep.subr.bf16.mxu0 %v12953_v28  ;;  %v662_v50 = vld [vmem:[%s13575_s30 + $0xf0] sm:$0xff]  ;;  %v12158_v52 = vld [vmem:[%s13575_s30 + $0x188] sm:$0xff]  ;;  %v12160_v55 = vld [vmem:[%s13575_s30 + $0x198] sm:$0xff] }
  0x29   : > { %12110 = vmatmul.mubr.msk.f32.gmra.mrb[2].mxu0 %vm664_vm0, %v13609_v31  ;;  %12958 = vmatprep.subr.bf16.mxu1 %v12957_v32  ;;  %v12967_v56 = vpack.c.bf16 %v662_v50, %v646_v49  ;;  %v12969_v57 = vpack.c.bf16 %v12158_v52, %v12142_v51  ;;  %v12973_v58 = vpack.c.bf16 %v12160_v55, %v12144_v54  ;;  %v12141_v59 = vld [vmem:[%s13575_s30 + $0x100] sm:$0xff]  ;;  %v12143_v61 = vld [vmem:[%s13575_s30 + $0x110] sm:$0xff]  ;;  %v12146_v63 = vld [vmem:[%s13575_s30 + $0x128] sm:$0xff] }
  0x2a   : > { %12114 = vmatmul.mubr.msk.f32.gmra.mrb[2].mxu1 %vm664_vm0, %v13609_v31  ;;  %753 = vmatprep.mubr.f32.mxu0 %v17164_v0  ;;  %v12157_v60 = vld [vmem:[%s13575_s30 + $0x180] sm:$0xff]  ;;  %v12159_v62 = vld [vmem:[%s13575_s30 + $0x190] sm:$0xff]  ;;  %v12162_v1 = vld [vmem:[%s13575_s30 + $0x1a8] sm:$0xff] }
  0x2b   : > { %842 = vmatprep.mubr.f32.mxu1 %v17164_v0  ;;  %v12971_v2 = vpack.c.bf16 %v12157_v60, %v12141_v59  ;;  %v12148_v3 = vld [vmem:[%s13575_s30 + $0x138] sm:$0xff]  ;;  %v12975_v5 = vpack.c.bf16 %v12159_v62, %v12143_v61  ;;  %v12977_v6 = vpack.c.bf16 %v12162_v1, %v12146_v63  ;;  %v12145_v8 = vld [vmem:[%s13575_s30 + $0x120] sm:$0xff]  ;;  %v12147_v10 = vld [vmem:[%s13575_s30 + $0x130] sm:$0xff] }
  0x2c   : > { %v12164_v4 = vld [vmem:[%s13575_s30 + $0x1b8] sm:$0xff]  ;;  %v12161_v9 = vld [vmem:[%s13575_s30 + $0x1a0] sm:$0xff]  ;;  %v12163_v11 = vld [vmem:[%s13575_s30 + $0x1b0] sm:$0xff] }
  0x2d   : > { %12111 = vmatmul.mubr.msk.f32.gmra.mrb[4].mxu0 %vm664_vm0, %v13621_v33  ;;  %v12981_v7 = vpack.c.bf16 %v12164_v4, %v12148_v3  ;;  %v12150_v13 = vld [vmem:[%s13575_s30 + $0x148] sm:$0xff]  ;;  %v12979_v15 = vpack.c.bf16 %v12161_v9, %v12145_v8  ;;  %v12152_v16 = vld [vmem:[%s13575_s30 + $0x158] sm:$0xff]  ;;  %v12983_v18 = vpack.c.bf16 %v12163_v11, %v12147_v10  ;;  %v12149_v21 = vld [vmem:[%s13575_s30 + $0x140] sm:$0xff] }
  0x2e   : > { %12115 = vmatmul.mubr.msk.f32.gmra.mrb[4].mxu1 %vm664_vm0, %v13621_v33  ;;  %759 = vmatprep.mubr.f32.mxu0 %v17164_v0  ;;  %v12166_v14 = vld [vmem:[%s13575_s30 + $0x1c8] sm:$0xff]  ;;  %v12168_v17 = vld [vmem:[%s13575_s30 + $0x1d8] sm:$0xff]  ;;  %v12165_v22 = vld [vmem:[%s13575_s30 + $0x1c0] sm:$0xff] }
  0x2f   : > { %848 = vmatprep.mubr.f32.mxu1 %v17164_v0  ;;  %v12985_v19 = vpack.c.bf16 %v12166_v14, %v12150_v13  ;;  %v12989_v20 = vpack.c.bf16 %v12168_v17, %v12152_v16  ;;  %v12151_v23 = vld [vmem:[%s13575_s30 + $0x150] sm:$0xff]  ;;  %v12154_v25 = vld [vmem:[%s13575_s30 + $0x168] sm:$0xff]  ;;  %v12987_v27 = vpack.c.bf16 %v12165_v22, %v12149_v21  ;;  %v12156_v28 = vld [vmem:[%s13575_s30 + $0x178] sm:$0xff] }
  0x30   : > { %v12167_v24 = vld [vmem:[%s13575_s30 + $0x1d0] sm:$0xff]  ;;  %v12170_v26 = vld [vmem:[%s13575_s30 + $0x1e8] sm:$0xff]  ;;  %v12172_v29 = vld [vmem:[%s13575_s30 + $0x1f8] sm:$0xff] }
  0x31   : > { %12112 = vmatmul.mubr.msk.f32.gmra.mrb[6].mxu0 %vm664_vm0, %v13632_v34  ;;  %v12991_v30 = vpack.c.bf16 %v12167_v24, %v12151_v23  ;;  %v12993_v32 = vpack.c.bf16 %v12170_v26, %v12154_v25  ;;  %v12997_v35 = vpack.c.bf16 %v12172_v29, %v12156_v28  ;;  %v12153_v36 = vld [vmem:[%s13575_s30 + $0x160] sm:$0xff]  ;;  %v12155_v38 = vld [vmem:[%s13575_s30 + $0x170] sm:$0xff]  ;;  %v12214_v40 = vld [vmem:[%s13575_s30 + $0x208] sm:$0xff] }
  0x32   : > { %12116 = vmatmul.mubr.msk.f32.gmra.mrb[6].mxu1 %vm664_vm0, %v13632_v34  ;;  %919 = vmatprep.mubr.f32.mxu0 %v17164_v0  ;;  %v12169_v37 = vld [vmem:[%s13575_s30 + $0x1e0] sm:$0xff]  ;;  %v12171_v39 = vld [vmem:[%s13575_s30 + $0x1f0] sm:$0xff]  ;;  %v12216_v43 = vld [vmem:[%s13575_s30 + $0x218] sm:$0xff] }
  0x33   : > { %1008 = vmatprep.mubr.f32.mxu1 %v17164_v0  ;;  %v12995_v42 = vpack.c.bf16 %v12169_v37, %v12153_v36  ;;  %v12213_v48 = vld [vmem:[%s13575_s30 + $0x200] sm:$0xff]  ;;  %v12215_v50 = vld [vmem:[%s13575_s30 + $0x210] sm:$0xff]  ;;  %v12218_v52 = vld [vmem:[%s13575_s30 + $0x228] sm:$0xff] }
  0x34   : > { %v12229_v49 = vld [vmem:[%s13575_s30 + $0x280] sm:$0xff]  ;;  %v12231_v51 = vld [vmem:[%s13575_s30 + $0x290] sm:$0xff]  ;;  %v12220_v55 = vld [vmem:[%s13575_s30 + $0x238] sm:$0xff] }
  0x35   : > { %12117 = vmatmul.mubr.msk.f32.vlgmr.msra.gmra.mrb[8].mxu0 %vm664_vm0, %v13588_v12  ;;  %v13003_v54 = vpack.c.bf16 %v12229_v49, %v12213_v48  ;;  %v12217_v60 = vld [vmem:[%s13575_s30 + $0x220] sm:$0xff]  ;;  %v12219_v62 = vld [vmem:[%s13575_s30 + $0x230] sm:$0xff]  ;;  %v12222_v1 = vld [vmem:[%s13575_s30 + $0x248] sm:$0xff] }
  0x36   : > { %12121 = vmatmul.mubr.msk.f32.vlgmr.msra.gmra.mrb[8].mxu1 %vm664_vm0, %v13588_v12  ;;  %12956 = vmatpush1.bf16.msra.mxu0 %v12955_v41  ;;  %v12230_v41 = vld [vmem:[%s13575_s30 + $0x288] sm:$0xff]  ;;  %v12233_v61 = vld [vmem:[%s13575_s30 + $0x2a0] sm:$0xff]  ;;  %v12235_v63 = vld [vmem:[%s13575_s30 + $0x2b0] sm:$0xff] }
  0x37   : > { %925 = vmatprep.mubr.f32.mxu0 %v17164_v0  ;;  %1014 = vmatprep.mubr.f32.mxu1 %v17164_v0  ;;  %v13011_v3 = vpack.c.bf16 %v12233_v61, %v12217_v60  ;;  %v12224_v4 = vld [vmem:[%s13575_s30 + $0x258] sm:$0xff]  ;;  %v12221_v9 = vld [vmem:[%s13575_s30 + $0x240] sm:$0xff]  ;;  %v12223_v11 = vld [vmem:[%s13575_s30 + $0x250] sm:$0xff] }
  0x38   : > { %12960 = vmatpush1.bf16.msra.mxu1 %v12959_v44  ;;  %12962 = vmatprep.subr.bf16.mxu0 %v12961_v45  ;;  %v12232_v44 = vld [vmem:[%s13575_s30 + $0x298] sm:$0xff]  ;;  %v12999_v45 = vpack.c.bf16 %v12171_v39, %v12155_v38  ;;  %v12237_v10 = vld [vmem:[%s13575_s30 + $0x2c0] sm:$0xff]  ;;  %v12239_v13 = vld [vmem:[%s13575_s30 + $0x2d0] sm:$0xff] }
  0x39   : > { %12118 = vmatmul.mubr.msk.f32.gmra.mrb[10].mxu0 %vm664_vm0, %v13609_v31  ;;  %12966 = vmatprep.subr.bf16.mxu1 %v12965_v46  ;;  %v13001_v46 = vpack.c.bf16 %v12230_v41, %v12214_v40  ;;  %v13005_v47 = vpack.c.bf16 %v12232_v44, %v12216_v43  ;;  %v12226_v14 = vld [vmem:[%s13575_s30 + $0x268] sm:$0xff]  ;;  %v13019_v16 = vpack.c.bf16 %v12237_v10, %v12221_v9  ;;  %v12228_v17 = vld [vmem:[%s13575_s30 + $0x278] sm:$0xff]  ;;  %v12225_v22 = vld [vmem:[%s13575_s30 + $0x260] sm:$0xff] }
  0x3a   : > { %12122 = vmatmul.mubr.msk.f32.gmra.mrb[10].mxu1 %vm664_vm0, %v13609_v31  ;;  %931 = vmatprep.mubr.f32.mxu0 %v17164_v0  ;;  %v12241_v23 = vld [vmem:[%s13575_s30 + $0x2e0] sm:$0xff]  ;;  %v12227_v24 = vld [vmem:[%s13575_s30 + $0x270] sm:$0xff]  ;;  %v12286_v26 = vld [vmem:[%s13575_s30 + $0x308] sm:$0xff] }
  0x3b   : > { %1020 = vmatprep.mubr.f32.mxu1 %v17164_v0  ;;  %v12243_v25 = vld [vmem:[%s13575_s30 + $0x2f0] sm:$0xff]  ;;  %v13027_v28 = vpack.c.bf16 %v12241_v23, %v12225_v22  ;;  %v12288_v29 = vld [vmem:[%s13575_s30 + $0x318] sm:$0xff]  ;;  %v285_v36 = vld [vmem:[%s13935_s23] sm:$0xff] }
  0x3c   : > { %v286_v37 = vld [vmem:[%s13935_s23 + $0x8] sm:$0xff]  ;;  %v293_v39 = vadd.f32 1.0, %v285_v36  ;;  %v287_v41 = vld [vmem:[%s13935_s23 + $0x10] sm:$0xff]  ;;  %v12285_v49 = vld [vmem:[%s13575_s30 + $0x300] sm:$0xff] }
  0x3d   : > { %12119 = vmatmul.mubr.msk.f32.gmra.mrb[12].mxu0 %vm664_vm0, %v13621_v33  ;;  %v294_v40 = vadd.f32 1.0, %v286_v37  ;;  %v290_v48 = vld [vmem:[%s13935_s23 + $0x28] sm:$0xff]  ;;  %v12308_v60 = vld [vmem:[%s13575_s30 + $0x3b8] sm:$0xff] }
  0x3e   : > { %12123 = vmatmul.mubr.msk.f32.gmra.mrb[12].mxu1 %vm664_vm0, %v13621_v33  ;;  %937 = vmatprep.mubr.f32.mxu0 %v17164_v0  ;;  %v13959_v43 = vmul.f32 3.5, %v293_v39 }
  0x3f   : > { %1026 = vmatprep.mubr.f32.mxu1 %v17164_v0  ;;  %v13961_v44 = vmul.f32 3.5, %v294_v40 }
  0x41   : > { %12120 = vmatmul.mubr.msk.f32.gmra.mrb[14].mxu0 %vm664_vm0, %v13632_v34  ;;  %17269 = vst [vmem:[#allocation6_spill] sm:$0xff] %v13961_v44 }
  0x42   : > { %12124 = vmatmul.mubr.msk.f32.gmra.mrb[14].mxu1 %vm664_vm0, %v13632_v34  ;;  %1097 = vmatprep.mubr.f32.mxu0 %v17164_v0 }
  0x43   : > { %1186 = vmatprep.mubr.f32.mxu1 %v17164_v0 }
  0x45   : > { %12125 = vmatmul.mubr.msk.f32.vlgmr.msra.gmra.mrb[16].mxu0 %vm664_vm0, %v13588_v12 }
  0x46   : > { %12129 = vmatmul.mubr.msk.f32.vlgmr.msra.gmra.mrb[16].mxu1 %vm664_vm0, %v13588_v12  ;;  %12964 = vmatpush1.bf16.msra.mxu0 %v12963_v53  ;;  %v12234_v53 = vld [vmem:[%s13575_s30 + $0x2a8] sm:$0xff] }
  0x47   : > { %1103 = vmatprep.mubr.f32.mxu0 %v17164_v0  ;;  %1192 = vmatprep.mubr.f32.mxu1 %v17164_v0 }
  0x48   : > { %12968 = vmatpush1.bf16.msra.mxu1 %v12967_v56  ;;  %12970 = vmatprep.subr.bf16.mxu0 %v12969_v57  ;;  %v12236_v56 = vld [vmem:[%s13575_s30 + $0x2b8] sm:$0xff]  ;;  %v13007_v57 = vpack.c.bf16 %v12231_v51, %v12215_v50  ;;  %v12301_v50 = vld [vmem:[%s13575_s30 + $0x380] sm:$0xff]  ;;  %v12053_v51 = vadd.f32 -1.0, %v13959_v43 }
  0x49   : > { %12126 = vmatmul.mubr.msk.f32.gmra.mrb[18].mxu0 %vm664_vm0, %v13609_v31  ;;  %12974 = vmatprep.subr.bf16.mxu1 %v12973_v58  ;;  %v13009_v58 = vpack.c.bf16 %v12234_v53, %v12218_v52  ;;  %v13013_v59 = vpack.c.bf16 %v12236_v56, %v12220_v55  ;;  %v12054_v52 = vadd.f32 -1.0, %v13961_v44  ;;  %v291_v53 = vld [vmem:[%s13935_s23 + $0x30] sm:$0xff]  ;;  %v12290_v56 = vld [vmem:[%s13575_s30 + $0x328] sm:$0xff] }
  0x4a   : > { %12130 = vmatmul.mubr.msk.f32.gmra.mrb[18].mxu1 %vm664_vm0, %v13609_v31  ;;  %1109 = vmatprep.mubr.f32.mxu0 %v17164_v0  ;;  %v12303_v55 = vld [vmem:[%s13575_s30 + $0x390] sm:$0xff] }
  0x4b   : > { %1198 = vmatprep.mubr.f32.mxu1 %v17164_v0  ;;  %v350_v9 = vand.u32 2147483647, %v12054_v52 }
  0x4d   : > { %12127 = vmatmul.mubr.msk.f32.gmra.mrb[20].mxu0 %vm664_vm0, %v13621_v33  ;;  %v358_v36 = vsub.f32 1.0, %v350_v9  ;;  %v12062_v9 = vadd.f32 -2.0, %v13961_v44 }
  0x4e   : > { %12131 = vmatmul.mubr.msk.f32.gmra.mrb[20].mxu1 %vm664_vm0, %v13621_v33  ;;  %1115 = vmatprep.mubr.f32.mxu0 %v17164_v0 }
  0x4f   : > { %1204 = vmatprep.mubr.f32.mxu1 %v17164_v0 }
  0x51   : > { %12128 = vmatmul.mubr.msk.f32.gmra.mrb[22].mxu0 %vm664_vm0, %v13632_v34 }
  0x52   : > { %12132 = vmatmul.mubr.msk.f32.gmra.mrb[22].mxu1 %vm664_vm0, %v13632_v34  ;;  %1275 = vmatprep.mubr.f32.mxu0 %v17164_v0 }
  0x53   : > { %1364 = vmatprep.mubr.f32.mxu1 %v17164_v0 }
  0x55   : > { %12133 = vmatmul.mubr.msk.f32.vlgmr.msra.gmra.mrb[24].mxu0 %vm664_vm0, %v13588_v12 }
  0x56   : > { %12137 = vmatmul.mubr.msk.f32.vlgmr.msra.gmra.mrb[24].mxu1 %vm664_vm0, %v13588_v12  ;;  %12972 = vmatpush1.bf16.msra.mxu0 %v12971_v2  ;;  %v12238_v2 = vld [vmem:[%s13575_s30 + $0x2c8] sm:$0xff] }
  0x57   : > { %1281 = vmatprep.mubr.f32.mxu0 %v17164_v0  ;;  %1370 = vmatprep.mubr.f32.mxu1 %v17164_v0 }
  0x58   : > { %12976 = vmatpush1.bf16.msra.mxu1 %v12975_v5  ;;  %12978 = vmatprep.subr.bf16.mxu0 %v12977_v6  ;;  %v12240_v5 = vld [vmem:[%s13575_s30 + $0x2d8] sm:$0xff]  ;;  %v13015_v6 = vpack.c.bf16 %v12235_v63, %v12219_v62  ;;  %v298_v63 = vadd.f32 1.0, %v290_v48 }
  0x59   : > { %12134 = vmatmul.mubr.msk.f32.gmra.mrb[26].mxu0 %vm664_vm0, %v13609_v31  ;;  %12982 = vmatprep.subr.bf16.mxu1 %v12981_v7  ;;  %v13017_v7 = vpack.c.bf16 %v12238_v2, %v12222_v1  ;;  %v13021_v8 = vpack.c.bf16 %v12240_v5, %v12224_v4  ;;  %v13035_v1 = vpack.c.bf16 %v12301_v50, %v12285_v49  ;;  %v13992_v2 = vld [vmem:[%s13575_s30 + $0x320] sm:$0xff]  ;;  %v309_v4 = vand.u32 2147483647, %v13959_v43 }
  0x5a   : > { %12138 = vmatmul.mubr.msk.f32.gmra.mrb[26].mxu1 %vm664_vm0, %v13609_v31  ;;  %1287 = vmatprep.mubr.f32.mxu0 %v17164_v0  ;;  %v299_v5 = vadd.f32 1.0, %v291_v53 }
  0x5b   : > { %1376 = vmatprep.mubr.f32.mxu1 %v17164_v0 }
  0x5d   : > { %12135 = vmatmul.mubr.msk.f32.gmra.mrb[28].mxu0 %vm664_vm0, %v13621_v33 }
  0x5e   : > { %12139 = vmatmul.mubr.msk.f32.gmra.mrb[28].mxu1 %vm664_vm0, %v13621_v33  ;;  %1293 = vmatprep.mubr.f32.mxu0 %v17164_v0 }
  0x5f   : > { %1382 = vmatprep.mubr.f32.mxu1 %v17164_v0 }
  0x61   : > { %12136 = vmatmul.mubr.msk.f32.gmra.mrb[30].mxu0 %vm664_vm0, %v13632_v34 }
  0x62   : > { %12140 = vmatmul.mubr.msk.f32.gmra.mrb[30].mxu1 %vm664_vm0, %v13632_v34  ;;  %1678 = vmatprep.mubr.f32.mxu0 %v17164_v0 }
  0x63   : > { %1767 = vmatprep.mubr.f32.mxu1 %v17164_v0 }
  0x65   : > { %12173 = vmatmul.mubr.msk.f32.vlgmr.msra.gmra.mrb[32].mxu0 %vm664_vm0, %v13588_v12 }
  0x66   : > { %12177 = vmatmul.mubr.msk.f32.vlgmr.msra.gmra.mrb[32].mxu1 %vm664_vm0, %v13588_v12  ;;  %12980 = vmatpush1.bf16.msra.mxu0 %v12979_v15  ;;  %v12242_v15 = vld [vmem:[%s13575_s30 + $0x2e8] sm:$0xff] }
  0x67   : > { %1684 = vmatprep.mubr.f32.mxu0 %v17164_v0  ;;  %1773 = vmatprep.mubr.f32.mxu1 %v17164_v0 }
  0x68   : > { %12984 = vmatpush1.bf16.msra.mxu1 %v12983_v18  ;;  %12986 = vmatprep.subr.bf16.mxu0 %v12985_v19  ;;  %v12244_v18 = vld [vmem:[%s13575_s30 + $0x2f8] sm:$0xff]  ;;  %v13023_v19 = vpack.c.bf16 %v12239_v13, %v12223_v11 }
  0x69   : > { %12174 = vmatmul.mubr.msk.f32.gmra.mrb[34].mxu0 %vm664_vm0, %v13609_v31  ;;  %12990 = vmatprep.subr.bf16.mxu1 %v12989_v20  ;;  %v13025_v20 = vpack.c.bf16 %v12242_v15, %v12226_v14  ;;  %v13029_v21 = vpack.c.bf16 %v12244_v18, %v12228_v17  ;;  %v14002_v14 = vld [vmem:[%s13575_s30 + $0x330] sm:$0xff]  ;;  %v14011_v17 = vld [vmem:[%s13575_s30 + $0x348] sm:$0xff] }
  0x6a   : > { %12178 = vmatmul.mubr.msk.f32.gmra.mrb[34].mxu1 %vm664_vm0, %v13609_v31  ;;  %1690 = vmatprep.mubr.f32.mxu0 %v17164_v0  ;;  %v14005_v15 = vld [vmem:[%s13575_s30 + $0x3b0] sm:$0xff]  ;;  %v14014_v18 = vld [vmem:[%s13575_s30 + $0x3c8] sm:$0xff] }
  0x6b   : > { %1779 = vmatprep.mubr.f32.mxu1 %v17164_v0  ;;  %v13049_v37 = vpack.c.bf16 %v14014_v18, %v14011_v17  ;;  %v14156_v17 = vld [vmem:[%s13575_s30 + $0x368] sm:$0xff] }
  0x6c   : > { %v14159_v18 = vld [vmem:[%s13575_s30 + $0x3e8] sm:$0xff] }
  0x6d   : > { %12175 = vmatmul.mubr.msk.f32.gmra.mrb[36].mxu0 %vm664_vm0, %v13621_v33 }
  0x6e   : > { %12179 = vmatmul.mubr.msk.f32.gmra.mrb[36].mxu1 %vm664_vm0, %v13621_v33  ;;  %1696 = vmatprep.mubr.f32.mxu0 %v17164_v0 }
  0x6f   : > { %1785 = vmatprep.mubr.f32.mxu1 %v17164_v0 }
  0x71   : > { %12176 = vmatmul.mubr.msk.f32.gmra.mrb[38].mxu0 %vm664_vm0, %v13632_v34 }
  0x72   : > { %12180 = vmatmul.mubr.msk.f32.gmra.mrb[38].mxu1 %vm664_vm0, %v13632_v34  ;;  %1856 = vmatprep.mubr.f32.mxu0 %v17164_v0 }
  0x73   : > { %1945 = vmatprep.mubr.f32.mxu1 %v17164_v0 }
  0x75   : > { %12181 = vmatmul.mubr.msk.f32.vlgmr.msra.gmra.mrb[40].mxu0 %vm664_vm0, %v13588_v12 }
  0x76   : > { %12185 = vmatmul.mubr.msk.f32.vlgmr.msra.gmra.mrb[40].mxu1 %vm664_vm0, %v13588_v12  ;;  %12988 = vmatpush1.bf16.msra.mxu0 %v12987_v27  ;;  %v12302_v27 = vld [vmem:[%s13575_s30 + $0x388] sm:$0xff] }
  0x77   : > { %1862 = vmatprep.mubr.f32.mxu0 %v17164_v0  ;;  %1951 = vmatprep.mubr.f32.mxu1 %v17164_v0 }
  0x78   : > { %12992 = vmatpush1.bf16.msra.mxu1 %v12991_v30  ;;  %12994 = vmatprep.subr.bf16.mxu0 %v12993_v32  ;;  %v12304_v30 = vld [vmem:[%s13575_s30 + $0x398] sm:$0xff]  ;;  %v13031_v32 = vpack.c.bf16 %v12243_v25, %v12227_v24  ;;  %v14026_v24 = vld [vmem:[%s13575_s30 + $0x340] sm:$0xff]  ;;  %v317_v25 = vsub.f32 1.0, %v309_v4 }
  0x79   : > { %12182 = vmatmul.mubr.msk.f32.gmra.mrb[42].mxu0 %vm664_vm0, %v13609_v31  ;;  %12998 = vmatprep.subr.bf16.mxu1 %v12997_v35  ;;  %v13033_v35 = vpack.c.bf16 %v12302_v27, %v12286_v26  ;;  %v13037_v38 = vpack.c.bf16 %v12304_v30, %v12288_v29  ;;  %v14028_v26 = vmul.f32 3.5, %v299_v5  ;;  %v13047_v27 = vpack.c.bf16 %v14005_v15, %v14002_v14  ;;  %v14038_v29 = vld [vmem:[%s13575_s30 + $0x358] sm:$0xff] }
  0x7a   : > { %12186 = vmatmul.mubr.msk.f32.gmra.mrb[42].mxu1 %vm664_vm0, %v13609_v31  ;;  %1868 = vmatprep.mubr.f32.mxu0 %v17164_v0  ;;  %v14041_v30 = vld [vmem:[%s13575_s30 + $0x3d8] sm:$0xff]  ;;  %v14060_v49 = vmax.f32 %v317_v25, 0.0  ;;  %v12069_v25 = vadd.f32 -3.0, %v13959_v43 }
  0x7b   : > { %1957 = vmatprep.mubr.f32.mxu1 %v17164_v0  ;;  %v13053_v48 = vpack.c.bf16 %v14041_v30, %v14038_v29  ;;  %v12059_v50 = vadd.f32 -1.0, %v14028_v26  ;;  %v12067_v30 = vadd.f32 -2.0, %v14028_v26 }
  0x7c   : > { %17271 = vst [vmem:[#allocation8_spill] sm:$0xff] %v14060_v49 }
  0x7d   : > { %12183 = vmatmul.mubr.msk.f32.gmra.mrb[44].mxu0 %vm664_vm0, %v13621_v33 }
  0x7e   : > { %12187 = vmatmul.mubr.msk.f32.gmra.mrb[44].mxu1 %vm664_vm0, %v13621_v33  ;;  %1874 = vmatprep.mubr.f32.mxu0 %v17164_v0 }
  0x7f   : > { %1963 = vmatprep.mubr.f32.mxu1 %v17164_v0 }
  0x81   : > { %12184 = vmatmul.mubr.msk.f32.gmra.mrb[46].mxu0 %vm664_vm0, %v13632_v34 }
  0x82   : > { %12188 = vmatmul.mubr.msk.f32.gmra.mrb[46].mxu1 %vm664_vm0, %v13632_v34  ;;  %2034 = vmatprep.mubr.f32.mxu0 %v17164_v0 }
  0x83   : > { %2123 = vmatprep.mubr.f32.mxu1 %v17164_v0 }
  0x85   : > { %12189 = vmatmul.mubr.msk.f32.vlgmr.msra.gmra.mrb[48].mxu0 %vm664_vm0, %v13588_v12 }
  0x86   : > { %12193 = vmatmul.mubr.msk.f32.vlgmr.msra.gmra.mrb[48].mxu1 %vm664_vm0, %v13588_v12  ;;  %12996 = vmatpush1.bf16.msra.mxu0 %v12995_v42  ;;  %v288_v42 = vld [vmem:[%s13935_s23 + $0x18] sm:$0xff] }
  0x87   : > { %2040 = vmatprep.mubr.f32.mxu0 %v17164_v0  ;;  %2129 = vmatprep.mubr.f32.mxu1 %v17164_v0 }
  0x88   : > { %13000 = vmatpush1.bf16.msra.mxu1 %v12999_v45  ;;  %13002 = vmatprep.subr.bf16.mxu0 %v13001_v46  ;;  %v295_v45 = vadd.f32 1.0, %v287_v41  ;;  %v296_v46 = vadd.f32 1.0, %v288_v42 }
  0x89   : > { %12190 = vmatmul.mubr.msk.f32.gmra.mrb[50].mxu0 %vm664_vm0, %v13609_v31  ;;  %13006 = vmatprep.subr.bf16.mxu1 %v13005_v47  ;;  %v289_v47 = vld [vmem:[%s13935_s23 + $0x20] sm:$0xff] }
  0x8a   : > { %12194 = vmatmul.mubr.msk.f32.gmra.mrb[50].mxu1 %vm664_vm0, %v13609_v31  ;;  %2046 = vmatprep.mubr.f32.mxu0 %v17164_v0  ;;  %v13986_v61 = vmul.f32 3.5, %v296_v46  ;;  %v297_v62 = vadd.f32 1.0, %v289_v47 }
  0x8b   : > { %2135 = vmatprep.mubr.f32.mxu1 %v17164_v0 }
  0x8c   : > { %v312_v40 = vand.u32 2147483647, %v13986_v61 }
  0x8d   : > { %12191 = vmatmul.mubr.msk.f32.gmra.mrb[52].mxu0 %vm664_vm0, %v13621_v33 }
  0x8e   : > { %12195 = vmatmul.mubr.msk.f32.gmra.mrb[52].mxu1 %vm664_vm0, %v13621_v33  ;;  %2052 = vmatprep.mubr.f32.mxu0 %v17164_v0 }
  0x8f   : > { %2141 = vmatprep.mubr.f32.mxu1 %v17164_v0 }
  0x91   : > { %12192 = vmatmul.mubr.msk.f32.gmra.mrb[54].mxu0 %vm664_vm0, %v13632_v34 }
  0x92   : > { %12196 = vmatmul.mubr.msk.f32.gmra.mrb[54].mxu1 %vm664_vm0, %v13632_v34  ;;  %2212 = vmatprep.mubr.f32.mxu0 %v17164_v0 }
  0x93   : > { %2301 = vmatprep.mubr.f32.mxu1 %v17164_v0 }
  0x95   : > { %12197 = vmatmul.mubr.msk.f32.vlgmr.msra.gmra.mrb[56].mxu0 %vm664_vm0, %v13588_v12 }
  0x96   : > { %12201 = vmatmul.mubr.msk.f32.vlgmr.msra.gmra.mrb[56].mxu1 %vm664_vm0, %v13588_v12  ;;  %13004 = vmatpush1.bf16.msra.mxu0 %v13003_v54  ;;  %v12287_v54 = vld [vmem:[%s13575_s30 + $0x310] sm:$0xff] }
  0x97   : > { %2218 = vmatprep.mubr.f32.mxu0 %v17164_v0  ;;  %2307 = vmatprep.mubr.f32.mxu1 %v17164_v0  ;;  %v13039_v10 = vpack.c.bf16 %v12303_v55, %v12287_v54  ;;  %v14071_v55 = vld [vmem:[%s13575_s30 + $0x350] sm:$0xff] }
  0x98   : > { %13008 = vmatpush1.bf16.msra.mxu1 %v13007_v57  ;;  %13010 = vmatprep.subr.bf16.mxu0 %v13009_v58  ;;  %v13979_v57 = vmul.f32 3.5, %v295_v45  ;;  %v12306_v58 = vld [vmem:[%s13575_s30 + $0x3a8] sm:$0xff] }
  0x99   : > { %12198 = vmatmul.mubr.msk.f32.gmra.mrb[58].mxu0 %vm664_vm0, %v13609_v31  ;;  %13014 = vmatprep.subr.bf16.mxu1 %v13013_v59  ;;  %v12292_v59 = vld [vmem:[%s13575_s30 + $0x338] sm:$0xff]  ;;  %v13041_v11 = vpack.c.bf16 %v12306_v58, %v12290_v56  ;;  %v14074_v56 = vld [vmem:[%s13575_s30 + $0x3d0] sm:$0xff] }
  0x9a   : > { %12202 = vmatmul.mubr.msk.f32.gmra.mrb[58].mxu1 %vm664_vm0, %v13609_v31  ;;  %2224 = vmatprep.mubr.f32.mxu0 %v17164_v0  ;;  %v13045_v13 = vpack.c.bf16 %v12308_v60, %v12292_v59  ;;  %v320_v60 = vsub.f32 1.0, %v312_v40 }
  0x9b   : > { %2313 = vmatprep.mubr.f32.mxu1 %v17164_v0 }
  0x9d   : > { %12199 = vmatmul.mubr.msk.f32.gmra.mrb[60].mxu0 %vm664_vm0, %v13621_v33 }
  0x9e   : > { %12203 = vmatmul.mubr.msk.f32.gmra.mrb[60].mxu1 %vm664_vm0, %v13621_v33  ;;  %2230 = vmatprep.mubr.f32.mxu0 %v17164_v0 }
  0x9f   : > { %2319 = vmatprep.mubr.f32.mxu1 %v17164_v0 }
  0xa1   : > { %12200 = vmatmul.mubr.msk.f32.gmra.mrb[62].mxu0 %vm664_vm0, %v13632_v34 }
  0xa2   : > { %12204 = vmatmul.mubr.msk.f32.gmra.mrb[62].mxu1 %vm664_vm0, %v13632_v34  ;;  %2616 = vmatprep.mubr.f32.mxu0 %v17164_v0 }
  0xa3   : > { %2705 = vmatprep.mubr.f32.mxu1 %v17164_v0 }
  0xa5   : > { %12245 = vmatmul.mubr.msk.f32.vlgmr.msra.gmra.mrb[64].mxu0 %vm664_vm0, %v13588_v12 }
  0xa6   : > { %12249 = vmatmul.mubr.msk.f32.vlgmr.msra.gmra.mrb[64].mxu1 %vm664_vm0, %v13588_v12  ;;  %13012 = vmatpush1.bf16.msra.mxu0 %v13011_v3  ;;  %v13995_v3 = vld [vmem:[%s13575_s30 + $0x3a0] sm:$0xff] }
  0xa7   : > { %2622 = vmatprep.mubr.f32.mxu0 %v17164_v0  ;;  %2711 = vmatprep.mubr.f32.mxu1 %v17164_v0  ;;  %v13043_v23 = vpack.c.bf16 %v13995_v3, %v13992_v2 }
  0xa8   : > { %13016 = vmatpush1.bf16.msra.mxu1 %v13015_v6  ;;  %13018 = vmatprep.subr.bf16.mxu0 %v13017_v7  ;;  %v292_v6 = vld [vmem:[%s13935_s23 + $0x38] sm:$0xff]  ;;  %v349_v7 = vand.u32 2147483647, %v12053_v51  ;;  %s13410_s23 = sshll.u32 %s13487_s21, 4  ;;  %s13411_s23 = int_to_ptr.vmem [resolvable:$false] %s13410_s23 }
  0xa9   : > { %12246 = vmatmul.mubr.msk.f32.gmra.mrb[66].mxu0 %vm664_vm0, %v13609_v31  ;;  %13022 = vmatprep.subr.bf16.mxu1 %v13021_v8  ;;  %v310_v8 = vand.u32 2147483647, %v13961_v44  ;;  %v300_v22 = vadd.f32 1.0, %v292_v6  ;;  %v14083_v6 = vmax.f32 %v358_v36, 0.0  ;;  %s13412_s26 = scalar_lea.vmem %s13411_s23, 24576  ;;  %p13413_p1 = scmp.lt.s32.totalorder %s17105_s7, %s13411_s23 }
  0xaa   : > { %12250 = vmatmul.mubr.msk.f32.gmra.mrb[66].mxu1 %vm664_vm0, %v13609_v31  ;;  %2628 = vmatprep.mubr.f32.mxu0 %v17164_v0  ;;  %p13414_p2 = scmp.lt.s32.totalorder %s13412_s26, %s13406_s19 }
  0xab   : > { %2717 = vmatprep.mubr.f32.mxu1 %v17164_v0  ;;  %v14051_v46 = vmul.f32 3.5, %v300_v22  ;;  %17274 = vst [vmem:[#allocation11_spill] sm:$0xff] %v14083_v6 }
  0xac   : > { %p13415_p3 = por %p13414_p2, %p13413_p1 }
  0xad   : > { %12247 = vmatmul.mubr.msk.f32.gmra.mrb[68].mxu0 %vm664_vm0, %v13621_v33  ;;  %v12060_v5 = vadd.f32 -1.0, %v14051_v46 }
  0xae   : > { %12251 = vmatmul.mubr.msk.f32.gmra.mrb[68].mxu1 %vm664_vm0, %v13621_v33  ;;  %2634 = vmatprep.mubr.f32.mxu0 %v17164_v0  ;;  %p13416_p5 = pnand %p13415_p3, %p13409_p0 }
  0xaf   : > { %2723 = vmatprep.mubr.f32.mxu1 %v17164_v0 }
  0xb1   : > { %12248 = vmatmul.mubr.msk.f32.gmra.mrb[70].mxu0 %vm664_vm0, %v13632_v34 }
  0xb2   : > { %12252 = vmatmul.mubr.msk.f32.gmra.mrb[70].mxu1 %vm664_vm0, %v13632_v34  ;;  %2794 = vmatprep.mubr.f32.mxu0 %v17164_v0 }
  0xb3   : > { %2883 = vmatprep.mubr.f32.mxu1 %v17164_v0 }
  0xb5   : > { %12253 = vmatmul.mubr.msk.f32.vlgmr.msra.gmra.mrb[72].mxu0 %vm664_vm0, %v13588_v12 }
  0xb6   : > { %12257 = vmatmul.mubr.msk.f32.vlgmr.msra.gmra.mrb[72].mxu1 %vm664_vm0, %v13588_v12  ;;  %13020 = vmatpush1.bf16.msra.mxu0 %v13019_v16  ;;  %v12055_v16 = vadd.f32 -1.0, %v13979_v57 }
  0xb7   : > { %2800 = vmatprep.mubr.f32.mxu0 %v17164_v0  ;;  %2889 = vmatprep.mubr.f32.mxu1 %v17164_v0 }
  0xb8   : > { %13024 = vmatpush1.bf16.msra.mxu1 %v13023_v19  ;;  %13026 = vmatprep.subr.bf16.mxu0 %v13025_v20  ;;  %v12056_v19 = vadd.f32 -1.0, %v13986_v61  ;;  %v14017_v20 = vmul.f32 3.5, %v297_v62  ;;  %v351_v39 = vand.u32 2147483647, %v12055_v16  ;;  %v12061_v62 = vadd.f32 -2.0, %v13959_v43 }
  0xb9   : > { %12254 = vmatmul.mubr.msk.f32.gmra.mrb[74].mxu0 %vm664_vm0, %v13609_v31  ;;  %13030 = vmatprep.subr.bf16.mxu1 %v13029_v21  ;;  %v14019_v21 = vmul.f32 3.5, %v298_v63  ;;  %v316_v16 = vand.u32 2147483647, %v14051_v46 }
  0xba   : > { %12258 = vmatmul.mubr.msk.f32.gmra.mrb[74].mxu1 %vm664_vm0, %v13609_v31  ;;  %2806 = vmatprep.mubr.f32.mxu0 %v17164_v0  ;;  %17270 = vst [vmem:[#allocation7_spill] sm:$0xff] %v14017_v20  ;;  %v352_v41 = vand.u32 2147483647, %v12056_v19  ;;  %v12057_v42 = vadd.f32 -1.0, %v14017_v20  ;;  %v313_v53 = vand.u32 2147483647, %v14017_v20 }
  0xbb   : > { %2895 = vmatprep.mubr.f32.mxu1 %v17164_v0  ;;  %v12058_v45 = vadd.f32 -1.0, %v14019_v21  ;;  %v314_v54 = vand.u32 2147483647, %v14019_v21  ;;  %v359_v59 = vsub.f32 1.0, %v351_v39  ;;  %v390_v22 = vand.u32 2147483647, %v12061_v62 }
  0xbc   : > { %v360_v63 = vsub.f32 1.0, %v352_v41  ;;  %v12066_v2 = vadd.f32 -2.0, %v14019_v21  ;;  %v12074_v29 = vadd.f32 -3.0, %v14019_v21 }
  0xbd   : > { %12255 = vmatmul.mubr.msk.f32.gmra.mrb[76].mxu0 %vm664_vm0, %v13621_v33  ;;  %v354_v4 = vand.u32 2147483647, %v12058_v45 }
  0xbe   : > { %12259 = vmatmul.mubr.msk.f32.gmra.mrb[76].mxu1 %vm664_vm0, %v13621_v33  ;;  %2812 = vmatprep.mubr.f32.mxu0 %v17164_v0 }
  0xbf   : > { %2901 = vmatprep.mubr.f32.mxu1 %v17164_v0  ;;  %v362_v39 = vsub.f32 1.0, %v354_v4  ;;  %v12072_v4 = vadd.f32 -3.0, %v13986_v61 }
  0xc1   : > { %12256 = vmatmul.mubr.msk.f32.gmra.mrb[78].mxu0 %vm664_vm0, %v13632_v34  ;;  %v434_v15 = vand.u32 2147483647, %v12072_v4  ;;  %v396_v4 = vand.u32 2147483647, %v12067_v30  ;;  %v12078_v30 = vadd.f32 -4.0, %v13961_v44 }
  0xc2   : > { %12260 = vmatmul.mubr.msk.f32.gmra.mrb[78].mxu1 %vm664_vm0, %v13632_v34  ;;  %2972 = vmatprep.mubr.f32.mxu0 %v17164_v0 }
  0xc3   : > { %3061 = vmatprep.mubr.f32.mxu1 %v17164_v0 }
  0xc5   : > { %12261 = vmatmul.mubr.msk.f32.vlgmr.msra.gmra.mrb[80].mxu0 %vm664_vm0, %v13588_v12 }
  0xc6   : > { %12265 = vmatmul.mubr.msk.f32.vlgmr.msra.gmra.mrb[80].mxu1 %vm664_vm0, %v13588_v12  ;;  %13028 = vmatpush1.bf16.msra.mxu0 %v13027_v28  ;;  %v14035_v28 = vld [vmem:[%s13575_s30 + $0x3c0] sm:$0xff] }
  0xc7   : > { %2978 = vmatprep.mubr.f32.mxu0 %v17164_v0  ;;  %3067 = vmatprep.mubr.f32.mxu1 %v17164_v0 }
  0xc8   : > { %13032 = vmatpush1.bf16.msra.mxu1 %v13031_v32  ;;  %13034 = vmatprep.subr.bf16.mxu0 %v13033_v35  ;;  %v357_v32 = vsub.f32 1.0, %v349_v7  ;;  %v318_v35 = vsub.f32 1.0, %v310_v8  ;;  %v315_v7 = vand.u32 2147483647, %v14028_v26  ;;  %v355_v8 = vand.u32 2147483647, %v12059_v50 }
  0xc9   : > { %12262 = vmatmul.mubr.msk.f32.gmra.mrb[82].mxu0 %vm664_vm0, %v13609_v31  ;;  %13038 = vmatprep.subr.bf16.mxu1 %v13037_v38  ;;  %v311_v38 = vand.u32 2147483647, %v13979_v57 }
  0xca   : > { %12266 = vmatmul.mubr.msk.f32.gmra.mrb[82].mxu1 %vm664_vm0, %v13609_v31  ;;  %2984 = vmatprep.mubr.f32.mxu0 %v17164_v0  ;;  %v14064_v51 = vmax.f32 %v357_v32, 0.0  ;;  %v14066_v52 = vmax.f32 %v318_v35, 0.0  ;;  %v14098_v32 = vmax.f32 %v320_v60, 0.0  ;;  %v14100_v35 = vmax.f32 %v360_v63, 0.0 }
  0xcb   : > { %3073 = vmatprep.mubr.f32.mxu1 %v17164_v0  ;;  %v319_v58 = vsub.f32 1.0, %v311_v38  ;;  %v356_v38 = vand.u32 2147483647, %v12060_v5  ;;  %v323_v40 = vsub.f32 1.0, %v315_v7  ;;  %v363_v41 = vsub.f32 1.0, %v355_v8 }
  0xcc   : > { %17272 = vst [vmem:[#allocation9_spill] sm:$0xff] %v14064_v51  ;;  %17273 = vst [vmem:[#allocation10_spill] sm:$0xff] %v14066_v52  ;;  %v12063_v60 = vadd.f32 -2.0, %v13979_v57  ;;  %v14124_v5 = vmax.f32 %v362_v39, 0.0  ;;  %v395_v39 = vand.u32 2147483647, %v12066_v2 }
  0xcd   : > { %12263 = vmatmul.mubr.msk.f32.gmra.mrb[84].mxu0 %vm664_vm0, %v13621_v33  ;;  %v14091_v19 = vmax.f32 %v319_v58, 0.0  ;;  %17277 = vst [vmem:[#allocation14_spill] sm:$0xff] %v14098_v32  ;;  %17278 = vst [vmem:[#allocation15_spill] sm:$0xff] %v14100_v35  ;;  %v398_v58 = vsub.f32 1.0, %v390_v22  ;;  %v364_v63 = vsub.f32 1.0, %v356_v38  ;;  %v14126_v7 = vmax.f32 %v323_v40, 0.0 }
  0xce   : > { %12267 = vmatmul.mubr.msk.f32.gmra.mrb[84].mxu1 %vm664_vm0, %v13621_v33  ;;  %2990 = vmatprep.mubr.f32.mxu0 %v17164_v0  ;;  %17282 = vst [vmem:[#allocation19_spill] sm:$0xff] %v14124_v5  ;;  %v14128_v8 = vmax.f32 %v363_v41, 0.0 }
  0xcf   : > { %3079 = vmatprep.mubr.f32.mxu1 %v17164_v0  ;;  %17275 = vst [vmem:[#allocation12_spill] sm:$0xff] %v14091_v19  ;;  %17283 = vst [vmem:[#allocation20_spill] sm:$0xff] %v14126_v7  ;;  %v14142_v3 = vmax.f32 %v398_v58, 0.0 }
  0xd0   : > { %17284 = vst [vmem:[#allocation21_spill] sm:$0xff] %v14128_v8 }
  0xd1   : > { %12264 = vmatmul.mubr.msk.f32.gmra.mrb[86].mxu0 %vm664_vm0, %v13632_v34  ;;  %17286 = vst [vmem:[#allocation23_spill] sm:$0xff] %v14142_v3 }
  0xd2   : > { %12268 = vmatmul.mubr.msk.f32.gmra.mrb[86].mxu1 %vm664_vm0, %v13632_v34  ;;  %3150 = vmatprep.mubr.f32.mxu0 %v17164_v0 }
  0xd3   : > { %3239 = vmatprep.mubr.f32.mxu1 %v17164_v0 }
  0xd5   : > { %12269 = vmatmul.mubr.msk.f32.vlgmr.msra.gmra.mrb[88].mxu0 %vm664_vm0, %v13588_v12 }
  0xd6   : > { %12273 = vmatmul.mubr.msk.f32.vlgmr.msra.gmra.mrb[88].mxu1 %vm664_vm0, %v13588_v12  ;;  %13036 = vmatpush1.bf16.msra.mxu0 %v13035_v1  ;;  %v353_v1 = vand.u32 2147483647, %v12057_v42  ;;  %v391_v42 = vand.u32 2147483647, %v12062_v9 }
  0xd7   : > { %3156 = vmatprep.mubr.f32.mxu0 %v17164_v0  ;;  %3245 = vmatprep.mubr.f32.mxu1 %v17164_v0 }
  0xd8   : > { %13040 = vmatpush1.bf16.msra.mxu1 %v13039_v10  ;;  %13042 = vmatprep.subr.bf16.mxu0 %v13041_v11  ;;  %v321_v11 = vsub.f32 1.0, %v313_v53  ;;  %v361_v36 = vsub.f32 1.0, %v353_v1  ;;  %v324_v53 = vsub.f32 1.0, %v316_v16  ;;  %v12071_v1 = vadd.f32 -3.0, %v13979_v57 }
  0xd9   : > { %12270 = vmatmul.mubr.msk.f32.gmra.mrb[90].mxu0 %vm664_vm0, %v13609_v31  ;;  %13046 = vmatprep.subr.bf16.mxu1 %v13045_v13  ;;  %v322_v13 = vsub.f32 1.0, %v314_v54  ;;  %v12070_v54 = vadd.f32 -3.0, %v13961_v44  ;;  %v399_v9 = vsub.f32 1.0, %v391_v42  ;;  %v392_v16 = vand.u32 2147483647, %v12063_v60 }
  0xda   : > { %12274 = vmatmul.mubr.msk.f32.gmra.mrb[90].mxu1 %vm664_vm0, %v13609_v31  ;;  %3162 = vmatprep.mubr.f32.mxu0 %v17164_v0  ;;  %v14106_v45 = vmax.f32 %v321_v11, 0.0  ;;  %v14115_v62 = vmax.f32 %v361_v36, 0.0  ;;  %v14132_v11 = vmax.f32 %v324_v53, 0.0  ;;  %v433_v14 = vand.u32 2147483647, %v12071_v1 }
  0xdb   : > { %3251 = vmatprep.mubr.f32.mxu1 %v17164_v0  ;;  %v14108_v50 = vmax.f32 %v322_v13, 0.0  ;;  %v432_v13 = vand.u32 2147483647, %v12070_v54  ;;  %v400_v41 = vsub.f32 1.0, %v392_v16  ;;  %v12076_v53 = vadd.f32 -3.0, %v14051_v46  ;;  %v14174_v54 = vld [vmem:[%s17159_s2 + $0x10] sm:$0xff] }
  0xdc   : > { %17279 = vst [vmem:[#allocation16_spill] sm:$0xff] %v14106_v45  ;;  %17281 = vst [vmem:[#allocation18_spill] sm:$0xff] %v14115_v62  ;;  %v441_v58 = vsub.f32 1.0, %v433_v14  ;;  %v436_v1 = vand.u32 2147483647, %v12074_v29  ;;  %v403_v16 = vsub.f32 1.0, %v395_v39 }
  0xdd   : > { %12271 = vmatmul.mubr.msk.f32.gmra.mrb[92].mxu0 %vm664_vm0, %v13621_v33  ;;  %17280 = vst [vmem:[#allocation17_spill] sm:$0xff] %v14108_v50  ;;  %17285 = vst [vmem:[#allocation22_spill] sm:$0xff] %v14132_v11  ;;  %v440_v36 = vsub.f32 1.0, %v432_v13  ;;  %v14186_v13 = vld [vmem:[%s13575_s30 + $0x360] sm:$0xff]  ;;  %v14194_v14 = vld [vmem:[%s13575_s30 + $0x378] sm:$0xff]  ;;  %v404_v10 = vsub.f32 1.0, %v396_v4 }
  0xde   : > { %12275 = vmatmul.mubr.msk.f32.gmra.mrb[92].mxu1 %vm664_vm0, %v13621_v33  ;;  %3168 = vmatprep.mubr.f32.mxu0 %v17164_v0  ;;  %v14093_v33 = vmax.f32 %v359_v59, 0.0  ;;  %v431_v59 = vand.u32 2147483647, %v12069_v25  ;;  %v14149_v25 = vmax.f32 %v364_v63, 0.0  ;;  %v438_v29 = vand.u32 2147483647, %v12076_v53 }
  0xdf   : > { %3257 = vmatprep.mubr.f32.mxu1 %v17164_v0  ;;  %v14191_v2 = vmax.f32 %v440_v36, 0.0  ;;  %v12316_v36 = vld [vmem:[%s13575_s30 + $0x3f8] sm:$0xff]  ;;  %v14219_v53 = vld [vmem:[%s13575_s30 + $0x3f0] sm:$0xff]  ;;  %v14226_v47 = vmax.f32 %v403_v16, 0.0  ;;  %v14236_v4 = vld [vmem:[%s13575_s30 + $0x488] sm:$0xff] }
  0xe0   : > { %17276 = vst [vmem:[#allocation13_spill] sm:$0xff] %v14093_v33  ;;  %17287 = vst [vmem:[#allocation24_spill] sm:$0xff] %v14149_v25  ;;  %v446_v16 = vsub.f32 1.0, %v438_v29 }
  0xe1   : > { %12272 = vmatmul.mubr.msk.f32.gmra.mrb[94].mxu0 %vm664_vm0, %v13632_v34  ;;  %17290 = vst [vmem:[#allocation27_spill] sm:$0xff] %v14191_v2  ;;  %17296 = vst [vmem:[#allocation33_spill] sm:$0xff] %v14226_v47  ;;  %v14259_v47 = vld [vmem:[%s13575_s30 + $0x498] sm:$0xff] }
  0xe2   : > { %12276 = vmatmul.mubr.msk.f32.gmra.mrb[94].mxu1 %vm664_vm0, %v13632_v34  ;;  %3554 = vmatprep.mubr.f32.mxu0 %v17164_v0  ;;  %v12064_v34 = vadd.f32 -2.0, %v13986_v61 }
  0xe3   : > { %3643 = vmatprep.mubr.f32.mxu1 %v17164_v0 }
  0xe4   : > { %v393_v22 = vand.u32 2147483647, %v12064_v34  ;;  %v12077_v34 = vadd.f32 -4.0, %v13959_v43 }
  0xe5   : > { %12317 = vmatmul.mubr.msk.f32.vlgmr.msra.gmra.mrb[96].mxu0 %vm664_vm0, %v13588_v12 }
  0xe6   : > { %12321 = vmatmul.mubr.msk.f32.vlgmr.msra.gmra.mrb[96].mxu1 %vm664_vm0, %v13588_v12  ;;  %13044 = vmatpush1.bf16.msra.mxu0 %v13043_v23  ;;  %v12065_v12 = vadd.f32 -2.0, %v14017_v20  ;;  %v439_v23 = vsub.f32 1.0, %v431_v59  ;;  %v401_v42 = vsub.f32 1.0, %v393_v22  ;;  %v442_v59 = vsub.f32 1.0, %v434_v15 }
  0xe7   : > { %3560 = vmatprep.mubr.f32.mxu0 %v17164_v0  ;;  %3649 = vmatprep.mubr.f32.mxu1 %v17164_v0  ;;  %v14196_v15 = vmax.f32 %v400_v41, 0.0  ;;  %v12085_v41 = vadd.f32 -5.0, %v13959_v43 }
  0xe8   : > { %13048 = vmatpush1.bf16.msra.mxu1 %v13047_v27  ;;  %13050 = vmatprep.subr.bf16.mxu0 %v13049_v37  ;;  %v12073_v27 = vadd.f32 -3.0, %v14017_v20  ;;  %v14161_v37 = vmax.f32 %v399_v9, 0.0  ;;  %v394_v38 = vand.u32 2147483647, %v12065_v12  ;;  %v14168_v40 = vmax.f32 %v439_v23, 0.0  ;;  %v14189_v12 = vld [vmem:[%s13575_s30 + $0x3e0] sm:$0xff] }
  0xe9   : > { %12318 = vmatmul.mubr.msk.f32.gmra.mrb[98].mxu0 %vm664_vm0, %v13609_v31  ;;  %13054 = vmatprep.subr.bf16.mxu1 %v13053_v48  ;;  %v12068_v48 = vadd.f32 -2.0, %v14051_v46  ;;  %17291 = vst [vmem:[#allocation28_spill] sm:$0xff] %v14196_v15  ;;  %v14221_v63 = vmax.f32 %v442_v59, 0.0  ;;  %v12086_v15 = vadd.f32 -5.0, %v13961_v44  ;;  %v14256_v59 = vld [vmem:[%s13575_s30 + $0x418] sm:$0xff]  ;;  %v14268_v44 = vmax.f32 %v404_v10, 0.0 }
  0xea   : > { %12322 = vmatmul.mubr.msk.f32.gmra.mrb[98].mxu1 %vm664_vm0, %v13609_v31  ;;  %3566 = vmatprep.mubr.f32.mxu0 %v17164_v0  ;;  %17288 = vst [vmem:[#allocation25_spill] sm:$0xff] %v14161_v37  ;;  %v12075_v31 = vadd.f32 -3.0, %v14028_v26  ;;  %17289 = vst [vmem:[#allocation26_spill] sm:$0xff] %v14168_v40  ;;  %v435_v60 = vand.u32 2147483647, %v12073_v27  ;;  %v402_v23 = vsub.f32 1.0, %v394_v38 }
  0xeb   : > { %3655 = vmatprep.mubr.f32.mxu1 %v17164_v0  ;;  %v397_v9 = vand.u32 2147483647, %v12068_v48  ;;  %v14198_v27 = vmax.f32 %v401_v42, 0.0  ;;  %v14204_v48 = vld [vmem:[%s17159_s2 + $0x18] sm:$0xff]  ;;  %v14209_v38 = vmax.f32 %v441_v58, 0.0  ;;  %v14216_v42 = vld [vmem:[%s13575_s30 + $0x370] sm:$0xff] }
  0xec   : > { %v437_v22 = vand.u32 2147483647, %v12075_v31  ;;  %v443_v39 = vsub.f32 1.0, %v435_v60  ;;  %v472_v31 = vand.u32 2147483647, %v12077_v34  ;;  %17294 = vst [vmem:[#allocation31_spill] sm:$0xff] %v14221_v63 }
  0xed   : > { %12319 = vmatmul.mubr.msk.f32.gmra.mrb[100].mxu0 %vm664_vm0, %v14174_v54  ;;  %17292 = vst [vmem:[#allocation29_spill] sm:$0xff] %v14198_v27  ;;  %17293 = vst [vmem:[#allocation30_spill] sm:$0xff] %v14209_v38  ;;  %v444_v58 = vsub.f32 1.0, %v436_v1  ;;  %v405_v60 = vsub.f32 1.0, %v397_v9  ;;  %v14224_v34 = vmax.f32 %v402_v23, 0.0  ;;  %v14229_v38 = vld [vmem:[%s13575_s30 + $0x408] sm:$0xff]  ;;  %v13061_v1 = vpack.c.bf16 %v12316_v36, %v14194_v14 }
  0xee   : > { %12323 = vmatmul.mubr.msk.f32.gmra.mrb[100].mxu1 %vm664_vm0, %v14174_v54  ;;  %3572 = vmatprep.mubr.f32.mxu0 %v17164_v0  ;;  %v445_v27 = vsub.f32 1.0, %v437_v22  ;;  %v14239_v9 = vld [vmem:[%s13575_s30 + $0x400] sm:$0xff]  ;;  %v14253_v36 = vmax.f32 %v443_v39, 0.0  ;;  %v480_v29 = vsub.f32 1.0, %v472_v31  ;;  %17302 = vst [vmem:[#allocation38_spill] sm:$0xff] %v14268_v44  ;;  %v14273_v39 = vld [vmem:[%s13575_s30 + $0x410] sm:$0xff] }
  0xef   : > { %3661 = vmatprep.mubr.f32.mxu1 %v17164_v0  ;;  %17295 = vst [vmem:[#allocation32_spill] sm:$0xff] %v14224_v34  ;;  %17297 = vst [vmem:[#allocation34_spill] sm:$0xff] %v14239_v9  ;;  %v14242_v23 = vld [vmem:[%s13575_s30 + $0x480] sm:$0xff]  ;;  %v513_v34 = vand.u32 2147483647, %v12085_v41  ;;  %v14266_v63 = vmax.f32 %v444_v58, 0.0 }
  0xf0   : > { %17298 = vst [vmem:[#allocation35_spill] sm:$0xff] %v14242_v23  ;;  %v14247_v22 = vld [vmem:[%s17159_s2] sm:$0xff]  ;;  %17299 = vst [vmem:[#allocation36_spill] sm:$0xff] %v14253_v36  ;;  %v14270_v14 = vmax.f32 %v405_v60, 0.0  ;;  %v14276_v36 = vld [vmem:[%s13575_s30 + $0x490] sm:$0xff]  ;;  %v12079_v31 = vadd.f32 -4.0, %v13979_v57 }
  0xf1   : > { %12320 = vmatmul.mubr.msk.f32.gmra.mrb[102].mxu0 %vm664_vm0, %v14204_v48  ;;  %17301 = vst [vmem:[#allocation37_spill] sm:$0xff] %v14266_v63  ;;  %v17304_v41 = vmov 0.0   ;;  %v12080_v58 = vadd.f32 -4.0, %v13986_v61  ;;  %v14294_v44 = vmax.f32 %v446_v16, 0.0 }
  0xf2   : > { %12324 = vmatmul.mubr.msk.f32.gmra.mrb[102].mxu1 %vm664_vm0, %v14204_v48  ;;  %3732 = vmatprep.mubr.f32.mxu0 %v17164_v0  ;;  %17303 = vst [vmem:[#allocation39_spill] sm:$0xff] %v14270_v14  ;;  %v17307_v14 = vpack.c.bf16 %v14159_v18, %v14156_v17 }
  0xf3   : > { %3821 = vmatprep.mubr.f32.mxu1 %v17164_v0  ;;  %v473_v0 = vand.u32 2147483647, %v12078_v30  ;;  %v17300_v30 = vpack.c.bf16 %v14035_v28, %v14026_v24  ;;  %v14283_v28 = vmax.f32 %v445_v27, 0.0  ;;  %17308 = vst [vmem:[#allocation41_spill] sm:$0xff] %v14294_v44 }
  0xf5   : > { %12325 = vmatmul.mubr.msk.f32.vlgmr.msra.gmra.mrb[104].mxu0 %vm664_vm0, %v14247_v22  ;;  %17305 = vst [vmem:[#allocation40_spill] sm:$0xff] %v14283_v28  ;;  %v481_v24 = vsub.f32 1.0, %v473_v0  ;;  %v514_v28 = vand.u32 2147483647, %v12086_v15  ;;  %v521_v0 = vsub.f32 1.0, %v513_v34  ;;  %v12088_v34 = vadd.f32 -5.0, %v13986_v61 }
  0xf6   : > { %12329 = vmatmul.mubr.msk.f32.vlgmr.msra.gmra.mrb[104].mxu1 %vm664_vm0, %v14247_v22  ;;  %13052 = vmatpush1.bf16.msra.mxu0 %v17300_v30  ;;  %v17306_v30 = vpack.c.bf16 %v14074_v56, %v14071_v55  ;;  %v14302_v55 = vld [vmem:[%s17159_s2 + $0x8] sm:$0xff]  ;;  %v14306_v56 = vmax.f32 %v480_v29, 0.0  ;;  %v475_v29 = vand.u32 2147483647, %v12080_v58 }
  0xf7   : > { %3738 = vmatprep.mubr.f32.mxu0 %v17304_v41  ;;  %3827 = vmatprep.mubr.f32.mxu1 %v17304_v41  ;;  %v14322_v17 = vmax.f32 %v481_v24, 0.0  ;;  %v522_v27 = vsub.f32 1.0, %v514_v28  ;;  %v14330_v58 = vmax.f32 %v521_v0, 0.0 }
  0xf8   : > { %v743_v60 = vpop.f32.mrb[0].mxu0  ;;  %13056 = vmatpush1.bf16.msra.mxu1 %v17306_v30  ;;  %13058 = vmatprep.subr.bf16.mxu0 %v17307_v14  ;;  %17309 = vst [vmem:[#allocation42_spill] sm:$0xff] %v14306_v56  ;;  %v474_v14 = vand.u32 2147483647, %v12079_v31  ;;  %v483_v0 = vsub.f32 1.0, %v475_v29 }
  0xf9   : > { %v1397_v10 = vmul.f32 %v743_v60, %v14060_v49  ;;  %v832_v9 = vpop.f32.mrb[0].mxu1  ;;  %v745_v23 = vpop.f32.mrb[1].mxu0  ;;  %12326 = vmatmul.mubr.msk.f32.gmra.mrb[106].mxu0 %vm664_vm0, %v14302_v55  ;;  %13062 = vmatprep.subr.bf16.mxu1 %v13061_v1  ;;  %v12087_v60 = vadd.f32 -5.0, %v13979_v57  ;;  %17310 = vst [vmem:[#allocation43_spill] sm:$0xff] %v14322_v17  ;;  %17311 = vst [vmem:[#allocation44_spill] sm:$0xff] %v14330_v58 }
  0xfa   : > { %v1413_v18 = vmul.f32 %v832_v9, %v14064_v51  ;;  %v1398_v15 = vmul.f32 %v745_v23, %v14066_v52  ;;  %v834_v16 = vpop.f32.mrb[1].mxu1  ;;  %12330 = vmatmul.mubr.msk.f32.gmra.mrb[106].mxu1 %vm664_vm0, %v14302_v55  ;;  %3744 = vmatprep.mubr.f32.mxu0 %v17304_v41  ;;  %v12081_v9 = vadd.f32 -4.0, %v14017_v20  ;;  %v12082_v52 = vadd.f32 -4.0, %v14019_v21 }
  0xfb   : > { %v1414_v1 = vmul.f32 %v834_v16, %v14083_v6  ;;  %3833 = vmatprep.mubr.f32.mxu1 %v17304_v41 }
  0xfc   : > { %v14320_v30 = vadd.f32 %v1413_v18, %v1397_v10  ;;  %v749_v23 = vpop.f32.mrb[2].mxu0  ;;  %v12089_v10 = vadd.f32 -5.0, %v14017_v20  ;;  %v476_v49 = vand.u32 2147483647, %v12081_v9 }
  0xfd   : > { %v14325_v31 = vadd.f32 %v1414_v1, %v1398_v15  ;;  %v1399_v51 = vmul.f32 %v749_v23, %v14091_v19  ;;  %v838_v16 = vpop.f32.mrb[2].mxu1  ;;  %v751_v6 = vpop.f32.mrb[3].mxu0  ;;  %12327 = vmatmul.mubr.msk.f32.gmra.mrb[108].mxu0 %vm664_vm0, %v14174_v54  ;;  %v482_v15 = vsub.f32 1.0, %v474_v14  ;;  %v515_v1 = vand.u32 2147483647, %v12087_v60 }
  0xfe   : > { %v1415_v18 = vmul.f32 %v838_v16, %v14093_v33  ;;  %v1400_v24 = vmul.f32 %v751_v6, %v14098_v32  ;;  %v840_v28 = vpop.f32.mrb[3].mxu1  ;;  %12331 = vmatmul.mubr.msk.f32.gmra.mrb[108].mxu1 %vm664_vm0, %v14174_v54  ;;  %3750 = vmatprep.mubr.f32.mxu0 %v17304_v41  ;;  %v516_v19 = vand.u32 2147483647, %v12088_v34  ;;  %v14342_v33 = vmax.f32 %v522_v27, 0.0 }
  0xff   : > { %v1416_v23 = vmul.f32 %v840_v28, %v14100_v35  ;;  %3839 = vmatprep.mubr.f32.mxu1 %v17304_v41  ;;  %v477_v6 = vand.u32 2147483647, %v12082_v52  ;;  %v12090_v32 = vadd.f32 -5.0, %v14019_v21  ;;  %v517_v29 = vand.u32 2147483647, %v12089_v10 }
 0x100   : > { %v14340_v58 = vadd.f32 %v1415_v18, %v1399_v51  ;;  %v755_v16 = vpop.f32.mrb[4].mxu0  ;;  %v12083_v34 = vadd.f32 -4.0, %v14028_v26  ;;  %v14356_v52 = vmax.f32 %v482_v15, 0.0  ;;  %v523_v18 = vsub.f32 1.0, %v515_v1 }
 0x101   : > { %v14345_v17 = vadd.f32 %v1416_v23, %v1400_v24  ;;  %v1401_v14 = vmul.f32 %v755_v16, %v14106_v45  ;;  %v844_v60 = vpop.f32.mrb[4].mxu1  ;;  %v757_v20 = vpop.f32.mrb[5].mxu0  ;;  %12328 = vmatmul.mubr.msk.f32.gmra.mrb[110].mxu0 %vm664_vm0, %v14204_v48  ;;  %v14360_v10 = vmax.f32 %v483_v0, 0.0  ;;  %v524_v28 = vsub.f32 1.0, %v516_v19 }
 0x102   : > { %v1417_v51 = vmul.f32 %v844_v60, %v14115_v62  ;;  %v1402_v27 = vmul.f32 %v757_v20, %v14108_v50  ;;  %v846_v9 = vpop.f32.mrb[5].mxu1  ;;  %12332 = vmatmul.mubr.msk.f32.gmra.mrb[110].mxu1 %vm664_vm0, %v14204_v48  ;;  %3910 = vmatprep.mubr.f32.mxu0 %v17304_v41  ;;  %17312 = vst [vmem:[#allocation45_spill] sm:$0xff] %v14356_v52  ;;  %v484_v23 = vsub.f32 1.0, %v476_v49  ;;  %v485_v60 = vsub.f32 1.0, %v477_v6 }
 0x103   : > { %v1418_v24 = vmul.f32 %v846_v9, %v14124_v5  ;;  %3999 = vmatprep.mubr.f32.mxu1 %v17304_v41  ;;  %17313 = vst [vmem:[#allocation46_spill] sm:$0xff] %v14360_v10  ;;  %v518_v50 = vand.u32 2147483647, %v12090_v32  ;;  %v12084_v62 = vadd.f32 -4.0, %v14051_v46  ;;  %v525_v0 = vsub.f32 1.0, %v517_v29 }
 0x104   : > { %v14362_v16 = vadd.f32 %v1417_v51, %v1401_v14  ;;  %v761_v20 = vpop.f32.mrb[6].mxu0  ;;  %v478_v9 = vand.u32 2147483647, %v12083_v34  ;;  %v17314_v32 = vpack.c.bf16 %v14189_v12, %v14186_v13  ;;  %v14377_v6 = vmax.f32 %v523_v18, 0.0 }
 0x105   : > { %v14365_v45 = vadd.f32 %v1418_v24, %v1402_v27  ;;  %v1403_v15 = vmul.f32 %v761_v20, %v14126_v7  ;;  %v850_v1 = vpop.f32.mrb[6].mxu1  ;;  %v763_v35 = vpop.f32.mrb[7].mxu0  ;;  %12333 = vmatmul.mubr.msk.f32.vlgmr.msra.gmra.mrb[112].mxu0 %vm664_vm0, %v14247_v22  ;;  %v12091_v51 = vadd.f32 -5.0, %v14028_v26  ;;  %v14383_v29 = vmax.f32 %v524_v28, 0.0 }
 0x106   : > { %v1419_v49 = vmul.f32 %v850_v1, %v14128_v8  ;;  %v1404_v19 = vmul.f32 %v763_v35, %v14132_v11  ;;  %v852_v14 = vpop.f32.mrb[7].mxu1  ;;  %12337 = vmatmul.mubr.msk.f32.vlgmr.msra.gmra.mrb[112].mxu1 %vm664_vm0, %v14247_v22  ;;  %13060 = vmatpush1.bf16.msra.mxu0 %v17314_v32  ;;  %17315 = vst [vmem:[#allocation47_spill] sm:$0xff] %v14377_v6  ;;  %v14385_v35 = vmax.f32 %v484_v23, 0.0  ;;  %v12092_v34 = vadd.f32 -5.0, %v14051_v46  ;;  %v17335_v8 = vld [vmem:[#allocation34_spill] sm:$0xff] }
 0x107   : > { %v1420_v27 = vmul.f32 %v852_v14, %v14149_v25  ;;  %3916 = vmatprep.mubr.f32.mxu0 %v17304_v41  ;;  %4005 = vmatprep.mubr.f32.mxu1 %v17304_v41  ;;  %17316 = vst [vmem:[#allocation48_spill] sm:$0xff] %v14383_v29  ;;  %v17318_v12 = vpack.c.bf16 %v14219_v53, %v14216_v42  ;;  %v14396_v20 = vmax.f32 %v485_v60, 0.0  ;;  %v526_v28 = vsub.f32 1.0, %v518_v50  ;;  %v14417_v14 = vld [vmem:[%s13575_s30 + $0x4a8] sm:$0xff] }
 0x108   : > { %17317 = vst [vmem:[#allocation49_spill] sm:$0xff] %v14385_v35  ;;  %v14388_v24 = vadd.f32 %v1419_v49, %v1403_v15  ;;  %v921_v13 = vpop.f32.mrb[8].mxu0  ;;  %v17319_v18 = vpack.c.bf16 %v14236_v4, %v14229_v38  ;;  %v479_v23 = vand.u32 2147483647, %v12084_v62  ;;  %v17321_v53 = vpack.c.bf16 %v14259_v47, %v14256_v59 }
 0x109   : > { %13064 = vmatpush1.bf16.msra.mxu1 %v17318_v12  ;;  %17320 = vst [vmem:[#allocation50_spill] sm:$0xff] %v14396_v20  ;;  %v14398_v1 = vadd.f32 %v1420_v27, %v1404_v19  ;;  %v1437_v15 = vmul.f32 %v921_v13, %v14142_v3  ;;  %v923_v49 = vpop.f32.mrb[9].mxu0  ;;  %12334 = vmatmul.mubr.msk.f32.gmra.mrb[114].mxu0 %vm664_vm0, %v14302_v55  ;;  %v1010_v42 = vpop.f32.mrb[8].mxu1  ;;  %v14406_v38 = vmax.f32 %v525_v0, 0.0  ;;  %v486_v4 = vsub.f32 1.0, %v478_v9  ;;  %v14414_v19 = vld [vmem:[%s13575_s30 + $0x428] sm:$0xff] }
 0x10a   : > { %13066 = vmatprep.subr.bf16.mxu0 %v17319_v18  ;;  %13070 = vmatprep.subr.bf16.mxu1 %v17321_v53  ;;  %v1438_v50 = vmul.f32 %v923_v49, %v14161_v37  ;;  %v1461_v62 = vmul.f32 %v1010_v42, %v14168_v40  ;;  %v1012_v60 = vpop.f32.mrb[9].mxu1  ;;  %v519_v32 = vand.u32 2147483647, %v12091_v51  ;;  %v12093_v47 = vadd.f32 -6.0, %v13959_v43  ;;  %v17323_v27 = vld [vmem:[#allocation6_spill] sm:$0xff]  ;;  %v14455_v40 = vld [vmem:[%s13575_s30 + $0x438] sm:$0xff] }
 0x10b   : > { %17322 = vst [vmem:[#allocation51_spill] sm:$0xff] %v14406_v38  ;;  %12338 = vmatmul.mubr.msk.f32.gmra.mrb[114].mxu1 %vm664_vm0, %v14302_v55  ;;  %3922 = vmatprep.mubr.f32.mxu0 %v17304_v41  ;;  %v1445_v59 = vadd.f32 %v1437_v15, %v14320_v30  ;;  %v1462_v0 = vmul.f32 %v1012_v60, %v14191_v2  ;;  %v520_v9 = vand.u32 2147483647, %v12092_v34  ;;  %v14424_v13 = vadd.f32 -6.0, %v17323_v27  ;;  %v17324_v15 = vld [vmem:[#allocation28_spill] sm:$0xff]  ;;  %v17327_v3 = vld [vmem:[#allocation31_spill] sm:$0xff] }
 0x10c   : > { %4011 = vmatprep.mubr.f32.mxu1 %v17304_v41  ;;  %v1446_v12 = vadd.f32 %v1438_v50, %v14325_v31  ;;  %v927_v18 = vpop.f32.mrb[10].mxu0  ;;  %v14427_v49 = vmax.f32 %v526_v28, 0.0  ;;  %v487_v51 = vsub.f32 1.0, %v479_v23  ;;  %v14430_v42 = vadd.f32 -7.0, %v13959_v43  ;;  %v14442_v28 = vld [vmem:[%s13575_s30 + $0x420] sm:$0xff]  ;;  %v17325_v50 = vld [vmem:[#allocation29_spill] sm:$0xff] }
 0x10d   : > { %v14432_v30 = vadd.f32 %v1461_v62, %v1445_v59  ;;  %v1439_v53 = vmul.f32 %v927_v18, %v17324_v15  ;;  %v929_v60 = vpop.f32.mrb[11].mxu0  ;;  %12335 = vmatmul.mubr.msk.f32.gmra.mrb[116].mxu0 %vm664_vm0, %v14174_v54  ;;  %v1016_v34 = vpop.f32.mrb[10].mxu1  ;;  %v14437_v2 = vmax.f32 %v486_v4, 0.0  ;;  %v14445_v43 = vld [vmem:[%s13575_s30 + $0x4a0] sm:$0xff]  ;;  %v527_v4 = vsub.f32 1.0, %v519_v32  ;;  %v14458_v31 = vld [vmem:[%s13575_s30 + $0x4b8] sm:$0xff] }
 0x10e   : > { %v14447_v23 = vadd.f32 %v1462_v0, %v1446_v12  ;;  %v1440_v62 = vmul.f32 %v929_v60, %v17325_v50  ;;  %v17326_v59 = vld [vmem:[#allocation30_spill] sm:$0xff]  ;;  %v1018_v15 = vpop.f32.mrb[11].mxu1  ;;  %3928 = vmatprep.mubr.f32.mxu0 %v17304_v41  ;;  %v528_v12 = vsub.f32 1.0, %v520_v9  ;;  %v554_v60 = vand.u32 2147483647, %v12093_v47  ;;  %v14479_v9 = vld [vmem:[%s13575_s30 + $0x430] sm:$0xff] }
 0x10f   : > { %12339 = vmatmul.mubr.msk.f32.gmra.mrb[116].mxu1 %vm664_vm0, %v14174_v54  ;;  %v1463_v18 = vmul.f32 %v1016_v34, %v17326_v59  ;;  %v1447_v37 = vadd.f32 %v1439_v53, %v14340_v58  ;;  %v1464_v0 = vmul.f32 %v1018_v15, %v17327_v3  ;;  %v14464_v50 = vmax.f32 %v487_v51, 0.0  ;;  %v17328_v53 = vld [vmem:[#allocation32_spill] sm:$0xff] }
 0x110   : > { %4017 = vmatprep.mubr.f32.mxu1 %v17304_v41  ;;  %v1448_v34 = vadd.f32 %v1440_v62, %v14345_v17  ;;  %v933_v59 = vpop.f32.mrb[12].mxu0  ;;  %v14469_v25 = vadd.f32 -7.0, %v17323_v27  ;;  %v13077_v17 = vpack.c.bf16 %v14458_v31, %v14455_v40  ;;  %v14482_v51 = vld [vmem:[%s13575_s30 + $0x4b0] sm:$0xff]  ;;  %v555_v62 = vand.u32 2147483647, %v14424_v13 }
 0x111   : > { %v14471_v58 = vadd.f32 %v1463_v18, %v1447_v37  ;;  %v1441_v15 = vmul.f32 %v933_v59, %v17328_v53  ;;  %v935_v3 = vpop.f32.mrb[13].mxu0  ;;  %12336 = vmatmul.mubr.msk.f32.gmra.mrb[118].mxu0 %vm664_vm0, %v14204_v48  ;;  %v1022_v47 = vpop.f32.mrb[12].mxu1  ;;  %v17329_v37 = vld [vmem:[#allocation33_spill] sm:$0xff]  ;;  %v17330_v59 = vld [vmem:[#allocation36_spill] sm:$0xff]  ;;  %v14492_v11 = vmax.f32 %v527_v4, 0.0  ;;  %v14497_v13 = vmax.f32 %v528_v12, 0.0 }
 0x112   : > { %v14485_v27 = vadd.f32 %v1464_v0, %v1448_v34  ;;  %v1442_v18 = vmul.f32 %v935_v3, %v17329_v37  ;;  %v1465_v32 = vmul.f32 %v1022_v47, %v17330_v59  ;;  %v1024_v53 = vpop.f32.mrb[13].mxu1  ;;  %4088 = vmatprep.mubr.f32.mxu0 %v17304_v41  ;;  %v562_v0 = vsub.f32 1.0, %v554_v60 }
 0x113   : > { %12340 = vmatmul.mubr.msk.f32.gmra.mrb[118].mxu1 %vm664_vm0, %v14204_v48  ;;  %v1449_v40 = vadd.f32 %v1441_v15, %v14362_v16  ;;  %v1466_v31 = vmul.f32 %v1024_v53, %v14266_v63  ;;  %v595_v59 = vand.u32 2147483647, %v14430_v42  ;;  %v12095_v4 = vadd.f32 -6.0, %v13979_v57  ;;  %v17331_v16 = vld [vmem:[#allocation38_spill] sm:$0xff]  ;;  %v17332_v63 = vld [vmem:[#allocation39_spill] sm:$0xff]  ;;  %v17333_v42 = vld [vmem:[#allocation40_spill] sm:$0xff] }
 0x114   : > { %4177 = vmatprep.mubr.f32.mxu1 %v17304_v41  ;;  %v1450_v3 = vadd.f32 %v1442_v18, %v14365_v45  ;;  %v939_v34 = vpop.f32.mrb[14].mxu0  ;;  %v563_v60 = vsub.f32 1.0, %v555_v62  ;;  %v596_v45 = vand.u32 2147483647, %v14469_v25  ;;  %v12096_v7 = vadd.f32 -6.0, %v13986_v61 }
 0x115   : > { %v14504_v37 = vadd.f32 %v1465_v32, %v1449_v40  ;;  %v1443_v15 = vmul.f32 %v939_v34, %v17331_v16  ;;  %v941_v53 = vpop.f32.mrb[15].mxu0  ;;  %12341 = vmatmul.mubr.msk.f32.vlgmr.msra.gmra.mrb[120].mxu0 %vm664_vm0, %v14247_v22  ;;  %v1028_v12 = vpop.f32.mrb[14].mxu1  ;;  %v17334_v40 = vld [vmem:[#allocation35_spill] sm:$0xff] }
 0x116   : > { %v14510_v18 = vadd.f32 %v1466_v31, %v1450_v3  ;;  %v1444_v47 = vmul.f32 %v941_v53, %v17332_v63  ;;  %v1467_v32 = vmul.f32 %v1028_v12, %v17333_v42  ;;  %v17336_v34 = vpack.c.bf16 %v17334_v40, %v17335_v8  ;;  %v1030_v16 = vpop.f32.mrb[15].mxu1  ;;  %4094 = vmatprep.mubr.f32.mxu0 %v17304_v41 }
 0x117   : > { %12345 = vmatmul.mubr.msk.f32.vlgmr.msra.gmra.mrb[120].mxu1 %vm664_vm0, %v14247_v22  ;;  %v1451_v62 = vadd.f32 %v1443_v15, %v14388_v24  ;;  %v1468_v25 = vmul.f32 %v1030_v16, %v14294_v44  ;;  %v14524_v31 = vmax.f32 %v562_v0, 0.0  ;;  %v12103_v3 = vadd.f32 -7.0, %v13979_v57 }
 0x118   : > { %13068 = vmatpush1.bf16.msra.mxu0 %v17336_v34  ;;  %4183 = vmatprep.mubr.f32.mxu1 %v17304_v41  ;;  %v1452_v53 = vadd.f32 %v1444_v47, %v14398_v1  ;;  %v1099_v12 = vpop.f32.mrb[16].mxu0  ;;  %v17337_v8 = vpack.c.bf16 %v14276_v36, %v14273_v39  ;;  %v17338_v24 = vpack.c.bf16 %v14417_v14, %v14414_v19  ;;  %v603_v16 = vsub.f32 1.0, %v595_v59  ;;  %v17339_v39 = vld [vmem:[#allocation7_spill] sm:$0xff] }
 0x119   : > { %v556_v15 = vand.u32 2147483647, %v12095_v4  ;;  %v12104_v40 = vadd.f32 -7.0, %v13986_v61  ;;  %v14535_v34 = vadd.f32 %v1467_v32, %v1451_v62  ;;  %v1485_v0 = vmul.f32 %v1099_v12, %v14306_v56  ;;  %v1101_v57 = vpop.f32.mrb[17].mxu0  ;;  %12342 = vmatmul.mubr.msk.f32.gmra.mrb[122].mxu0 %vm664_vm0, %v14302_v55  ;;  %v1188_v1 = vpop.f32.mrb[16].mxu1  ;;  %v17340_v14 = vld [vmem:[#allocation43_spill] sm:$0xff] }
 0x11a   : > { %13072 = vmatpush1.bf16.msra.mxu1 %v17337_v8  ;;  %13074 = vmatprep.subr.bf16.mxu0 %v17338_v24  ;;  %v14540_v36 = vmax.f32 %v563_v60, 0.0  ;;  %v12097_v47 = vadd.f32 -6.0, %v17339_v39  ;;  %v14543_v19 = vadd.f32 %v1468_v25, %v1452_v53  ;;  %v1486_v59 = vmul.f32 %v1101_v57, %v17340_v14  ;;  %v17341_v61 = vld [vmem:[#allocation44_spill] sm:$0xff]  ;;  %v1190_v32 = vpop.f32.mrb[17].mxu1 }
 0x11b   : > { %13078 = vmatprep.subr.bf16.mxu1 %v13077_v17  ;;  %12346 = vmatmul.mubr.msk.f32.gmra.mrb[122].mxu1 %vm664_vm0, %v14302_v55  ;;  %v1509_v4 = vmul.f32 %v1188_v1, %v17341_v61  ;;  %v604_v62 = vsub.f32 1.0, %v596_v45  ;;  %v1493_v12 = vadd.f32 %v1485_v0, %v14432_v30  ;;  %v1510_v17 = vmul.f32 %v1190_v32, %v14342_v33 }
 0x11c   : > { %4100 = vmatprep.mubr.f32.mxu0 %v17304_v41  ;;  %4189 = vmatprep.mubr.f32.mxu1 %v17304_v41  ;;  %v557_v60 = vand.u32 2147483647, %v12096_v7  ;;  %v597_v25 = vand.u32 2147483647, %v12103_v3  ;;  %v1494_v53 = vadd.f32 %v1486_v59, %v14447_v23  ;;  %v1105_v8 = vpop.f32.mrb[18].mxu0  ;;  %v14554_v24 = vmax.f32 %v603_v16, 0.0 }
 0x11d   : > { %v564_v57 = vsub.f32 1.0, %v556_v15  ;;  %v14557_v1 = vadd.f32 -6.0, %v14019_v21  ;;  %v14559_v61 = vadd.f32 %v1509_v4, %v1493_v12  ;;  %v1487_v45 = vmul.f32 %v1105_v8, %v14356_v52  ;;  %v1107_v30 = vpop.f32.mrb[19].mxu0  ;;  %12343 = vmatmul.mubr.msk.f32.gmra.mrb[124].mxu0 %vm664_vm0, %v14174_v54  ;;  %v1194_v0 = vpop.f32.mrb[18].mxu1 }
 0x11e   : > { %v598_v7 = vand.u32 2147483647, %v12104_v40  ;;  %v558_v3 = vand.u32 2147483647, %v12097_v47  ;;  %v14564_v32 = vadd.f32 %v1510_v17, %v1494_v53  ;;  %v1488_v23 = vmul.f32 %v1107_v30, %v14360_v10  ;;  %v1196_v15 = vpop.f32.mrb[19].mxu1  ;;  %4106 = vmatprep.mubr.f32.mxu0 %v17304_v41 }
 0x11f   : > { %12347 = vmatmul.mubr.msk.f32.gmra.mrb[124].mxu1 %vm664_vm0, %v14174_v54  ;;  %v1511_v16 = vmul.f32 %v1194_v0, %v14377_v6  ;;  %v14571_v59 = vmax.f32 %v604_v62, 0.0  ;;  %v1495_v4 = vadd.f32 %v1487_v45, %v14471_v58  ;;  %v1512_v12 = vmul.f32 %v1196_v15, %v14383_v29 }
 0x120   : > { %4195 = vmatprep.mubr.f32.mxu1 %v17304_v41  ;;  %v565_v40 = vsub.f32 1.0, %v557_v60  ;;  %v605_v47 = vsub.f32 1.0, %v597_v25  ;;  %v1496_v17 = vadd.f32 %v1488_v23, %v14485_v27  ;;  %v1111_v53 = vpop.f32.mrb[20].mxu0  ;;  %v14577_v8 = vmax.f32 %v564_v57, 0.0  ;;  %v12366_v57 = vld [vmem:[%s13575_s30 + $0x448] sm:$0xff] }
 0x121   : > { %v559_v30 = vand.u32 2147483647, %v14557_v1  ;;  %v14581_v62 = vadd.f32 -7.0, %v17339_v39  ;;  %v14583_v0 = vadd.f32 %v1511_v16, %v1495_v4  ;;  %v1489_v58 = vmul.f32 %v1111_v53, %v14385_v35  ;;  %v1113_v45 = vpop.f32.mrb[21].mxu0  ;;  %12344 = vmatmul.mubr.msk.f32.gmra.mrb[126].mxu0 %vm664_vm0, %v14204_v48  ;;  %v1200_v60 = vpop.f32.mrb[20].mxu1  ;;  %v12382_v23 = vld [vmem:[%s13575_s30 + $0x4c8] sm:$0xff] }
 0x122   : > { %v606_v27 = vsub.f32 1.0, %v598_v7  ;;  %v14588_v25 = vsub.f32 1.0, %v558_v3  ;;  %v14592_v1 = vadd.f32 %v1512_v12, %v1496_v17  ;;  %v1490_v39 = vmul.f32 %v1113_v45, %v14396_v20  ;;  %v1202_v15 = vpop.f32.mrb[21].mxu1  ;;  %4492 = vmatprep.mubr.f32.mxu0 %v17304_v41  ;;  %v12368_v53 = vld [vmem:[%s13575_s30 + $0x458] sm:$0xff] }
 0x123   : > { %12348 = vmatmul.mubr.msk.f32.gmra.mrb[126].mxu1 %vm664_vm0, %v14204_v48  ;;  %v1513_v16 = vmul.f32 %v1200_v60, %v14406_v38  ;;  %v12106_v4 = vadd.f32 -7.0, %v14019_v21  ;;  %v12384_v7 = vld [vmem:[%s13575_s30 + $0x4d8] sm:$0xff]  ;;  %v1497_v3 = vadd.f32 %v1489_v58, %v14504_v37  ;;  %v1514_v12 = vmul.f32 %v1202_v15, %v14427_v49 }
 0x124   : > { %4581 = vmatprep.mubr.f32.mxu1 %v17304_v41  ;;  %v14605_v17 = vmax.f32 %v565_v40, 0.0  ;;  %v14607_v45 = vmax.f32 %v605_v47, 0.0  ;;  %v1498_v60 = vadd.f32 %v1490_v39, %v14510_v18  ;;  %v1117_v38 = vpop.f32.mrb[22].mxu0  ;;  %v599_v20 = vand.u32 2147483647, %v14581_v62 }
 0x125   : > { %v12099_v21 = vadd.f32 -6.0, %v14028_v26  ;;  %v13081_v35 = vpack.c.bf16 %v12382_v23, %v12366_v57  ;;  %v14612_v29 = vadd.f32 %v1513_v16, %v1497_v3  ;;  %v1491_v37 = vmul.f32 %v1117_v38, %v14437_v2  ;;  %v1119_v58 = vpop.f32.mrb[23].mxu0  ;;  %12389 = vmatmul.mubr.msk.f32.vlgmr.msra.gmra.mrb[128].mxu0 %vm664_vm0, %v14247_v22  ;;  %v1206_v40 = vpop.f32.mrb[22].mxu1 }
 0x126   : > { %v12100_v47 = vadd.f32 -6.0, %v14051_v46  ;;  %v13085_v15 = vpack.c.bf16 %v12384_v7, %v12368_v53  ;;  %v14619_v18 = vadd.f32 %v1514_v12, %v1498_v60  ;;  %v1492_v62 = vmul.f32 %v1119_v58, %v14464_v50  ;;  %v1208_v23 = vpop.f32.mrb[23].mxu1  ;;  %4498 = vmatprep.mubr.f32.mxu0 %v17304_v41 }
 0x127   : > { %12393 = vmatmul.mubr.msk.f32.vlgmr.msra.gmra.mrb[128].mxu1 %vm664_vm0, %v14247_v22  ;;  %v1515_v57 = vmul.f32 %v1206_v40, %v14492_v11  ;;  %v17342_v38 = vpack.c.bf16 %v14445_v43, %v14442_v28  ;;  %v12107_v39 = vadd.f32 -7.0, %v14028_v26  ;;  %v1499_v16 = vadd.f32 %v1491_v37, %v14535_v34 }
 0x128   : > { %v1516_v53 = vmul.f32 %v1208_v23, %v14497_v13  ;;  %4587 = vmatprep.mubr.f32.mxu1 %v17304_v41  ;;  %v600_v7 = vand.u32 2147483647, %v12106_v4  ;;  %v12108_v3 = vadd.f32 -7.0, %v14051_v46  ;;  %v1500_v12 = vadd.f32 %v1492_v62, %v14543_v19  ;;  %v1277_v60 = vpop.f32.mrb[24].mxu0 }
 0x129   : > { %13076 = vmatpush1.bf16.msra.mxu0 %v17342_v38  ;;  %v17343_v28 = vpack.c.bf16 %v14482_v51, %v14479_v9  ;;  %v14642_v26 = vmax.f32 %v606_v27, 0.0  ;;  %v567_v43 = vsub.f32 1.0, %v559_v30  ;;  %v560_v34 = vand.u32 2147483647, %v12099_v21  ;;  %v1279_v46 = vpop.f32.mrb[25].mxu0  ;;  %v1366_v19 = vpop.f32.mrb[24].mxu1 }
 0x12a   : > { %13082 = vmatprep.subr.bf16.mxu0 %v13081_v35  ;;  %v14644_v37 = vadd.f32 %v1515_v57, %v1499_v16  ;;  %v1533_v4 = vmul.f32 %v1277_v60, %v14524_v31  ;;  %12390 = vmatmul.mubr.msk.f32.gmra.mrb[130].mxu0 %vm664_vm0, %v14302_v55  ;;  %v607_v58 = vsub.f32 1.0, %v599_v20  ;;  %v561_v9 = vand.u32 2147483647, %v12100_v47  ;;  %v1368_v30 = vpop.f32.mrb[25].mxu1 }
 0x12b   : > { %13080 = vmatpush1.bf16.msra.mxu1 %v17343_v28  ;;  %v14649_v51 = vadd.f32 %v1516_v53, %v1500_v12  ;;  %v1534_v27 = vmul.f32 %v1279_v46, %v14540_v36  ;;  %v1557_v35 = vmul.f32 %v1366_v19, %v14554_v24  ;;  %4504 = vmatprep.mubr.f32.mxu0 %v17304_v41  ;;  %v601_v21 = vand.u32 2147483647, %v12107_v39 }
 0x12c   : > { %13086 = vmatprep.subr.bf16.mxu1 %v13085_v15  ;;  %12394 = vmatmul.mubr.msk.f32.gmra.mrb[130].mxu1 %vm664_vm0, %v14302_v55  ;;  %v1541_v40 = vadd.f32 %v1533_v4, %v14559_v61  ;;  %v1558_v62 = vmul.f32 %v1368_v30, %v14571_v59  ;;  %v608_v20 = vsub.f32 1.0, %v600_v7  ;;  %v602_v47 = vand.u32 2147483647, %v12108_v3  ;;  %v1283_v57 = vpop.f32.mrb[26].mxu0  ;;  %v12381_v4 = vld [vmem:[%s13575_s30 + $0x4c0] sm:$0xff]  ;;  %v12367_v30 = vld [vmem:[%s13575_s30 + $0x450] sm:$0xff] }
 0x12d   : > { %4593 = vmatprep.mubr.f32.mxu1 %v17304_v41  ;;  %v1542_v15 = vadd.f32 %v1534_v27, %v14564_v32  ;;  %v14661_v38 = vmax.f32 %v14588_v25, 0.0  ;;  %v14663_v23 = vmax.f32 %v567_v43, 0.0  ;;  %v568_v16 = vsub.f32 1.0, %v560_v34  ;;  %v1285_v53 = vpop.f32.mrb[27].mxu0  ;;  %v1372_v7 = vpop.f32.mrb[26].mxu1  ;;  %v12365_v34 = vld [vmem:[%s13575_s30 + $0x440] sm:$0xff] }
 0x12e   : > { %v1565_v39 = vadd.f32 %v1557_v35, %v1541_v40  ;;  %v1535_v61 = vmul.f32 %v1283_v57, %v14577_v8  ;;  %12391 = vmatmul.mubr.msk.f32.gmra.mrb[132].mxu0 %vm664_vm0, %v14174_v54  ;;  %v14668_v3 = vmax.f32 %v607_v58, 0.0  ;;  %v569_v32 = vsub.f32 1.0, %v561_v9  ;;  %v1374_v28 = vpop.f32.mrb[27].mxu1  ;;  %v12386_v57 = vld [vmem:[%s13575_s30 + $0x4e8] sm:$0xff] }
 0x12f   : > { %v1566_v12 = vadd.f32 %v1558_v62, %v1542_v15  ;;  %v1536_v25 = vmul.f32 %v1285_v53, %v14605_v17  ;;  %v1559_v60 = vmul.f32 %v1372_v7, %v14607_v45  ;;  %4510 = vmatprep.mubr.f32.mxu0 %v17304_v41  ;;  %v609_v43 = vsub.f32 1.0, %v601_v21  ;;  %v12383_v15 = vld [vmem:[%s13575_s30 + $0x4d0] sm:$0xff] }
 0x130   : > { %17344 = vst [vmem:[#allocation6_spill] sm:$0xff] %v14668_v3  ;;  %12395 = vmatmul.mubr.msk.f32.gmra.mrb[132].mxu1 %vm664_vm0, %v14174_v54  ;;  %1573 = vst [vmem:[%s14678_s10] sm:$0xff] %v1565_v39  ;;  %v1543_v46 = vadd.f32 %v1535_v61, %v14583_v0  ;;  %v1560_v19 = vmul.f32 %v1374_v28, %v14642_v26  ;;  %v14684_v54 = vmax.f32 %v608_v20, 0.0  ;;  %v610_v58 = vsub.f32 1.0, %v602_v47  ;;  %v1289_v27 = vpop.f32.mrb[28].mxu0 }
 0x131   : > { %4599 = vmatprep.mubr.f32.mxu1 %v17304_v41  ;;  %1574 = vst [vmem:[%s14678_s10 + $0x8] sm:$0xff] %v1566_v12  ;;  %v1544_v9 = vadd.f32 %v1536_v25, %v14592_v1  ;;  %v14688_v35 = vmax.f32 %v568_v16, 0.0  ;;  %v1537_v0 = vmul.f32 %v1289_v27, %v14661_v38  ;;  %v1291_v40 = vpop.f32.mrb[29].mxu0  ;;  %v1378_v62 = vpop.f32.mrb[28].mxu1  ;;  %v14694_v20 = vmax.f32 %v569_v32, 0.0  ;;  %v12370_v1 = vld [vmem:[%s13575_s30 + $0x468] sm:$0xff] }
 0x132   : > { %17345 = vst [vmem:[#allocation39_spill] sm:$0xff] %v14684_v54  ;;  %v1567_v21 = vadd.f32 %v1559_v60, %v1543_v46  ;;  %12392 = vmatmul.mubr.msk.f32.gmra.mrb[134].mxu0 %vm664_vm0, %v14204_v48  ;;  %v13083_v47 = vpack.c.bf16 %v12381_v4, %v12365_v34  ;;  %v1538_v39 = vmul.f32 %v1291_v40, %v14663_v23  ;;  %v1380_v53 = vpop.f32.mrb[29].mxu1  ;;  %v14704_v7 = vmax.f32 %v609_v43, 0.0  ;;  %v12372_v32 = vld [vmem:[%s13575_s30 + $0x478] sm:$0xff] }
 0x133   : > { %17346 = vst [vmem:[#allocation35_spill] sm:$0xff] %v14688_v35  ;;  %17347 = vst [vmem:[#allocation34_spill] sm:$0xff] %v14694_v20  ;;  %v1568_v16 = vadd.f32 %v1560_v19, %v1544_v9  ;;  %v1561_v61 = vmul.f32 %v1378_v62, %v14668_v3  ;;  %4670 = vmatprep.mubr.f32.mxu0 %v17304_v41  ;;  %v12388_v12 = vld [vmem:[%s13575_s30 + $0x4f8] sm:$0xff]  ;;  %v1545_v25 = vadd.f32 %v1537_v0, %v14612_v29 }
 0x134   : > { %12396 = vmatmul.mubr.msk.f32.gmra.mrb[134].mxu1 %vm664_vm0, %v14204_v48  ;;  %17348 = vst [vmem:[#allocation7_spill] sm:$0xff] %v14704_v7  ;;  %1575 = vst [vmem:[%s14678_s10 + $0x10] sm:$0xff] %v1567_v21  ;;  %v1562_v60 = vmul.f32 %v1380_v53, %v14684_v54  ;;  %v14712_v28 = vmax.f32 %v610_v58, 0.0  ;;  %v1546_v48 = vadd.f32 %v1538_v39, %v14619_v18  ;;  %v1295_v34 = vpop.f32.mrb[30].mxu0 }
 0x135   : > { %4759 = vmatprep.mubr.f32.mxu1 %v17304_v41  ;;  %1576 = vst [vmem:[%s14678_s10 + $0x18] sm:$0xff] %v1568_v16  ;;  %v13087_v4 = vpack.c.bf16 %v12383_v15, %v12367_v30  ;;  %v13089_v46 = vpack.c.bf16 %v12386_v57, %v12370_v1  ;;  %v1569_v43 = vadd.f32 %v1561_v61, %v1545_v25  ;;  %v1297_v9 = vpop.f32.mrb[31].mxu0  ;;  %v1384_v29 = vpop.f32.mrb[30].mxu1  ;;  %v17351_v61 = vld [vmem:[#allocation9_spill] sm:$0xff]  ;;  %v17353_v25 = vld [vmem:[#allocation11_spill] sm:$0xff] }
 0x136   : > { %17349 = vst [vmem:[#allocation43_spill] sm:$0xff] %v14712_v28  ;;  %v1539_v19 = vmul.f32 %v1295_v34, %v14688_v35  ;;  %12397 = vmatmul.mubr.msk.f32.vlgmr.msra.gmra.mrb[136].mxu0 %vm664_vm0, %v14247_v22  ;;  %v13093_v27 = vpack.c.bf16 %v12388_v12, %v12372_v32  ;;  %v1570_v21 = vadd.f32 %v1562_v60, %v1546_v48  ;;  %v1386_v30 = vpop.f32.mrb[31].mxu1  ;;  %v17352_v32 = vld [vmem:[#allocation10_spill] sm:$0xff] }
 0x137   : > { %v1540_v58 = vmul.f32 %v1297_v9, %v14694_v20  ;;  %v1563_v18 = vmul.f32 %v1384_v29, %v14704_v7  ;;  %13084 = vmatpush1.bf16.msra.mxu0 %v13083_v47  ;;  %1577 = vst [vmem:[%s14678_s10 + $0x20] sm:$0xff] %v1569_v43  ;;  %v1564_v40 = vmul.f32 %v1386_v30, %v14712_v28  ;;  %v17350_v47 = vld [vmem:[#allocation8_spill] sm:$0xff] }
 0x138   : > { %12401 = vmatmul.mubr.msk.f32.vlgmr.msra.gmra.mrb[136].mxu1 %vm664_vm0, %v14247_v22  ;;  %v1547_v0 = vadd.f32 %v1539_v19, %v14644_v37  ;;  %4676 = vmatprep.mubr.f32.mxu0 %v17304_v41  ;;  %1578 = vst [vmem:[%s14678_s10 + $0x28] sm:$0xff] %v1570_v21  ;;  %v1680_v15 = vpop.f32.mrb[32].mxu0  ;;  %v14750_v29 = vld [vmem:[%s17159_s2 + $0x10] sm:$0xff] }
 0x139   : > { %4765 = vmatprep.mubr.f32.mxu1 %v17304_v41  ;;  %v1548_v62 = vadd.f32 %v1540_v58, %v14649_v51  ;;  %13088 = vmatpush1.bf16.msra.mxu1 %v13087_v4  ;;  %v2334_v57 = vmul.f32 %v1680_v15, %v17350_v47  ;;  %v1769_v16 = vpop.f32.mrb[32].mxu1  ;;  %v1682_v39 = vpop.f32.mrb[33].mxu0  ;;  %v17356_v58 = vld [vmem:[#allocation14_spill] sm:$0xff] }
 0x13a   : > { %13090 = vmatprep.subr.bf16.mxu0 %v13089_v46  ;;  %v1571_v1 = vadd.f32 %v1563_v18, %v1547_v0  ;;  %12398 = vmatmul.mubr.msk.f32.gmra.mrb[138].mxu0 %vm664_vm0, %v14302_v55  ;;  %v2350_v53 = vmul.f32 %v1769_v16, %v17351_v61  ;;  %v2335_v12 = vmul.f32 %v1682_v39, %v17352_v32  ;;  %v1771_v51 = vpop.f32.mrb[33].mxu1  ;;  %v17354_v46 = vld [vmem:[#allocation12_spill] sm:$0xff]  ;;  %v17357_v0 = vld [vmem:[#allocation15_spill] sm:$0xff]  ;;  %v12385_v15 = vld [vmem:[%s13575_s30 + $0x4e0] sm:$0xff] }
 0x13b   : > { %13094 = vmatprep.subr.bf16.mxu1 %v13093_v27  ;;  %v1572_v37 = vadd.f32 %v1564_v40, %v1548_v62  ;;  %4682 = vmatprep.mubr.f32.mxu0 %v17304_v41  ;;  %v2351_v60 = vmul.f32 %v1771_v51, %v17353_v25  ;;  %v17355_v27 = vld [vmem:[#allocation13_spill] sm:$0xff]  ;;  %v12369_v62 = vld [vmem:[%s13575_s30 + $0x460] sm:$0xff]  ;;  %v12371_v16 = vld [vmem:[%s13575_s30 + $0x470] sm:$0xff] }
 0x13c   : > { %12402 = vmatmul.mubr.msk.f32.gmra.mrb[138].mxu1 %vm664_vm0, %v14302_v55  ;;  %1579 = vst [vmem:[%s14678_s10 + $0x30] sm:$0xff] %v1571_v1  ;;  %v14742_v48 = vadd.f32 %v2350_v53, %v2334_v57  ;;  %v1686_v34 = vpop.f32.mrb[34].mxu0 }
 0x13d   : > { %4771 = vmatprep.mubr.f32.mxu1 %v17304_v41  ;;  %1580 = vst [vmem:[%s14678_s10 + $0x38] sm:$0xff] %v1572_v37  ;;  %v14744_v4 = vadd.f32 %v2351_v60, %v2335_v12  ;;  %v2336_v43 = vmul.f32 %v1686_v34, %v17354_v46  ;;  %v1775_v19 = vpop.f32.mrb[34].mxu1  ;;  %v1688_v9 = vpop.f32.mrb[35].mxu0  ;;  %v17358_v37 = vld [vmem:[#allocation16_spill] sm:$0xff]  ;;  %v14772_v60 = vld [vmem:[%s17159_s2 + $0x18] sm:$0xff] }
 0x13e   : > { %12399 = vmatmul.mubr.msk.f32.gmra.mrb[140].mxu0 %vm664_vm0, %v14750_v29  ;;  %v2352_v21 = vmul.f32 %v1775_v19, %v17355_v27  ;;  %v2337_v18 = vmul.f32 %v1688_v9, %v17356_v58  ;;  %v1777_v30 = vpop.f32.mrb[35].mxu1  ;;  %v12387_v34 = vld [vmem:[%s13575_s30 + $0x4f0] sm:$0xff]  ;;  %v12446_v19 = vld [vmem:[%s13575_s30 + $0x588] sm:$0xff]  ;;  %v17359_v9 = vld [vmem:[#allocation18_spill] sm:$0xff] }
 0x13f   : > { %4688 = vmatprep.mubr.f32.mxu0 %v17304_v41  ;;  %v2353_v40 = vmul.f32 %v1777_v30, %v17357_v0  ;;  %v12448_v0 = vld [vmem:[%s13575_s30 + $0x598] sm:$0xff]  ;;  %v13095_v25 = vpack.c.bf16 %v12387_v34, %v12371_v16  ;;  %v14800_v16 = vld [vmem:[%s17159_s2] sm:$0xff] }
 0x140   : > { %12403 = vmatmul.mubr.msk.f32.gmra.mrb[140].mxu1 %vm664_vm0, %v14750_v29  ;;  %v14763_v1 = vadd.f32 %v2352_v21, %v2336_v43  ;;  %v1692_v57 = vpop.f32.mrb[36].mxu0  ;;  %v12430_v43 = vld [vmem:[%s13575_s30 + $0x508] sm:$0xff] }
 0x141   : > { %4777 = vmatprep.mubr.f32.mxu1 %v17304_v41  ;;  %v14766_v39 = vadd.f32 %v2353_v40, %v2337_v18  ;;  %v2338_v53 = vmul.f32 %v1692_v57, %v17358_v37  ;;  %v1781_v12 = vpop.f32.mrb[36].mxu1  ;;  %v1694_v51 = vpop.f32.mrb[37].mxu0  ;;  %v17360_v18 = vld [vmem:[#allocation17_spill] sm:$0xff]  ;;  %v13091_v57 = vpack.c.bf16 %v12385_v15, %v12369_v62 }
 0x142   : > { %12400 = vmatmul.mubr.msk.f32.gmra.mrb[142].mxu0 %vm664_vm0, %v14772_v60  ;;  %v2354_v21 = vmul.f32 %v1781_v12, %v17359_v9  ;;  %v2339_v30 = vmul.f32 %v1694_v51, %v17360_v18  ;;  %v1783_v40 = vpop.f32.mrb[37].mxu1  ;;  %v12432_v37 = vld [vmem:[%s13575_s30 + $0x518] sm:$0xff]  ;;  %v13097_v12 = vpack.c.bf16 %v12446_v19, %v12430_v43  ;;  %v17361_v51 = vld [vmem:[#allocation20_spill] sm:$0xff] }
 0x143   : > { %4848 = vmatprep.mubr.f32.mxu0 %v17304_v41  ;;  %v2355_v58 = vmul.f32 %v1783_v40, %v14124_v5  ;;  %v13101_v62 = vpack.c.bf16 %v12448_v0, %v12432_v37  ;;  %v17362_v15 = vld [vmem:[#allocation21_spill] sm:$0xff]  ;;  %v17363_v40 = vld [vmem:[#allocation22_spill] sm:$0xff]  ;;  %v17365_v0 = vld [vmem:[#allocation23_spill] sm:$0xff] }
 0x144   : > { %12404 = vmatmul.mubr.msk.f32.gmra.mrb[142].mxu1 %vm664_vm0, %v14772_v60  ;;  %v14788_v27 = vadd.f32 %v2354_v21, %v2338_v53  ;;  %v1698_v46 = vpop.f32.mrb[38].mxu0 }
 0x145   : > { %4937 = vmatprep.mubr.f32.mxu1 %v17304_v41  ;;  %v14790_v9 = vadd.f32 %v2355_v58, %v2339_v30  ;;  %v2340_v18 = vmul.f32 %v1698_v46, %v17361_v51  ;;  %v1787_v32 = vpop.f32.mrb[38].mxu1  ;;  %v1700_v61 = vpop.f32.mrb[39].mxu0  ;;  %v17364_v46 = vld [vmem:[#allocation24_spill] sm:$0xff] }
 0x146   : > { %12405 = vmatmul.mubr.msk.f32.vlgmr.msra.gmra.mrb[144].mxu0 %vm664_vm0, %v14247_v22  ;;  %v2356_v47 = vmul.f32 %v1787_v32, %v17362_v15  ;;  %v2341_v5 = vmul.f32 %v1700_v61, %v17363_v40  ;;  %v1789_v28 = vpop.f32.mrb[39].mxu1  ;;  %v17377_v15 = vld [vmem:[#allocation38_spill] sm:$0xff] }
 0x147   : > { %13092 = vmatpush1.bf16.msra.mxu0 %v13091_v57  ;;  %v2357_v58 = vmul.f32 %v1789_v28, %v17364_v46  ;;  %4854 = vmatprep.mubr.f32.mxu0 %v17304_v41  ;;  %v17366_v28 = vld [vmem:[#allocation25_spill] sm:$0xff] }
 0x148   : > { %12409 = vmatmul.mubr.msk.f32.vlgmr.msra.gmra.mrb[144].mxu1 %vm664_vm0, %v14800_v16  ;;  %v14807_v22 = vadd.f32 %v2356_v47, %v2340_v18  ;;  %v1858_v32 = vpop.f32.mrb[40].mxu0  ;;  %13098 = vmatprep.subr.bf16.mxu0 %v13097_v12  ;;  %v17367_v47 = vld [vmem:[#allocation26_spill] sm:$0xff] }
 0x149   : > { %4943 = vmatprep.mubr.f32.mxu1 %v17304_v41  ;;  %13096 = vmatpush1.bf16.msra.mxu1 %v13095_v25  ;;  %v14809_v61 = vadd.f32 %v2357_v58, %v2341_v5  ;;  %v2374_v37 = vmul.f32 %v1858_v32, %v17365_v0  ;;  %v1860_v53 = vpop.f32.mrb[41].mxu0  ;;  %v1947_v34 = vpop.f32.mrb[40].mxu1  ;;  %v17368_v25 = vld [vmem:[#allocation27_spill] sm:$0xff] }
 0x14a   : > { %12406 = vmatmul.mubr.msk.f32.gmra.mrb[146].mxu0 %vm664_vm0, %v14302_v55  ;;  %13102 = vmatprep.subr.bf16.mxu1 %v13101_v62  ;;  %v2375_v43 = vmul.f32 %v1860_v53, %v17366_v28  ;;  %v2398_v19 = vmul.f32 %v1947_v34, %v17367_v47  ;;  %v1949_v21 = vpop.f32.mrb[41].mxu1  ;;  %v17369_v62 = vld [vmem:[#allocation28_spill] sm:$0xff]  ;;  %v17371_v34 = vld [vmem:[#allocation30_spill] sm:$0xff] }
 0x14b   : > { %4860 = vmatprep.mubr.f32.mxu0 %v17304_v41  ;;  %v2382_v5 = vadd.f32 %v2374_v37, %v14742_v48  ;;  %v2399_v18 = vmul.f32 %v1949_v21, %v17368_v25  ;;  %v17370_v37 = vld [vmem:[#allocation29_spill] sm:$0xff]  ;;  %v12445_v21 = vld [vmem:[%s13575_s30 + $0x580] sm:$0xff] }
 0x14c   : > { %12410 = vmatmul.mubr.msk.f32.gmra.mrb[146].mxu1 %vm664_vm0, %v14302_v55  ;;  %v2383_v30 = vadd.f32 %v2375_v43, %v14744_v4  ;;  %v1864_v57 = vpop.f32.mrb[42].mxu0 }
 0x14d   : > { %4949 = vmatprep.mubr.f32.mxu1 %v17304_v41  ;;  %v14823_v12 = vadd.f32 %v2398_v19, %v2382_v5  ;;  %v2376_v55 = vmul.f32 %v1864_v57, %v17369_v62  ;;  %v1866_v58 = vpop.f32.mrb[43].mxu0  ;;  %v1953_v32 = vpop.f32.mrb[42].mxu1  ;;  %v12429_v19 = vld [vmem:[%s13575_s30 + $0x500] sm:$0xff]  ;;  %v17372_v57 = vld [vmem:[#allocation31_spill] sm:$0xff] }
 0x14e   : > { %12407 = vmatmul.mubr.msk.f32.gmra.mrb[148].mxu0 %vm664_vm0, %v14750_v29  ;;  %v14828_v48 = vadd.f32 %v2399_v18, %v2383_v30  ;;  %v2377_v53 = vmul.f32 %v1866_v58, %v17370_v37  ;;  %v2400_v4 = vmul.f32 %v1953_v32, %v17371_v34  ;;  %v1955_v43 = vpop.f32.mrb[43].mxu1  ;;  %v12431_v37 = vld [vmem:[%s13575_s30 + $0x510] sm:$0xff] }
 0x14f   : > { %4866 = vmatprep.mubr.f32.mxu0 %v17304_v41  ;;  %v2384_v5 = vadd.f32 %v2376_v55, %v14763_v1  ;;  %v2401_v18 = vmul.f32 %v1955_v43, %v17372_v57  ;;  %v17373_v34 = vld [vmem:[#allocation32_spill] sm:$0xff]  ;;  %v13099_v1 = vpack.c.bf16 %v12445_v21, %v12429_v19  ;;  %v12434_v43 = vld [vmem:[%s13575_s30 + $0x528] sm:$0xff]  ;;  %v17376_v19 = vld [vmem:[#allocation37_spill] sm:$0xff] }
 0x150   : > { %12411 = vmatmul.mubr.msk.f32.gmra.mrb[148].mxu1 %vm664_vm0, %v14750_v29  ;;  %v2385_v30 = vadd.f32 %v2377_v53, %v14766_v39  ;;  %v1870_v58 = vpop.f32.mrb[44].mxu0  ;;  %v12447_v55 = vld [vmem:[%s13575_s30 + $0x590] sm:$0xff]  ;;  %v12450_v57 = vld [vmem:[%s13575_s30 + $0x5a8] sm:$0xff]  ;;  %v17374_v39 = vld [vmem:[#allocation33_spill] sm:$0xff] }
 0x151   : > { %4955 = vmatprep.mubr.f32.mxu1 %v17304_v41  ;;  %v14842_v32 = vadd.f32 %v2400_v4, %v2384_v5  ;;  %v2378_v62 = vmul.f32 %v1870_v58, %v17373_v34  ;;  %v1872_v25 = vpop.f32.mrb[45].mxu0  ;;  %v1959_v47 = vpop.f32.mrb[44].mxu1  ;;  %v17375_v4 = vld [vmem:[#allocation36_spill] sm:$0xff]  ;;  %v12436_v58 = vld [vmem:[%s13575_s30 + $0x538] sm:$0xff] }
 0x152   : > { %12408 = vmatmul.mubr.msk.f32.gmra.mrb[150].mxu0 %vm664_vm0, %v14772_v60  ;;  %v14850_v28 = vadd.f32 %v2401_v18, %v2385_v30  ;;  %v2379_v53 = vmul.f32 %v1872_v25, %v17374_v39  ;;  %v2402_v5 = vmul.f32 %v1959_v47, %v17375_v4  ;;  %v1961_v0 = vpop.f32.mrb[45].mxu1  ;;  %v12452_v34 = vld [vmem:[%s13575_s30 + $0x5b8] sm:$0xff]  ;;  %v13103_v25 = vpack.c.bf16 %v12447_v55, %v12431_v37 }
 0x153   : > { %5026 = vmatprep.mubr.f32.mxu0 %v17304_v41  ;;  %v2386_v46 = vadd.f32 %v2378_v62, %v14788_v27  ;;  %v2403_v21 = vmul.f32 %v1961_v0, %v17376_v19  ;;  %v13105_v39 = vpack.c.bf16 %v12450_v57, %v12434_v43  ;;  %v13109_v7 = vpack.c.bf16 %v12452_v34, %v12436_v58 }
 0x154   : > { %12412 = vmatmul.mubr.msk.f32.gmra.mrb[150].mxu1 %vm664_vm0, %v14772_v60  ;;  %v2387_v18 = vadd.f32 %v2379_v53, %v14790_v9  ;;  %v1876_v30 = vpop.f32.mrb[46].mxu0 }
 0x155   : > { %5115 = vmatprep.mubr.f32.mxu1 %v17304_v41  ;;  %v14863_v40 = vadd.f32 %v2402_v5, %v2386_v46  ;;  %v2380_v47 = vmul.f32 %v1876_v30, %v17377_v15  ;;  %v1878_v4 = vpop.f32.mrb[47].mxu0  ;;  %v1965_v51 = vpop.f32.mrb[46].mxu1 }
 0x156   : > { %12413 = vmatmul.mubr.msk.f32.vlgmr.msra.gmra.mrb[152].mxu0 %vm664_vm0, %v14800_v16  ;;  %v14868_v27 = vadd.f32 %v2403_v21, %v2387_v18  ;;  %v2381_v0 = vmul.f32 %v1878_v4, %v17332_v63  ;;  %v2404_v9 = vmul.f32 %v1965_v51, %v17333_v42  ;;  %v1967_v46 = vpop.f32.mrb[47].mxu1 }
 0x157   : > { %13100 = vmatpush1.bf16.msra.mxu0 %v13099_v1  ;;  %v2388_v62 = vadd.f32 %v2380_v47, %v14807_v22  ;;  %v2405_v37 = vmul.f32 %v1967_v46, %v14294_v44  ;;  %5032 = vmatprep.mubr.f32.mxu0 %v17304_v41  ;;  %v14885_v22 = vld [vmem:[%s17159_s2 + $0x8] sm:$0xff] }
 0x158   : > { %12417 = vmatmul.mubr.msk.f32.vlgmr.msra.gmra.mrb[152].mxu1 %vm664_vm0, %v14800_v16  ;;  %v2389_v34 = vadd.f32 %v2381_v0, %v14809_v61  ;;  %v2036_v57 = vpop.f32.mrb[48].mxu0  ;;  %13106 = vmatprep.subr.bf16.mxu0 %v13105_v39  ;;  %v17378_v39 = vld [vmem:[#allocation44_spill] sm:$0xff] }
 0x159   : > { %5121 = vmatprep.mubr.f32.mxu1 %v17304_v41  ;;  %13104 = vmatpush1.bf16.msra.mxu1 %v13103_v25  ;;  %v14879_v55 = vadd.f32 %v2404_v9, %v2388_v62  ;;  %v2422_v43 = vmul.f32 %v2036_v57, %v14306_v56  ;;  %v2038_v51 = vpop.f32.mrb[49].mxu0  ;;  %v2125_v1 = vpop.f32.mrb[48].mxu1  ;;  %v12433_v62 = vld [vmem:[%s13575_s30 + $0x520] sm:$0xff]  ;;  %v17379_v57 = vld [vmem:[#allocation48_spill] sm:$0xff] }
 0x15a   : > { %12414 = vmatmul.mubr.msk.f32.gmra.mrb[154].mxu0 %vm664_vm0, %v14885_v22  ;;  %13110 = vmatprep.subr.bf16.mxu1 %v13109_v7  ;;  %v14889_v53 = vadd.f32 %v2405_v37, %v2389_v34  ;;  %v2423_v61 = vmul.f32 %v2038_v51, %v17340_v14  ;;  %v2446_v4 = vmul.f32 %v2125_v1, %v17378_v39  ;;  %v2127_v5 = vpop.f32.mrb[49].mxu1  ;;  %v12449_v37 = vld [vmem:[%s13575_s30 + $0x5a0] sm:$0xff] }
 0x15b   : > { %5038 = vmatprep.mubr.f32.mxu0 %v17304_v41  ;;  %v2430_v58 = vadd.f32 %v2422_v43, %v14823_v12  ;;  %v2447_v21 = vmul.f32 %v2127_v5, %v14342_v33  ;;  %v17380_v5 = vld [vmem:[#allocation49_spill] sm:$0xff] }
 0x15c   : > { %12418 = vmatmul.mubr.msk.f32.gmra.mrb[154].mxu1 %vm664_vm0, %v14885_v22  ;;  %v2431_v7 = vadd.f32 %v2423_v61, %v14828_v48  ;;  %v2042_v18 = vpop.f32.mrb[50].mxu0  ;;  %v12435_v61 = vld [vmem:[%s13575_s30 + $0x530] sm:$0xff] }
 0x15d   : > { %5127 = vmatprep.mubr.f32.mxu1 %v17304_v41  ;;  %v14900_v30 = vadd.f32 %v2446_v4, %v2430_v58  ;;  %v2424_v25 = vmul.f32 %v2042_v18, %v14356_v52  ;;  %v2044_v47 = vpop.f32.mrb[51].mxu0  ;;  %v2131_v0 = vpop.f32.mrb[50].mxu1  ;;  %v12451_v18 = vld [vmem:[%s13575_s30 + $0x5b0] sm:$0xff] }
 0x15e   : > { %12415 = vmatmul.mubr.msk.f32.gmra.mrb[156].mxu0 %vm664_vm0, %v14750_v29  ;;  %v14905_v12 = vadd.f32 %v2447_v21, %v2431_v7  ;;  %v2425_v9 = vmul.f32 %v2044_v47, %v14360_v10  ;;  %v2448_v48 = vmul.f32 %v2131_v0, %v14377_v6  ;;  %v2133_v46 = vpop.f32.mrb[51].mxu1  ;;  %v12454_v47 = vld [vmem:[%s13575_s30 + $0x5c8] sm:$0xff] }
 0x15f   : > { %5044 = vmatprep.mubr.f32.mxu0 %v17304_v41  ;;  %v2432_v34 = vadd.f32 %v2424_v25, %v14842_v32  ;;  %v2449_v43 = vmul.f32 %v2133_v46, %v17379_v57  ;;  %v13107_v32 = vpack.c.bf16 %v12449_v37, %v12433_v62  ;;  %v12438_v25 = vld [vmem:[%s13575_s30 + $0x548] sm:$0xff] }
 0x160   : > { %12419 = vmatmul.mubr.msk.f32.gmra.mrb[156].mxu1 %vm664_vm0, %v14750_v29  ;;  %v2433_v51 = vadd.f32 %v2425_v9, %v14850_v28  ;;  %v2048_v1 = vpop.f32.mrb[52].mxu0  ;;  %v17381_v28 = vld [vmem:[#allocation50_spill] sm:$0xff] }
 0x161   : > { %5133 = vmatprep.mubr.f32.mxu1 %v17304_v41  ;;  %v14919_v4 = vadd.f32 %v2448_v48, %v2432_v34  ;;  %v2426_v58 = vmul.f32 %v2048_v1, %v17380_v5  ;;  %v2050_v21 = vpop.f32.mrb[53].mxu0  ;;  %v2137_v7 = vpop.f32.mrb[52].mxu1  ;;  %v17382_v48 = vld [vmem:[#allocation51_spill] sm:$0xff]  ;;  %v12440_v1 = vld [vmem:[%s13575_s30 + $0x558] sm:$0xff] }
 0x162   : > { %12416 = vmatmul.mubr.msk.f32.gmra.mrb[158].mxu0 %vm664_vm0, %v14772_v60  ;;  %v14927_v0 = vadd.f32 %v2449_v43, %v2433_v51  ;;  %v2427_v9 = vmul.f32 %v2050_v21, %v17381_v28  ;;  %v2450_v46 = vmul.f32 %v2137_v7, %v17382_v48  ;;  %v2139_v34 = vpop.f32.mrb[53].mxu1  ;;  %v12456_v5 = vld [vmem:[%s13575_s30 + $0x5d8] sm:$0xff]  ;;  %v13111_v51 = vpack.c.bf16 %v12451_v18, %v12435_v61 }
 0x163   : > { %5430 = vmatprep.mubr.f32.mxu0 %v17304_v41  ;;  %v2434_v57 = vadd.f32 %v2426_v58, %v14863_v40  ;;  %v2451_v62 = vmul.f32 %v2139_v34, %v14427_v49  ;;  %v13113_v21 = vpack.c.bf16 %v12454_v47, %v12438_v25  ;;  %v13117_v10 = vpack.c.bf16 %v12456_v5, %v12440_v1 }
 0x164   : > { %12420 = vmatmul.mubr.msk.f32.gmra.mrb[158].mxu1 %vm664_vm0, %v14772_v60  ;;  %v2435_v37 = vadd.f32 %v2427_v9, %v14868_v27  ;;  %v2054_v43 = vpop.f32.mrb[54].mxu0 }
 0x165   : > { %5519 = vmatprep.mubr.f32.mxu1 %v17304_v41  ;;  %v14940_v28 = vadd.f32 %v2450_v46, %v2434_v57  ;;  %v2428_v7 = vmul.f32 %v2054_v43, %v14437_v2  ;;  %v2056_v48 = vpop.f32.mrb[55].mxu0  ;;  %v2143_v6 = vpop.f32.mrb[54].mxu1 }
 0x166   : > { %12461 = vmatmul.mubr.msk.f32.vlgmr.msra.gmra.mrb[160].mxu0 %vm664_vm0, %v14800_v16  ;;  %v14945_v40 = vadd.f32 %v2451_v62, %v2435_v37  ;;  %v2429_v58 = vmul.f32 %v2056_v48, %v14464_v50  ;;  %v2452_v27 = vmul.f32 %v2143_v6, %v14492_v11  ;;  %v2145_v57 = vpop.f32.mrb[55].mxu1 }
 0x167   : > { %13108 = vmatpush1.bf16.msra.mxu0 %v13107_v32  ;;  %v2436_v61 = vadd.f32 %v2428_v7, %v14879_v55  ;;  %v2453_v18 = vmul.f32 %v2145_v57, %v14497_v13  ;;  %5436 = vmatprep.mubr.f32.mxu0 %v17304_v41  ;;  %v12453_v57 = vld [vmem:[%s13575_s30 + $0x5c0] sm:$0xff] }
 0x168   : > { %12465 = vmatmul.mubr.msk.f32.vlgmr.msra.gmra.mrb[160].mxu1 %vm664_vm0, %v14800_v16  ;;  %v2437_v5 = vadd.f32 %v2429_v58, %v14889_v53  ;;  %v2214_v25 = vpop.f32.mrb[56].mxu0  ;;  %13114 = vmatprep.subr.bf16.mxu0 %v13113_v21 }
 0x169   : > { %5525 = vmatprep.mubr.f32.mxu1 %v17304_v41  ;;  %13112 = vmatpush1.bf16.msra.mxu1 %v13111_v51  ;;  %v14956_v47 = vadd.f32 %v2452_v27, %v2436_v61  ;;  %v2470_v9 = vmul.f32 %v2214_v25, %v14524_v31  ;;  %v2216_v6 = vpop.f32.mrb[57].mxu0  ;;  %v2303_v55 = vpop.f32.mrb[56].mxu1  ;;  %v12437_v27 = vld [vmem:[%s13575_s30 + $0x540] sm:$0xff] }
 0x16a   : > { %12462 = vmatmul.mubr.msk.f32.gmra.mrb[162].mxu0 %vm664_vm0, %v14885_v22  ;;  %13118 = vmatprep.subr.bf16.mxu1 %v13117_v10  ;;  %v14961_v32 = vadd.f32 %v2453_v18, %v2437_v5  ;;  %v2471_v48 = vmul.f32 %v2216_v6, %v14540_v36  ;;  %v2494_v53 = vmul.f32 %v2303_v55, %v14554_v24  ;;  %v2305_v46 = vpop.f32.mrb[57].mxu1 }
 0x16b   : > { %5442 = vmatprep.mubr.f32.mxu0 %v17304_v41  ;;  %v2478_v34 = vadd.f32 %v2470_v9, %v14900_v30  ;;  %v2495_v1 = vmul.f32 %v2305_v46, %v14571_v59  ;;  %v12439_v9 = vld [vmem:[%s13575_s30 + $0x550] sm:$0xff] }
 0x16c   : > { %12466 = vmatmul.mubr.msk.f32.gmra.mrb[162].mxu1 %vm664_vm0, %v14885_v22  ;;  %v2479_v10 = vadd.f32 %v2471_v48, %v14905_v12  ;;  %v2220_v62 = vpop.f32.mrb[58].mxu0  ;;  %v12455_v46 = vld [vmem:[%s13575_s30 + $0x5d0] sm:$0xff] }
 0x16d   : > { %5531 = vmatprep.mubr.f32.mxu1 %v17304_v41  ;;  %v2502_v37 = vadd.f32 %v2494_v53, %v2478_v34  ;;  %v2472_v43 = vmul.f32 %v2220_v62, %v14577_v8  ;;  %v2222_v51 = vpop.f32.mrb[59].mxu0  ;;  %v2309_v21 = vpop.f32.mrb[58].mxu1  ;;  %v13115_v53 = vpack.c.bf16 %v12453_v57, %v12437_v27  ;;  %v12442_v34 = vld [vmem:[%s13575_s30 + $0x568] sm:$0xff] }
 0x16e   : > { %12463 = vmatmul.mubr.msk.f32.gmra.mrb[164].mxu0 %vm664_vm0, %v14750_v29  ;;  %v2503_v30 = vadd.f32 %v2495_v1, %v2479_v10  ;;  %v2473_v7 = vmul.f32 %v2222_v51, %v14605_v17  ;;  %v2496_v58 = vmul.f32 %v2309_v21, %v14607_v45  ;;  %v2311_v12 = vpop.f32.mrb[59].mxu1  ;;  %v12458_v1 = vld [vmem:[%s13575_s30 + $0x5e8] sm:$0xff]  ;;  %v12460_v51 = vld [vmem:[%s13575_s30 + $0x5f8] sm:$0xff] }
 0x16f   : > { %5448 = vmatprep.mubr.f32.mxu0 %v17304_v41  ;;  %12205 = vst [vmem:[%s14678_s10 + $0x40] sm:$0xff] %v2502_v37  ;;  %v2480_v61 = vadd.f32 %v2472_v43, %v14919_v4  ;;  %v2497_v18 = vmul.f32 %v2311_v12, %v14642_v26  ;;  %v12444_v43 = vld [vmem:[%s13575_s30 + $0x578] sm:$0xff]  ;;  %v13119_v12 = vpack.c.bf16 %v12455_v46, %v12439_v9 }
 0x170   : > { %12467 = vmatmul.mubr.msk.f32.gmra.mrb[164].mxu1 %vm664_vm0, %v14750_v29  ;;  %12206 = vst [vmem:[%s14678_s10 + $0x48] sm:$0xff] %v2503_v30  ;;  %v2481_v5 = vadd.f32 %v2473_v7, %v14927_v0  ;;  %v2226_v25 = vpop.f32.mrb[60].mxu0  ;;  %v13121_v27 = vpack.c.bf16 %v12458_v1, %v12442_v34 }
 0x171   : > { %5537 = vmatprep.mubr.f32.mxu1 %v17304_v41  ;;  %v2504_v6 = vadd.f32 %v2496_v58, %v2480_v61  ;;  %v2474_v55 = vmul.f32 %v2226_v25, %v14661_v38  ;;  %v2228_v48 = vpop.f32.mrb[61].mxu0  ;;  %v2315_v4 = vpop.f32.mrb[60].mxu1 }
 0x172   : > { %12464 = vmatmul.mubr.msk.f32.gmra.mrb[166].mxu0 %vm664_vm0, %v14772_v60  ;;  %v2505_v10 = vadd.f32 %v2497_v18, %v2481_v5  ;;  %v2475_v0 = vmul.f32 %v2228_v48, %v14663_v23  ;;  %v2498_v62 = vmul.f32 %v2315_v4, %v14668_v3  ;;  %v2317_v37 = vpop.f32.mrb[61].mxu1  ;;  %v13125_v5 = vpack.c.bf16 %v12460_v51, %v12444_v43  ;;  %v17384_v4 = vld [vmem:[#allocation43_spill] sm:$0xff]  ;;  %v17386_v43 = vld [vmem:[#allocation9_spill] sm:$0xff] }
 0x173   : > { %5608 = vmatprep.mubr.f32.mxu0 %v17304_v41  ;;  %12207 = vst [vmem:[%s14678_s10 + $0x50] sm:$0xff] %v2504_v6  ;;  %v2482_v21 = vadd.f32 %v2474_v55, %v14940_v28  ;;  %v2499_v30 = vmul.f32 %v2317_v37, %v14684_v54 }
 0x174   : > { %12468 = vmatmul.mubr.msk.f32.gmra.mrb[166].mxu1 %vm664_vm0, %v14772_v60  ;;  %12208 = vst [vmem:[%s14678_s10 + $0x58] sm:$0xff] %v2505_v10  ;;  %v2483_v7 = vadd.f32 %v2475_v0, %v14945_v40  ;;  %v2232_v58 = vpop.f32.mrb[62].mxu0  ;;  %v17383_v40 = vld [vmem:[#allocation7_spill] sm:$0xff] }
 0x175   : > { %5697 = vmatprep.mubr.f32.mxu1 %v17304_v41  ;;  %v2506_v57 = vadd.f32 %v2498_v62, %v2482_v21  ;;  %v2476_v61 = vmul.f32 %v2232_v58, %v14688_v35  ;;  %v2234_v18 = vpop.f32.mrb[63].mxu0  ;;  %v2321_v28 = vpop.f32.mrb[62].mxu1  ;;  %v17387_v21 = vld [vmem:[#allocation10_spill] sm:$0xff] }
 0x176   : > { %12469 = vmatmul.mubr.msk.f32.vlgmr.msra.gmra.mrb[168].mxu0 %vm664_vm0, %v14800_v16  ;;  %v2507_v25 = vadd.f32 %v2499_v30, %v2483_v7  ;;  %v2477_v6 = vmul.f32 %v2234_v18, %v14694_v20  ;;  %v2500_v55 = vmul.f32 %v2321_v28, %v17383_v40  ;;  %v2323_v9 = vpop.f32.mrb[63].mxu1  ;;  %v17388_v7 = vld [vmem:[#allocation11_spill] sm:$0xff] }
 0x177   : > { %13116 = vmatpush1.bf16.msra.mxu0 %v13115_v53  ;;  %12209 = vst [vmem:[%s14678_s10 + $0x60] sm:$0xff] %v2506_v57  ;;  %v2484_v48 = vadd.f32 %v2476_v61, %v14956_v47  ;;  %v2501_v46 = vmul.f32 %v2323_v9, %v17384_v4  ;;  %5614 = vmatprep.mubr.f32.mxu0 %v17304_v41  ;;  %v17385_v53 = vld [vmem:[#allocation8_spill] sm:$0xff] }
 0x178   : > { %12473 = vmatmul.mubr.msk.f32.vlgmr.msra.gmra.mrb[168].mxu1 %vm664_vm0, %v14800_v16  ;;  %12210 = vst [vmem:[%s14678_s10 + $0x68] sm:$0xff] %v2507_v25  ;;  %v2485_v34 = vadd.f32 %v2477_v6, %v14961_v32  ;;  %v2618_v1 = vpop.f32.mrb[64].mxu0  ;;  %13122 = vmatprep.subr.bf16.mxu0 %v13121_v27  ;;  %v17389_v61 = vld [vmem:[#allocation12_spill] sm:$0xff]  ;;  %v17390_v25 = vld [vmem:[#allocation13_spill] sm:$0xff] }
 0x179   : > { %5703 = vmatprep.mubr.f32.mxu1 %v17304_v41  ;;  %13120 = vmatpush1.bf16.msra.mxu1 %v13119_v12  ;;  %v2508_v10 = vadd.f32 %v2500_v55, %v2484_v48  ;;  %v3272_v0 = vmul.f32 %v2618_v1, %v17385_v53  ;;  %v2707_v62 = vpop.f32.mrb[64].mxu1  ;;  %v2620_v37 = vpop.f32.mrb[65].mxu0  ;;  %v17391_v55 = vld [vmem:[#allocation14_spill] sm:$0xff] }
 0x17a   : > { %12470 = vmatmul.mubr.msk.f32.gmra.mrb[170].mxu0 %vm664_vm0, %v14885_v22  ;;  %13126 = vmatprep.subr.bf16.mxu1 %v13125_v5  ;;  %v2509_v47 = vadd.f32 %v2501_v46, %v2485_v34  ;;  %v3288_v51 = vmul.f32 %v2707_v62, %v17386_v43  ;;  %v3273_v30 = vmul.f32 %v2620_v37, %v17387_v21  ;;  %v2709_v32 = vpop.f32.mrb[65].mxu1  ;;  %v17392_v46 = vld [vmem:[#allocation15_spill] sm:$0xff]  ;;  %v12441_v1 = vld [vmem:[%s13575_s30 + $0x560] sm:$0xff]  ;;  %v12443_v37 = vld [vmem:[%s13575_s30 + $0x570] sm:$0xff] }
 0x17b   : > { %5620 = vmatprep.mubr.f32.mxu0 %v17304_v41  ;;  %12211 = vst [vmem:[%s14678_s10 + $0x70] sm:$0xff] %v2508_v10  ;;  %v3289_v58 = vmul.f32 %v2709_v32, %v17388_v7  ;;  %v12457_v10 = vld [vmem:[%s13575_s30 + $0x5e0] sm:$0xff] }
 0x17c   : > { %12474 = vmatmul.mubr.msk.f32.gmra.mrb[170].mxu1 %vm664_vm0, %v14885_v22  ;;  %12212 = vst [vmem:[%s14678_s10 + $0x78] sm:$0xff] %v2509_v47  ;;  %v15034_v12 = vadd.f32 %v3288_v51, %v3272_v0  ;;  %v2624_v27 = vpop.f32.mrb[66].mxu0  ;;  %v17393_v51 = vld [vmem:[#allocation16_spill] sm:$0xff] }
 0x17d   : > { %5709 = vmatprep.mubr.f32.mxu1 %v17304_v41  ;;  %v15036_v57 = vadd.f32 %v3289_v58, %v3273_v30  ;;  %v3274_v18 = vmul.f32 %v2624_v27, %v17389_v61  ;;  %v2713_v28 = vpop.f32.mrb[66].mxu1  ;;  %v2626_v5 = vpop.f32.mrb[67].mxu0  ;;  %v12459_v27 = vld [vmem:[%s13575_s30 + $0x5f0] sm:$0xff] }
 0x17e   : > { %12471 = vmatmul.mubr.msk.f32.gmra.mrb[172].mxu0 %vm664_vm0, %v14750_v29  ;;  %v3290_v6 = vmul.f32 %v2713_v28, %v17390_v25  ;;  %v3275_v9 = vmul.f32 %v2626_v5, %v17391_v55  ;;  %v2715_v48 = vpop.f32.mrb[67].mxu1  ;;  %v12502_v28 = vld [vmem:[%s13575_s30 + $0x608] sm:$0xff]  ;;  %v13127_v21 = vpack.c.bf16 %v12459_v27, %v12443_v37 }
 0x17f   : > { %5626 = vmatprep.mubr.f32.mxu0 %v17304_v41  ;;  %v3291_v34 = vmul.f32 %v2715_v48, %v17392_v46  ;;  %v12518_v5 = vld [vmem:[%s13575_s30 + $0x688] sm:$0xff]  ;;  %v17394_v48 = vld [vmem:[#allocation18_spill] sm:$0xff] }
 0x180   : > { %12475 = vmatmul.mubr.msk.f32.gmra.mrb[172].mxu1 %vm664_vm0, %v14750_v29  ;;  %v15050_v0 = vadd.f32 %v3290_v6, %v3274_v18  ;;  %v2630_v62 = vpop.f32.mrb[68].mxu0  ;;  %v17395_v18 = vld [vmem:[#allocation17_spill] sm:$0xff] }
 0x181   : > { %5715 = vmatprep.mubr.f32.mxu1 %v17304_v41  ;;  %v15053_v47 = vadd.f32 %v3291_v34, %v3275_v9  ;;  %v3276_v30 = vmul.f32 %v2630_v62, %v17393_v51  ;;  %v2719_v32 = vpop.f32.mrb[68].mxu1  ;;  %v2632_v58 = vpop.f32.mrb[69].mxu0  ;;  %v13123_v9 = vpack.c.bf16 %v12457_v10, %v12441_v1  ;;  %v12504_v34 = vld [vmem:[%s13575_s30 + $0x618] sm:$0xff]  ;;  %v17396_v51 = vld [vmem:[#allocation19_spill] sm:$0xff] }
 0x182   : > { %12472 = vmatmul.mubr.msk.f32.gmra.mrb[174].mxu0 %vm664_vm0, %v14772_v60  ;;  %v3292_v46 = vmul.f32 %v2719_v32, %v17394_v48  ;;  %v3277_v6 = vmul.f32 %v2632_v58, %v17395_v18  ;;  %v2721_v55 = vpop.f32.mrb[69].mxu1  ;;  %v12520_v62 = vld [vmem:[%s13575_s30 + $0x698] sm:$0xff]  ;;  %v13129_v32 = vpack.c.bf16 %v12518_v5, %v12502_v28  ;;  %v17397_v58 = vld [vmem:[#allocation20_spill] sm:$0xff] }
 0x183   : > { %5786 = vmatprep.mubr.f32.mxu0 %v17304_v41  ;;  %v3293_v25 = vmul.f32 %v2721_v55, %v17396_v51  ;;  %v13133_v1 = vpack.c.bf16 %v12520_v62, %v12504_v34  ;;  %v17398_v10 = vld [vmem:[#allocation21_spill] sm:$0xff]  ;;  %v17399_v55 = vld [vmem:[#allocation22_spill] sm:$0xff] }
 0x184   : > { %12476 = vmatmul.mubr.msk.f32.gmra.mrb[174].mxu1 %vm664_vm0, %v14772_v60  ;;  %v15070_v61 = vadd.f32 %v3292_v46, %v3276_v30  ;;  %v2636_v7 = vpop.f32.mrb[70].mxu0  ;;  %v17400_v46 = vld [vmem:[#allocation24_spill] sm:$0xff] }
 0x185   : > { %5875 = vmatprep.mubr.f32.mxu1 %v17304_v41  ;;  %v15072_v48 = vadd.f32 %v3293_v25, %v3277_v6  ;;  %v3278_v18 = vmul.f32 %v2636_v7, %v17397_v58  ;;  %v2725_v43 = vpop.f32.mrb[70].mxu1  ;;  %v2638_v53 = vpop.f32.mrb[71].mxu0 }
 0x186   : > { %12477 = vmatmul.mubr.msk.f32.vlgmr.msra.gmra.mrb[176].mxu0 %vm664_vm0, %v14800_v16  ;;  %v3294_v4 = vmul.f32 %v2725_v43, %v17398_v10  ;;  %v3279_v51 = vmul.f32 %v2638_v53, %v17399_v55  ;;  %v2727_v40 = vpop.f32.mrb[71].mxu1  ;;  %v17401_v43 = vld [vmem:[#allocation23_spill] sm:$0xff] }
 0x187   : > { %13124 = vmatpush1.bf16.msra.mxu0 %v13123_v9  ;;  %v3295_v25 = vmul.f32 %v2727_v40, %v17400_v46  ;;  %5792 = vmatprep.mubr.f32.mxu0 %v17304_v41  ;;  %v17402_v40 = vld [vmem:[#allocation25_spill] sm:$0xff] }
 0x188   : > { %12481 = vmatmul.mubr.msk.f32.vlgmr.msra.gmra.mrb[176].mxu1 %vm664_vm0, %v14800_v16  ;;  %v15084_v7 = vadd.f32 %v3294_v4, %v3278_v18  ;;  %v2796_v37 = vpop.f32.mrb[72].mxu0  ;;  %13130 = vmatprep.subr.bf16.mxu0 %v13129_v32  ;;  %v17403_v4 = vld [vmem:[#allocation26_spill] sm:$0xff] }
 0x189   : > { %5881 = vmatprep.mubr.f32.mxu1 %v17304_v41  ;;  %13128 = vmatpush1.bf16.msra.mxu1 %v13127_v21  ;;  %v15086_v30 = vadd.f32 %v3295_v25, %v3279_v51  ;;  %v3312_v53 = vmul.f32 %v2796_v37, %v17401_v43  ;;  %v2798_v27 = vpop.f32.mrb[73].mxu0  ;;  %v2885_v28 = vpop.f32.mrb[72].mxu1  ;;  %v17404_v51 = vld [vmem:[#allocation27_spill] sm:$0xff] }
 0x18a   : > { %12478 = vmatmul.mubr.msk.f32.gmra.mrb[178].mxu0 %vm664_vm0, %v14885_v22  ;;  %13134 = vmatprep.subr.bf16.mxu1 %v13133_v1  ;;  %v3313_v5 = vmul.f32 %v2798_v27, %v17402_v40  ;;  %v3336_v18 = vmul.f32 %v2885_v28, %v17403_v4  ;;  %v2887_v6 = vpop.f32.mrb[73].mxu1  ;;  %v17405_v1 = vld [vmem:[#allocation28_spill] sm:$0xff] }
 0x18b   : > { %5798 = vmatprep.mubr.f32.mxu0 %v17304_v41  ;;  %v3320_v21 = vadd.f32 %v3312_v53, %v15034_v12  ;;  %v3337_v9 = vmul.f32 %v2887_v6, %v17404_v51  ;;  %v17406_v53 = vld [vmem:[#allocation29_spill] sm:$0xff]  ;;  %v17407_v6 = vld [vmem:[#allocation30_spill] sm:$0xff] }
 0x18c   : > { %12482 = vmatmul.mubr.msk.f32.gmra.mrb[178].mxu1 %vm664_vm0, %v14885_v22  ;;  %v3321_v34 = vadd.f32 %v3313_v5, %v15036_v57  ;;  %v2802_v62 = vpop.f32.mrb[74].mxu0 }
 0x18d   : > { %5887 = vmatprep.mubr.f32.mxu1 %v17304_v41  ;;  %v15100_v32 = vadd.f32 %v3336_v18, %v3320_v21  ;;  %v3314_v25 = vmul.f32 %v2802_v62, %v17405_v1  ;;  %v2804_v37 = vpop.f32.mrb[75].mxu0  ;;  %v2891_v27 = vpop.f32.mrb[74].mxu1  ;;  %v12501_v18 = vld [vmem:[%s13575_s30 + $0x600] sm:$0xff]  ;;  %v17408_v1 = vld [vmem:[#allocation31_spill] sm:$0xff] }
 0x18e   : > { %12479 = vmatmul.mubr.msk.f32.gmra.mrb[180].mxu0 %vm664_vm0, %v14750_v29  ;;  %v15105_v12 = vadd.f32 %v3337_v9, %v3321_v34  ;;  %v3315_v28 = vmul.f32 %v2804_v37, %v17406_v53  ;;  %v3338_v57 = vmul.f32 %v2891_v27, %v17407_v6  ;;  %v2893_v5 = vpop.f32.mrb[75].mxu1  ;;  %v12517_v21 = vld [vmem:[%s13575_s30 + $0x680] sm:$0xff]  ;;  %v12503_v53 = vld [vmem:[%s13575_s30 + $0x610] sm:$0xff] }
 0x18f   : > { %5804 = vmatprep.mubr.f32.mxu0 %v17304_v41  ;;  %v3322_v62 = vadd.f32 %v3314_v25, %v15050_v0  ;;  %v3339_v9 = vmul.f32 %v2893_v5, %v17408_v1  ;;  %v17409_v6 = vld [vmem:[#allocation32_spill] sm:$0xff]  ;;  %v13131_v0 = vpack.c.bf16 %v12517_v21, %v12501_v18  ;;  %v12506_v5 = vld [vmem:[%s13575_s30 + $0x628] sm:$0xff] }
 0x190   : > { %12483 = vmatmul.mubr.msk.f32.gmra.mrb[180].mxu1 %vm664_vm0, %v14750_v29  ;;  %v3323_v34 = vadd.f32 %v3315_v28, %v15053_v47  ;;  %v2808_v37 = vpop.f32.mrb[76].mxu0  ;;  %v12519_v25 = vld [vmem:[%s13575_s30 + $0x690] sm:$0xff]  ;;  %v12522_v1 = vld [vmem:[%s13575_s30 + $0x6a8] sm:$0xff]  ;;  %v17410_v47 = vld [vmem:[#allocation33_spill] sm:$0xff] }
 0x191   : > { %5893 = vmatprep.mubr.f32.mxu1 %v17304_v41  ;;  %v15119_v27 = vadd.f32 %v3338_v57, %v3322_v62  ;;  %v3316_v51 = vmul.f32 %v2808_v37, %v17409_v6  ;;  %v2810_v4 = vpop.f32.mrb[77].mxu0  ;;  %v2897_v40 = vpop.f32.mrb[76].mxu1  ;;  %v17411_v57 = vld [vmem:[#allocation36_spill] sm:$0xff]  ;;  %v12508_v37 = vld [vmem:[%s13575_s30 + $0x638] sm:$0xff] }
 0x192   : > { %12480 = vmatmul.mubr.msk.f32.gmra.mrb[182].mxu0 %vm664_vm0, %v14772_v60  ;;  %v15127_v43 = vadd.f32 %v3339_v9, %v3323_v34  ;;  %v3317_v28 = vmul.f32 %v2810_v4, %v17410_v47  ;;  %v3340_v62 = vmul.f32 %v2897_v40, %v17411_v57  ;;  %v2899_v46 = vpop.f32.mrb[77].mxu1  ;;  %v12524_v6 = vld [vmem:[%s13575_s30 + $0x6b8] sm:$0xff]  ;;  %v13135_v4 = vpack.c.bf16 %v12519_v25, %v12503_v53 }
 0x193   : > { %5964 = vmatprep.mubr.f32.mxu0 %v17304_v41  ;;  %v3324_v55 = vadd.f32 %v3316_v51, %v15070_v61  ;;  %v3341_v18 = vmul.f32 %v2899_v46, %v17376_v19  ;;  %v13137_v34 = vpack.c.bf16 %v12522_v1, %v12506_v5  ;;  %v13141_v58 = vpack.c.bf16 %v12524_v6, %v12508_v37 }
 0x194   : > { %12484 = vmatmul.mubr.msk.f32.gmra.mrb[182].mxu1 %vm664_vm0, %v14772_v60  ;;  %v3325_v21 = vadd.f32 %v3317_v28, %v15072_v48  ;;  %v2814_v9 = vpop.f32.mrb[78].mxu0 }
 0x195   : > { %6053 = vmatprep.mubr.f32.mxu1 %v17304_v41  ;;  %v15140_v47 = vadd.f32 %v3340_v62, %v3324_v55  ;;  %v3318_v40 = vmul.f32 %v2814_v9, %v17377_v15  ;;  %v2816_v57 = vpop.f32.mrb[79].mxu0  ;;  %v2903_v10 = vpop.f32.mrb[78].mxu1 }
 0x196   : > { %12485 = vmatmul.mubr.msk.f32.vlgmr.msra.gmra.mrb[184].mxu0 %vm664_vm0, %v14800_v16  ;;  %v15145_v61 = vadd.f32 %v3341_v18, %v3325_v21  ;;  %v3319_v46 = vmul.f32 %v2816_v57, %v17332_v63  ;;  %v3342_v48 = vmul.f32 %v2903_v10, %v17333_v42  ;;  %v2905_v55 = vpop.f32.mrb[79].mxu1 }
 0x197   : > { %13132 = vmatpush1.bf16.msra.mxu0 %v13131_v0  ;;  %v3326_v51 = vadd.f32 %v3318_v40, %v15084_v7  ;;  %v3343_v1 = vmul.f32 %v2905_v55, %v14294_v44  ;;  %5970 = vmatprep.mubr.f32.mxu0 %v17304_v41  ;;  %v17412_v40 = vld [vmem:[#allocation46_spill] sm:$0xff] }
 0x198   : > { %12489 = vmatmul.mubr.msk.f32.vlgmr.msra.gmra.mrb[184].mxu1 %vm664_vm0, %v14800_v16  ;;  %v3327_v53 = vadd.f32 %v3319_v46, %v15086_v30  ;;  %v2974_v6 = vpop.f32.mrb[80].mxu0  ;;  %13138 = vmatprep.subr.bf16.mxu0 %v13137_v34 }
 0x199   : > { %6059 = vmatprep.mubr.f32.mxu1 %v17304_v41  ;;  %13136 = vmatpush1.bf16.msra.mxu1 %v13135_v4  ;;  %v15156_v25 = vadd.f32 %v3342_v48, %v3326_v51  ;;  %v3360_v5 = vmul.f32 %v2974_v6, %v14306_v56  ;;  %v2976_v10 = vpop.f32.mrb[81].mxu0  ;;  %v3063_v7 = vpop.f32.mrb[80].mxu1  ;;  %v17413_v48 = vld [vmem:[#allocation47_spill] sm:$0xff]  ;;  %v12505_v51 = vld [vmem:[%s13575_s30 + $0x620] sm:$0xff]  ;;  %v17414_v6 = vld [vmem:[#allocation48_spill] sm:$0xff] }
 0x19a   : > { %12486 = vmatmul.mubr.msk.f32.gmra.mrb[186].mxu0 %vm664_vm0, %v14885_v22  ;;  %13142 = vmatprep.subr.bf16.mxu1 %v13141_v58  ;;  %v15161_v0 = vadd.f32 %v3343_v1, %v3327_v53  ;;  %v3361_v28 = vmul.f32 %v2976_v10, %v17340_v14  ;;  %v3384_v30 = vmul.f32 %v3063_v7, %v17378_v39  ;;  %v3065_v57 = vpop.f32.mrb[81].mxu1  ;;  %v12521_v1 = vld [vmem:[%s13575_s30 + $0x6a0] sm:$0xff] }
 0x19b   : > { %5976 = vmatprep.mubr.f32.mxu0 %v17304_v41  ;;  %v3368_v62 = vadd.f32 %v3360_v5, %v15100_v32  ;;  %v3385_v37 = vmul.f32 %v3065_v57, %v14342_v33 }
 0x19c   : > { %12490 = vmatmul.mubr.msk.f32.gmra.mrb[186].mxu1 %vm664_vm0, %v14885_v22  ;;  %v3369_v58 = vadd.f32 %v3361_v28, %v15105_v12  ;;  %v2980_v18 = vpop.f32.mrb[82].mxu0 }
 0x19d   : > { %6065 = vmatprep.mubr.f32.mxu1 %v17304_v41  ;;  %v15172_v21 = vadd.f32 %v3384_v30, %v3368_v62  ;;  %v3362_v9 = vmul.f32 %v2980_v18, %v14356_v52  ;;  %v2982_v4 = vpop.f32.mrb[83].mxu0  ;;  %v3069_v34 = vpop.f32.mrb[82].mxu1  ;;  %v17415_v30 = vld [vmem:[#allocation49_spill] sm:$0xff]  ;;  %v12510_v18 = vld [vmem:[%s13575_s30 + $0x648] sm:$0xff] }
 0x19e   : > { %12487 = vmatmul.mubr.msk.f32.gmra.mrb[188].mxu0 %vm664_vm0, %v14750_v29  ;;  %v15177_v32 = vadd.f32 %v3385_v37, %v3369_v58  ;;  %v3363_v46 = vmul.f32 %v2982_v4, %v17412_v40  ;;  %v3386_v12 = vmul.f32 %v3069_v34, %v17413_v48  ;;  %v3071_v55 = vpop.f32.mrb[83].mxu1  ;;  %v12523_v58 = vld [vmem:[%s13575_s30 + $0x6b0] sm:$0xff] }
 0x19f   : > { %5982 = vmatprep.mubr.f32.mxu0 %v17304_v41  ;;  %v3370_v53 = vadd.f32 %v3362_v9, %v15119_v27  ;;  %v3387_v5 = vmul.f32 %v3071_v55, %v17414_v6  ;;  %v13139_v27 = vpack.c.bf16 %v12521_v1, %v12505_v51  ;;  %v12526_v9 = vld [vmem:[%s13575_s30 + $0x6c8] sm:$0xff] }
 0x1a0   : > { %12491 = vmatmul.mubr.msk.f32.gmra.mrb[188].mxu1 %vm664_vm0, %v14750_v29  ;;  %v3371_v10 = vadd.f32 %v3363_v46, %v15127_v43  ;;  %v2986_v7 = vpop.f32.mrb[84].mxu0  ;;  %v12507_v29 = vld [vmem:[%s13575_s30 + $0x630] sm:$0xff]  ;;  %v17416_v43 = vld [vmem:[#allocation50_spill] sm:$0xff]  ;;  %v17417_v46 = vld [vmem:[#allocation51_spill] sm:$0xff] }
 0x1a1   : > { %6071 = vmatprep.mubr.f32.mxu1 %v17304_v41  ;;  %v15191_v28 = vadd.f32 %v3386_v12, %v3370_v53  ;;  %v3364_v57 = vmul.f32 %v2986_v7, %v17415_v30  ;;  %v2988_v62 = vpop.f32.mrb[85].mxu0  ;;  %v3075_v37 = vpop.f32.mrb[84].mxu1  ;;  %v12512_v53 = vld [vmem:[%s13575_s30 + $0x658] sm:$0xff] }
 0x1a2   : > { %12488 = vmatmul.mubr.msk.f32.gmra.mrb[190].mxu0 %vm664_vm0, %v14772_v60  ;;  %v15199_v4 = vadd.f32 %v3387_v5, %v3371_v10  ;;  %v3365_v34 = vmul.f32 %v2988_v62, %v17416_v43  ;;  %v3388_v12 = vmul.f32 %v3075_v37, %v17417_v46  ;;  %v3077_v55 = vpop.f32.mrb[85].mxu1  ;;  %v12528_v7 = vld [vmem:[%s13575_s30 + $0x6d8] sm:$0xff]  ;;  %v13143_v10 = vpack.c.bf16 %v12523_v58, %v12507_v29 }
 0x1a3   : > { %6368 = vmatprep.mubr.f32.mxu0 %v17304_v41  ;;  %v3372_v30 = vadd.f32 %v3364_v57, %v15140_v47  ;;  %v3389_v51 = vmul.f32 %v3077_v55, %v14427_v49  ;;  %v13145_v62 = vpack.c.bf16 %v12526_v9, %v12510_v18  ;;  %v13149_v6 = vpack.c.bf16 %v12528_v7, %v12512_v53 }
 0x1a4   : > { %12492 = vmatmul.mubr.msk.f32.gmra.mrb[190].mxu1 %vm664_vm0, %v14772_v60  ;;  %v3373_v1 = vadd.f32 %v3365_v34, %v15145_v61  ;;  %v2992_v5 = vpop.f32.mrb[86].mxu0 }
 0x1a5   : > { %6457 = vmatprep.mubr.f32.mxu1 %v17304_v41  ;;  %v15212_v43 = vadd.f32 %v3388_v12, %v3372_v30  ;;  %v3366_v60 = vmul.f32 %v2992_v5, %v14437_v2  ;;  %v2994_v37 = vpop.f32.mrb[87].mxu0  ;;  %v3081_v46 = vpop.f32.mrb[86].mxu1 }
 0x1a6   : > { %12533 = vmatmul.mubr.msk.f32.vlgmr.msra.gmra.mrb[192].mxu0 %vm664_vm0, %v14800_v16  ;;  %v15217_v47 = vadd.f32 %v3389_v51, %v3373_v1  ;;  %v3367_v57 = vmul.f32 %v2994_v37, %v14464_v50  ;;  %v3390_v61 = vmul.f32 %v3081_v46, %v14492_v11  ;;  %v3083_v29 = vpop.f32.mrb[87].mxu1 }
 0x1a7   : > { %13140 = vmatpush1.bf16.msra.mxu0 %v13139_v27  ;;  %v3374_v30 = vadd.f32 %v3366_v60, %v15156_v25  ;;  %v3391_v58 = vmul.f32 %v3083_v29, %v14497_v13  ;;  %6374 = vmatprep.mubr.f32.mxu0 %v17304_v41  ;;  %v12525_v29 = vld [vmem:[%s13575_s30 + $0x6c0] sm:$0xff] }
 0x1a8   : > { %12537 = vmatmul.mubr.msk.f32.vlgmr.msra.gmra.mrb[192].mxu1 %vm664_vm0, %v14800_v16  ;;  %v3375_v18 = vadd.f32 %v3367_v57, %v15161_v0  ;;  %v3152_v9 = vpop.f32.mrb[88].mxu0  ;;  %13146 = vmatprep.subr.bf16.mxu0 %v13145_v62  ;;  %v15248_v62 = vld [vmem:[%s17159_s2 + $0x10] sm:$0xff] }
 0x1a9   : > { %6463 = vmatprep.mubr.f32.mxu1 %v17304_v41  ;;  %13144 = vmatpush1.bf16.msra.mxu1 %v13143_v10  ;;  %v15228_v34 = vadd.f32 %v3390_v61, %v3374_v30  ;;  %v3408_v16 = vmul.f32 %v3152_v9, %v14524_v31  ;;  %v3154_v46 = vpop.f32.mrb[89].mxu0  ;;  %v3241_v25 = vpop.f32.mrb[88].mxu1  ;;  %v12509_v61 = vld [vmem:[%s13575_s30 + $0x640] sm:$0xff] }
 0x1aa   : > { %12534 = vmatmul.mubr.msk.f32.gmra.mrb[194].mxu0 %vm664_vm0, %v14885_v22  ;;  %13150 = vmatprep.subr.bf16.mxu1 %v13149_v6  ;;  %v15233_v27 = vadd.f32 %v3391_v58, %v3375_v18  ;;  %v3409_v12 = vmul.f32 %v3154_v46, %v14540_v36  ;;  %v3432_v0 = vmul.f32 %v3241_v25, %v14554_v24  ;;  %v3243_v55 = vpop.f32.mrb[89].mxu1 }
 0x1ab   : > { %6380 = vmatprep.mubr.f32.mxu0 %v17304_v41  ;;  %v3416_v53 = vadd.f32 %v3408_v16, %v15172_v21  ;;  %v3433_v7 = vmul.f32 %v3243_v55, %v14571_v59  ;;  %v12511_v16 = vld [vmem:[%s13575_s30 + $0x650] sm:$0xff]  ;;  %v13147_v55 = vpack.c.bf16 %v12525_v29, %v12509_v61 }
 0x1ac   : > { %12538 = vmatmul.mubr.msk.f32.gmra.mrb[194].mxu1 %vm664_vm0, %v14885_v22  ;;  %v3417_v6 = vadd.f32 %v3409_v12, %v15177_v32  ;;  %v3158_v51 = vpop.f32.mrb[90].mxu0 }
 0x1ad   : > { %6469 = vmatprep.mubr.f32.mxu1 %v17304_v41  ;;  %v3440_v1 = vadd.f32 %v3432_v0, %v3416_v53  ;;  %v3410_v5 = vmul.f32 %v3158_v51, %v14577_v8  ;;  %v3160_v10 = vpop.f32.mrb[91].mxu0  ;;  %v3247_v21 = vpop.f32.mrb[90].mxu1  ;;  %v12514_v53 = vld [vmem:[%s13575_s30 + $0x668] sm:$0xff] }
 0x1ae   : > { %12535 = vmatmul.mubr.msk.f32.gmra.mrb[196].mxu0 %vm664_vm0, %v15248_v62  ;;  %v3441_v60 = vadd.f32 %v3433_v7, %v3417_v6  ;;  %v3411_v32 = vmul.f32 %v3160_v10, %v14605_v17  ;;  %v3434_v37 = vmul.f32 %v3247_v21, %v14607_v45  ;;  %v3249_v57 = vpop.f32.mrb[91].mxu1  ;;  %v12530_v7 = vld [vmem:[%s13575_s30 + $0x6e8] sm:$0xff]  ;;  %v12516_v10 = vld [vmem:[%s13575_s30 + $0x678] sm:$0xff] }
 0x1af   : > { %6386 = vmatprep.mubr.f32.mxu0 %v17304_v41  ;;  %12277 = vst [vmem:[%s14678_s10 + $0x80] sm:$0xff] %v3440_v1  ;;  %v3418_v30 = vadd.f32 %v3410_v5, %v15191_v28  ;;  %v3435_v58 = vmul.f32 %v3249_v57, %v14642_v26  ;;  %v15270_v28 = vld [vmem:[%s17159_s2 + $0x18] sm:$0xff]  ;;  %v13153_v29 = vpack.c.bf16 %v12530_v7, %v12514_v53  ;;  %v17419_v53 = vld [vmem:[#allocation43_spill] sm:$0xff] }
 0x1b0   : > { %12539 = vmatmul.mubr.msk.f32.gmra.mrb[196].mxu1 %vm664_vm0, %v15248_v62  ;;  %12278 = vst [vmem:[%s14678_s10 + $0x88] sm:$0xff] %v3441_v60  ;;  %v3419_v18 = vadd.f32 %v3411_v32, %v15199_v4  ;;  %v3164_v9 = vpop.f32.mrb[92].mxu0  ;;  %v12527_v4 = vld [vmem:[%s13575_s30 + $0x6d0] sm:$0xff]  ;;  %v12532_v21 = vld [vmem:[%s13575_s30 + $0x6f8] sm:$0xff] }
 0x1b1   : > { %6475 = vmatprep.mubr.f32.mxu1 %v17304_v41  ;;  %v3442_v46 = vadd.f32 %v3434_v37, %v3418_v30  ;;  %v3412_v25 = vmul.f32 %v3164_v9, %v14661_v38  ;;  %v3166_v12 = vpop.f32.mrb[93].mxu0  ;;  %v3253_v0 = vpop.f32.mrb[92].mxu1  ;;  %v13151_v61 = vpack.c.bf16 %v12527_v4, %v12511_v16  ;;  %v17418_v16 = vld [vmem:[#allocation7_spill] sm:$0xff] }
 0x1b2   : > { %12536 = vmatmul.mubr.msk.f32.gmra.mrb[198].mxu0 %vm664_vm0, %v15270_v28  ;;  %v3443_v6 = vadd.f32 %v3435_v58, %v3419_v18  ;;  %v3413_v51 = vmul.f32 %v3166_v12, %v14663_v23  ;;  %v3436_v1 = vmul.f32 %v3253_v0, %v14668_v3  ;;  %v3255_v5 = vpop.f32.mrb[93].mxu1 }
 0x1b3   : > { %6546 = vmatprep.mubr.f32.mxu0 %v17304_v41  ;;  %12279 = vst [vmem:[%s14678_s10 + $0x90] sm:$0xff] %v3442_v46  ;;  %v3420_v60 = vadd.f32 %v3412_v25, %v15212_v43  ;;  %v3437_v32 = vmul.f32 %v3255_v5, %v14684_v54  ;;  %v15294_v43 = vld [vmem:[%s17159_s2] sm:$0xff]  ;;  %v13157_v46 = vpack.c.bf16 %v12532_v21, %v12516_v10 }
 0x1b4   : > { %12540 = vmatmul.mubr.msk.f32.gmra.mrb[198].mxu1 %vm664_vm0, %v15270_v28  ;;  %12280 = vst [vmem:[%s14678_s10 + $0x98] sm:$0xff] %v3443_v6  ;;  %v3421_v37 = vadd.f32 %v3413_v51, %v15217_v47  ;;  %v3170_v57 = vpop.f32.mrb[94].mxu0 }
 0x1b5   : > { %6635 = vmatprep.mubr.f32.mxu1 %v17304_v41  ;;  %v3444_v30 = vadd.f32 %v3436_v1, %v3420_v60  ;;  %v3414_v58 = vmul.f32 %v3170_v57, %v14688_v35  ;;  %v3172_v18 = vpop.f32.mrb[95].mxu0  ;;  %v3259_v9 = vpop.f32.mrb[94].mxu1  ;;  %v17421_v60 = vld [vmem:[#allocation9_spill] sm:$0xff] }
 0x1b6   : > { %12541 = vmatmul.mubr.msk.f32.vlgmr.msra.gmra.mrb[200].mxu0 %vm664_vm0, %v15294_v43  ;;  %v3445_v47 = vadd.f32 %v3437_v32, %v3421_v37  ;;  %v3415_v25 = vmul.f32 %v3172_v18, %v14694_v20  ;;  %v3438_v12 = vmul.f32 %v3259_v9, %v17418_v16  ;;  %v3261_v0 = vpop.f32.mrb[95].mxu1  ;;  %v17422_v37 = vld [vmem:[#allocation10_spill] sm:$0xff]  ;;  %v17424_v9 = vld [vmem:[#allocation12_spill] sm:$0xff] }
 0x1b7   : > { %13148 = vmatpush1.bf16.msra.mxu0 %v13147_v55  ;;  %12281 = vst [vmem:[%s14678_s10 + $0xa0] sm:$0xff] %v3444_v30  ;;  %v3422_v4 = vadd.f32 %v3414_v58, %v15228_v34  ;;  %v3439_v7 = vmul.f32 %v3261_v0, %v17419_v53  ;;  %6552 = vmatprep.mubr.f32.mxu0 %v17304_v41  ;;  %v17420_v55 = vld [vmem:[#allocation8_spill] sm:$0xff]  ;;  %v17426_v0 = vld [vmem:[#allocation14_spill] sm:$0xff] }
 0x1b8   : > { %12545 = vmatmul.mubr.msk.f32.vlgmr.msra.gmra.mrb[200].mxu1 %vm664_vm0, %v15294_v43  ;;  %12282 = vst [vmem:[%s14678_s10 + $0xa8] sm:$0xff] %v3445_v47  ;;  %v3423_v6 = vadd.f32 %v3415_v25, %v15233_v27  ;;  %v3556_v51 = vpop.f32.mrb[96].mxu0  ;;  %13154 = vmatprep.subr.bf16.mxu0 %v13153_v29  ;;  %v17425_v25 = vld [vmem:[#allocation13_spill] sm:$0xff] }
 0x1b9   : > { %6641 = vmatprep.mubr.f32.mxu1 %v17304_v41  ;;  %13152 = vmatpush1.bf16.msra.mxu1 %v13151_v61  ;;  %v3446_v1 = vadd.f32 %v3438_v12, %v3422_v4  ;;  %v4210_v5 = vmul.f32 %v3556_v51, %v17420_v55  ;;  %v3645_v10 = vpop.f32.mrb[96].mxu1  ;;  %v3558_v21 = vpop.f32.mrb[97].mxu0  ;;  %v17423_v61 = vld [vmem:[#allocation11_spill] sm:$0xff] }
 0x1ba   : > { %12542 = vmatmul.mubr.msk.f32.gmra.mrb[202].mxu0 %vm664_vm0, %v14885_v22  ;;  %13158 = vmatprep.subr.bf16.mxu1 %v13157_v46  ;;  %v3447_v34 = vadd.f32 %v3439_v7, %v3423_v6  ;;  %v4226_v32 = vmul.f32 %v3645_v10, %v17421_v60  ;;  %v4211_v57 = vmul.f32 %v3558_v21, %v17422_v37  ;;  %v3647_v27 = vpop.f32.mrb[97].mxu1  ;;  %v17427_v6 = vld [vmem:[#allocation15_spill] sm:$0xff] }
 0x1bb   : > { %6558 = vmatprep.mubr.f32.mxu0 %v17304_v41  ;;  %12283 = vst [vmem:[%s14678_s10 + $0xb0] sm:$0xff] %v3446_v1  ;;  %v4227_v29 = vmul.f32 %v3647_v27, %v17423_v61  ;;  %v12513_v1 = vld [vmem:[%s13575_s30 + $0x660] sm:$0xff] }
 0x1bc   : > { %12546 = vmatmul.mubr.msk.f32.gmra.mrb[202].mxu1 %vm664_vm0, %v14885_v22  ;;  %12284 = vst [vmem:[%s14678_s10 + $0xb8] sm:$0xff] %v3447_v34  ;;  %v15321_v30 = vadd.f32 %v4226_v32, %v4210_v5  ;;  %v3562_v58 = vpop.f32.mrb[98].mxu0  ;;  %v12529_v5 = vld [vmem:[%s13575_s30 + $0x6e0] sm:$0xff]  ;;  %v12515_v34 = vld [vmem:[%s13575_s30 + $0x670] sm:$0xff] }
 0x1bd   : > { %6647 = vmatprep.mubr.f32.mxu1 %v17304_v41  ;;  %v15323_v18 = vadd.f32 %v4227_v29, %v4211_v57  ;;  %v4212_v46 = vmul.f32 %v3562_v58, %v17424_v9  ;;  %v3651_v47 = vpop.f32.mrb[98].mxu1  ;;  %v3564_v22 = vpop.f32.mrb[99].mxu0  ;;  %v17428_v57 = vld [vmem:[#allocation16_spill] sm:$0xff] }
 0x1be   : > { %12543 = vmatmul.mubr.msk.f32.gmra.mrb[204].mxu0 %vm664_vm0, %v15248_v62  ;;  %v4228_v12 = vmul.f32 %v3651_v47, %v17425_v25  ;;  %v4213_v4 = vmul.f32 %v3564_v22, %v17426_v0  ;;  %v3653_v7 = vpop.f32.mrb[99].mxu1  ;;  %v12531_v47 = vld [vmem:[%s13575_s30 + $0x6f0] sm:$0xff]  ;;  %v12574_v22 = vld [vmem:[%s13575_s30 + $0x708] sm:$0xff] }
 0x1bf   : > { %6564 = vmatprep.mubr.f32.mxu0 %v17304_v41  ;;  %v4229_v51 = vmul.f32 %v3653_v7, %v17427_v6  ;;  %v12590_v7 = vld [vmem:[%s13575_s30 + $0x788] sm:$0xff]  ;;  %v17429_v6 = vld [vmem:[#allocation18_spill] sm:$0xff]  ;;  %v13159_v60 = vpack.c.bf16 %v12531_v47, %v12515_v34 }
 0x1c0   : > { %12547 = vmatmul.mubr.msk.f32.gmra.mrb[204].mxu1 %vm664_vm0, %v15248_v62  ;;  %v15337_v10 = vadd.f32 %v4228_v12, %v4212_v46  ;;  %v3568_v21 = vpop.f32.mrb[100].mxu0  ;;  %v17430_v46 = vld [vmem:[#allocation17_spill] sm:$0xff] }
 0x1c1   : > { %6653 = vmatprep.mubr.f32.mxu1 %v17304_v41  ;;  %v15340_v32 = vadd.f32 %v4229_v51, %v4213_v4  ;;  %v4214_v27 = vmul.f32 %v3568_v21, %v17428_v57  ;;  %v3657_v29 = vpop.f32.mrb[100].mxu1  ;;  %v3570_v58 = vpop.f32.mrb[101].mxu0  ;;  %v13155_v4 = vpack.c.bf16 %v12529_v5, %v12513_v1  ;;  %v12576_v51 = vld [vmem:[%s13575_s30 + $0x718] sm:$0xff]  ;;  %v17431_v57 = vld [vmem:[#allocation19_spill] sm:$0xff] }
 0x1c2   : > { %12544 = vmatmul.mubr.msk.f32.gmra.mrb[206].mxu0 %vm664_vm0, %v15270_v28  ;;  %v4230_v0 = vmul.f32 %v3657_v29, %v17429_v6  ;;  %v4215_v12 = vmul.f32 %v3570_v58, %v17430_v46  ;;  %v3659_v25 = vpop.f32.mrb[101].mxu1  ;;  %v12592_v21 = vld [vmem:[%s13575_s30 + $0x798] sm:$0xff]  ;;  %v13161_v29 = vpack.c.bf16 %v12590_v7, %v12574_v22  ;;  %v17432_v58 = vld [vmem:[#allocation20_spill] sm:$0xff]  ;;  %v15379_v22 = vld [vmem:[%s17159_s2 + $0x8] sm:$0xff] }
 0x1c3   : > { %6724 = vmatprep.mubr.f32.mxu0 %v17304_v41  ;;  %v4231_v9 = vmul.f32 %v3659_v25, %v17431_v57  ;;  %v13165_v1 = vpack.c.bf16 %v12592_v21, %v12576_v51  ;;  %v17433_v5 = vld [vmem:[#allocation21_spill] sm:$0xff]  ;;  %v17434_v25 = vld [vmem:[#allocation22_spill] sm:$0xff] }
 0x1c4   : > { %12548 = vmatmul.mubr.msk.f32.gmra.mrb[206].mxu1 %vm664_vm0, %v15270_v28  ;;  %v15357_v61 = vadd.f32 %v4230_v0, %v4214_v27  ;;  %v3574_v37 = vpop.f32.mrb[102].mxu0  ;;  %v17435_v0 = vld [vmem:[#allocation24_spill] sm:$0xff] }
 0x1c5   : > { %6813 = vmatprep.mubr.f32.mxu1 %v17304_v41  ;;  %v15359_v6 = vadd.f32 %v4231_v9, %v4215_v12  ;;  %v4216_v46 = vmul.f32 %v3574_v37, %v17432_v58  ;;  %v3663_v55 = vpop.f32.mrb[102].mxu1  ;;  %v3576_v53 = vpop.f32.mrb[103].mxu0 }
 0x1c6   : > { %12549 = vmatmul.mubr.msk.f32.vlgmr.msra.gmra.mrb[208].mxu0 %vm664_vm0, %v15294_v43  ;;  %v4232_v16 = vmul.f32 %v3663_v55, %v17433_v5  ;;  %v4217_v57 = vmul.f32 %v3576_v53, %v17434_v25  ;;  %v3665_v20 = vpop.f32.mrb[103].mxu1  ;;  %v17436_v55 = vld [vmem:[#allocation23_spill] sm:$0xff] }
 0x1c7   : > { %13156 = vmatpush1.bf16.msra.mxu0 %v13155_v4  ;;  %v4233_v9 = vmul.f32 %v3665_v20, %v17435_v0  ;;  %6730 = vmatprep.mubr.f32.mxu0 %v17304_v41  ;;  %v17439_v4 = vld [vmem:[#allocation27_spill] sm:$0xff] }
 0x1c8   : > { %12553 = vmatmul.mubr.msk.f32.vlgmr.msra.gmra.mrb[208].mxu1 %vm664_vm0, %v15294_v43  ;;  %v15371_v37 = vadd.f32 %v4232_v16, %v4216_v46  ;;  %v3734_v34 = vpop.f32.mrb[104].mxu0  ;;  %13162 = vmatprep.subr.bf16.mxu0 %v13161_v29  ;;  %v17437_v16 = vld [vmem:[#allocation25_spill] sm:$0xff] }
 0x1c9   : > { %6819 = vmatprep.mubr.f32.mxu1 %v17304_v41  ;;  %13160 = vmatpush1.bf16.msra.mxu1 %v13159_v60  ;;  %v15373_v27 = vadd.f32 %v4233_v9, %v4217_v57  ;;  %v4250_v53 = vmul.f32 %v3734_v34, %v17436_v55  ;;  %v3736_v47 = vpop.f32.mrb[105].mxu0  ;;  %v3823_v20 = vpop.f32.mrb[104].mxu1  ;;  %v17438_v60 = vld [vmem:[#allocation26_spill] sm:$0xff]  ;;  %v17440_v9 = vld [vmem:[#allocation28_spill] sm:$0xff] }
 0x1ca   : > { %12550 = vmatmul.mubr.msk.f32.gmra.mrb[210].mxu0 %vm664_vm0, %v15379_v22  ;;  %13166 = vmatprep.subr.bf16.mxu1 %v13165_v1  ;;  %v4251_v7 = vmul.f32 %v3736_v47, %v17437_v16  ;;  %v4274_v57 = vmul.f32 %v3823_v20, %v17438_v60  ;;  %v3825_v46 = vpop.f32.mrb[105].mxu1 }
 0x1cb   : > { %6736 = vmatprep.mubr.f32.mxu0 %v17304_v41  ;;  %v4258_v12 = vadd.f32 %v4250_v53, %v15321_v30  ;;  %v4275_v51 = vmul.f32 %v3825_v46, %v17439_v4  ;;  %v17441_v53 = vld [vmem:[#allocation29_spill] sm:$0xff]  ;;  %v17442_v4 = vld [vmem:[#allocation30_spill] sm:$0xff] }
 0x1cc   : > { %12554 = vmatmul.mubr.msk.f32.gmra.mrb[210].mxu1 %vm664_vm0, %v15379_v22  ;;  %v4259_v21 = vadd.f32 %v4251_v7, %v15323_v18  ;;  %v3740_v29 = vpop.f32.mrb[106].mxu0 }
 0x1cd   : > { %6825 = vmatprep.mubr.f32.mxu1 %v17304_v41  ;;  %v15392_v1 = vadd.f32 %v4274_v57, %v4258_v12  ;;  %v4252_v34 = vmul.f32 %v3740_v29, %v17440_v9  ;;  %v3742_v47 = vpop.f32.mrb[107].mxu0  ;;  %v3829_v20 = vpop.f32.mrb[106].mxu1  ;;  %v12573_v57 = vld [vmem:[%s13575_s30 + $0x700] sm:$0xff]  ;;  %v17443_v9 = vld [vmem:[#allocation31_spill] sm:$0xff] }
 0x1ce   : > { %12551 = vmatmul.mubr.msk.f32.gmra.mrb[212].mxu0 %vm664_vm0, %v15248_v62  ;;  %v15397_v30 = vadd.f32 %v4275_v51, %v4259_v21  ;;  %v4253_v46 = vmul.f32 %v3742_v47, %v17441_v53  ;;  %v4276_v18 = vmul.f32 %v3829_v20, %v17442_v4  ;;  %v3831_v7 = vpop.f32.mrb[107].mxu1  ;;  %v12589_v12 = vld [vmem:[%s13575_s30 + $0x780] sm:$0xff]  ;;  %v12575_v53 = vld [vmem:[%s13575_s30 + $0x710] sm:$0xff] }
 0x1cf   : > { %6742 = vmatprep.mubr.f32.mxu0 %v17304_v41  ;;  %v4260_v29 = vadd.f32 %v4252_v34, %v15337_v10  ;;  %v4277_v51 = vmul.f32 %v3831_v7, %v17443_v9  ;;  %v17444_v4 = vld [vmem:[#allocation32_spill] sm:$0xff]  ;;  %v13163_v10 = vpack.c.bf16 %v12589_v12, %v12573_v57  ;;  %v12578_v7 = vld [vmem:[%s13575_s30 + $0x728] sm:$0xff] }
 0x1d0   : > { %12555 = vmatmul.mubr.msk.f32.gmra.mrb[212].mxu1 %vm664_vm0, %v15248_v62  ;;  %v4261_v21 = vadd.f32 %v4253_v46, %v15340_v32  ;;  %v3746_v47 = vpop.f32.mrb[108].mxu0  ;;  %v12591_v34 = vld [vmem:[%s13575_s30 + $0x790] sm:$0xff]  ;;  %v12594_v9 = vld [vmem:[%s13575_s30 + $0x7a8] sm:$0xff]  ;;  %v17445_v32 = vld [vmem:[#allocation33_spill] sm:$0xff] }
 0x1d1   : > { %6831 = vmatprep.mubr.f32.mxu1 %v17304_v41  ;;  %v15411_v20 = vadd.f32 %v4276_v18, %v4260_v29  ;;  %v4254_v60 = vmul.f32 %v3746_v47, %v17444_v4  ;;  %v3748_v16 = vpop.f32.mrb[109].mxu0  ;;  %v3835_v55 = vpop.f32.mrb[108].mxu1  ;;  %v17446_v18 = vld [vmem:[#allocation36_spill] sm:$0xff]  ;;  %v12580_v47 = vld [vmem:[%s13575_s30 + $0x738] sm:$0xff] }
 0x1d2   : > { %12552 = vmatmul.mubr.msk.f32.gmra.mrb[214].mxu0 %vm664_vm0, %v15270_v28  ;;  %v15419_v0 = vadd.f32 %v4277_v51, %v4261_v21  ;;  %v4255_v46 = vmul.f32 %v3748_v16, %v17445_v32  ;;  %v4278_v29 = vmul.f32 %v3835_v55, %v17446_v18  ;;  %v3837_v25 = vpop.f32.mrb[109].mxu1  ;;  %v12596_v4 = vld [vmem:[%s13575_s30 + $0x7b8] sm:$0xff]  ;;  %v13167_v16 = vpack.c.bf16 %v12591_v34, %v12575_v53 }
 0x1d3   : > { %6902 = vmatprep.mubr.f32.mxu0 %v17304_v41  ;;  %v4262_v5 = vadd.f32 %v4254_v60, %v15357_v61  ;;  %v4279_v57 = vmul.f32 %v3837_v25, %v17376_v19  ;;  %v13169_v21 = vpack.c.bf16 %v12594_v9, %v12578_v7  ;;  %v13173_v35 = vpack.c.bf16 %v12596_v4, %v12580_v47 }
 0x1d4   : > { %12556 = vmatmul.mubr.msk.f32.gmra.mrb[214].mxu1 %vm664_vm0, %v15270_v28  ;;  %v4263_v12 = vadd.f32 %v4255_v46, %v15359_v6  ;;  %v3752_v51 = vpop.f32.mrb[110].mxu0 }
 0x1d5   : > { %6991 = vmatprep.mubr.f32.mxu1 %v17304_v41  ;;  %v15432_v32 = vadd.f32 %v4278_v29, %v4262_v5  ;;  %v4256_v55 = vmul.f32 %v3752_v51, %v17377_v15  ;;  %v3754_v18 = vpop.f32.mrb[111].mxu0  ;;  %v3841_v58 = vpop.f32.mrb[110].mxu1 }
 0x1d6   : > { %12557 = vmatmul.mubr.msk.f32.vlgmr.msra.gmra.mrb[216].mxu0 %vm664_vm0, %v15294_v43  ;;  %v15437_v61 = vadd.f32 %v4279_v57, %v4263_v12  ;;  %v4257_v25 = vmul.f32 %v3754_v18, %v17332_v63  ;;  %v4280_v6 = vmul.f32 %v3841_v58, %v17333_v42  ;;  %v3843_v5 = vpop.f32.mrb[111].mxu1 }
 0x1d7   : > { %13164 = vmatpush1.bf16.msra.mxu0 %v13163_v10  ;;  %v4264_v60 = vadd.f32 %v4256_v55, %v15371_v37  ;;  %v4281_v9 = vmul.f32 %v3843_v5, %v14294_v44  ;;  %6908 = vmatprep.mubr.f32.mxu0 %v17304_v41  ;;  %v12593_v5 = vld [vmem:[%s13575_s30 + $0x7a0] sm:$0xff] }
 0x1d8   : > { %12561 = vmatmul.mubr.msk.f32.vlgmr.msra.gmra.mrb[216].mxu1 %vm664_vm0, %v15294_v43  ;;  %v4265_v4 = vadd.f32 %v4257_v25, %v15373_v27  ;;  %v3912_v53 = vpop.f32.mrb[112].mxu0  ;;  %13170 = vmatprep.subr.bf16.mxu0 %v13169_v21 }
 0x1d9   : > { %6997 = vmatprep.mubr.f32.mxu1 %v17304_v41  ;;  %13168 = vmatpush1.bf16.msra.mxu1 %v13167_v16  ;;  %v15448_v34 = vadd.f32 %v4280_v6, %v4264_v60  ;;  %v4298_v7 = vmul.f32 %v3912_v53, %v14306_v56  ;;  %v3914_v58 = vpop.f32.mrb[113].mxu0  ;;  %v4001_v37 = vpop.f32.mrb[112].mxu1  ;;  %v12577_v6 = vld [vmem:[%s13575_s30 + $0x720] sm:$0xff] }
 0x1da   : > { %12558 = vmatmul.mubr.msk.f32.gmra.mrb[218].mxu0 %vm664_vm0, %v15379_v22  ;;  %13174 = vmatprep.subr.bf16.mxu1 %v13173_v35  ;;  %v15453_v10 = vadd.f32 %v4281_v9, %v4265_v4  ;;  %v4299_v46 = vmul.f32 %v3914_v58, %v17340_v14  ;;  %v4322_v27 = vmul.f32 %v4001_v37, %v17378_v39  ;;  %v4003_v18 = vpop.f32.mrb[113].mxu1  ;;  %v17447_v9 = vld [vmem:[#allocation48_spill] sm:$0xff] }
 0x1db   : > { %6914 = vmatprep.mubr.f32.mxu0 %v17304_v41  ;;  %v4306_v29 = vadd.f32 %v4298_v7, %v15392_v1  ;;  %v4323_v47 = vmul.f32 %v4003_v18, %v14342_v33  ;;  %v12579_v58 = vld [vmem:[%s13575_s30 + $0x730] sm:$0xff] }
 0x1dc   : > { %12562 = vmatmul.mubr.msk.f32.gmra.mrb[218].mxu1 %vm664_vm0, %v15379_v22  ;;  %v4307_v35 = vadd.f32 %v4299_v46, %v15397_v30  ;;  %v3918_v57 = vpop.f32.mrb[114].mxu0  ;;  %v17448_v46 = vld [vmem:[#allocation49_spill] sm:$0xff] }
 0x1dd   : > { %7003 = vmatprep.mubr.f32.mxu1 %v17304_v41  ;;  %v15464_v12 = vadd.f32 %v4322_v27, %v4306_v29  ;;  %v4300_v51 = vmul.f32 %v3918_v57, %v14356_v52  ;;  %v3920_v16 = vpop.f32.mrb[115].mxu0  ;;  %v12598_v57 = vld [vmem:[%s13575_s30 + $0x7c8] sm:$0xff] }
 0x1de   : > { %12559 = vmatmul.mubr.msk.f32.gmra.mrb[220].mxu0 %vm664_vm0, %v15248_v62  ;;  %v4007_v21 = vpop.f32.mrb[114].mxu1  ;;  %v15469_v1 = vadd.f32 %v4323_v47, %v4307_v35  ;;  %v4301_v55 = vmul.f32 %v3920_v16, %v17412_v40  ;;  %v12595_v47 = vld [vmem:[%s13575_s30 + $0x7b0] sm:$0xff]  ;;  %v12582_v35 = vld [vmem:[%s13575_s30 + $0x748] sm:$0xff] }
 0x1df   : > { %v4324_v30 = vmul.f32 %v4007_v21, %v17413_v48  ;;  %v4009_v25 = vpop.f32.mrb[115].mxu1  ;;  %6920 = vmatprep.mubr.f32.mxu0 %v17304_v41  ;;  %v4308_v60 = vadd.f32 %v4300_v51, %v15411_v20  ;;  %v13171_v20 = vpack.c.bf16 %v12593_v5, %v12577_v6  ;;  %v17450_v21 = vld [vmem:[#allocation51_spill] sm:$0xff] }
 0x1e0   : > { %12563 = vmatmul.mubr.msk.f32.gmra.mrb[220].mxu1 %vm664_vm0, %v15248_v62  ;;  %v4325_v4 = vmul.f32 %v4009_v25, %v17447_v9  ;;  %v4309_v53 = vadd.f32 %v4301_v55, %v15419_v0  ;;  %v3924_v7 = vpop.f32.mrb[116].mxu0  ;;  %v17449_v0 = vld [vmem:[#allocation50_spill] sm:$0xff]  ;;  %v12584_v25 = vld [vmem:[%s13575_s30 + $0x758] sm:$0xff] }
 0x1e1   : > { %7009 = vmatprep.mubr.f32.mxu1 %v17304_v41  ;;  %v15483_v37 = vadd.f32 %v4324_v30, %v4308_v60  ;;  %v4302_v27 = vmul.f32 %v3924_v7, %v17448_v46  ;;  %v3926_v18 = vpop.f32.mrb[117].mxu0  ;;  %v12600_v60 = vld [vmem:[%s13575_s30 + $0x7d8] sm:$0xff] }
 0x1e2   : > { %12560 = vmatmul.mubr.msk.f32.gmra.mrb[222].mxu0 %vm664_vm0, %v15270_v28  ;;  %v4013_v29 = vpop.f32.mrb[116].mxu1  ;;  %v15491_v51 = vadd.f32 %v4325_v4, %v4309_v53  ;;  %v4303_v16 = vmul.f32 %v3926_v18, %v17449_v0  ;;  %v13175_v53 = vpack.c.bf16 %v12595_v47, %v12579_v58  ;;  %v13177_v18 = vpack.c.bf16 %v12598_v57, %v12582_v35 }
 0x1e3   : > { %v4326_v55 = vmul.f32 %v4013_v29, %v17450_v21  ;;  %v4015_v30 = vpop.f32.mrb[117].mxu1  ;;  %7306 = vmatprep.mubr.f32.mxu0 %v17304_v41  ;;  %v4310_v7 = vadd.f32 %v4302_v27, %v15432_v32  ;;  %v13181_v9 = vpack.c.bf16 %v12600_v60, %v12584_v25 }
 0x1e4   : > { %12564 = vmatmul.mubr.msk.f32.gmra.mrb[222].mxu1 %vm664_vm0, %v15270_v28  ;;  %v4327_v6 = vmul.f32 %v4015_v30, %v14427_v49  ;;  %v4311_v5 = vadd.f32 %v4303_v16, %v15437_v61  ;;  %v3930_v4 = vpop.f32.mrb[118].mxu0 }
 0x1e5   : > { %7395 = vmatprep.mubr.f32.mxu1 %v17304_v41  ;;  %v15504_v0 = vadd.f32 %v4326_v55, %v4310_v7  ;;  %v4304_v29 = vmul.f32 %v3930_v4, %v14437_v2  ;;  %v3932_v21 = vpop.f32.mrb[119].mxu0 }
 0x1e6   : > { %12605 = vmatmul.mubr.msk.f32.vlgmr.msra.gmra.mrb[224].mxu0 %vm664_vm0, %v15294_v43  ;;  %v4019_v46 = vpop.f32.mrb[118].mxu1  ;;  %v15509_v32 = vadd.f32 %v4327_v6, %v4311_v5  ;;  %v4305_v27 = vmul.f32 %v3932_v21, %v14464_v50 }
 0x1e7   : > { %v4328_v61 = vmul.f32 %v4019_v46, %v14492_v11  ;;  %13172 = vmatpush1.bf16.msra.mxu0 %v13171_v20  ;;  %v4021_v58 = vpop.f32.mrb[119].mxu1  ;;  %v4312_v47 = vadd.f32 %v4304_v29, %v15448_v34  ;;  %7312 = vmatprep.mubr.f32.mxu0 %v17304_v41 }
 0x1e8   : > { %12609 = vmatmul.mubr.msk.f32.vlgmr.msra.gmra.mrb[224].mxu1 %vm664_vm0, %v15294_v43  ;;  %v4329_v35 = vmul.f32 %v4021_v58, %v14497_v13  ;;  %v4313_v57 = vadd.f32 %v4305_v27, %v15453_v10  ;;  %v4090_v16 = vpop.f32.mrb[120].mxu0  ;;  %13178 = vmatprep.subr.bf16.mxu0 %v13177_v18  ;;  %v12597_v58 = vld [vmem:[%s13575_s30 + $0x7c0] sm:$0xff] }
 0x1e9   : > { %7401 = vmatprep.mubr.f32.mxu1 %v17304_v41  ;;  %13176 = vmatpush1.bf16.msra.mxu1 %v13175_v53  ;;  %v15520_v21 = vadd.f32 %v4328_v61, %v4312_v47  ;;  %v4346_v55 = vmul.f32 %v4090_v16, %v14524_v31  ;;  %v4092_v46 = vpop.f32.mrb[121].mxu0  ;;  %v12581_v61 = vld [vmem:[%s13575_s30 + $0x740] sm:$0xff] }
 0x1ea   : > { %12606 = vmatmul.mubr.msk.f32.gmra.mrb[226].mxu0 %vm664_vm0, %v15379_v22  ;;  %v4179_v34 = vpop.f32.mrb[120].mxu1  ;;  %13182 = vmatprep.subr.bf16.mxu1 %v13181_v9  ;;  %v15525_v20 = vadd.f32 %v4329_v35, %v4313_v57  ;;  %v4347_v30 = vmul.f32 %v4092_v46, %v14540_v36 }
 0x1eb   : > { %v4370_v10 = vmul.f32 %v4179_v34, %v14554_v24  ;;  %v4181_v25 = vpop.f32.mrb[121].mxu1  ;;  %7318 = vmatprep.mubr.f32.mxu0 %v17304_v41  ;;  %v4354_v60 = vadd.f32 %v4346_v55, %v15464_v12  ;;  %v12583_v55 = vld [vmem:[%s13575_s30 + $0x750] sm:$0xff] }
 0x1ec   : > { %12610 = vmatmul.mubr.msk.f32.gmra.mrb[226].mxu1 %vm664_vm0, %v15379_v22  ;;  %v4371_v7 = vmul.f32 %v4181_v25, %v14571_v59  ;;  %v4355_v9 = vadd.f32 %v4347_v30, %v15469_v1  ;;  %v4096_v6 = vpop.f32.mrb[122].mxu0  ;;  %v12599_v25 = vld [vmem:[%s13575_s30 + $0x7d0] sm:$0xff] }
 0x1ed   : > { %7407 = vmatprep.mubr.f32.mxu1 %v17304_v41  ;;  %v4378_v5 = vadd.f32 %v4370_v10, %v4354_v60  ;;  %v4348_v4 = vmul.f32 %v4096_v6, %v14577_v8  ;;  %v4098_v53 = vpop.f32.mrb[123].mxu0  ;;  %v13179_v10 = vpack.c.bf16 %v12597_v58, %v12581_v61  ;;  %v12586_v60 = vld [vmem:[%s13575_s30 + $0x768] sm:$0xff] }
 0x1ee   : > { %12607 = vmatmul.mubr.msk.f32.gmra.mrb[228].mxu0 %vm664_vm0, %v15248_v62  ;;  %v4185_v18 = vpop.f32.mrb[122].mxu1  ;;  %v4379_v12 = vadd.f32 %v4371_v7, %v4355_v9  ;;  %v4349_v29 = vmul.f32 %v4098_v53, %v14605_v17  ;;  %v12602_v7 = vld [vmem:[%s13575_s30 + $0x7e8] sm:$0xff]  ;;  %v12604_v53 = vld [vmem:[%s13575_s30 + $0x7f8] sm:$0xff] }
 0x1ef   : > { %v4372_v27 = vmul.f32 %v4185_v18, %v14607_v45  ;;  %v4187_v1 = vpop.f32.mrb[123].mxu1  ;;  %7324 = vmatprep.mubr.f32.mxu0 %v17304_v41  ;;  %12349 = vst [vmem:[%s14678_s10 + $0xc0] sm:$0xff] %v4378_v5  ;;  %v4356_v47 = vadd.f32 %v4348_v4, %v15483_v37  ;;  %v12588_v4 = vld [vmem:[%s13575_s30 + $0x778] sm:$0xff]  ;;  %v13185_v61 = vpack.c.bf16 %v12602_v7, %v12586_v60  ;;  %v17454_v60 = vld [vmem:[#allocation43_spill] sm:$0xff] }
 0x1f0   : > { %12611 = vmatmul.mubr.msk.f32.gmra.mrb[228].mxu1 %vm664_vm0, %v15248_v62  ;;  %v4373_v35 = vmul.f32 %v4187_v1, %v14642_v26  ;;  %12350 = vst [vmem:[%s14678_s10 + $0xc8] sm:$0xff] %v4379_v12  ;;  %v4357_v57 = vadd.f32 %v4349_v29, %v15491_v51  ;;  %v4102_v16 = vpop.f32.mrb[124].mxu0  ;;  %v13183_v1 = vpack.c.bf16 %v12599_v25, %v12583_v55 }
 0x1f1   : > { %7413 = vmatprep.mubr.f32.mxu1 %v17304_v41  ;;  %v4380_v46 = vadd.f32 %v4372_v27, %v4356_v47  ;;  %v4350_v34 = vmul.f32 %v4102_v16, %v14661_v38  ;;  %v4104_v30 = vpop.f32.mrb[125].mxu0  ;;  %v17451_v47 = vld [vmem:[#allocation35_spill] sm:$0xff]  ;;  %v13189_v16 = vpack.c.bf16 %v12604_v53, %v12588_v4 }
 0x1f2   : > { %12608 = vmatmul.mubr.msk.f32.gmra.mrb[230].mxu0 %vm664_vm0, %v15270_v28  ;;  %v4191_v37 = vpop.f32.mrb[124].mxu1  ;;  %v4381_v9 = vadd.f32 %v4373_v35, %v4357_v57  ;;  %v4351_v51 = vmul.f32 %v4104_v30, %v14663_v23 }
 0x1f3   : > { %v4374_v6 = vmul.f32 %v4191_v37, %v14668_v3  ;;  %v4193_v5 = vpop.f32.mrb[125].mxu1  ;;  %7484 = vmatprep.mubr.f32.mxu0 %v17304_v41  ;;  %12351 = vst [vmem:[%s14678_s10 + $0xd0] sm:$0xff] %v4380_v46  ;;  %v4358_v18 = vadd.f32 %v4350_v34, %v15504_v0  ;;  %v17452_v34 = vld [vmem:[#allocation34_spill] sm:$0xff] }
 0x1f4   : > { %12612 = vmatmul.mubr.msk.f32.gmra.mrb[230].mxu1 %vm664_vm0, %v15270_v28  ;;  %v4375_v12 = vmul.f32 %v4193_v5, %v14684_v54  ;;  %12352 = vst [vmem:[%s14678_s10 + $0xd8] sm:$0xff] %v4381_v9  ;;  %v4359_v29 = vadd.f32 %v4351_v51, %v15509_v32  ;;  %v4108_v27 = vpop.f32.mrb[126].mxu0  ;;  %v17453_v32 = vld [vmem:[#allocation7_spill] sm:$0xff] }
 0x1f5   : > { %7573 = vmatprep.mubr.f32.mxu1 %v17304_v41  ;;  %v4382_v58 = vadd.f32 %v4374_v6, %v4358_v18  ;;  %v4352_v35 = vmul.f32 %v4108_v27, %v17451_v47  ;;  %v4110_v57 = vpop.f32.mrb[127].mxu0  ;;  %v17456_v18 = vld [vmem:[#allocation9_spill] sm:$0xff] }
 0x1f6   : > { %12613 = vmatmul.mubr.msk.f32.vlgmr.msra.gmra.mrb[232].mxu0 %vm664_vm0, %v15294_v43  ;;  %v4197_v0 = vpop.f32.mrb[126].mxu1  ;;  %v4383_v46 = vadd.f32 %v4375_v12, %v4359_v29  ;;  %v4353_v30 = vmul.f32 %v4110_v57, %v17452_v34  ;;  %v17457_v29 = vld [vmem:[#allocation10_spill] sm:$0xff] }
 0x1f7   : > { %v4376_v37 = vmul.f32 %v4197_v0, %v17453_v32  ;;  %13180 = vmatpush1.bf16.msra.mxu0 %v13179_v10  ;;  %v4199_v55 = vpop.f32.mrb[127].mxu1  ;;  %12353 = vst [vmem:[%s14678_s10 + $0xe0] sm:$0xff] %v4382_v58  ;;  %v4360_v25 = vadd.f32 %v4352_v35, %v15520_v21  ;;  %7490 = vmatprep.mubr.f32.mxu0 %v17304_v41  ;;  %v17455_v10 = vld [vmem:[#allocation8_spill] sm:$0xff] }
 0x1f8   : > { %12617 = vmatmul.mubr.msk.f32.vlgmr.msra.gmra.mrb[232].mxu1 %vm664_vm0, %v15294_v43  ;;  %v4377_v7 = vmul.f32 %v4199_v55, %v17454_v60  ;;  %12354 = vst [vmem:[%s14678_s10 + $0xe8] sm:$0xff] %v4383_v46  ;;  %v4361_v9 = vadd.f32 %v4353_v30, %v15525_v20  ;;  %v4494_v51 = vpop.f32.mrb[128].mxu0  ;;  %13186 = vmatprep.subr.bf16.mxu0 %v13185_v61  ;;  %v17459_v0 = vld [vmem:[#allocation12_spill] sm:$0xff] }
 0x1f9   : > { %7579 = vmatprep.mubr.f32.mxu1 %v17304_v41  ;;  %13184 = vmatpush1.bf16.msra.mxu1 %v13183_v1  ;;  %v4384_v6 = vadd.f32 %v4376_v37, %v4360_v25  ;;  %v5148_v5 = vmul.f32 %v4494_v51, %v17455_v10  ;;  %v4496_v53 = vpop.f32.mrb[129].mxu0  ;;  %v17458_v1 = vld [vmem:[#allocation11_spill] sm:$0xff]  ;;  %v17460_v37 = vld [vmem:[#allocation13_spill] sm:$0xff]  ;;  %v17461_v25 = vld [vmem:[#allocation14_spill] sm:$0xff] }
 0x1fa   : > { %v4583_v4 = vpop.f32.mrb[128].mxu1  ;;  %12614 = vmatmul.mubr.msk.f32.gmra.mrb[234].mxu0 %vm664_vm0, %v15379_v22  ;;  %13190 = vmatprep.subr.bf16.mxu1 %v13189_v16  ;;  %v4385_v21 = vadd.f32 %v4377_v7, %v4361_v9  ;;  %v5149_v27 = vmul.f32 %v4496_v53, %v17457_v29  ;;  %v17462_v51 = vld [vmem:[#allocation15_spill] sm:$0xff] }
 0x1fb   : > { %v5164_v12 = vmul.f32 %v4583_v4, %v17456_v18  ;;  %v4585_v20 = vpop.f32.mrb[129].mxu1  ;;  %7496 = vmatprep.mubr.f32.mxu0 %v17304_v41  ;;  %12355 = vst [vmem:[%s14678_s10 + $0xf0] sm:$0xff] %v4384_v6  ;;  %v12601_v4 = vld [vmem:[%s13575_s30 + $0x7e0] sm:$0xff] }
 0x1fc   : > { %12618 = vmatmul.mubr.msk.f32.gmra.mrb[234].mxu1 %vm664_vm0, %v15379_v22  ;;  %v5165_v61 = vmul.f32 %v4585_v20, %v17458_v1  ;;  %12356 = vst [vmem:[%s14678_s10 + $0xf8] sm:$0xff] %v4385_v21  ;;  %v17463_v20 = vld [vmem:[#allocation16_spill] sm:$0xff] }
 0x1fd   : > { %7585 = vmatprep.mubr.f32.mxu1 %v17304_v41  ;;  %v15598_v58 = vadd.f32 %v5164_v12, %v5148_v5  ;;  %v4500_v35 = vpop.f32.mrb[130].mxu0  ;;  %v12585_v5 = vld [vmem:[%s13575_s30 + $0x760] sm:$0xff]  ;;  %v12587_v12 = vld [vmem:[%s13575_s30 + $0x770] sm:$0xff] }
 0x1fe   : > { %v15600_v57 = vadd.f32 %v5165_v61, %v5149_v27  ;;  %v5150_v16 = vmul.f32 %v4500_v35, %v17459_v0  ;;  %v4502_v30 = vpop.f32.mrb[131].mxu0  ;;  %12615 = vmatmul.mubr.msk.f32.gmra.mrb[236].mxu0 %vm664_vm0, %v15248_v62 }
 0x1ff   : > { %v4589_v46 = vpop.f32.mrb[130].mxu1  ;;  %v5151_v7 = vmul.f32 %v4502_v30, %v17461_v25  ;;  %7502 = vmatprep.mubr.f32.mxu0 %v17304_v41  ;;  %v12603_v30 = vld [vmem:[%s13575_s30 + $0x7f0] sm:$0xff]  ;;  %v17464_v25 = vld [vmem:[#allocation18_spill] sm:$0xff] }
 0x200   : > { %v5166_v55 = vmul.f32 %v4589_v46, %v17460_v37  ;;  %v4591_v9 = vpop.f32.mrb[131].mxu1  ;;  %12619 = vmatmul.mubr.msk.f32.gmra.mrb[236].mxu1 %vm664_vm0, %v15248_v62  ;;  %v13191_v10 = vpack.c.bf16 %v12603_v30, %v12587_v12 }
 0x201   : > { %v5167_v6 = vmul.f32 %v4591_v9, %v17462_v51  ;;  %7591 = vmatprep.mubr.f32.mxu1 %v17304_v41  ;;  %v4506_v21 = vpop.f32.mrb[132].mxu0  ;;  %v12646_v9 = vld [vmem:[%s13575_s30 + $0x808] sm:$0xff] }
 0x202   : > { %v15614_v53 = vadd.f32 %v5166_v55, %v5150_v16  ;;  %v5152_v61 = vmul.f32 %v4506_v21, %v17463_v20  ;;  %v4508_v46 = vpop.f32.mrb[133].mxu0  ;;  %12616 = vmatmul.mubr.msk.f32.gmra.mrb[238].mxu0 %vm664_vm0, %v15270_v28  ;;  %v12662_v51 = vld [vmem:[%s13575_s30 + $0x888] sm:$0xff]  ;;  %v17465_v16 = vld [vmem:[#allocation17_spill] sm:$0xff] }
 0x203   : > { %v15617_v27 = vadd.f32 %v5167_v6, %v5151_v7  ;;  %v4595_v35 = vpop.f32.mrb[132].mxu1  ;;  %v5153_v55 = vmul.f32 %v4508_v46, %v17465_v16  ;;  %7662 = vmatprep.mubr.f32.mxu0 %v17304_v41  ;;  %v13187_v7 = vpack.c.bf16 %v12601_v4, %v12585_v5  ;;  %v12648_v6 = vld [vmem:[%s13575_s30 + $0x818] sm:$0xff]  ;;  %v17466_v20 = vld [vmem:[#allocation19_spill] sm:$0xff]  ;;  %v17467_v46 = vld [vmem:[#allocation20_spill] sm:$0xff] }
 0x204   : > { %v5168_v37 = vmul.f32 %v4595_v35, %v17464_v25  ;;  %v4597_v0 = vpop.f32.mrb[133].mxu1  ;;  %12620 = vmatmul.mubr.msk.f32.gmra.mrb[238].mxu1 %vm664_vm0, %v15270_v28  ;;  %v12664_v21 = vld [vmem:[%s13575_s30 + $0x898] sm:$0xff]  ;;  %v13193_v35 = vpack.c.bf16 %v12662_v51, %v12646_v9 }
 0x205   : > { %v5169_v1 = vmul.f32 %v4597_v0, %v17466_v20  ;;  %7751 = vmatprep.mubr.f32.mxu1 %v17304_v41  ;;  %v4512_v18 = vpop.f32.mrb[134].mxu0  ;;  %v13197_v5 = vpack.c.bf16 %v12664_v21, %v12648_v6  ;;  %v17468_v4 = vld [vmem:[#allocation21_spill] sm:$0xff]  ;;  %v17469_v0 = vld [vmem:[#allocation22_spill] sm:$0xff] }
 0x206   : > { %v15634_v29 = vadd.f32 %v5168_v37, %v5152_v61  ;;  %v5154_v16 = vmul.f32 %v4512_v18, %v17467_v46  ;;  %v4514_v32 = vpop.f32.mrb[135].mxu0  ;;  %12621 = vmatmul.mubr.msk.f32.vlgmr.msra.gmra.mrb[240].mxu0 %vm664_vm0, %v15294_v43  ;;  %v17470_v37 = vld [vmem:[#allocation24_spill] sm:$0xff] }
 0x207   : > { %v15636_v25 = vadd.f32 %v5169_v1, %v5153_v55  ;;  %v4601_v60 = vpop.f32.mrb[134].mxu1  ;;  %v5155_v20 = vmul.f32 %v4514_v32, %v17469_v0  ;;  %13188 = vmatpush1.bf16.msra.mxu0 %v13187_v7  ;;  %7668 = vmatprep.mubr.f32.mxu0 %v17304_v41 }
 0x208   : > { %v5170_v34 = vmul.f32 %v4601_v60, %v17468_v4  ;;  %v4603_v47 = vpop.f32.mrb[135].mxu1  ;;  %12625 = vmatmul.mubr.msk.f32.vlgmr.msra.gmra.mrb[240].mxu1 %vm664_vm0, %v15294_v43  ;;  %13194 = vmatprep.subr.bf16.mxu0 %v13193_v35  ;;  %v17471_v60 = vld [vmem:[#allocation23_spill] sm:$0xff] }
 0x209   : > { %v5171_v1 = vmul.f32 %v4603_v47, %v17470_v37  ;;  %7757 = vmatprep.mubr.f32.mxu1 %v17304_v41  ;;  %v4672_v51 = vpop.f32.mrb[136].mxu0  ;;  %13192 = vmatpush1.bf16.msra.mxu1 %v13191_v10  ;;  %v17472_v47 = vld [vmem:[#allocation25_spill] sm:$0xff] }
 0x20a   : > { %v15648_v18 = vadd.f32 %v5170_v34, %v5154_v16  ;;  %v5188_v32 = vmul.f32 %v4672_v51, %v17471_v60  ;;  %v4674_v61 = vpop.f32.mrb[137].mxu0  ;;  %12622 = vmatmul.mubr.msk.f32.gmra.mrb[242].mxu0 %vm664_vm0, %v15379_v22  ;;  %13198 = vmatprep.subr.bf16.mxu1 %v13197_v5  ;;  %v17473_v34 = vld [vmem:[#allocation26_spill] sm:$0xff]  ;;  %v17475_v5 = vld [vmem:[#allocation28_spill] sm:$0xff] }
 0x20b   : > { %v15650_v12 = vadd.f32 %v5171_v1, %v5155_v20  ;;  %v4761_v30 = vpop.f32.mrb[136].mxu1  ;;  %v5189_v9 = vmul.f32 %v4674_v61, %v17472_v47  ;;  %7674 = vmatprep.mubr.f32.mxu0 %v17304_v41  ;;  %v17474_v20 = vld [vmem:[#allocation27_spill] sm:$0xff] }
 0x20c   : > { %12626 = vmatmul.mubr.msk.f32.gmra.mrb[242].mxu1 %vm664_vm0, %v15379_v22  ;;  %v5212_v16 = vmul.f32 %v4761_v30, %v17473_v34  ;;  %v4763_v55 = vpop.f32.mrb[137].mxu1  ;;  %v5196_v10 = vadd.f32 %v5188_v32, %v15598_v58  ;;  %v17476_v32 = vld [vmem:[#allocation29_spill] sm:$0xff] }
 0x20d   : > { %v5213_v7 = vmul.f32 %v4763_v55, %v17474_v20  ;;  %7763 = vmatprep.mubr.f32.mxu1 %v17304_v41  ;;  %v5197_v6 = vadd.f32 %v5189_v9, %v15600_v57  ;;  %v4678_v21 = vpop.f32.mrb[138].mxu0  ;;  %v17477_v55 = vld [vmem:[#allocation30_spill] sm:$0xff] }
 0x20e   : > { %v15664_v35 = vadd.f32 %v5212_v16, %v5196_v10  ;;  %v5190_v1 = vmul.f32 %v4678_v21, %v17475_v5  ;;  %v4680_v51 = vpop.f32.mrb[139].mxu0  ;;  %12623 = vmatmul.mubr.msk.f32.gmra.mrb[244].mxu0 %vm664_vm0, %v15248_v62  ;;  %v12645_v16 = vld [vmem:[%s13575_s30 + $0x800] sm:$0xff]  ;;  %v17478_v5 = vld [vmem:[#allocation31_spill] sm:$0xff] }
 0x20f   : > { %v4767_v61 = vpop.f32.mrb[138].mxu1  ;;  %v15669_v58 = vadd.f32 %v5213_v7, %v5197_v6  ;;  %v5191_v30 = vmul.f32 %v4680_v51, %v17476_v32  ;;  %7680 = vmatprep.mubr.f32.mxu0 %v17304_v41  ;;  %v12661_v10 = vld [vmem:[%s13575_s30 + $0x880] sm:$0xff] }
 0x210   : > { %12627 = vmatmul.mubr.msk.f32.gmra.mrb[244].mxu1 %vm664_vm0, %v15248_v62  ;;  %v5214_v57 = vmul.f32 %v4767_v61, %v17477_v55  ;;  %v4769_v9 = vpop.f32.mrb[139].mxu1  ;;  %v5198_v21 = vadd.f32 %v5190_v1, %v15614_v53  ;;  %v12647_v62 = vld [vmem:[%s13575_s30 + $0x810] sm:$0xff]  ;;  %v13195_v53 = vpack.c.bf16 %v12661_v10, %v12645_v16 }
 0x211   : > { %v5215_v7 = vmul.f32 %v4769_v9, %v17478_v5  ;;  %7769 = vmatprep.mubr.f32.mxu1 %v17304_v41  ;;  %v5199_v6 = vadd.f32 %v5191_v30, %v15617_v27  ;;  %v4684_v51 = vpop.f32.mrb[140].mxu0  ;;  %v17479_v55 = vld [vmem:[#allocation32_spill] sm:$0xff]  ;;  %v12650_v9 = vld [vmem:[%s13575_s30 + $0x828] sm:$0xff]  ;;  %v17480_v27 = vld [vmem:[#allocation33_spill] sm:$0xff] }
 0x212   : > { %v15683_v61 = vadd.f32 %v5214_v57, %v5198_v21  ;;  %v5192_v32 = vmul.f32 %v4684_v51, %v17479_v55  ;;  %v4686_v20 = vpop.f32.mrb[141].mxu0  ;;  %12624 = vmatmul.mubr.msk.f32.gmra.mrb[246].mxu0 %vm664_vm0, %v15270_v28  ;;  %v12663_v1 = vld [vmem:[%s13575_s30 + $0x890] sm:$0xff]  ;;  %v12666_v5 = vld [vmem:[%s13575_s30 + $0x8a8] sm:$0xff]  ;;  %v12652_v51 = vld [vmem:[%s13575_s30 + $0x838] sm:$0xff] }
 0x213   : > { %v4773_v34 = vpop.f32.mrb[140].mxu1  ;;  %v15691_v47 = vadd.f32 %v5215_v7, %v5199_v6  ;;  %v5193_v30 = vmul.f32 %v4686_v20, %v17480_v27  ;;  %v17481_v57 = vld [vmem:[#allocation36_spill] sm:$0xff]  ;;  %7840 = vmatprep.mubr.f32.mxu0 %v17304_v41  ;;  %v12668_v55 = vld [vmem:[%s13575_s30 + $0x8b8] sm:$0xff]  ;;  %v13199_v20 = vpack.c.bf16 %v12663_v1, %v12647_v62  ;;  %v13201_v6 = vpack.c.bf16 %v12666_v5, %v12650_v9 }
 0x214   : > { %12628 = vmatmul.mubr.msk.f32.gmra.mrb[246].mxu1 %vm664_vm0, %v15270_v28  ;;  %v5216_v21 = vmul.f32 %v4773_v34, %v17481_v57  ;;  %v4775_v60 = vpop.f32.mrb[141].mxu1  ;;  %v5200_v37 = vadd.f32 %v5192_v32, %v15634_v29  ;;  %v13205_v0 = vpack.c.bf16 %v12668_v55, %v12652_v51 }
 0x215   : > { %v5217_v16 = vmul.f32 %v4775_v60, %v17376_v19  ;;  %7929 = vmatprep.mubr.f32.mxu1 %v17304_v41  ;;  %v5201_v10 = vadd.f32 %v5193_v30, %v15636_v25  ;;  %v4690_v7 = vpop.f32.mrb[142].mxu0 }
 0x216   : > { %v15704_v27 = vadd.f32 %v5216_v21, %v5200_v37  ;;  %v5194_v28 = vmul.f32 %v4690_v7, %v17377_v15  ;;  %v4692_v34 = vpop.f32.mrb[143].mxu0  ;;  %12629 = vmatmul.mubr.msk.f32.vlgmr.msra.gmra.mrb[248].mxu0 %vm664_vm0, %v15294_v43 }
 0x217   : > { %v4779_v57 = vpop.f32.mrb[142].mxu1  ;;  %v15709_v29 = vadd.f32 %v5217_v16, %v5201_v10  ;;  %v5195_v60 = vmul.f32 %v4692_v34, %v17332_v63  ;;  %13196 = vmatpush1.bf16.msra.mxu0 %v13195_v53  ;;  %7846 = vmatprep.mubr.f32.mxu0 %v17304_v41 }
 0x218   : > { %12633 = vmatmul.mubr.msk.f32.vlgmr.msra.gmra.mrb[248].mxu1 %vm664_vm0, %v15294_v43  ;;  %v5218_v25 = vmul.f32 %v4779_v57, %v17333_v42  ;;  %v4781_v37 = vpop.f32.mrb[143].mxu1  ;;  %v5202_v5 = vadd.f32 %v5194_v28, %v15648_v18  ;;  %13202 = vmatprep.subr.bf16.mxu0 %v13201_v6  ;;  %v15742_v6 = vld [vmem:[%s17159_s2 + $0x10] sm:$0xff] }
 0x219   : > { %v5219_v32 = vmul.f32 %v4781_v37, %v14294_v44  ;;  %7935 = vmatprep.mubr.f32.mxu1 %v17304_v41  ;;  %v5203_v55 = vadd.f32 %v5195_v60, %v15650_v12  ;;  %v4850_v62 = vpop.f32.mrb[144].mxu0  ;;  %13200 = vmatpush1.bf16.msra.mxu1 %v13199_v20  ;;  %v12665_v37 = vld [vmem:[%s13575_s30 + $0x8a0] sm:$0xff] }
 0x21a   : > { %v15720_v1 = vadd.f32 %v5218_v25, %v5202_v5  ;;  %v5236_v43 = vmul.f32 %v4850_v62, %v14306_v56  ;;  %v4852_v9 = vpop.f32.mrb[145].mxu0  ;;  %12630 = vmatmul.mubr.msk.f32.gmra.mrb[250].mxu0 %vm664_vm0, %v15379_v22  ;;  %13206 = vmatprep.subr.bf16.mxu1 %v13205_v0  ;;  %v12649_v25 = vld [vmem:[%s13575_s30 + $0x820] sm:$0xff] }
 0x21b   : > { %v4939_v18 = vpop.f32.mrb[144].mxu1  ;;  %v15725_v53 = vadd.f32 %v5219_v32, %v5203_v55  ;;  %v5237_v30 = vmul.f32 %v4852_v9, %v17340_v14  ;;  %7852 = vmatprep.mubr.f32.mxu0 %v17304_v41  ;;  %v17482_v32 = vld [vmem:[#allocation48_spill] sm:$0xff] }
 0x21c   : > { %12634 = vmatmul.mubr.msk.f32.gmra.mrb[250].mxu1 %vm664_vm0, %v15379_v22  ;;  %v5260_v12 = vmul.f32 %v4939_v18, %v17378_v39  ;;  %v4941_v57 = vpop.f32.mrb[145].mxu1  ;;  %v5244_v21 = vadd.f32 %v5236_v43, %v15664_v35  ;;  %v12651_v9 = vld [vmem:[%s13575_s30 + $0x830] sm:$0xff] }
 0x21d   : > { %v5261_v51 = vmul.f32 %v4941_v57, %v14342_v33  ;;  %7941 = vmatprep.mubr.f32.mxu1 %v17304_v41  ;;  %v5245_v0 = vadd.f32 %v5237_v30, %v15669_v58  ;;  %v4856_v16 = vpop.f32.mrb[146].mxu0  ;;  %v17483_v30 = vld [vmem:[#allocation49_spill] sm:$0xff] }
 0x21e   : > { %v15736_v10 = vadd.f32 %v5260_v12, %v5244_v21  ;;  %v5238_v7 = vmul.f32 %v4856_v16, %v14356_v52  ;;  %v4858_v20 = vpop.f32.mrb[147].mxu0  ;;  %12631 = vmatmul.mubr.msk.f32.gmra.mrb[252].mxu0 %vm664_vm0, %v15742_v6  ;;  %v15766_v21 = vld [vmem:[%s17159_s2 + $0x18] sm:$0xff]  ;;  %v12670_v16 = vld [vmem:[%s13575_s30 + $0x8c8] sm:$0xff] }
 0x21f   : > { %v4945_v35 = vpop.f32.mrb[146].mxu1  ;;  %v15746_v28 = vadd.f32 %v5261_v51, %v5245_v0  ;;  %v5239_v58 = vmul.f32 %v4858_v20, %v17412_v40  ;;  %7858 = vmatprep.mubr.f32.mxu0 %v17304_v41  ;;  %v13203_v51 = vpack.c.bf16 %v12665_v37, %v12649_v25  ;;  %v12654_v0 = vld [vmem:[%s13575_s30 + $0x848] sm:$0xff]  ;;  %v17484_v20 = vld [vmem:[#allocation50_spill] sm:$0xff] }
 0x220   : > { %12635 = vmatmul.mubr.msk.f32.gmra.mrb[252].mxu1 %vm664_vm0, %v15742_v6  ;;  %v5262_v34 = vmul.f32 %v4945_v35, %v17413_v48  ;;  %v4947_v60 = vpop.f32.mrb[147].mxu1  ;;  %v5246_v5 = vadd.f32 %v5238_v7, %v15683_v61 }
 0x221   : > { %v5263_v55 = vmul.f32 %v4947_v60, %v17482_v32  ;;  %7947 = vmatprep.mubr.f32.mxu1 %v17304_v41  ;;  %v5247_v62 = vadd.f32 %v5239_v58, %v15691_v47  ;;  %v4862_v43 = vpop.f32.mrb[148].mxu0  ;;  %v12667_v47 = vld [vmem:[%s13575_s30 + $0x8b0] sm:$0xff]  ;;  %v17485_v58 = vld [vmem:[#allocation51_spill] sm:$0xff]  ;;  %v15792_v32 = vld [vmem:[%s17159_s2] sm:$0xff] }
 0x222   : > { %v15760_v18 = vadd.f32 %v5262_v34, %v5246_v5  ;;  %v5240_v12 = vmul.f32 %v4862_v43, %v17483_v30  ;;  %v4864_v57 = vpop.f32.mrb[149].mxu0  ;;  %12632 = vmatmul.mubr.msk.f32.gmra.mrb[254].mxu0 %vm664_vm0, %v15766_v21  ;;  %v12656_v5 = vld [vmem:[%s13575_s30 + $0x858] sm:$0xff] }
 0x223   : > { %v4951_v61 = vpop.f32.mrb[148].mxu1  ;;  %v15773_v7 = vadd.f32 %v5263_v55, %v5247_v62  ;;  %v5241_v35 = vmul.f32 %v4864_v57, %v17484_v20  ;;  %8244 = vmatprep.mubr.f32.mxu0 %v17304_v41  ;;  %v12672_v43 = vld [vmem:[%s13575_s30 + $0x8d8] sm:$0xff]  ;;  %v13207_v62 = vpack.c.bf16 %v12667_v47, %v12651_v9  ;;  %v13209_v57 = vpack.c.bf16 %v12670_v16, %v12654_v0 }
 0x224   : > { %12636 = vmatmul.mubr.msk.f32.gmra.mrb[254].mxu1 %vm664_vm0, %v15766_v21  ;;  %v5264_v34 = vmul.f32 %v4951_v61, %v17485_v58  ;;  %v4953_v60 = vpop.f32.mrb[149].mxu1  ;;  %v5248_v30 = vadd.f32 %v5240_v12, %v15704_v27  ;;  %v13213_v12 = vpack.c.bf16 %v12672_v43, %v12656_v5 }
 0x225   : > { %v5265_v25 = vmul.f32 %v4953_v60, %v14427_v49  ;;  %8333 = vmatprep.mubr.f32.mxu1 %v17304_v41  ;;  %v5249_v37 = vadd.f32 %v5241_v35, %v15709_v29  ;;  %v4868_v55 = vpop.f32.mrb[150].mxu0 }
 0x226   : > { %v15786_v20 = vadd.f32 %v5264_v34, %v5248_v30  ;;  %v5242_v61 = vmul.f32 %v4868_v55, %v14437_v2  ;;  %v4870_v58 = vpop.f32.mrb[151].mxu0  ;;  %12677 = vmatmul.mubr.msk.f32.vlgmr.msra.gmra.mrb[0].mxu0 %vm664_vm0, %v15792_v32 }
 0x227   : > { %v4957_v27 = vpop.f32.mrb[150].mxu1  ;;  %v15796_v60 = vadd.f32 %v5265_v25, %v5249_v37  ;;  %v5243_v29 = vmul.f32 %v4870_v58, %v14464_v50  ;;  %13204 = vmatpush1.bf16.msra.mxu0 %v13203_v51  ;;  %8250 = vmatprep.mubr.f32.mxu0 %v17304_v41 }
 0x228   : > { %12681 = vmatmul.mubr.msk.f32.vlgmr.msra.gmra.mrb[0].mxu1 %vm664_vm0, %v15792_v32  ;;  %v5266_v9 = vmul.f32 %v4957_v27, %v14492_v11  ;;  %v4959_v30 = vpop.f32.mrb[151].mxu1  ;;  %v5250_v47 = vadd.f32 %v5242_v61, %v15720_v1  ;;  %13210 = vmatprep.subr.bf16.mxu0 %v13209_v57 }
 0x229   : > { %v5267_v0 = vmul.f32 %v4959_v30, %v14497_v13  ;;  %8339 = vmatprep.mubr.f32.mxu1 %v17304_v41  ;;  %v5251_v16 = vadd.f32 %v5243_v29, %v15725_v53  ;;  %v5028_v35 = vpop.f32.mrb[152].mxu0  ;;  %13208 = vmatpush1.bf16.msra.mxu1 %v13207_v62  ;;  %v12653_v30 = vld [vmem:[%s13575_s30 + $0x840] sm:$0xff] }
 0x22a   : > { %v15807_v58 = vadd.f32 %v5266_v9, %v5250_v47  ;;  %v5284_v34 = vmul.f32 %v5028_v35, %v14524_v31  ;;  %v5030_v5 = vpop.f32.mrb[153].mxu0  ;;  %12678 = vmatmul.mubr.msk.f32.gmra.mrb[2].mxu0 %vm664_vm0, %v15379_v22  ;;  %13214 = vmatprep.subr.bf16.mxu1 %v13213_v12  ;;  %v12669_v47 = vld [vmem:[%s13575_s30 + $0x8c0] sm:$0xff] }
 0x22b   : > { %v5117_v1 = vpop.f32.mrb[152].mxu1  ;;  %v15812_v51 = vadd.f32 %v5267_v0, %v5251_v16  ;;  %v5285_v43 = vmul.f32 %v5030_v5, %v14540_v36  ;;  %8256 = vmatprep.mubr.f32.mxu0 %v17304_v41  ;;  %v12655_v5 = vld [vmem:[%s13575_s30 + $0x850] sm:$0xff] }
 0x22c   : > { %12682 = vmatmul.mubr.msk.f32.gmra.mrb[2].mxu1 %vm664_vm0, %v15379_v22  ;;  %v5308_v53 = vmul.f32 %v5117_v1, %v14554_v24  ;;  %v5119_v25 = vpop.f32.mrb[153].mxu1  ;;  %v5292_v37 = vadd.f32 %v5284_v34, %v15736_v10 }
 0x22d   : > { %v5309_v55 = vmul.f32 %v5119_v25, %v14571_v59  ;;  %8345 = vmatprep.mubr.f32.mxu1 %v17304_v41  ;;  %v5293_v62 = vadd.f32 %v5285_v43, %v15746_v28  ;;  %v5034_v57 = vpop.f32.mrb[154].mxu0  ;;  %v13211_v25 = vpack.c.bf16 %v12669_v47, %v12653_v30 }
 0x22e   : > { %v5316_v61 = vadd.f32 %v5308_v53, %v5292_v37  ;;  %v5286_v22 = vmul.f32 %v5034_v57, %v14577_v8  ;;  %v5036_v27 = vpop.f32.mrb[155].mxu0  ;;  %12679 = vmatmul.mubr.msk.f32.gmra.mrb[4].mxu0 %vm664_vm0, %v15742_v6  ;;  %v12671_v37 = vld [vmem:[%s13575_s30 + $0x8d0] sm:$0xff] }
 0x22f   : > { %v5123_v12 = vpop.f32.mrb[154].mxu1  ;;  %v5317_v10 = vadd.f32 %v5309_v55, %v5293_v62  ;;  %v5287_v29 = vmul.f32 %v5036_v27, %v14605_v17  ;;  %8262 = vmatprep.mubr.f32.mxu0 %v17304_v41  ;;  %v12658_v55 = vld [vmem:[%s13575_s30 + $0x868] sm:$0xff]  ;;  %v12660_v27 = vld [vmem:[%s13575_s30 + $0x878] sm:$0xff]  ;;  %v13215_v30 = vpack.c.bf16 %v12671_v37, %v12655_v5 }
 0x230   : > { %12683 = vmatmul.mubr.msk.f32.gmra.mrb[4].mxu1 %vm664_vm0, %v15742_v6  ;;  %v5310_v9 = vmul.f32 %v5123_v12, %v14607_v45  ;;  %v5125_v28 = vpop.f32.mrb[155].mxu1  ;;  %12421 = vst [vmem:[%s14678_s10 + $0x100] sm:$0xff] %v5316_v61  ;;  %v5294_v0 = vadd.f32 %v5286_v22, %v15760_v18  ;;  %v12674_v62 = vld [vmem:[%s13575_s30 + $0x8e8] sm:$0xff]  ;;  %v12676_v12 = vld [vmem:[%s13575_s30 + $0x8f8] sm:$0xff] }
 0x231   : > { %v5311_v16 = vmul.f32 %v5125_v28, %v14642_v26  ;;  %8351 = vmatprep.mubr.f32.mxu1 %v17304_v41  ;;  %12422 = vst [vmem:[%s14678_s10 + $0x108] sm:$0xff] %v5317_v10  ;;  %v5295_v35 = vadd.f32 %v5287_v29, %v15773_v7  ;;  %v5040_v34 = vpop.f32.mrb[156].mxu0  ;;  %v13217_v47 = vpack.c.bf16 %v12674_v62, %v12658_v55  ;;  %v17489_v55 = vld [vmem:[#allocation43_spill] sm:$0xff] }
 0x232   : > { %v5318_v1 = vadd.f32 %v5310_v9, %v5294_v0  ;;  %v5288_v43 = vmul.f32 %v5040_v34, %v14661_v38  ;;  %v5042_v53 = vpop.f32.mrb[157].mxu0  ;;  %12680 = vmatmul.mubr.msk.f32.gmra.mrb[6].mxu0 %vm664_vm0, %v15766_v21 }
 0x233   : > { %v5129_v18 = vpop.f32.mrb[156].mxu1  ;;  %v5319_v57 = vadd.f32 %v5311_v16, %v5295_v35  ;;  %v5289_v7 = vmul.f32 %v5042_v53, %v14663_v23  ;;  %8422 = vmatprep.mubr.f32.mxu0 %v17304_v41  ;;  %v17486_v16 = vld [vmem:[#allocation35_spill] sm:$0xff]  ;;  %v17487_v53 = vld [vmem:[#allocation34_spill] sm:$0xff] }
 0x234   : > { %12684 = vmatmul.mubr.msk.f32.gmra.mrb[6].mxu1 %vm664_vm0, %v15766_v21  ;;  %v5312_v61 = vmul.f32 %v5129_v18, %v14668_v3  ;;  %v5131_v22 = vpop.f32.mrb[157].mxu1  ;;  %12423 = vst [vmem:[%s14678_s10 + $0x110] sm:$0xff] %v5318_v1  ;;  %v5296_v10 = vadd.f32 %v5288_v43, %v15786_v20  ;;  %v13221_v1 = vpack.c.bf16 %v12676_v12, %v12660_v27  ;;  %v17490_v27 = vld [vmem:[#allocation8_spill] sm:$0xff] }
 0x235   : > { %v5313_v29 = vmul.f32 %v5131_v22, %v14684_v54  ;;  %8511 = vmatprep.mubr.f32.mxu1 %v17304_v41  ;;  %12424 = vst [vmem:[%s14678_s10 + $0x118] sm:$0xff] %v5319_v57  ;;  %v5297_v9 = vadd.f32 %v5289_v7, %v15796_v60  ;;  %v5046_v28 = vpop.f32.mrb[158].mxu0  ;;  %v17488_v60 = vld [vmem:[#allocation7_spill] sm:$0xff] }
 0x236   : > { %v5320_v0 = vadd.f32 %v5312_v61, %v5296_v10  ;;  %v5290_v35 = vmul.f32 %v5046_v28, %v17486_v16  ;;  %v5048_v34 = vpop.f32.mrb[159].mxu0  ;;  %12685 = vmatmul.mubr.msk.f32.vlgmr.msra.gmra.mrb[8].mxu0 %vm664_vm0, %v15792_v32  ;;  %v17492_v28 = vld [vmem:[#allocation10_spill] sm:$0xff] }
 0x237   : > { %v5135_v20 = vpop.f32.mrb[158].mxu1  ;;  %v5321_v43 = vadd.f32 %v5313_v29, %v5297_v9  ;;  %v5291_v18 = vmul.f32 %v5048_v34, %v17487_v53  ;;  %13212 = vmatpush1.bf16.msra.mxu0 %v13211_v25  ;;  %8428 = vmatprep.mubr.f32.mxu0 %v17304_v41  ;;  %v17491_v29 = vld [vmem:[#allocation9_spill] sm:$0xff] }
 0x238   : > { %12689 = vmatmul.mubr.msk.f32.vlgmr.msra.gmra.mrb[8].mxu1 %vm664_vm0, %v15792_v32  ;;  %v5314_v57 = vmul.f32 %v5135_v20, %v17488_v60  ;;  %v5137_v5 = vpop.f32.mrb[159].mxu1  ;;  %12425 = vst [vmem:[%s14678_s10 + $0x120] sm:$0xff] %v5320_v0  ;;  %v5298_v37 = vadd.f32 %v5290_v35, %v15807_v58  ;;  %13218 = vmatprep.subr.bf16.mxu0 %v13217_v47  ;;  %v15877_v58 = vld [vmem:[%s17159_s2 + $0x8] sm:$0xff] }
 0x239   : > { %v5315_v62 = vmul.f32 %v5137_v5, %v17489_v55  ;;  %8517 = vmatprep.mubr.f32.mxu1 %v17304_v41  ;;  %12426 = vst [vmem:[%s14678_s10 + $0x128] sm:$0xff] %v5321_v43  ;;  %v5299_v7 = vadd.f32 %v5291_v18, %v15812_v51  ;;  %v5432_v61 = vpop.f32.mrb[160].mxu0  ;;  %13216 = vmatpush1.bf16.msra.mxu1 %v13215_v30  ;;  %v17493_v0 = vld [vmem:[#allocation11_spill] sm:$0xff]  ;;  %v17494_v43 = vld [vmem:[#allocation12_spill] sm:$0xff] }
 0x23a   : > { %v5322_v22 = vadd.f32 %v5314_v57, %v5298_v37  ;;  %v6086_v25 = vmul.f32 %v5432_v61, %v17490_v27  ;;  %v5434_v10 = vpop.f32.mrb[161].mxu0  ;;  %12686 = vmatmul.mubr.msk.f32.gmra.mrb[10].mxu0 %vm664_vm0, %v15877_v58  ;;  %13222 = vmatprep.subr.bf16.mxu1 %v13221_v1  ;;  %v17495_v37 = vld [vmem:[#allocation13_spill] sm:$0xff] }
 0x23b   : > { %v5521_v12 = vpop.f32.mrb[160].mxu1  ;;  %v5323_v51 = vadd.f32 %v5315_v62, %v5299_v7  ;;  %v6087_v30 = vmul.f32 %v5434_v10, %v17492_v28  ;;  %8434 = vmatprep.mubr.f32.mxu0 %v17304_v41  ;;  %v17496_v7 = vld [vmem:[#allocation14_spill] sm:$0xff] }
 0x23c   : > { %v6102_v9 = vmul.f32 %v5521_v12, %v17491_v29  ;;  %v5523_v47 = vpop.f32.mrb[161].mxu1  ;;  %12690 = vmatmul.mubr.msk.f32.gmra.mrb[10].mxu1 %vm664_vm0, %v15877_v58  ;;  %12427 = vst [vmem:[%s14678_s10 + $0x130] sm:$0xff] %v5322_v22  ;;  %v12657_v10 = vld [vmem:[%s13575_s30 + $0x860] sm:$0xff] }
 0x23d   : > { %v6103_v35 = vmul.f32 %v5523_v47, %v17493_v0  ;;  %8523 = vmatprep.mubr.f32.mxu1 %v17304_v41  ;;  %12428 = vst [vmem:[%s14678_s10 + $0x138] sm:$0xff] %v5323_v51  ;;  %v5438_v20 = vpop.f32.mrb[162].mxu0  ;;  %v12673_v51 = vld [vmem:[%s13575_s30 + $0x8e0] sm:$0xff]  ;;  %v12659_v47 = vld [vmem:[%s13575_s30 + $0x870] sm:$0xff] }
 0x23e   : > { %v15890_v34 = vadd.f32 %v6102_v9, %v6086_v25  ;;  %v6088_v18 = vmul.f32 %v5438_v20, %v17494_v43  ;;  %v5440_v5 = vpop.f32.mrb[163].mxu0  ;;  %12687 = vmatmul.mubr.msk.f32.gmra.mrb[12].mxu0 %vm664_vm0, %v15742_v6  ;;  %v17497_v25 = vld [vmem:[#allocation15_spill] sm:$0xff]  ;;  %v17498_v20 = vld [vmem:[#allocation16_spill] sm:$0xff]  ;;  %v17499_v43 = vld [vmem:[#allocation18_spill] sm:$0xff] }
 0x23f   : > { %v15892_v1 = vadd.f32 %v6103_v35, %v6087_v30  ;;  %v5527_v57 = vpop.f32.mrb[162].mxu1  ;;  %v6089_v61 = vmul.f32 %v5440_v5, %v17496_v7  ;;  %8440 = vmatprep.mubr.f32.mxu0 %v17304_v41 }
 0x240   : > { %v6104_v62 = vmul.f32 %v5527_v57, %v17495_v37  ;;  %v5529_v22 = vpop.f32.mrb[163].mxu1  ;;  %12691 = vmatmul.mubr.msk.f32.gmra.mrb[12].mxu1 %vm664_vm0, %v15742_v6  ;;  %v12734_v37 = vld [vmem:[%s13575_s30 + $0x988] sm:$0xff] }
 0x241   : > { %v6105_v12 = vmul.f32 %v5529_v22, %v17497_v25  ;;  %8529 = vmatprep.mubr.f32.mxu1 %v17304_v41  ;;  %v5444_v30 = vpop.f32.mrb[164].mxu0  ;;  %v12675_v22 = vld [vmem:[%s13575_s30 + $0x8f0] sm:$0xff]  ;;  %v12718_v25 = vld [vmem:[%s13575_s30 + $0x908] sm:$0xff] }
 0x242   : > { %v15906_v9 = vadd.f32 %v6104_v62, %v6088_v18  ;;  %v6090_v57 = vmul.f32 %v5444_v30, %v17498_v20  ;;  %v5446_v7 = vpop.f32.mrb[165].mxu0  ;;  %12688 = vmatmul.mubr.msk.f32.gmra.mrb[14].mxu0 %vm664_vm0, %v15766_v21  ;;  %v17500_v18 = vld [vmem:[#allocation17_spill] sm:$0xff]  ;;  %v17501_v20 = vld [vmem:[#allocation19_spill] sm:$0xff]  ;;  %v13223_v60 = vpack.c.bf16 %v12675_v22, %v12659_v47 }
 0x243   : > { %v15909_v35 = vadd.f32 %v6105_v12, %v6089_v61  ;;  %v5533_v5 = vpop.f32.mrb[164].mxu1  ;;  %v6091_v62 = vmul.f32 %v5446_v7, %v17500_v18  ;;  %8600 = vmatprep.mubr.f32.mxu0 %v17304_v41  ;;  %v13219_v61 = vpack.c.bf16 %v12673_v51, %v12657_v10  ;;  %v12720_v12 = vld [vmem:[%s13575_s30 + $0x918] sm:$0xff]  ;;  %v17504_v47 = vld [vmem:[#allocation23_spill] sm:$0xff] }
 0x244   : > { %v6106_v0 = vmul.f32 %v5533_v5, %v17499_v43  ;;  %v5535_v28 = vpop.f32.mrb[165].mxu1  ;;  %12692 = vmatmul.mubr.msk.f32.gmra.mrb[14].mxu1 %vm664_vm0, %v15766_v21  ;;  %v12736_v30 = vld [vmem:[%s13575_s30 + $0x998] sm:$0xff]  ;;  %v13225_v5 = vpack.c.bf16 %v12734_v37, %v12718_v25 }
 0x245   : > { %v6107_v29 = vmul.f32 %v5535_v28, %v17501_v20  ;;  %8689 = vmatprep.mubr.f32.mxu1 %v17304_v41  ;;  %v5450_v55 = vpop.f32.mrb[166].mxu0  ;;  %v13229_v10 = vpack.c.bf16 %v12736_v30, %v12720_v12  ;;  %v17502_v28 = vld [vmem:[#allocation22_spill] sm:$0xff] }
 0x246   : > { %v15926_v27 = vadd.f32 %v6106_v0, %v6090_v57  ;;  %v6092_v7 = vmul.f32 %v5450_v55, %v17467_v46  ;;  %v5452_v53 = vpop.f32.mrb[167].mxu0  ;;  %12693 = vmatmul.mubr.msk.f32.vlgmr.msra.gmra.mrb[16].mxu0 %vm664_vm0, %v15792_v32  ;;  %v17503_v0 = vld [vmem:[#allocation24_spill] sm:$0xff] }
 0x247   : > { %v15928_v43 = vadd.f32 %v6107_v29, %v6091_v62  ;;  %v5539_v18 = vpop.f32.mrb[166].mxu1  ;;  %v6093_v20 = vmul.f32 %v5452_v53, %v17502_v28  ;;  %13220 = vmatpush1.bf16.msra.mxu0 %v13219_v61  ;;  %8606 = vmatprep.mubr.f32.mxu0 %v17304_v41  ;;  %v17506_v62 = vld [vmem:[#allocation26_spill] sm:$0xff] }
 0x248   : > { %v6108_v51 = vmul.f32 %v5539_v18, %v17468_v4  ;;  %v5541_v16 = vpop.f32.mrb[167].mxu1  ;;  %12697 = vmatmul.mubr.msk.f32.vlgmr.msra.gmra.mrb[16].mxu1 %vm664_vm0, %v15792_v32  ;;  %13226 = vmatprep.subr.bf16.mxu0 %v13225_v5 }
 0x249   : > { %v6109_v29 = vmul.f32 %v5541_v16, %v17503_v0  ;;  %8695 = vmatprep.mubr.f32.mxu1 %v17304_v41  ;;  %v5610_v37 = vpop.f32.mrb[168].mxu0  ;;  %13224 = vmatpush1.bf16.msra.mxu1 %v13223_v60  ;;  %v17505_v16 = vld [vmem:[#allocation25_spill] sm:$0xff] }
 0x24a   : > { %v15940_v55 = vadd.f32 %v6108_v51, %v6092_v7  ;;  %v6126_v53 = vmul.f32 %v5610_v37, %v17504_v47  ;;  %v5612_v57 = vpop.f32.mrb[169].mxu0  ;;  %12694 = vmatmul.mubr.msk.f32.gmra.mrb[18].mxu0 %vm664_vm0, %v15877_v58  ;;  %13230 = vmatprep.subr.bf16.mxu1 %v13229_v10  ;;  %v17508_v51 = vld [vmem:[#allocation28_spill] sm:$0xff] }
 0x24b   : > { %v15942_v25 = vadd.f32 %v6109_v29, %v6093_v20  ;;  %v5699_v22 = vpop.f32.mrb[168].mxu1  ;;  %v6127_v18 = vmul.f32 %v5612_v57, %v17505_v16  ;;  %8612 = vmatprep.mubr.f32.mxu0 %v17304_v41  ;;  %v17507_v20 = vld [vmem:[#allocation27_spill] sm:$0xff] }
 0x24c   : > { %12698 = vmatmul.mubr.msk.f32.gmra.mrb[18].mxu1 %vm664_vm0, %v15877_v58  ;;  %v6150_v61 = vmul.f32 %v5699_v22, %v17506_v62  ;;  %v5701_v12 = vpop.f32.mrb[169].mxu1  ;;  %v6134_v60 = vadd.f32 %v6126_v53, %v15890_v34  ;;  %v17509_v53 = vld [vmem:[#allocation29_spill] sm:$0xff] }
 0x24d   : > { %v6151_v30 = vmul.f32 %v5701_v12, %v17507_v20  ;;  %8701 = vmatprep.mubr.f32.mxu1 %v17304_v41  ;;  %v6135_v5 = vadd.f32 %v6127_v18, %v15892_v1  ;;  %v5616_v7 = vpop.f32.mrb[170].mxu0  ;;  %v17510_v12 = vld [vmem:[#allocation30_spill] sm:$0xff] }
 0x24e   : > { %v15956_v10 = vadd.f32 %v6150_v61, %v6134_v60  ;;  %v6128_v29 = vmul.f32 %v5616_v7, %v17508_v51  ;;  %v5618_v37 = vpop.f32.mrb[171].mxu0  ;;  %12695 = vmatmul.mubr.msk.f32.gmra.mrb[20].mxu0 %vm664_vm0, %v15742_v6  ;;  %v12717_v61 = vld [vmem:[%s13575_s30 + $0x900] sm:$0xff]  ;;  %v17511_v51 = vld [vmem:[#allocation31_spill] sm:$0xff] }
 0x24f   : > { %v5705_v57 = vpop.f32.mrb[170].mxu1  ;;  %v15961_v34 = vadd.f32 %v6151_v30, %v6135_v5  ;;  %v6129_v22 = vmul.f32 %v5618_v37, %v17509_v53  ;;  %8618 = vmatprep.mubr.f32.mxu0 %v17304_v41  ;;  %v12733_v60 = vld [vmem:[%s13575_s30 + $0x980] sm:$0xff]  ;;  %v12719_v53 = vld [vmem:[%s13575_s30 + $0x910] sm:$0xff] }
 0x250   : > { %12699 = vmatmul.mubr.msk.f32.gmra.mrb[20].mxu1 %vm664_vm0, %v15742_v6  ;;  %v6152_v1 = vmul.f32 %v5705_v57, %v17510_v12  ;;  %v5707_v18 = vpop.f32.mrb[171].mxu1  ;;  %v6136_v7 = vadd.f32 %v6128_v29, %v15906_v9  ;;  %v17512_v12 = vld [vmem:[#allocation32_spill] sm:$0xff]  ;;  %v13227_v9 = vpack.c.bf16 %v12733_v60, %v12717_v61 }
 0x251   : > { %v6153_v30 = vmul.f32 %v5707_v18, %v17511_v51  ;;  %8707 = vmatprep.mubr.f32.mxu1 %v17304_v41  ;;  %v6137_v5 = vadd.f32 %v6129_v22, %v15909_v35  ;;  %v5622_v37 = vpop.f32.mrb[172].mxu0  ;;  %v12735_v29 = vld [vmem:[%s13575_s30 + $0x990] sm:$0xff]  ;;  %v12722_v18 = vld [vmem:[%s13575_s30 + $0x928] sm:$0xff]  ;;  %v17513_v35 = vld [vmem:[#allocation33_spill] sm:$0xff] }
 0x252   : > { %v15975_v57 = vadd.f32 %v6152_v1, %v6136_v7  ;;  %v6130_v20 = vmul.f32 %v5622_v37, %v17512_v12  ;;  %v5624_v62 = vpop.f32.mrb[173].mxu0  ;;  %12696 = vmatmul.mubr.msk.f32.gmra.mrb[22].mxu0 %vm664_vm0, %v15766_v21  ;;  %v12738_v51 = vld [vmem:[%s13575_s30 + $0x9a8] sm:$0xff]  ;;  %v17514_v1 = vld [vmem:[#allocation36_spill] sm:$0xff]  ;;  %v12724_v37 = vld [vmem:[%s13575_s30 + $0x938] sm:$0xff] }
 0x253   : > { %v5711_v16 = vpop.f32.mrb[172].mxu1  ;;  %v15983_v47 = vadd.f32 %v6153_v30, %v6137_v5  ;;  %v6131_v22 = vmul.f32 %v5624_v62, %v17513_v35  ;;  %8778 = vmatprep.mubr.f32.mxu0 %v17304_v41  ;;  %v12740_v12 = vld [vmem:[%s13575_s30 + $0x9b8] sm:$0xff]  ;;  %v13231_v62 = vpack.c.bf16 %v12735_v29, %v12719_v53  ;;  %v13233_v5 = vpack.c.bf16 %v12738_v51, %v12722_v18 }
 0x254   : > { %12700 = vmatmul.mubr.msk.f32.gmra.mrb[22].mxu1 %vm664_vm0, %v15766_v21  ;;  %v6154_v7 = vmul.f32 %v5711_v16, %v17514_v1  ;;  %v5713_v0 = vpop.f32.mrb[173].mxu1  ;;  %v6138_v28 = vadd.f32 %v6130_v20, %v15926_v27  ;;  %v13237_v46 = vpack.c.bf16 %v12740_v12, %v12724_v37 }
 0x255   : > { %v6155_v61 = vmul.f32 %v5713_v0, %v17376_v19  ;;  %8867 = vmatprep.mubr.f32.mxu1 %v17304_v41  ;;  %v6139_v60 = vadd.f32 %v6131_v22, %v15928_v43  ;;  %v5628_v30 = vpop.f32.mrb[174].mxu0 }
 0x256   : > { %v15996_v35 = vadd.f32 %v6154_v7, %v6138_v28  ;;  %v6132_v16 = vmul.f32 %v5628_v30, %v17377_v15  ;;  %v5630_v1 = vpop.f32.mrb[175].mxu0  ;;  %12701 = vmatmul.mubr.msk.f32.vlgmr.msra.gmra.mrb[24].mxu0 %vm664_vm0, %v15792_v32 }
 0x257   : > { %v5717_v4 = vpop.f32.mrb[174].mxu1  ;;  %v16001_v27 = vadd.f32 %v6155_v61, %v6139_v60  ;;  %v6133_v0 = vmul.f32 %v5630_v1, %v17332_v63  ;;  %13228 = vmatpush1.bf16.msra.mxu0 %v13227_v9  ;;  %8784 = vmatprep.mubr.f32.mxu0 %v17304_v41 }
 0x258   : > { %12705 = vmatmul.mubr.msk.f32.vlgmr.msra.gmra.mrb[24].mxu1 %vm664_vm0, %v15792_v32  ;;  %v6156_v43 = vmul.f32 %v5717_v4, %v17333_v42  ;;  %v5719_v28 = vpop.f32.mrb[175].mxu1  ;;  %v6140_v20 = vadd.f32 %v6132_v16, %v15940_v55  ;;  %13234 = vmatprep.subr.bf16.mxu0 %v13233_v5 }
 0x259   : > { %v6157_v51 = vmul.f32 %v5719_v28, %v14294_v44  ;;  %8873 = vmatprep.mubr.f32.mxu1 %v17304_v41  ;;  %v6141_v53 = vadd.f32 %v6133_v0, %v15942_v25  ;;  %v5788_v12 = vpop.f32.mrb[176].mxu0  ;;  %13232 = vmatpush1.bf16.msra.mxu1 %v13231_v62  ;;  %v12737_v28 = vld [vmem:[%s13575_s30 + $0x9a0] sm:$0xff] }
 0x25a   : > { %v16012_v29 = vadd.f32 %v6156_v43, %v6140_v20  ;;  %v6174_v18 = vmul.f32 %v5788_v12, %v14306_v56  ;;  %v5790_v4 = vpop.f32.mrb[177].mxu0  ;;  %12702 = vmatmul.mubr.msk.f32.gmra.mrb[26].mxu0 %vm664_vm0, %v15877_v58  ;;  %13238 = vmatprep.subr.bf16.mxu1 %v13237_v46  ;;  %v12721_v43 = vld [vmem:[%s13575_s30 + $0x920] sm:$0xff] }
 0x25b   : > { %v5877_v55 = vpop.f32.mrb[176].mxu1  ;;  %v16017_v9 = vadd.f32 %v6157_v51, %v6141_v53  ;;  %v6175_v22 = vmul.f32 %v5790_v4, %v17340_v14  ;;  %8790 = vmatprep.mubr.f32.mxu0 %v17304_v41  ;;  %v17515_v51 = vld [vmem:[#allocation48_spill] sm:$0xff] }
 0x25c   : > { %12706 = vmatmul.mubr.msk.f32.gmra.mrb[26].mxu1 %vm664_vm0, %v15877_v58  ;;  %v6198_v25 = vmul.f32 %v5877_v55, %v17378_v39  ;;  %v5879_v1 = vpop.f32.mrb[177].mxu1  ;;  %v6182_v7 = vadd.f32 %v6174_v18, %v15956_v10  ;;  %v12723_v4 = vld [vmem:[%s13575_s30 + $0x930] sm:$0xff] }
 0x25d   : > { %v6199_v37 = vmul.f32 %v5879_v1, %v14342_v33  ;;  %8879 = vmatprep.mubr.f32.mxu1 %v17304_v41  ;;  %v6183_v46 = vadd.f32 %v6175_v22, %v15961_v34  ;;  %v5794_v61 = vpop.f32.mrb[178].mxu0  ;;  %v17516_v22 = vld [vmem:[#allocation49_spill] sm:$0xff] }
 0x25e   : > { %v16028_v60 = vadd.f32 %v6198_v25, %v6182_v7  ;;  %v6176_v30 = vmul.f32 %v5794_v61, %v14356_v52  ;;  %v5796_v62 = vpop.f32.mrb[179].mxu0  ;;  %12703 = vmatmul.mubr.msk.f32.gmra.mrb[28].mxu0 %vm664_vm0, %v15742_v6  ;;  %v12742_v61 = vld [vmem:[%s13575_s30 + $0x9c8] sm:$0xff] }
 0x25f   : > { %v5883_v5 = vpop.f32.mrb[178].mxu1  ;;  %v16033_v10 = vadd.f32 %v6199_v37, %v6183_v46  ;;  %v6177_v16 = vmul.f32 %v5796_v62, %v17412_v40  ;;  %8796 = vmatprep.mubr.f32.mxu0 %v17304_v41  ;;  %v12739_v37 = vld [vmem:[%s13575_s30 + $0x9b0] sm:$0xff]  ;;  %v12726_v46 = vld [vmem:[%s13575_s30 + $0x948] sm:$0xff] }
 0x260   : > { %12707 = vmatmul.mubr.msk.f32.gmra.mrb[28].mxu1 %vm664_vm0, %v15742_v6  ;;  %v6200_v34 = vmul.f32 %v5883_v5, %v17413_v48  ;;  %v5885_v0 = vpop.f32.mrb[179].mxu1  ;;  %v6184_v20 = vadd.f32 %v6176_v30, %v15975_v57  ;;  %v13235_v57 = vpack.c.bf16 %v12737_v28, %v12721_v43  ;;  %v17518_v5 = vld [vmem:[#allocation51_spill] sm:$0xff] }
 0x261   : > { %v6201_v53 = vmul.f32 %v5885_v0, %v17515_v51  ;;  %8885 = vmatprep.mubr.f32.mxu1 %v17304_v41  ;;  %v6185_v12 = vadd.f32 %v6177_v16, %v15983_v47  ;;  %v5800_v18 = vpop.f32.mrb[180].mxu0  ;;  %v17517_v47 = vld [vmem:[#allocation50_spill] sm:$0xff]  ;;  %v12728_v0 = vld [vmem:[%s13575_s30 + $0x958] sm:$0xff] }
 0x262   : > { %v16047_v55 = vadd.f32 %v6200_v34, %v6184_v20  ;;  %v6178_v25 = vmul.f32 %v5800_v18, %v17516_v22  ;;  %v5802_v1 = vpop.f32.mrb[181].mxu0  ;;  %12704 = vmatmul.mubr.msk.f32.gmra.mrb[30].mxu0 %vm664_vm0, %v15766_v21  ;;  %v12744_v20 = vld [vmem:[%s13575_s30 + $0x9d8] sm:$0xff] }
 0x263   : > { %v5889_v7 = vpop.f32.mrb[180].mxu1  ;;  %v16055_v30 = vadd.f32 %v6201_v53, %v6185_v12  ;;  %v6179_v62 = vmul.f32 %v5802_v1, %v17517_v47  ;;  %9182 = vmatprep.mubr.f32.mxu0 %v17304_v41  ;;  %v13239_v12 = vpack.c.bf16 %v12739_v37, %v12723_v4  ;;  %v13241_v1 = vpack.c.bf16 %v12742_v61, %v12726_v46 }
 0x264   : > { %12708 = vmatmul.mubr.msk.f32.gmra.mrb[30].mxu1 %vm664_vm0, %v15766_v21  ;;  %v6202_v16 = vmul.f32 %v5889_v7, %v17518_v5  ;;  %v5891_v34 = vpop.f32.mrb[181].mxu1  ;;  %v6186_v18 = vadd.f32 %v6178_v25, %v15996_v35  ;;  %v13245_v51 = vpack.c.bf16 %v12744_v20, %v12728_v0 }
 0x265   : > { %v6203_v43 = vmul.f32 %v5891_v34, %v14427_v49  ;;  %9271 = vmatprep.mubr.f32.mxu1 %v17304_v41  ;;  %v6187_v28 = vadd.f32 %v6179_v62, %v16001_v27  ;;  %v5806_v53 = vpop.f32.mrb[182].mxu0 }
 0x266   : > { %v16068_v47 = vadd.f32 %v6202_v16, %v6186_v18  ;;  %v6180_v7 = vmul.f32 %v5806_v53, %v14437_v2  ;;  %v5808_v5 = vpop.f32.mrb[183].mxu0  ;;  %12749 = vmatmul.mubr.msk.f32.vlgmr.msra.gmra.mrb[32].mxu0 %vm664_vm0, %v15792_v32 }
 0x267   : > { %v5895_v22 = vpop.f32.mrb[182].mxu1  ;;  %v16073_v35 = vadd.f32 %v6203_v43, %v6187_v28  ;;  %v6181_v25 = vmul.f32 %v5808_v5, %v14464_v50  ;;  %13236 = vmatpush1.bf16.msra.mxu0 %v13235_v57  ;;  %9188 = vmatprep.mubr.f32.mxu0 %v17304_v41 }
 0x268   : > { %12753 = vmatmul.mubr.msk.f32.vlgmr.msra.gmra.mrb[32].mxu1 %vm664_vm0, %v15792_v32  ;;  %v6204_v27 = vmul.f32 %v5895_v22, %v14492_v11  ;;  %v5897_v4 = vpop.f32.mrb[183].mxu1  ;;  %v6188_v37 = vadd.f32 %v6180_v7, %v16012_v29  ;;  %13242 = vmatprep.subr.bf16.mxu0 %v13241_v1 }
 0x269   : > { %v6205_v46 = vmul.f32 %v5897_v4, %v14497_v13  ;;  %9277 = vmatprep.mubr.f32.mxu1 %v17304_v41  ;;  %v6189_v61 = vadd.f32 %v6181_v25, %v16017_v9  ;;  %v5966_v62 = vpop.f32.mrb[184].mxu0  ;;  %13240 = vmatpush1.bf16.msra.mxu1 %v13239_v12  ;;  %v12741_v4 = vld [vmem:[%s13575_s30 + $0x9c0] sm:$0xff] }
 0x26a   : > { %v16084_v5 = vadd.f32 %v6204_v27, %v6188_v37  ;;  %v6222_v16 = vmul.f32 %v5966_v62, %v14524_v31  ;;  %v5968_v22 = vpop.f32.mrb[185].mxu0  ;;  %12750 = vmatmul.mubr.msk.f32.gmra.mrb[34].mxu0 %vm664_vm0, %v15877_v58  ;;  %13246 = vmatprep.subr.bf16.mxu1 %v13245_v51  ;;  %v12725_v27 = vld [vmem:[%s13575_s30 + $0x940] sm:$0xff] }
 0x26b   : > { %v6055_v29 = vpop.f32.mrb[184].mxu1  ;;  %v16089_v57 = vadd.f32 %v6205_v46, %v6189_v61  ;;  %v6223_v34 = vmul.f32 %v5968_v22, %v14540_v36  ;;  %9194 = vmatprep.mubr.f32.mxu0 %v17304_v41 }
 0x26c   : > { %12754 = vmatmul.mubr.msk.f32.gmra.mrb[34].mxu1 %vm664_vm0, %v15877_v58  ;;  %v6246_v9 = vmul.f32 %v6055_v29, %v14554_v24  ;;  %v6057_v0 = vpop.f32.mrb[185].mxu1  ;;  %v6230_v20 = vadd.f32 %v6222_v16, %v16028_v60  ;;  %v12727_v16 = vld [vmem:[%s13575_s30 + $0x950] sm:$0xff] }
 0x26d   : > { %v6247_v18 = vmul.f32 %v6057_v0, %v14571_v59  ;;  %9283 = vmatprep.mubr.f32.mxu1 %v17304_v41  ;;  %v6231_v51 = vadd.f32 %v6223_v34, %v16033_v10  ;;  %v5972_v43 = vpop.f32.mrb[186].mxu0  ;;  %v12743_v0 = vld [vmem:[%s13575_s30 + $0x9d0] sm:$0xff] }
 0x26e   : > { %v6254_v28 = vadd.f32 %v6246_v9, %v6230_v20  ;;  %v6224_v53 = vmul.f32 %v5972_v43, %v14577_v8  ;;  %v5974_v12 = vpop.f32.mrb[187].mxu0  ;;  %12751 = vmatmul.mubr.msk.f32.gmra.mrb[36].mxu0 %vm664_vm0, %v15742_v6  ;;  %v13243_v9 = vpack.c.bf16 %v12741_v4, %v12725_v27  ;;  %v12730_v20 = vld [vmem:[%s13575_s30 + $0x968] sm:$0xff] }
 0x26f   : > { %v6061_v1 = vpop.f32.mrb[186].mxu1  ;;  %v6255_v60 = vadd.f32 %v6247_v18, %v6231_v51  ;;  %v6225_v7 = vmul.f32 %v5974_v12, %v14605_v17  ;;  %9200 = vmatprep.mubr.f32.mxu0 %v17304_v41  ;;  %v12746_v18 = vld [vmem:[%s13575_s30 + $0x9e8] sm:$0xff]  ;;  %v12748_v12 = vld [vmem:[%s13575_s30 + $0x9f8] sm:$0xff] }
 0x270   : > { %12755 = vmatmul.mubr.msk.f32.gmra.mrb[36].mxu1 %vm664_vm0, %v15742_v6  ;;  %v6248_v25 = vmul.f32 %v6061_v1, %v14607_v45  ;;  %v6063_v10 = vpop.f32.mrb[187].mxu1  ;;  %12493 = vst [vmem:[%s14678_s10 + $0x140] sm:$0xff] %v6254_v28  ;;  %v6232_v37 = vadd.f32 %v6224_v53, %v16047_v55  ;;  %v12732_v53 = vld [vmem:[%s13575_s30 + $0x978] sm:$0xff]  ;;  %v13249_v27 = vpack.c.bf16 %v12746_v18, %v12730_v20  ;;  %v17522_v20 = vld [vmem:[#allocation43_spill] sm:$0xff] }
 0x271   : > { %v6249_v46 = vmul.f32 %v6063_v10, %v14642_v26  ;;  %9289 = vmatprep.mubr.f32.mxu1 %v17304_v41  ;;  %12494 = vst [vmem:[%s14678_s10 + $0x148] sm:$0xff] %v6255_v60  ;;  %v6233_v61 = vadd.f32 %v6225_v7, %v16055_v30  ;;  %v5978_v62 = vpop.f32.mrb[188].mxu0  ;;  %v13247_v10 = vpack.c.bf16 %v12743_v0, %v12727_v16 }
 0x272   : > { %v6256_v22 = vadd.f32 %v6248_v25, %v6232_v37  ;;  %v6226_v29 = vmul.f32 %v5978_v62, %v14661_v38  ;;  %v5980_v34 = vpop.f32.mrb[189].mxu0  ;;  %12752 = vmatmul.mubr.msk.f32.gmra.mrb[38].mxu0 %vm664_vm0, %v15766_v21  ;;  %v17519_v37 = vld [vmem:[#allocation35_spill] sm:$0xff]  ;;  %v13253_v62 = vpack.c.bf16 %v12748_v12, %v12732_v53 }
 0x273   : > { %v6067_v55 = vpop.f32.mrb[188].mxu1  ;;  %v6257_v51 = vadd.f32 %v6249_v46, %v6233_v61  ;;  %v6227_v30 = vmul.f32 %v5980_v34, %v14663_v23  ;;  %9360 = vmatprep.mubr.f32.mxu0 %v17304_v41 }
 0x274   : > { %12756 = vmatmul.mubr.msk.f32.gmra.mrb[38].mxu1 %vm664_vm0, %v15766_v21  ;;  %v6250_v43 = vmul.f32 %v6067_v55, %v14668_v3  ;;  %v6069_v28 = vpop.f32.mrb[189].mxu1  ;;  %12495 = vst [vmem:[%s14678_s10 + $0x150] sm:$0xff] %v6256_v22  ;;  %v6234_v1 = vadd.f32 %v6226_v29, %v16068_v47  ;;  %v17520_v29 = vld [vmem:[#allocation34_spill] sm:$0xff] }
 0x275   : > { %v6251_v60 = vmul.f32 %v6069_v28, %v14684_v54  ;;  %9449 = vmatprep.mubr.f32.mxu1 %v17304_v41  ;;  %12496 = vst [vmem:[%s14678_s10 + $0x158] sm:$0xff] %v6257_v51  ;;  %v6235_v7 = vadd.f32 %v6227_v30, %v16073_v35  ;;  %v5984_v25 = vpop.f32.mrb[190].mxu0  ;;  %v17521_v35 = vld [vmem:[#allocation7_spill] sm:$0xff] }
 0x276   : > { %v6258_v4 = vadd.f32 %v6250_v43, %v6234_v1  ;;  %v6228_v46 = vmul.f32 %v5984_v25, %v17519_v37  ;;  %v5986_v61 = vpop.f32.mrb[191].mxu0  ;;  %12757 = vmatmul.mubr.msk.f32.vlgmr.msra.gmra.mrb[40].mxu0 %vm664_vm0, %v15792_v32  ;;  %v17524_v1 = vld [vmem:[#allocation9_spill] sm:$0xff] }
 0x277   : > { %v6073_v47 = vpop.f32.mrb[190].mxu1  ;;  %v6259_v22 = vadd.f32 %v6251_v60, %v6235_v7  ;;  %v6229_v34 = vmul.f32 %v5986_v61, %v17520_v29  ;;  %13244 = vmatpush1.bf16.msra.mxu0 %v13243_v9  ;;  %9366 = vmatprep.mubr.f32.mxu0 %v17304_v41  ;;  %v17523_v9 = vld [vmem:[#allocation8_spill] sm:$0xff]  ;;  %v17525_v7 = vld [vmem:[#allocation10_spill] sm:$0xff] }
 0x278   : > { %12761 = vmatmul.mubr.msk.f32.vlgmr.msra.gmra.mrb[40].mxu1 %vm664_vm0, %v15792_v32  ;;  %v6252_v55 = vmul.f32 %v6073_v47, %v17521_v35  ;;  %v6075_v16 = vpop.f32.mrb[191].mxu1  ;;  %12497 = vst [vmem:[%s14678_s10 + $0x160] sm:$0xff] %v6258_v4  ;;  %v6236_v0 = vadd.f32 %v6228_v46, %v16084_v5  ;;  %13250 = vmatprep.subr.bf16.mxu0 %v13249_v27  ;;  %v17527_v47 = vld [vmem:[#allocation12_spill] sm:$0xff] }
 0x279   : > { %v6253_v18 = vmul.f32 %v6075_v16, %v17522_v20  ;;  %9455 = vmatprep.mubr.f32.mxu1 %v17304_v41  ;;  %12498 = vst [vmem:[%s14678_s10 + $0x168] sm:$0xff] %v6259_v22  ;;  %v6237_v51 = vadd.f32 %v6229_v34, %v16089_v57  ;;  %v6370_v30 = vpop.f32.mrb[192].mxu0  ;;  %13248 = vmatpush1.bf16.msra.mxu1 %v13247_v10  ;;  %v17526_v10 = vld [vmem:[#allocation11_spill] sm:$0xff] }
 0x27a   : > { %v6260_v43 = vadd.f32 %v6252_v55, %v6236_v0  ;;  %v7024_v28 = vmul.f32 %v6370_v30, %v17523_v9  ;;  %v6372_v12 = vpop.f32.mrb[193].mxu0  ;;  %12758 = vmatmul.mubr.msk.f32.gmra.mrb[42].mxu0 %vm664_vm0, %v15877_v58  ;;  %13254 = vmatprep.subr.bf16.mxu1 %v13253_v62  ;;  %v17528_v55 = vld [vmem:[#allocation13_spill] sm:$0xff]  ;;  %v17529_v0 = vld [vmem:[#allocation14_spill] sm:$0xff]  ;;  %v17530_v30 = vld [vmem:[#allocation15_spill] sm:$0xff] }
 0x27b   : > { %v6459_v53 = vpop.f32.mrb[192].mxu1  ;;  %v6261_v5 = vadd.f32 %v6253_v18, %v6237_v51  ;;  %v7025_v25 = vmul.f32 %v6372_v12, %v17525_v7  ;;  %9372 = vmatprep.mubr.f32.mxu0 %v17304_v41 }
 0x27c   : > { %v7040_v60 = vmul.f32 %v6459_v53, %v17524_v1  ;;  %v6461_v57 = vpop.f32.mrb[193].mxu1  ;;  %12762 = vmatmul.mubr.msk.f32.gmra.mrb[42].mxu1 %vm664_vm0, %v15877_v58  ;;  %12499 = vst [vmem:[%s14678_s10 + $0x170] sm:$0xff] %v6260_v43  ;;  %v12745_v53 = vld [vmem:[%s13575_s30 + $0x9e0] sm:$0xff] }
 0x27d   : > { %v7041_v27 = vmul.f32 %v6461_v57, %v17526_v10  ;;  %9461 = vmatprep.mubr.f32.mxu1 %v17304_v41  ;;  %12500 = vst [vmem:[%s14678_s10 + $0x178] sm:$0xff] %v6261_v5  ;;  %v6376_v46 = vpop.f32.mrb[194].mxu0  ;;  %v17531_v57 = vld [vmem:[#allocation16_spill] sm:$0xff] }
 0x27e   : > { %v16162_v4 = vadd.f32 %v7040_v60, %v7024_v28  ;;  %v7026_v62 = vmul.f32 %v6376_v46, %v17527_v47  ;;  %v6378_v34 = vpop.f32.mrb[195].mxu0  ;;  %12759 = vmatmul.mubr.msk.f32.gmra.mrb[44].mxu0 %vm664_vm0, %v15742_v6  ;;  %v12729_v28 = vld [vmem:[%s13575_s30 + $0x960] sm:$0xff]  ;;  %v12731_v60 = vld [vmem:[%s13575_s30 + $0x970] sm:$0xff] }
 0x27f   : > { %v16164_v61 = vadd.f32 %v7041_v27, %v7025_v25  ;;  %v6465_v22 = vpop.f32.mrb[194].mxu1  ;;  %v7027_v18 = vmul.f32 %v6378_v34, %v17529_v0  ;;  %9378 = vmatprep.mubr.f32.mxu0 %v17304_v41  ;;  %v12790_v34 = vld [vmem:[%s13575_s30 + $0xa08] sm:$0xff] }
 0x280   : > { %v7042_v16 = vmul.f32 %v6465_v22, %v17528_v55  ;;  %v6467_v51 = vpop.f32.mrb[195].mxu1  ;;  %12763 = vmatmul.mubr.msk.f32.gmra.mrb[44].mxu1 %vm664_vm0, %v15742_v6  ;;  %v12747_v22 = vld [vmem:[%s13575_s30 + $0x9f0] sm:$0xff] }
 0x281   : > { %v7043_v43 = vmul.f32 %v6467_v51, %v17530_v30  ;;  %9467 = vmatprep.mubr.f32.mxu1 %v17304_v41  ;;  %v6382_v5 = vpop.f32.mrb[196].mxu0  ;;  %v12806_v51 = vld [vmem:[%s13575_s30 + $0xa88] sm:$0xff]  ;;  %v17532_v30 = vld [vmem:[#allocation18_spill] sm:$0xff]  ;;  %v13255_v1 = vpack.c.bf16 %v12747_v22, %v12731_v60 }
 0x282   : > { %v16178_v12 = vadd.f32 %v7042_v16, %v7026_v62  ;;  %v7028_v27 = vmul.f32 %v6382_v5, %v17531_v57  ;;  %v6384_v46 = vpop.f32.mrb[197].mxu0  ;;  %12760 = vmatmul.mubr.msk.f32.gmra.mrb[46].mxu0 %vm664_vm0, %v15766_v21  ;;  %v17533_v62 = vld [vmem:[#allocation17_spill] sm:$0xff]  ;;  %v17534_v57 = vld [vmem:[#allocation19_spill] sm:$0xff] }
 0x283   : > { %v16181_v25 = vadd.f32 %v7043_v43, %v7027_v18  ;;  %v6471_v6 = vpop.f32.mrb[196].mxu1  ;;  %v7029_v16 = vmul.f32 %v6384_v46, %v17533_v62  ;;  %9538 = vmatprep.mubr.f32.mxu0 %v17304_v41  ;;  %v13251_v18 = vpack.c.bf16 %v12745_v53, %v12729_v28  ;;  %v12792_v43 = vld [vmem:[%s13575_s30 + $0xa18] sm:$0xff]  ;;  %v17535_v46 = vld [vmem:[#allocation20_spill] sm:$0xff] }
 0x284   : > { %v7044_v0 = vmul.f32 %v6471_v6, %v17532_v30  ;;  %v6473_v55 = vpop.f32.mrb[197].mxu1  ;;  %12764 = vmatmul.mubr.msk.f32.gmra.mrb[46].mxu1 %vm664_vm0, %v15766_v21  ;;  %v12808_v5 = vld [vmem:[%s13575_s30 + $0xa98] sm:$0xff]  ;;  %v13257_v6 = vpack.c.bf16 %v12806_v51, %v12790_v34 }
 0x285   : > { %v7045_v47 = vmul.f32 %v6473_v55, %v17534_v57  ;;  %9627 = vmatprep.mubr.f32.mxu1 %v17304_v41  ;;  %v6388_v7 = vpop.f32.mrb[198].mxu0  ;;  %v13261_v28 = vpack.c.bf16 %v12808_v5, %v12792_v43  ;;  %v17536_v53 = vld [vmem:[#allocation21_spill] sm:$0xff]  ;;  %v17537_v55 = vld [vmem:[#allocation22_spill] sm:$0xff] }
 0x286   : > { %v16198_v10 = vadd.f32 %v7044_v0, %v7028_v27  ;;  %v7030_v62 = vmul.f32 %v6388_v7, %v17535_v46  ;;  %v6390_v21 = vpop.f32.mrb[199].mxu0  ;;  %12765 = vmatmul.mubr.msk.f32.vlgmr.msra.gmra.mrb[48].mxu0 %vm664_vm0, %v15792_v32  ;;  %v17538_v0 = vld [vmem:[#allocation24_spill] sm:$0xff]  ;;  %v16284_v46 = vld [vmem:[%s17159_s2] sm:$0xff] }
 0x287   : > { %v16200_v30 = vadd.f32 %v7045_v47, %v7029_v16  ;;  %v6477_v9 = vpop.f32.mrb[198].mxu1  ;;  %v7031_v57 = vmul.f32 %v6390_v21, %v17537_v55  ;;  %13252 = vmatpush1.bf16.msra.mxu0 %v13251_v18  ;;  %9544 = vmatprep.mubr.f32.mxu0 %v17304_v41  ;;  %v17543_v21 = vld [vmem:[#allocation28_spill] sm:$0xff]  ;;  %v12812_v55 = vld [vmem:[%s13575_s30 + $0xab8] sm:$0xff] }
 0x288   : > { %v7046_v20 = vmul.f32 %v6477_v9, %v17536_v53  ;;  %v6479_v35 = vpop.f32.mrb[199].mxu1  ;;  %12769 = vmatmul.mubr.msk.f32.vlgmr.msra.gmra.mrb[48].mxu1 %vm664_vm0, %v15792_v32  ;;  %13258 = vmatprep.subr.bf16.mxu0 %v13257_v6  ;;  %v17539_v9 = vld [vmem:[#allocation23_spill] sm:$0xff] }
 0x289   : > { %v7047_v47 = vmul.f32 %v6479_v35, %v17538_v0  ;;  %9633 = vmatprep.mubr.f32.mxu1 %v17304_v41  ;;  %v6548_v60 = vpop.f32.mrb[200].mxu0  ;;  %13256 = vmatpush1.bf16.msra.mxu1 %v13255_v1  ;;  %v17540_v35 = vld [vmem:[#allocation25_spill] sm:$0xff] }
 0x28a   : > { %v16212_v7 = vadd.f32 %v7046_v20, %v7030_v62  ;;  %v7064_v22 = vmul.f32 %v6548_v60, %v17539_v9  ;;  %v6550_v34 = vpop.f32.mrb[201].mxu0  ;;  %12766 = vmatmul.mubr.msk.f32.gmra.mrb[50].mxu0 %vm664_vm0, %v15877_v58  ;;  %13262 = vmatprep.subr.bf16.mxu1 %v13261_v28  ;;  %v17541_v20 = vld [vmem:[#allocation26_spill] sm:$0xff]  ;;  %v16234_v60 = vld [vmem:[%s17159_s2 + $0x10] sm:$0xff]  ;;  %v12796_v0 = vld [vmem:[%s13575_s30 + $0xa38] sm:$0xff] }
 0x28b   : > { %v16214_v27 = vadd.f32 %v7047_v47, %v7031_v57  ;;  %v6637_v32 = vpop.f32.mrb[200].mxu1  ;;  %v7065_v51 = vmul.f32 %v6550_v34, %v17540_v35  ;;  %9550 = vmatprep.mubr.f32.mxu0 %v17304_v41  ;;  %v17542_v57 = vld [vmem:[#allocation27_spill] sm:$0xff]  ;;  %v17544_v34 = vld [vmem:[#allocation29_spill] sm:$0xff] }
 0x28c   : > { %12770 = vmatmul.mubr.msk.f32.gmra.mrb[50].mxu1 %vm664_vm0, %v15877_v58  ;;  %v7088_v62 = vmul.f32 %v6637_v32, %v17541_v20  ;;  %v6639_v16 = vpop.f32.mrb[201].mxu1  ;;  %v7072_v1 = vadd.f32 %v7064_v22, %v16162_v4  ;;  %v17545_v32 = vld [vmem:[#allocation30_spill] sm:$0xff]  ;;  %v16258_v35 = vld [vmem:[%s17159_s2 + $0x18] sm:$0xff] }
 0x28d   : > { %v7089_v18 = vmul.f32 %v6639_v16, %v17542_v57  ;;  %9639 = vmatprep.mubr.f32.mxu1 %v17304_v41  ;;  %v7073_v43 = vadd.f32 %v7065_v51, %v16164_v61  ;;  %v6554_v5 = vpop.f32.mrb[202].mxu0  ;;  %v12789_v16 = vld [vmem:[%s13575_s30 + $0xa00] sm:$0xff] }
 0x28e   : > { %v16228_v6 = vadd.f32 %v7088_v62, %v7072_v1  ;;  %v7066_v28 = vmul.f32 %v6554_v5, %v17543_v21  ;;  %v6556_v47 = vpop.f32.mrb[203].mxu0  ;;  %12767 = vmatmul.mubr.msk.f32.gmra.mrb[52].mxu0 %vm664_vm0, %v16234_v60  ;;  %v12805_v1 = vld [vmem:[%s13575_s30 + $0xa80] sm:$0xff]  ;;  %v17546_v21 = vld [vmem:[#allocation31_spill] sm:$0xff] }
 0x28f   : > { %v6643_v4 = vpop.f32.mrb[202].mxu1  ;;  %v16238_v22 = vadd.f32 %v7089_v18, %v7073_v43  ;;  %v7067_v61 = vmul.f32 %v6556_v47, %v17544_v34  ;;  %9556 = vmatprep.mubr.f32.mxu0 %v17304_v41  ;;  %v12791_v34 = vld [vmem:[%s13575_s30 + $0xa10] sm:$0xff] }
 0x290   : > { %12771 = vmatmul.mubr.msk.f32.gmra.mrb[52].mxu1 %vm664_vm0, %v16234_v60  ;;  %v7090_v51 = vmul.f32 %v6643_v4, %v17545_v32  ;;  %v6645_v62 = vpop.f32.mrb[203].mxu1  ;;  %v7074_v5 = vadd.f32 %v7066_v28, %v16178_v12  ;;  %v17547_v4 = vld [vmem:[#allocation32_spill] sm:$0xff]  ;;  %v13259_v28 = vpack.c.bf16 %v12805_v1, %v12789_v16 }
 0x291   : > { %v7091_v18 = vmul.f32 %v6645_v62, %v17546_v21  ;;  %9645 = vmatprep.mubr.f32.mxu1 %v17304_v41  ;;  %v7075_v43 = vadd.f32 %v7067_v61, %v16181_v25  ;;  %v6560_v47 = vpop.f32.mrb[204].mxu0  ;;  %v12807_v25 = vld [vmem:[%s13575_s30 + $0xa90] sm:$0xff]  ;;  %v12794_v61 = vld [vmem:[%s13575_s30 + $0xa28] sm:$0xff] }
 0x292   : > { %v16252_v57 = vadd.f32 %v7090_v51, %v7074_v5  ;;  %v7068_v32 = vmul.f32 %v6560_v47, %v17547_v4  ;;  %v6562_v20 = vpop.f32.mrb[205].mxu0  ;;  %12768 = vmatmul.mubr.msk.f32.gmra.mrb[54].mxu0 %vm664_vm0, %v16258_v35  ;;  %v12810_v62 = vld [vmem:[%s13575_s30 + $0xaa8] sm:$0xff]  ;;  %v17548_v5 = vld [vmem:[#allocation33_spill] sm:$0xff]  ;;  %v17549_v47 = vld [vmem:[#allocation36_spill] sm:$0xff] }
 0x293   : > { %v6649_v12 = vpop.f32.mrb[204].mxu1  ;;  %v16265_v51 = vadd.f32 %v7091_v18, %v7075_v43  ;;  %v7069_v21 = vmul.f32 %v6562_v20, %v17548_v5  ;;  %9716 = vmatprep.mubr.f32.mxu0 %v17304_v41  ;;  %v13263_v20 = vpack.c.bf16 %v12807_v25, %v12791_v34  ;;  %v13265_v43 = vpack.c.bf16 %v12810_v62, %v12794_v61 }
 0x294   : > { %12772 = vmatmul.mubr.msk.f32.gmra.mrb[54].mxu1 %vm664_vm0, %v16258_v35  ;;  %v7092_v4 = vmul.f32 %v6649_v12, %v17549_v47  ;;  %v6651_v9 = vpop.f32.mrb[205].mxu1  ;;  %v7076_v53 = vadd.f32 %v7068_v32, %v16198_v10 }
 0x295   : > { %v7093_v16 = vmul.f32 %v6651_v9, %v17376_v19  ;;  %9805 = vmatprep.mubr.f32.mxu1 %v17304_v41  ;;  %v7077_v1 = vadd.f32 %v7069_v21, %v16200_v30  ;;  %v6566_v18 = vpop.f32.mrb[206].mxu0  ;;  %v13269_v9 = vpack.c.bf16 %v12812_v55, %v12796_v0 }
 0x296   : > { %v16278_v5 = vadd.f32 %v7092_v4, %v7076_v53  ;;  %v7070_v12 = vmul.f32 %v6566_v18, %v17377_v15  ;;  %v6568_v47 = vpop.f32.mrb[207].mxu0  ;;  %12773 = vmatmul.mubr.msk.f32.vlgmr.msra.gmra.mrb[56].mxu0 %vm664_vm0, %v16284_v46 }
 0x297   : > { %v6655_v10 = vpop.f32.mrb[206].mxu1  ;;  %v16288_v32 = vadd.f32 %v7093_v16, %v7077_v1  ;;  %v7071_v30 = vmul.f32 %v6568_v47, %v17332_v63  ;;  %13260 = vmatpush1.bf16.msra.mxu0 %v13259_v28  ;;  %9722 = vmatprep.mubr.f32.mxu0 %v17304_v41 }
 0x298   : > { %12777 = vmatmul.mubr.msk.f32.vlgmr.msra.gmra.mrb[56].mxu1 %vm664_vm0, %v16284_v46  ;;  %v7094_v53 = vmul.f32 %v6655_v10, %v17333_v42  ;;  %v6657_v21 = vpop.f32.mrb[207].mxu1  ;;  %v7078_v34 = vadd.f32 %v7070_v12, %v16212_v7  ;;  %13266 = vmatprep.subr.bf16.mxu0 %v13265_v43 }
 0x299   : > { %v7095_v4 = vmul.f32 %v6657_v21, %v14294_v44  ;;  %9811 = vmatprep.mubr.f32.mxu1 %v17304_v41  ;;  %v7079_v55 = vadd.f32 %v7071_v30, %v16214_v27  ;;  %v6726_v0 = vpop.f32.mrb[208].mxu0  ;;  %13264 = vmatpush1.bf16.msra.mxu1 %v13263_v20  ;;  %v12793_v21 = vld [vmem:[%s13575_s30 + $0xa20] sm:$0xff] }
 0x29a   : > { %v16299_v25 = vadd.f32 %v7094_v53, %v7078_v34  ;;  %v7112_v61 = vmul.f32 %v6726_v0, %v14306_v56  ;;  %v6728_v62 = vpop.f32.mrb[209].mxu0  ;;  %12774 = vmatmul.mubr.msk.f32.gmra.mrb[58].mxu0 %vm664_vm0, %v15877_v58  ;;  %13270 = vmatprep.subr.bf16.mxu1 %v13269_v9  ;;  %v12809_v34 = vld [vmem:[%s13575_s30 + $0xaa0] sm:$0xff] }
 0x29b   : > { %v6815_v7 = vpop.f32.mrb[208].mxu1  ;;  %v16304_v28 = vadd.f32 %v7095_v4, %v7079_v55  ;;  %v7113_v47 = vmul.f32 %v6728_v62, %v17340_v14  ;;  %9728 = vmatprep.mubr.f32.mxu0 %v17304_v41  ;;  %v17550_v55 = vld [vmem:[#allocation48_spill] sm:$0xff] }
 0x29c   : > { %12778 = vmatmul.mubr.msk.f32.gmra.mrb[58].mxu1 %vm664_vm0, %v15877_v58  ;;  %v7136_v27 = vmul.f32 %v6815_v7, %v17378_v39  ;;  %v6817_v16 = vpop.f32.mrb[209].mxu1  ;;  %v7120_v1 = vadd.f32 %v7112_v61, %v16228_v6  ;;  %v12795_v7 = vld [vmem:[%s13575_s30 + $0xa30] sm:$0xff] }
 0x29d   : > { %v7137_v18 = vmul.f32 %v6817_v16, %v14342_v33  ;;  %9817 = vmatprep.mubr.f32.mxu1 %v17304_v41  ;;  %v7121_v20 = vadd.f32 %v7113_v47, %v16238_v22  ;;  %v6732_v43 = vpop.f32.mrb[210].mxu0 }
 0x29e   : > { %v16315_v12 = vadd.f32 %v7136_v27, %v7120_v1  ;;  %v7114_v58 = vmul.f32 %v6732_v43, %v14356_v52  ;;  %v6734_v10 = vpop.f32.mrb[211].mxu0  ;;  %12775 = vmatmul.mubr.msk.f32.gmra.mrb[60].mxu0 %vm664_vm0, %v16234_v60  ;;  %v17551_v27 = vld [vmem:[#allocation49_spill] sm:$0xff]  ;;  %v12798_v43 = vld [vmem:[%s13575_s30 + $0xa48] sm:$0xff] }
 0x29f   : > { %v6821_v9 = vpop.f32.mrb[210].mxu1  ;;  %v16320_v6 = vadd.f32 %v7137_v18, %v7121_v20  ;;  %v7115_v30 = vmul.f32 %v6734_v10, %v17412_v40  ;;  %9734 = vmatprep.mubr.f32.mxu0 %v17304_v41  ;;  %v12811_v20 = vld [vmem:[%s13575_s30 + $0xab0] sm:$0xff] }
 0x2a0   : > { %12779 = vmatmul.mubr.msk.f32.gmra.mrb[60].mxu1 %vm664_vm0, %v16234_v60  ;;  %v7138_v22 = vmul.f32 %v6821_v9, %v17413_v48  ;;  %v6823_v53 = vpop.f32.mrb[211].mxu1  ;;  %v7122_v4 = vadd.f32 %v7114_v58, %v16252_v57  ;;  %v13267_v57 = vpack.c.bf16 %v12809_v34, %v12793_v21  ;;  %v12814_v58 = vld [vmem:[%s13575_s30 + $0xac8] sm:$0xff] }
 0x2a1   : > { %v7139_v0 = vmul.f32 %v6823_v53, %v17550_v55  ;;  %9823 = vmatprep.mubr.f32.mxu1 %v17304_v41  ;;  %v7123_v61 = vadd.f32 %v7115_v30, %v16265_v51  ;;  %v6738_v62 = vpop.f32.mrb[212].mxu0  ;;  %v17552_v51 = vld [vmem:[#allocation50_spill] sm:$0xff]  ;;  %v17553_v30 = vld [vmem:[#allocation51_spill] sm:$0xff] }
 0x2a2   : > { %v16334_v47 = vadd.f32 %v7138_v22, %v7122_v4  ;;  %v7116_v16 = vmul.f32 %v6738_v62, %v17551_v27  ;;  %v6740_v1 = vpop.f32.mrb[213].mxu0  ;;  %12776 = vmatmul.mubr.msk.f32.gmra.mrb[62].mxu0 %vm664_vm0, %v16258_v35  ;;  %v12800_v4 = vld [vmem:[%s13575_s30 + $0xa58] sm:$0xff] }
 0x2a3   : > { %v6827_v18 = vpop.f32.mrb[212].mxu1  ;;  %v16342_v10 = vadd.f32 %v7139_v0, %v7123_v61  ;;  %v7117_v9 = vmul.f32 %v6740_v1, %v17552_v51  ;;  %10120 = vmatprep.mubr.f32.mxu0 %v17304_v41  ;;  %v12816_v62 = vld [vmem:[%s13575_s30 + $0xad8] sm:$0xff]  ;;  %v13271_v61 = vpack.c.bf16 %v12811_v20, %v12795_v7  ;;  %v13273_v1 = vpack.c.bf16 %v12814_v58, %v12798_v43 }
 0x2a4   : > { %12780 = vmatmul.mubr.msk.f32.gmra.mrb[62].mxu1 %vm664_vm0, %v16258_v35  ;;  %v7140_v22 = vmul.f32 %v6827_v18, %v17553_v30  ;;  %v6829_v53 = vpop.f32.mrb[213].mxu1  ;;  %v7124_v27 = vadd.f32 %v7116_v16, %v16278_v5  ;;  %v13277_v48 = vpack.c.bf16 %v12816_v62, %v12800_v4 }
 0x2a5   : > { %v7141_v21 = vmul.f32 %v6829_v53, %v14427_v49  ;;  %10209 = vmatprep.mubr.f32.mxu1 %v17304_v41  ;;  %v7125_v34 = vadd.f32 %v7117_v9, %v16288_v32  ;;  %v6744_v0 = vpop.f32.mrb[214].mxu0 }
 0x2a6   : > { %v16355_v51 = vadd.f32 %v7140_v22, %v7124_v27  ;;  %v7118_v18 = vmul.f32 %v6744_v0, %v14437_v2  ;;  %v6746_v30 = vpop.f32.mrb[215].mxu0  ;;  %12821 = vmatmul.mubr.msk.f32.vlgmr.msra.gmra.mrb[64].mxu0 %vm664_vm0, %v16284_v46 }
 0x2a7   : > { %v6833_v55 = vpop.f32.mrb[214].mxu1  ;;  %v16360_v5 = vadd.f32 %v7141_v21, %v7125_v34  ;;  %v7119_v16 = vmul.f32 %v6746_v30, %v14464_v50  ;;  %13268 = vmatpush1.bf16.msra.mxu0 %v13267_v57  ;;  %10126 = vmatprep.mubr.f32.mxu0 %v17304_v41 }
 0x2a8   : > { %12825 = vmatmul.mubr.msk.f32.vlgmr.msra.gmra.mrb[64].mxu1 %vm664_vm0, %v16284_v46  ;;  %v7142_v32 = vmul.f32 %v6833_v55, %v14492_v11  ;;  %v6835_v7 = vpop.f32.mrb[215].mxu1  ;;  %v7126_v27 = vadd.f32 %v7118_v18, %v16299_v25  ;;  %13274 = vmatprep.subr.bf16.mxu0 %v13273_v1  ;;  %v16377_v25 = vld [vmem:[%s17159_s2 + $0x8] sm:$0xff] }
 0x2a9   : > { %v7143_v20 = vmul.f32 %v6835_v7, %v14497_v13  ;;  %10215 = vmatprep.mubr.f32.mxu1 %v17304_v41  ;;  %v7127_v43 = vadd.f32 %v7119_v16, %v16304_v28  ;;  %v6904_v58 = vpop.f32.mrb[216].mxu0  ;;  %13272 = vmatpush1.bf16.msra.mxu1 %v13271_v61  ;;  %v12797_v7 = vld [vmem:[%s13575_s30 + $0xa40] sm:$0xff] }
 0x2aa   : > { %v16371_v9 = vadd.f32 %v7142_v32, %v7126_v27  ;;  %v7160_v30 = vmul.f32 %v6904_v58, %v14524_v31  ;;  %v6906_v55 = vpop.f32.mrb[217].mxu0  ;;  %12822 = vmatmul.mubr.msk.f32.gmra.mrb[66].mxu0 %vm664_vm0, %v16377_v25  ;;  %13278 = vmatprep.subr.bf16.mxu1 %v13277_v48  ;;  %v12813_v27 = vld [vmem:[%s13575_s30 + $0xac0] sm:$0xff] }
 0x2ab   : > { %v6993_v57 = vpop.f32.mrb[216].mxu1  ;;  %v16381_v22 = vadd.f32 %v7143_v20, %v7127_v43  ;;  %v7161_v28 = vmul.f32 %v6906_v55, %v14540_v36  ;;  %10132 = vmatprep.mubr.f32.mxu0 %v17304_v41  ;;  %v12799_v55 = vld [vmem:[%s13575_s30 + $0xa50] sm:$0xff] }
 0x2ac   : > { %12826 = vmatmul.mubr.msk.f32.gmra.mrb[66].mxu1 %vm664_vm0, %v16377_v25  ;;  %v7184_v53 = vmul.f32 %v6993_v57, %v14554_v24  ;;  %v6995_v4 = vpop.f32.mrb[217].mxu1  ;;  %v7168_v62 = vadd.f32 %v7160_v30, %v16315_v12 }
 0x2ad   : > { %v7185_v21 = vmul.f32 %v6995_v4, %v14571_v59  ;;  %10221 = vmatprep.mubr.f32.mxu1 %v17304_v41  ;;  %v7169_v48 = vadd.f32 %v7161_v28, %v16320_v6  ;;  %v6910_v34 = vpop.f32.mrb[218].mxu0  ;;  %v13275_v4 = vpack.c.bf16 %v12813_v27, %v12797_v7 }
 0x2ae   : > { %v7192_v0 = vadd.f32 %v7184_v53, %v7168_v62  ;;  %v7162_v61 = vmul.f32 %v6910_v34, %v14577_v8  ;;  %v6912_v1 = vpop.f32.mrb[219].mxu0  ;;  %12823 = vmatmul.mubr.msk.f32.gmra.mrb[68].mxu0 %vm664_vm0, %v16234_v60  ;;  %v12815_v62 = vld [vmem:[%s13575_s30 + $0xad0] sm:$0xff] }
 0x2af   : > { %v6999_v18 = vpop.f32.mrb[218].mxu1  ;;  %v7193_v12 = vadd.f32 %v7185_v21, %v7169_v48  ;;  %v7163_v16 = vmul.f32 %v6912_v1, %v14605_v17  ;;  %10138 = vmatprep.mubr.f32.mxu0 %v17304_v41  ;;  %v12802_v21 = vld [vmem:[%s13575_s30 + $0xa68] sm:$0xff]  ;;  %v12804_v1 = vld [vmem:[%s13575_s30 + $0xa78] sm:$0xff]  ;;  %v13279_v7 = vpack.c.bf16 %v12815_v62, %v12799_v55 }
 0x2b0   : > { %12827 = vmatmul.mubr.msk.f32.gmra.mrb[68].mxu1 %vm664_vm0, %v16234_v60  ;;  %v7186_v32 = vmul.f32 %v6999_v18, %v14607_v45  ;;  %v7001_v6 = vpop.f32.mrb[219].mxu1  ;;  %12565 = vst [vmem:[%s14678_s10 + $0x180] sm:$0xff] %v7192_v0  ;;  %v7170_v20 = vadd.f32 %v7162_v61, %v16334_v47  ;;  %v12818_v48 = vld [vmem:[%s13575_s30 + $0xae8] sm:$0xff]  ;;  %v12820_v18 = vld [vmem:[%s13575_s30 + $0xaf8] sm:$0xff] }
 0x2b1   : > { %v7187_v43 = vmul.f32 %v7001_v6, %v14642_v26  ;;  %10227 = vmatprep.mubr.f32.mxu1 %v17304_v41  ;;  %12566 = vst [vmem:[%s14678_s10 + $0x188] sm:$0xff] %v7193_v12  ;;  %v7171_v58 = vadd.f32 %v7163_v16, %v16342_v10  ;;  %v6916_v30 = vpop.f32.mrb[220].mxu0  ;;  %v13281_v27 = vpack.c.bf16 %v12818_v48, %v12802_v21  ;;  %v17555_v62 = vld [vmem:[#allocation43_spill] sm:$0xff] }
 0x2b2   : > { %v7194_v57 = vadd.f32 %v7186_v32, %v7170_v20  ;;  %v7164_v28 = vmul.f32 %v6916_v30, %v14661_v38  ;;  %v6918_v53 = vpop.f32.mrb[221].mxu0  ;;  %12824 = vmatmul.mubr.msk.f32.gmra.mrb[70].mxu0 %vm664_vm0, %v16258_v35  ;;  %v13285_v30 = vpack.c.bf16 %v12820_v18, %v12804_v1  ;;  %v17557_v18 = vld [vmem:[#allocation9_spill] sm:$0xff] }
 0x2b3   : > { %v7005_v47 = vpop.f32.mrb[220].mxu1  ;;  %v7195_v34 = vadd.f32 %v7187_v43, %v7171_v58  ;;  %v7165_v10 = vmul.f32 %v6918_v53, %v14663_v23  ;;  %10298 = vmatprep.mubr.f32.mxu0 %v17304_v41 }
 0x2b4   : > { %12828 = vmatmul.mubr.msk.f32.gmra.mrb[70].mxu1 %vm664_vm0, %v16258_v35  ;;  %v7188_v0 = vmul.f32 %v7005_v47, %v14668_v3  ;;  %v7007_v61 = vpop.f32.mrb[221].mxu1  ;;  %12567 = vst [vmem:[%s14678_s10 + $0x190] sm:$0xff] %v7194_v57  ;;  %v7172_v12 = vadd.f32 %v7164_v28, %v16355_v51 }
 0x2b5   : > { %v7189_v16 = vmul.f32 %v7007_v61, %v14684_v54  ;;  %10387 = vmatprep.mubr.f32.mxu1 %v17304_v41  ;;  %12568 = vst [vmem:[%s14678_s10 + $0x198] sm:$0xff] %v7195_v34  ;;  %v7173_v32 = vadd.f32 %v7165_v10, %v16360_v5  ;;  %v6922_v6 = vpop.f32.mrb[222].mxu0  ;;  %v17554_v5 = vld [vmem:[#allocation7_spill] sm:$0xff] }
 0x2b6   : > { %v7196_v20 = vadd.f32 %v7188_v0, %v7172_v12  ;;  %v7166_v43 = vmul.f32 %v6922_v6, %v17519_v37  ;;  %v6924_v58 = vpop.f32.mrb[223].mxu0  ;;  %12829 = vmatmul.mubr.msk.f32.vlgmr.msra.gmra.mrb[72].mxu0 %vm664_vm0, %v16284_v46  ;;  %v17559_v6 = vld [vmem:[#allocation11_spill] sm:$0xff] }
 0x2b7   : > { %v7011_v51 = vpop.f32.mrb[222].mxu1  ;;  %v7197_v57 = vadd.f32 %v7189_v16, %v7173_v32  ;;  %v7167_v28 = vmul.f32 %v6924_v58, %v17520_v29  ;;  %13276 = vmatpush1.bf16.msra.mxu0 %v13275_v4  ;;  %10304 = vmatprep.mubr.f32.mxu0 %v17304_v41  ;;  %v17556_v4 = vld [vmem:[#allocation8_spill] sm:$0xff]  ;;  %v17558_v16 = vld [vmem:[#allocation10_spill] sm:$0xff] }
 0x2b8   : > { %12833 = vmatmul.mubr.msk.f32.vlgmr.msra.gmra.mrb[72].mxu1 %vm664_vm0, %v16284_v46  ;;  %v7190_v53 = vmul.f32 %v7011_v51, %v17554_v5  ;;  %v7013_v55 = vpop.f32.mrb[223].mxu1  ;;  %12569 = vst [vmem:[%s14678_s10 + $0x1a0] sm:$0xff] %v7196_v20  ;;  %v7174_v47 = vadd.f32 %v7166_v43, %v16371_v9  ;;  %13282 = vmatprep.subr.bf16.mxu0 %v13281_v27  ;;  %v17560_v58 = vld [vmem:[#allocation12_spill] sm:$0xff] }
 0x2b9   : > { %v7191_v21 = vmul.f32 %v7013_v55, %v17555_v62  ;;  %10393 = vmatprep.mubr.f32.mxu1 %v17304_v41  ;;  %12570 = vst [vmem:[%s14678_s10 + $0x1a8] sm:$0xff] %v7197_v57  ;;  %v7175_v48 = vadd.f32 %v7167_v28, %v16381_v22  ;;  %v7308_v34 = vpop.f32.mrb[224].mxu0  ;;  %13280 = vmatpush1.bf16.msra.mxu1 %v13279_v7  ;;  %v17561_v28 = vld [vmem:[#allocation13_spill] sm:$0xff]  ;;  %v17562_v55 = vld [vmem:[#allocation14_spill] sm:$0xff] }
 0x2ba   : > { %v7198_v10 = vadd.f32 %v7190_v53, %v7174_v47  ;;  %v7962_v0 = vmul.f32 %v7308_v34, %v17556_v4  ;;  %v7310_v1 = vpop.f32.mrb[225].mxu0  ;;  %12830 = vmatmul.mubr.msk.f32.gmra.mrb[74].mxu0 %vm664_vm0, %v16377_v25  ;;  %13286 = vmatprep.subr.bf16.mxu1 %v13285_v30 }
 0x2bb   : > { %v7397_v61 = vpop.f32.mrb[224].mxu1  ;;  %v7199_v9 = vadd.f32 %v7191_v21, %v7175_v48  ;;  %v7963_v32 = vmul.f32 %v7310_v1, %v17558_v16  ;;  %10310 = vmatprep.mubr.f32.mxu0 %v17304_v41  ;;  %v17563_v48 = vld [vmem:[#allocation15_spill] sm:$0xff] }
 0x2bc   : > { %v7978_v12 = vmul.f32 %v7397_v61, %v17557_v18  ;;  %v7399_v22 = vpop.f32.mrb[225].mxu1  ;;  %12834 = vmatmul.mubr.msk.f32.gmra.mrb[74].mxu1 %vm664_vm0, %v16377_v25  ;;  %12571 = vst [vmem:[%s14678_s10 + $0x1b0] sm:$0xff] %v7198_v10  ;;  %v12801_v10 = vld [vmem:[%s13575_s30 + $0xa60] sm:$0xff] }
 0x2bd   : > { %v7979_v7 = vmul.f32 %v7399_v22, %v17559_v6  ;;  %10399 = vmatprep.mubr.f32.mxu1 %v17304_v41  ;;  %12572 = vst [vmem:[%s14678_s10 + $0x1b8] sm:$0xff] %v7199_v9  ;;  %v7314_v20 = vpop.f32.mrb[226].mxu0  ;;  %v12803_v9 = vld [vmem:[%s13575_s30 + $0xa70] sm:$0xff] }
 0x2be   : > { %v16454_v27 = vadd.f32 %v7978_v12, %v7962_v0  ;;  %v7964_v51 = vmul.f32 %v7314_v20, %v17560_v58  ;;  %v7316_v57 = vpop.f32.mrb[227].mxu0  ;;  %12831 = vmatmul.mubr.msk.f32.gmra.mrb[76].mxu0 %vm664_vm0, %v16234_v60  ;;  %v12817_v0 = vld [vmem:[%s13575_s30 + $0xae0] sm:$0xff] }
 0x2bf   : > { %v16456_v43 = vadd.f32 %v7979_v7, %v7963_v32  ;;  %v7403_v30 = vpop.f32.mrb[226].mxu1  ;;  %v7965_v47 = vmul.f32 %v7316_v57, %v17562_v55  ;;  %10316 = vmatprep.mubr.f32.mxu0 %v17304_v41  ;;  %v17564_v32 = vld [vmem:[#allocation16_spill] sm:$0xff]  ;;  %v12862_v57 = vld [vmem:[%s13575_s30 + $0xb08] sm:$0xff] }
 0x2c0   : > { %v7980_v53 = vmul.f32 %v7403_v30, %v17561_v28  ;;  %v7405_v21 = vpop.f32.mrb[227].mxu1  ;;  %12835 = vmatmul.mubr.msk.f32.gmra.mrb[76].mxu1 %vm664_vm0, %v16234_v60  ;;  %v12819_v30 = vld [vmem:[%s13575_s30 + $0xaf0] sm:$0xff] }
 0x2c1   : > { %v7981_v34 = vmul.f32 %v7405_v21, %v17563_v48  ;;  %10405 = vmatprep.mubr.f32.mxu1 %v17304_v41  ;;  %v7320_v1 = vpop.f32.mrb[228].mxu0  ;;  %v12878_v21 = vld [vmem:[%s13575_s30 + $0xb88] sm:$0xff]  ;;  %v17565_v48 = vld [vmem:[#allocation18_spill] sm:$0xff]  ;;  %v13287_v18 = vpack.c.bf16 %v12819_v30, %v12803_v9 }
 0x2c2   : > { %v16470_v61 = vadd.f32 %v7980_v53, %v7964_v51  ;;  %v7966_v22 = vmul.f32 %v7320_v1, %v17564_v32  ;;  %v7322_v20 = vpop.f32.mrb[229].mxu0  ;;  %12832 = vmatmul.mubr.msk.f32.gmra.mrb[78].mxu0 %vm664_vm0, %v16258_v35  ;;  %v17566_v51 = vld [vmem:[#allocation17_spill] sm:$0xff]  ;;  %v17567_v32 = vld [vmem:[#allocation19_spill] sm:$0xff] }
 0x2c3   : > { %v16473_v12 = vadd.f32 %v7981_v34, %v7965_v47  ;;  %v7409_v7 = vpop.f32.mrb[228].mxu1  ;;  %v7967_v53 = vmul.f32 %v7322_v20, %v17566_v51  ;;  %10476 = vmatprep.mubr.f32.mxu0 %v17304_v41  ;;  %v13283_v47 = vpack.c.bf16 %v12817_v0, %v12801_v10  ;;  %v12864_v34 = vld [vmem:[%s13575_s30 + $0xb18] sm:$0xff]  ;;  %v17568_v20 = vld [vmem:[#allocation20_spill] sm:$0xff] }
 0x2c4   : > { %v7982_v55 = vmul.f32 %v7409_v7, %v17565_v48  ;;  %v7411_v28 = vpop.f32.mrb[229].mxu1  ;;  %12836 = vmatmul.mubr.msk.f32.gmra.mrb[78].mxu1 %vm664_vm0, %v16258_v35  ;;  %v12880_v1 = vld [vmem:[%s13575_s30 + $0xb98] sm:$0xff]  ;;  %v13289_v7 = vpack.c.bf16 %v12878_v21, %v12862_v57 }
 0x2c5   : > { %v7983_v58 = vmul.f32 %v7411_v28, %v17567_v32  ;;  %10565 = vmatprep.mubr.f32.mxu1 %v17304_v41  ;;  %v7326_v16 = vpop.f32.mrb[230].mxu0  ;;  %v13293_v10 = vpack.c.bf16 %v12880_v1, %v12864_v34  ;;  %v17569_v0 = vld [vmem:[#allocation21_spill] sm:$0xff]  ;;  %v17570_v28 = vld [vmem:[#allocation22_spill] sm:$0xff] }
 0x2c6   : > { %v16490_v6 = vadd.f32 %v7982_v55, %v7966_v22  ;;  %v7968_v51 = vmul.f32 %v7326_v16, %v17568_v20  ;;  %v7328_v62 = vpop.f32.mrb[231].mxu0  ;;  %12837 = vmatmul.mubr.msk.f32.vlgmr.msra.gmra.mrb[80].mxu0 %vm664_vm0, %v16284_v46  ;;  %v17571_v55 = vld [vmem:[#allocation24_spill] sm:$0xff] }
 0x2c7   : > { %v16492_v48 = vadd.f32 %v7983_v58, %v7967_v53  ;;  %v7415_v4 = vpop.f32.mrb[230].mxu1  ;;  %v7969_v32 = vmul.f32 %v7328_v62, %v17570_v28  ;;  %13284 = vmatpush1.bf16.msra.mxu0 %v13283_v47  ;;  %10482 = vmatprep.mubr.f32.mxu0 %v17304_v41 }
 0x2c8   : > { %v7984_v5 = vmul.f32 %v7415_v4, %v17569_v0  ;;  %v7417_v29 = vpop.f32.mrb[231].mxu1  ;;  %12841 = vmatmul.mubr.msk.f32.vlgmr.msra.gmra.mrb[80].mxu1 %vm664_vm0, %v16284_v46  ;;  %13290 = vmatprep.subr.bf16.mxu0 %v13289_v7  ;;  %v17572_v4 = vld [vmem:[#allocation23_spill] sm:$0xff] }
 0x2c9   : > { %v7985_v58 = vmul.f32 %v7417_v29, %v17571_v55  ;;  %10571 = vmatprep.mubr.f32.mxu1 %v17304_v41  ;;  %v7486_v9 = vpop.f32.mrb[232].mxu0  ;;  %13288 = vmatpush1.bf16.msra.mxu1 %v13287_v18  ;;  %v17573_v29 = vld [vmem:[#allocation25_spill] sm:$0xff] }
 0x2ca   : > { %v16504_v16 = vadd.f32 %v7984_v5, %v7968_v51  ;;  %v8002_v62 = vmul.f32 %v7486_v9, %v17572_v4  ;;  %v7488_v30 = vpop.f32.mrb[233].mxu0  ;;  %12838 = vmatmul.mubr.msk.f32.gmra.mrb[82].mxu0 %vm664_vm0, %v16377_v25  ;;  %13294 = vmatprep.subr.bf16.mxu1 %v13293_v10  ;;  %v17574_v5 = vld [vmem:[#allocation26_spill] sm:$0xff]  ;;  %v17576_v10 = vld [vmem:[#allocation28_spill] sm:$0xff] }
 0x2cb   : > { %v16506_v22 = vadd.f32 %v7985_v58, %v7969_v32  ;;  %v7575_v57 = vpop.f32.mrb[232].mxu1  ;;  %v8003_v21 = vmul.f32 %v7488_v30, %v17573_v29  ;;  %10488 = vmatprep.mubr.f32.mxu0 %v17304_v41  ;;  %v17575_v32 = vld [vmem:[#allocation27_spill] sm:$0xff] }
 0x2cc   : > { %12842 = vmatmul.mubr.msk.f32.gmra.mrb[82].mxu1 %vm664_vm0, %v16377_v25  ;;  %v8026_v51 = vmul.f32 %v7575_v57, %v17574_v5  ;;  %v7577_v53 = vpop.f32.mrb[233].mxu1  ;;  %v8010_v18 = vadd.f32 %v8002_v62, %v16454_v27  ;;  %v17577_v62 = vld [vmem:[#allocation29_spill] sm:$0xff] }
 0x2cd   : > { %v8027_v47 = vmul.f32 %v7577_v53, %v17575_v32  ;;  %10577 = vmatprep.mubr.f32.mxu1 %v17304_v41  ;;  %v8011_v34 = vadd.f32 %v8003_v21, %v16456_v43  ;;  %v7492_v1 = vpop.f32.mrb[234].mxu0  ;;  %v17578_v53 = vld [vmem:[#allocation30_spill] sm:$0xff] }
 0x2ce   : > { %v16520_v7 = vadd.f32 %v8026_v51, %v8010_v18  ;;  %v8004_v58 = vmul.f32 %v7492_v1, %v17576_v10  ;;  %v7494_v9 = vpop.f32.mrb[235].mxu0  ;;  %12839 = vmatmul.mubr.msk.f32.gmra.mrb[84].mxu0 %vm664_vm0, %v16234_v60  ;;  %v12861_v51 = vld [vmem:[%s13575_s30 + $0xb00] sm:$0xff]  ;;  %v17579_v10 = vld [vmem:[#allocation31_spill] sm:$0xff] }
 0x2cf   : > { %v7581_v30 = vpop.f32.mrb[234].mxu1  ;;  %v16525_v27 = vadd.f32 %v8027_v47, %v8011_v34  ;;  %v8005_v57 = vmul.f32 %v7494_v9, %v17577_v62  ;;  %10494 = vmatprep.mubr.f32.mxu0 %v17304_v41  ;;  %v12877_v18 = vld [vmem:[%s13575_s30 + $0xb80] sm:$0xff]  ;;  %v12863_v62 = vld [vmem:[%s13575_s30 + $0xb10] sm:$0xff] }
 0x2d0   : > { %12843 = vmatmul.mubr.msk.f32.gmra.mrb[84].mxu1 %vm664_vm0, %v16234_v60  ;;  %v8028_v43 = vmul.f32 %v7581_v30, %v17578_v53  ;;  %v7583_v21 = vpop.f32.mrb[235].mxu1  ;;  %v8012_v1 = vadd.f32 %v8004_v58, %v16470_v61  ;;  %v17580_v53 = vld [vmem:[#allocation32_spill] sm:$0xff]  ;;  %v13291_v61 = vpack.c.bf16 %v12877_v18, %v12861_v51 }
 0x2d1   : > { %v8029_v47 = vmul.f32 %v7583_v21, %v17579_v10  ;;  %10583 = vmatprep.mubr.f32.mxu1 %v17304_v41  ;;  %v8013_v34 = vadd.f32 %v8005_v57, %v16473_v12  ;;  %v7498_v9 = vpop.f32.mrb[236].mxu0  ;;  %v12879_v58 = vld [vmem:[%s13575_s30 + $0xb90] sm:$0xff]  ;;  %v12866_v21 = vld [vmem:[%s13575_s30 + $0xb28] sm:$0xff]  ;;  %v17581_v12 = vld [vmem:[#allocation33_spill] sm:$0xff] }
 0x2d2   : > { %v16539_v30 = vadd.f32 %v8028_v43, %v8012_v1  ;;  %v8006_v32 = vmul.f32 %v7498_v9, %v17580_v53  ;;  %v7500_v5 = vpop.f32.mrb[237].mxu0  ;;  %12840 = vmatmul.mubr.msk.f32.gmra.mrb[86].mxu0 %vm664_vm0, %v16258_v35  ;;  %v12882_v10 = vld [vmem:[%s13575_s30 + $0xba8] sm:$0xff]  ;;  %v17582_v43 = vld [vmem:[#allocation36_spill] sm:$0xff]  ;;  %v12868_v9 = vld [vmem:[%s13575_s30 + $0xb38] sm:$0xff] }
 0x2d3   : > { %v7587_v29 = vpop.f32.mrb[236].mxu1  ;;  %v16547_v4 = vadd.f32 %v8029_v47, %v8013_v34  ;;  %v8007_v57 = vmul.f32 %v7500_v5, %v17581_v12  ;;  %10654 = vmatprep.mubr.f32.mxu0 %v17304_v41  ;;  %v12884_v53 = vld [vmem:[%s13575_s30 + $0xbb8] sm:$0xff]  ;;  %v13295_v5 = vpack.c.bf16 %v12879_v58, %v12863_v62  ;;  %v13297_v34 = vpack.c.bf16 %v12882_v10, %v12866_v21 }
 0x2d4   : > { %12844 = vmatmul.mubr.msk.f32.gmra.mrb[86].mxu1 %vm664_vm0, %v16258_v35  ;;  %v8030_v1 = vmul.f32 %v7587_v29, %v17582_v43  ;;  %v7589_v55 = vpop.f32.mrb[237].mxu1  ;;  %v8014_v28 = vadd.f32 %v8006_v32, %v16490_v6  ;;  %v13301_v20 = vpack.c.bf16 %v12884_v53, %v12868_v9 }
 0x2d5   : > { %v8031_v51 = vmul.f32 %v7589_v55, %v17376_v19  ;;  %10743 = vmatprep.mubr.f32.mxu1 %v17304_v41  ;;  %v8015_v18 = vadd.f32 %v8007_v57, %v16492_v48  ;;  %v7504_v47 = vpop.f32.mrb[238].mxu0 }
 0x2d6   : > { %v16560_v12 = vadd.f32 %v8030_v1, %v8014_v28  ;;  %v8008_v29 = vmul.f32 %v7504_v47, %v17377_v15  ;;  %v7506_v43 = vpop.f32.mrb[239].mxu0  ;;  %12845 = vmatmul.mubr.msk.f32.vlgmr.msra.gmra.mrb[88].mxu0 %vm664_vm0, %v16284_v46 }
 0x2d7   : > { %v7593_v0 = vpop.f32.mrb[238].mxu1  ;;  %v16565_v6 = vadd.f32 %v8031_v51, %v8015_v18  ;;  %v8009_v55 = vmul.f32 %v7506_v43, %v17332_v63  ;;  %13292 = vmatpush1.bf16.msra.mxu0 %v13291_v61  ;;  %10660 = vmatprep.mubr.f32.mxu0 %v17304_v41 }
 0x2d8   : > { %12849 = vmatmul.mubr.msk.f32.vlgmr.msra.gmra.mrb[88].mxu1 %vm664_vm0, %v16284_v46  ;;  %v8032_v48 = vmul.f32 %v7593_v0, %v17333_v42  ;;  %v7595_v28 = vpop.f32.mrb[239].mxu1  ;;  %v8016_v32 = vadd.f32 %v8008_v29, %v16504_v16  ;;  %13298 = vmatprep.subr.bf16.mxu0 %v13297_v34 }
 0x2d9   : > { %v8033_v10 = vmul.f32 %v7595_v28, %v14294_v44  ;;  %10749 = vmatprep.mubr.f32.mxu1 %v17304_v41  ;;  %v8017_v62 = vadd.f32 %v8009_v55, %v16506_v22  ;;  %v7664_v53 = vpop.f32.mrb[240].mxu0  ;;  %13296 = vmatpush1.bf16.msra.mxu1 %v13295_v5  ;;  %v17583_v55 = vld [vmem:[#allocation47_spill] sm:$0xff]  ;;  %v12865_v28 = vld [vmem:[%s13575_s30 + $0xb20] sm:$0xff] }
 0x2da   : > { %v16576_v58 = vadd.f32 %v8032_v48, %v8016_v32  ;;  %v8050_v21 = vmul.f32 %v7664_v53, %v14306_v56  ;;  %v7666_v0 = vpop.f32.mrb[241].mxu0  ;;  %12846 = vmatmul.mubr.msk.f32.gmra.mrb[90].mxu0 %vm664_vm0, %v16377_v25  ;;  %13302 = vmatprep.subr.bf16.mxu1 %v13301_v20  ;;  %v12881_v32 = vld [vmem:[%s13575_s30 + $0xba0] sm:$0xff] }
 0x2db   : > { %v7753_v16 = vpop.f32.mrb[240].mxu1  ;;  %v16581_v61 = vadd.f32 %v8033_v10, %v8017_v62  ;;  %v8051_v57 = vmul.f32 %v7666_v0, %v17340_v14  ;;  %10666 = vmatprep.mubr.f32.mxu0 %v17304_v41  ;;  %v17584_v62 = vld [vmem:[#allocation48_spill] sm:$0xff] }
 0x2dc   : > { %12850 = vmatmul.mubr.msk.f32.gmra.mrb[90].mxu1 %vm664_vm0, %v16377_v25  ;;  %v8074_v22 = vmul.f32 %v7753_v16, %v17378_v39  ;;  %v7755_v43 = vpop.f32.mrb[241].mxu1  ;;  %v8058_v1 = vadd.f32 %v8050_v21, %v16520_v7  ;;  %v12867_v16 = vld [vmem:[%s13575_s30 + $0xb30] sm:$0xff] }
 0x2dd   : > { %v8075_v9 = vmul.f32 %v7755_v43, %v14342_v33  ;;  %10755 = vmatprep.mubr.f32.mxu1 %v17304_v41  ;;  %v8059_v20 = vadd.f32 %v8051_v57, %v16525_v27  ;;  %v7670_v51 = vpop.f32.mrb[242].mxu0 }
 0x2de   : > { %v16592_v18 = vadd.f32 %v8074_v22, %v8058_v1  ;;  %v8052_v47 = vmul.f32 %v7670_v51, %v14356_v52  ;;  %v7672_v5 = vpop.f32.mrb[243].mxu0  ;;  %12847 = vmatmul.mubr.msk.f32.gmra.mrb[92].mxu0 %vm664_vm0, %v16234_v60  ;;  %v17585_v22 = vld [vmem:[#allocation49_spill] sm:$0xff]  ;;  %v12870_v51 = vld [vmem:[%s13575_s30 + $0xb48] sm:$0xff] }
 0x2df   : > { %v7759_v34 = vpop.f32.mrb[242].mxu1  ;;  %v16597_v7 = vadd.f32 %v8075_v9, %v8059_v20  ;;  %v8053_v29 = vmul.f32 %v7672_v5, %v17412_v40  ;;  %10672 = vmatprep.mubr.f32.mxu0 %v17304_v41  ;;  %v12883_v20 = vld [vmem:[%s13575_s30 + $0xbb0] sm:$0xff] }
 0x2e0   : > { %12851 = vmatmul.mubr.msk.f32.gmra.mrb[92].mxu1 %vm664_vm0, %v16234_v60  ;;  %v8076_v27 = vmul.f32 %v7759_v34, %v17583_v55  ;;  %v7761_v48 = vpop.f32.mrb[243].mxu1  ;;  %v8060_v10 = vadd.f32 %v8052_v47, %v16539_v30  ;;  %v13299_v30 = vpack.c.bf16 %v12881_v32, %v12865_v28  ;;  %v12886_v47 = vld [vmem:[%s13575_s30 + $0xbc8] sm:$0xff] }
 0x2e1   : > { %v8077_v53 = vmul.f32 %v7761_v48, %v17584_v62  ;;  %10761 = vmatprep.mubr.f32.mxu1 %v17304_v41  ;;  %v8061_v21 = vadd.f32 %v8053_v29, %v16547_v4  ;;  %v7676_v0 = vpop.f32.mrb[244].mxu0  ;;  %v17586_v4 = vld [vmem:[#allocation50_spill] sm:$0xff]  ;;  %v17587_v29 = vld [vmem:[#allocation51_spill] sm:$0xff] }
 0x2e2   : > { %v16611_v57 = vadd.f32 %v8076_v27, %v8060_v10  ;;  %v8054_v43 = vmul.f32 %v7676_v0, %v17585_v22  ;;  %v7678_v1 = vpop.f32.mrb[245].mxu0  ;;  %12848 = vmatmul.mubr.msk.f32.gmra.mrb[94].mxu0 %vm664_vm0, %v16258_v35  ;;  %v12872_v10 = vld [vmem:[%s13575_s30 + $0xb58] sm:$0xff] }
 0x2e3   : > { %v7765_v9 = vpop.f32.mrb[244].mxu1  ;;  %v16619_v5 = vadd.f32 %v8077_v53, %v8061_v21  ;;  %v8055_v34 = vmul.f32 %v7678_v1, %v17586_v4  ;;  %11058 = vmatprep.mubr.f32.mxu0 %v17304_v41  ;;  %v12888_v0 = vld [vmem:[%s13575_s30 + $0xbd8] sm:$0xff]  ;;  %v13303_v21 = vpack.c.bf16 %v12883_v20, %v12867_v16  ;;  %v13305_v1 = vpack.c.bf16 %v12886_v47, %v12870_v51 }
 0x2e4   : > { %12852 = vmatmul.mubr.msk.f32.gmra.mrb[94].mxu1 %vm664_vm0, %v16258_v35  ;;  %v8078_v27 = vmul.f32 %v7765_v9, %v17587_v29  ;;  %v7767_v48 = vpop.f32.mrb[245].mxu1  ;;  %v8062_v22 = vadd.f32 %v8054_v43, %v16560_v12  ;;  %v13309_v55 = vpack.c.bf16 %v12888_v0, %v12872_v10 }
 0x2e5   : > { %v8079_v28 = vmul.f32 %v7767_v48, %v14427_v49  ;;  %11147 = vmatprep.mubr.f32.mxu1 %v17304_v41  ;;  %v8063_v32 = vadd.f32 %v8055_v34, %v16565_v6  ;;  %v7682_v53 = vpop.f32.mrb[246].mxu0 }
 0x2e6   : > { %v16632_v4 = vadd.f32 %v8078_v27, %v8062_v22  ;;  %v8056_v9 = vmul.f32 %v7682_v53, %v14437_v2  ;;  %v7684_v29 = vpop.f32.mrb[247].mxu0  ;;  %12893 = vmatmul.mubr.msk.f32.vlgmr.msra.gmra.mrb[96].mxu0 %vm664_vm0, %v16284_v46 }
 0x2e7   : > { %v7771_v62 = vpop.f32.mrb[246].mxu1  ;;  %v16637_v12 = vadd.f32 %v8079_v28, %v8063_v32  ;;  %v8057_v43 = vmul.f32 %v7684_v29, %v14464_v50  ;;  %13300 = vmatpush1.bf16.msra.mxu0 %v13299_v30  ;;  %11064 = vmatprep.mubr.f32.mxu0 %v17304_v41 }
 0x2e8   : > { %12897 = vmatmul.mubr.msk.f32.vlgmr.msra.gmra.mrb[96].mxu1 %vm664_vm0, %v16284_v46  ;;  %v8080_v6 = vmul.f32 %v7771_v62, %v14492_v11  ;;  %v7773_v16 = vpop.f32.mrb[247].mxu1  ;;  %v8064_v22 = vadd.f32 %v8056_v9, %v16576_v58  ;;  %13306 = vmatprep.subr.bf16.mxu0 %v13305_v1 }
 0x2e9   : > { %v8081_v20 = vmul.f32 %v7773_v16, %v14497_v13  ;;  %11153 = vmatprep.mubr.f32.mxu1 %v17304_v41  ;;  %v8065_v51 = vadd.f32 %v8057_v43, %v16581_v61  ;;  %v7842_v47 = vpop.f32.mrb[248].mxu0  ;;  %13304 = vmatpush1.bf16.msra.mxu1 %v13303_v21  ;;  %v12885_v16 = vld [vmem:[%s13575_s30 + $0xbc0] sm:$0xff] }
 0x2ea   : > { %v16648_v34 = vadd.f32 %v8080_v6, %v8064_v22  ;;  %v8098_v29 = vmul.f32 %v7842_v47, %v14524_v31  ;;  %v7844_v62 = vpop.f32.mrb[249].mxu0  ;;  %12894 = vmatmul.mubr.msk.f32.gmra.mrb[98].mxu0 %vm664_vm0, %v16377_v25  ;;  %13310 = vmatprep.subr.bf16.mxu1 %v13309_v55  ;;  %v12869_v6 = vld [vmem:[%s13575_s30 + $0xb40] sm:$0xff]  ;;  %v12871_v47 = vld [vmem:[%s13575_s30 + $0xb50] sm:$0xff] }
 0x2eb   : > { %v7931_v58 = vpop.f32.mrb[248].mxu1  ;;  %v16653_v30 = vadd.f32 %v8081_v20, %v8065_v51  ;;  %v8099_v27 = vmul.f32 %v7844_v62, %v14540_v36  ;;  %11070 = vmatprep.mubr.f32.mxu0 %v17304_v41 }
 0x2ec   : > { %12898 = vmatmul.mubr.msk.f32.gmra.mrb[98].mxu1 %vm664_vm0, %v16377_v25  ;;  %v8122_v61 = vmul.f32 %v7931_v58, %v14554_v24  ;;  %v7933_v48 = vpop.f32.mrb[249].mxu1  ;;  %v8106_v10 = vadd.f32 %v8098_v29, %v16592_v18  ;;  %v12887_v29 = vld [vmem:[%s13575_s30 + $0xbd0] sm:$0xff] }
 0x2ed   : > { %v8123_v0 = vmul.f32 %v7933_v48, %v14571_v59  ;;  %11159 = vmatprep.mubr.f32.mxu1 %v17304_v41  ;;  %v8107_v55 = vadd.f32 %v8099_v27, %v16597_v7  ;;  %v7848_v28 = vpop.f32.mrb[250].mxu0  ;;  %v12874_v48 = vld [vmem:[%s13575_s30 + $0xb68] sm:$0xff] }
 0x2ee   : > { %v8130_v32 = vadd.f32 %v8122_v61, %v8106_v10  ;;  %v8100_v53 = vmul.f32 %v7848_v28, %v14577_v8  ;;  %v7850_v21 = vpop.f32.mrb[251].mxu0  ;;  %12895 = vmatmul.mubr.msk.f32.gmra.mrb[100].mxu0 %vm664_vm0, %v16234_v60  ;;  %v13307_v61 = vpack.c.bf16 %v12885_v16, %v12869_v6  ;;  %v12890_v10 = vld [vmem:[%s13575_s30 + $0xbe8] sm:$0xff] }
 0x2ef   : > { %v7937_v1 = vpop.f32.mrb[250].mxu1  ;;  %v8131_v18 = vadd.f32 %v8123_v0, %v8107_v55  ;;  %v8101_v9 = vmul.f32 %v7850_v21, %v14605_v17  ;;  %11076 = vmatprep.mubr.f32.mxu0 %v17304_v41 }
 0x2f0   : > { %12899 = vmatmul.mubr.msk.f32.gmra.mrb[100].mxu1 %vm664_vm0, %v16234_v60  ;;  %v8124_v7 = vmul.f32 %v7937_v1, %v14607_v45  ;;  %v7939_v43 = vpop.f32.mrb[251].mxu1  ;;  %12637 = vst [vmem:[%s14678_s10 + $0x1c0] sm:$0xff] %v8130_v32  ;;  %v8108_v22 = vadd.f32 %v8100_v53, %v16611_v57  ;;  %v12876_v32 = vld [vmem:[%s13575_s30 + $0xb78] sm:$0xff] }
 0x2f1   : > { %v8125_v20 = vmul.f32 %v7939_v43, %v14642_v26  ;;  %11165 = vmatprep.mubr.f32.mxu1 %v17304_v41  ;;  %12638 = vst [vmem:[%s14678_s10 + $0x1c8] sm:$0xff] %v8131_v18  ;;  %v8109_v51 = vadd.f32 %v8101_v9, %v16619_v5  ;;  %v7854_v60 = vpop.f32.mrb[252].mxu0  ;;  %v12892_v53 = vld [vmem:[%s13575_s30 + $0xbf8] sm:$0xff]  ;;  %v13311_v18 = vpack.c.bf16 %v12887_v29, %v12871_v47  ;;  %v17589_v47 = vld [vmem:[#allocation7_spill] sm:$0xff] }
 0x2f2   : > { %v8132_v62 = vadd.f32 %v8124_v7, %v8108_v22  ;;  %v8102_v58 = vmul.f32 %v7854_v60, %v14661_v38  ;;  %v7856_v27 = vpop.f32.mrb[253].mxu0  ;;  %12896 = vmatmul.mubr.msk.f32.gmra.mrb[102].mxu0 %vm664_vm0, %v16258_v35  ;;  %v13313_v7 = vpack.c.bf16 %v12890_v10, %v12874_v48  ;;  %v13317_v22 = vpack.c.bf16 %v12892_v53, %v12876_v32  ;;  %v17591_v10 = vld [vmem:[#allocation8_spill] sm:$0xff]  ;;  %v17593_v32 = vld [vmem:[#allocation10_spill] sm:$0xff] }
 0x2f3   : > { %v7943_v57 = vpop.f32.mrb[252].mxu1  ;;  %v8133_v0 = vadd.f32 %v8125_v20, %v8109_v51  ;;  %v8103_v5 = vmul.f32 %v7856_v27, %v14663_v23  ;;  %11236 = vmatprep.mubr.f32.mxu0 %v17304_v41  ;;  %v17588_v51 = vld [vmem:[#allocation34_spill] sm:$0xff] }
 0x2f4   : > { %12900 = vmatmul.mubr.msk.f32.gmra.mrb[102].mxu1 %vm664_vm0, %v16258_v35  ;;  %v8126_v55 = vmul.f32 %v7943_v57, %v14668_v3  ;;  %v7945_v28 = vpop.f32.mrb[253].mxu1  ;;  %12639 = vst [vmem:[%s14678_s10 + $0x1d0] sm:$0xff] %v8132_v62  ;;  %v8110_v21 = vadd.f32 %v8102_v58, %v16632_v4  ;;  %v17590_v58 = vld [vmem:[#allocation43_spill] sm:$0xff] }
 0x2f5   : > { %v8127_v1 = vmul.f32 %v7945_v28, %v14684_v54  ;;  %11325 = vmatprep.mubr.f32.mxu1 %v17304_v41  ;;  %12640 = vst [vmem:[%s14678_s10 + $0x1d8] sm:$0xff] %v8133_v0  ;;  %v8111_v9 = vadd.f32 %v8103_v5, %v16637_v12  ;;  %v7860_v35 = vpop.f32.mrb[254].mxu0 }
 0x2f6   : > { %v8134_v43 = vadd.f32 %v8126_v55, %v8110_v21  ;;  %v8104_v6 = vmul.f32 %v7860_v35, %v17519_v37  ;;  %v7862_v16 = vpop.f32.mrb[255].mxu0  ;;  %12901 = vmatmul.mubr.msk.f32.vlgmr.msra.gmra.mrb[104].mxu0 %vm664_vm0, %v16284_v46  ;;  %v17592_v55 = vld [vmem:[#allocation9_spill] sm:$0xff]  ;;  %v17594_v21 = vld [vmem:[#allocation11_spill] sm:$0xff] }
 0x2f7   : > { %v7949_v4 = vpop.f32.mrb[254].mxu1  ;;  %v8135_v20 = vadd.f32 %v8127_v1, %v8111_v9  ;;  %v8105_v60 = vmul.f32 %v7862_v16, %v17588_v51  ;;  %13308 = vmatpush1.bf16.msra.mxu0 %v13307_v61  ;;  %11242 = vmatprep.mubr.f32.mxu0 %v17304_v41 }
 0x2f8   : > { %v8128_v29 = vmul.f32 %v7949_v4, %v17589_v47  ;;  %v7951_v62 = vpop.f32.mrb[255].mxu1  ;;  %12905 = vmatmul.mubr.msk.f32.vlgmr.msra.gmra.mrb[104].mxu1 %vm664_vm0, %v16284_v46  ;;  %12641 = vst [vmem:[%s14678_s10 + $0x1e0] sm:$0xff] %v8134_v43  ;;  %v8112_v12 = vadd.f32 %v8104_v6, %v16648_v34  ;;  %13314 = vmatprep.subr.bf16.mxu0 %v13313_v7  ;;  %v17595_v7 = vld [vmem:[#allocation12_spill] sm:$0xff] }
 0x2f9   : > { %v8129_v27 = vmul.f32 %v7951_v62, %v17590_v58  ;;  %13312 = vmatpush1.bf16.msra.mxu1 %v13311_v18  ;;  %12642 = vst [vmem:[%s14678_s10 + $0x1e8] sm:$0xff] %v8135_v20  ;;  %v8113_v57 = vadd.f32 %v8105_v60, %v16653_v30  ;;  %v8246_v48 = vpop.f32.mrb[0].mxu0  ;;  %11331 = vmatprep.mubr.f32.mxu1 %v17304_v41  ;;  %v16734_v4 = vld [vmem:[%s17159_s2 + $0x10] sm:$0xff]  ;;  %v17597_v60 = vld [vmem:[#allocation14_spill] sm:$0xff] }
 0x2fa   : > { %v8136_v61 = vadd.f32 %v8128_v29, %v8112_v12  ;;  %v8900_v46 = vmul.f32 %v8246_v48, %v17591_v10  ;;  %v8248_v5 = vpop.f32.mrb[1].mxu0  ;;  %12902 = vmatmul.mubr.msk.f32.gmra.mrb[106].mxu0 %vm664_vm0, %v16377_v25  ;;  %13318 = vmatprep.subr.bf16.mxu1 %v13317_v22  ;;  %v17596_v22 = vld [vmem:[#allocation13_spill] sm:$0xff]  ;;  %v17598_v12 = vld [vmem:[#allocation15_spill] sm:$0xff]  ;;  %v12889_v48 = vld [vmem:[%s13575_s30 + $0xbe0] sm:$0xff] }
 0x2fb   : > { %v8335_v0 = vpop.f32.mrb[0].mxu1  ;;  %v8137_v34 = vadd.f32 %v8129_v27, %v8113_v57  ;;  %v8901_v30 = vmul.f32 %v8248_v5, %v17593_v32  ;;  %11248 = vmatprep.mubr.f32.mxu0 %v17304_v41  ;;  %v12873_v57 = vld [vmem:[%s13575_s30 + $0xb60] sm:$0xff]  ;;  %v12891_v5 = vld [vmem:[%s13575_s30 + $0xbf0] sm:$0xff] }
 0x2fc   : > { %v8916_v28 = vmul.f32 %v8335_v0, %v17592_v55  ;;  %v8337_v53 = vpop.f32.mrb[1].mxu1  ;;  %12906 = vmatmul.mubr.msk.f32.gmra.mrb[106].mxu1 %vm664_vm0, %v16377_v25  ;;  %12643 = vst [vmem:[%s14678_s10 + $0x1f0] sm:$0xff] %v8136_v61  ;;  %v12875_v0 = vld [vmem:[%s13575_s30 + $0xb70] sm:$0xff]  ;;  %v17613_v32 = vld [vmem:[#allocation30_spill] sm:$0xff] }
 0x2fd   : > { %v8917_v1 = vmul.f32 %v8337_v53, %v17594_v21  ;;  %11337 = vmatprep.mubr.f32.mxu1 %v17304_v41  ;;  %12644 = vst [vmem:[%s14678_s10 + $0x1f8] sm:$0xff] %v8137_v34  ;;  %v8252_v9 = vpop.f32.mrb[2].mxu0 }
 0x2fe   : > { %v16726_v18 = vadd.f32 %v8916_v28, %v8900_v46  ;;  %v8902_v43 = vmul.f32 %v8252_v9, %v17595_v7  ;;  %v8254_v16 = vpop.f32.mrb[3].mxu0  ;;  %12903 = vmatmul.mubr.msk.f32.gmra.mrb[108].mxu0 %vm664_vm0, %v16734_v4  ;;  %v17599_v28 = vld [vmem:[#allocation16_spill] sm:$0xff]  ;;  %v16757_v9 = vld [vmem:[%s17159_s2 + $0x18] sm:$0xff] }
 0x2ff   : > { %v16728_v35 = vadd.f32 %v8917_v1, %v8901_v30  ;;  %v8341_v6 = vpop.f32.mrb[2].mxu1  ;;  %v8903_v29 = vmul.f32 %v8254_v16, %v17597_v60  ;;  %11254 = vmatprep.mubr.f32.mxu0 %v17304_v41  ;;  %v17601_v16 = vld [vmem:[#allocation17_spill] sm:$0xff]  ;;  %v17603_v7 = vld [vmem:[#allocation20_spill] sm:$0xff] }
 0x300   : > { %v8918_v20 = vmul.f32 %v8341_v6, %v17596_v22  ;;  %v8343_v62 = vpop.f32.mrb[3].mxu1  ;;  %12907 = vmatmul.mubr.msk.f32.gmra.mrb[108].mxu1 %vm664_vm0, %v16734_v4  ;;  %v17600_v6 = vld [vmem:[#allocation18_spill] sm:$0xff] }
 0x301   : > { %v8919_v27 = vmul.f32 %v8343_v62, %v17598_v12  ;;  %11343 = vmatprep.mubr.f32.mxu1 %v17304_v41  ;;  %v8258_v46 = vpop.f32.mrb[4].mxu0 }
 0x302   : > { %v16747_v61 = vadd.f32 %v8918_v20, %v8902_v43  ;;  %v8904_v30 = vmul.f32 %v8258_v46, %v17599_v28  ;;  %v8260_v1 = vpop.f32.mrb[5].mxu0  ;;  %12904 = vmatmul.mubr.msk.f32.gmra.mrb[110].mxu0 %vm664_vm0, %v16757_v9  ;;  %v13319_v28 = vpack.c.bf16 %v12891_v5, %v12875_v0 }
 0x303   : > { %v16751_v34 = vadd.f32 %v8919_v27, %v8903_v29  ;;  %v8347_v53 = vpop.f32.mrb[4].mxu1  ;;  %v8905_v20 = vmul.f32 %v8260_v1, %v17601_v16  ;;  %11414 = vmatprep.mubr.f32.mxu0 %v17304_v41  ;;  %v13315_v29 = vpack.c.bf16 %v12889_v48, %v12873_v57  ;;  %v17602_v27 = vld [vmem:[#allocation19_spill] sm:$0xff]  ;;  %v16772_v1 = vld [vmem:[%s17159_s2] sm:$0xff]  ;;  %v17604_v57 = vld [vmem:[#allocation21_spill] sm:$0xff] }
 0x304   : > { %v8920_v43 = vmul.f32 %v8347_v53, %v17600_v6  ;;  %v8349_v62 = vpop.f32.mrb[5].mxu1  ;;  %12908 = vmatmul.mubr.msk.f32.gmra.mrb[110].mxu1 %vm664_vm0, %v16757_v9 }
 0x305   : > { %v8921_v46 = vmul.f32 %v8349_v62, %v17602_v27  ;;  %11503 = vmatprep.mubr.f32.mxu1 %v17304_v41  ;;  %v8264_v60 = vpop.f32.mrb[6].mxu0  ;;  %v17605_v62 = vld [vmem:[#allocation22_spill] sm:$0xff] }
 0x306   : > { %v8928_v12 = vadd.f32 %v8920_v43, %v8904_v30  ;;  %v8906_v21 = vmul.f32 %v8264_v60, %v17603_v7  ;;  %v8266_v6 = vpop.f32.mrb[7].mxu0  ;;  %12909 = vmatmul.mubr.msk.f32.vlgmr.msra.gmra.mrb[112].mxu0 %vm664_vm0, %v16772_v1  ;;  %v17606_v60 = vld [vmem:[#allocation24_spill] sm:$0xff] }
 0x307   : > { %v8929_v22 = vadd.f32 %v8921_v46, %v8905_v20  ;;  %v8353_v53 = vpop.f32.mrb[6].mxu1  ;;  %v8907_v27 = vmul.f32 %v8266_v6, %v17605_v62  ;;  %13316 = vmatpush1.bf16.msra.mxu0 %v13315_v29  ;;  %11420 = vmatprep.mubr.f32.mxu0 %v17304_v41  ;;  %v17607_v46 = vld [vmem:[#allocation23_spill] sm:$0xff]  ;;  %v17608_v29 = vld [vmem:[#allocation25_spill] sm:$0xff] }
 0x308   : > { %v8922_v48 = vmul.f32 %v8353_v53, %v17604_v57  ;;  %v8355_v0 = vpop.f32.mrb[7].mxu1  ;;  %12913 = vmatmul.mubr.msk.f32.vlgmr.msra.gmra.mrb[112].mxu1 %vm664_vm0, %v16772_v1  ;;  %v17609_v57 = vld [vmem:[#allocation26_spill] sm:$0xff] }
 0x309   : > { %v8923_v5 = vmul.f32 %v8355_v0, %v17606_v60  ;;  %13320 = vmatpush1.bf16.msra.mxu1 %v13319_v28  ;;  %v8424_v43 = vpop.f32.mrb[8].mxu0  ;;  %11509 = vmatprep.mubr.f32.mxu1 %v17304_v41  ;;  %v17610_v28 = vld [vmem:[#allocation27_spill] sm:$0xff] }
 0x30a   : > { %v8930_v30 = vadd.f32 %v8922_v48, %v8906_v21  ;;  %v8940_v7 = vmul.f32 %v8424_v43, %v17607_v46  ;;  %v8426_v53 = vpop.f32.mrb[9].mxu0  ;;  %12910 = vmatmul.mubr.msk.f32.gmra.mrb[114].mxu0 %vm664_vm0, %v16377_v25  ;;  %v17611_v46 = vld [vmem:[#allocation28_spill] sm:$0xff] }
 0x30b   : > { %v8931_v20 = vadd.f32 %v8923_v5, %v8907_v27  ;;  %v8513_v6 = vpop.f32.mrb[8].mxu1  ;;  %v8941_v62 = vmul.f32 %v8426_v53, %v17608_v29  ;;  %11426 = vmatprep.mubr.f32.mxu0 %v17304_v41 }
 0x30c   : > { %v8964_v16 = vmul.f32 %v8513_v6, %v17609_v57  ;;  %v8515_v0 = vpop.f32.mrb[9].mxu1  ;;  %12914 = vmatmul.mubr.msk.f32.gmra.mrb[114].mxu1 %vm664_vm0, %v16377_v25  ;;  %v8948_v21 = vadd.f32 %v8940_v7, %v16726_v18  ;;  %v17612_v57 = vld [vmem:[#allocation29_spill] sm:$0xff] }
 0x30d   : > { %v8965_v27 = vmul.f32 %v8515_v0, %v17610_v28  ;;  %11515 = vmatprep.mubr.f32.mxu1 %v17304_v41  ;;  %v8949_v48 = vadd.f32 %v8941_v62, %v16728_v35  ;;  %v8430_v5 = vpop.f32.mrb[10].mxu0  ;;  %v17617_v28 = vld [vmem:[#allocation36_spill] sm:$0xff] }
 0x30e   : > { %v8972_v43 = vadd.f32 %v8964_v16, %v8948_v21  ;;  %v8942_v53 = vmul.f32 %v8430_v5, %v17611_v46  ;;  %v8432_v29 = vpop.f32.mrb[11].mxu0  ;;  %12911 = vmatmul.mubr.msk.f32.gmra.mrb[116].mxu0 %vm664_vm0, %v16734_v4  ;;  %v17614_v16 = vld [vmem:[#allocation31_spill] sm:$0xff] }
 0x30f   : > { %v8519_v6 = vpop.f32.mrb[10].mxu1  ;;  %v8973_v25 = vadd.f32 %v8965_v27, %v8949_v48  ;;  %v8943_v60 = vmul.f32 %v8432_v29, %v17612_v57  ;;  %11432 = vmatprep.mubr.f32.mxu0 %v17304_v41  ;;  %v17615_v48 = vld [vmem:[#allocation32_spill] sm:$0xff]  ;;  %v17616_v57 = vld [vmem:[#allocation33_spill] sm:$0xff] }
 0x310   : > { %v8966_v18 = vmul.f32 %v8519_v6, %v17613_v32  ;;  %v8521_v7 = vpop.f32.mrb[11].mxu1  ;;  %12915 = vmatmul.mubr.msk.f32.gmra.mrb[116].mxu1 %vm664_vm0, %v16734_v4  ;;  %v8950_v35 = vadd.f32 %v8942_v53, %v16747_v61 }
 0x311   : > { %v8967_v62 = vmul.f32 %v8521_v7, %v17614_v16  ;;  %11521 = vmatprep.mubr.f32.mxu1 %v17304_v41  ;;  %v8951_v0 = vadd.f32 %v8943_v60, %v16751_v34  ;;  %v8436_v21 = vpop.f32.mrb[12].mxu0 }
 0x312   : > { %v8974_v27 = vadd.f32 %v8966_v18, %v8950_v35  ;;  %v8944_v29 = vmul.f32 %v8436_v21, %v17615_v48  ;;  %v8438_v5 = vpop.f32.mrb[13].mxu0  ;;  %12912 = vmatmul.mubr.msk.f32.gmra.mrb[118].mxu0 %vm664_vm0, %v16757_v9 }
 0x313   : > { %v8525_v6 = vpop.f32.mrb[12].mxu1  ;;  %v8975_v32 = vadd.f32 %v8967_v62, %v8951_v0  ;;  %v8945_v46 = vmul.f32 %v8438_v5, %v17616_v57  ;;  %11592 = vmatprep.mubr.f32.mxu0 %v17304_v41 }
 0x314   : > { %v8968_v61 = vmul.f32 %v8525_v6, %v17617_v28  ;;  %v8527_v53 = vpop.f32.mrb[13].mxu1  ;;  %12916 = vmatmul.mubr.msk.f32.gmra.mrb[118].mxu1 %vm664_vm0, %v16757_v9  ;;  %v8952_v34 = vadd.f32 %v8944_v29, %v8928_v12 }
 0x315   : > { %v8969_v60 = vmul.f32 %v8527_v53, %v17376_v19  ;;  %11681 = vmatprep.mubr.f32.mxu1 %v17304_v41  ;;  %v8953_v18 = vadd.f32 %v8945_v46, %v8929_v22  ;;  %v8442_v7 = vpop.f32.mrb[14].mxu0 }
 0x316   : > { %v8976_v35 = vadd.f32 %v8968_v61, %v8952_v34  ;;  %v8946_v62 = vmul.f32 %v8442_v7, %v17377_v15  ;;  %v8444_v0 = vpop.f32.mrb[15].mxu0  ;;  %12917 = vmatmul.mubr.msk.f32.vlgmr.msra.gmra.mrb[120].mxu0 %vm664_vm0, %v16772_v1 }
 0x317   : > { %v8531_v21 = vpop.f32.mrb[14].mxu1  ;;  %v8977_v5 = vadd.f32 %v8969_v60, %v8953_v18  ;;  %v8947_v6 = vmul.f32 %v8444_v0, %v17332_v63  ;;  %11598 = vmatprep.mubr.f32.mxu0 %v17304_v41  ;;  %v13405_v18 = vld [vmem:[%s17159_s2 + $0x8] sm:$0xff] }
 0x318   : > { %v8970_v28 = vmul.f32 %v8531_v21, %v17333_v42  ;;  %v8533_v12 = vpop.f32.mrb[15].mxu1  ;;  %12921 = vmatmul.mubr.msk.f32.vlgmr.msra.gmra.mrb[120].mxu1 %vm664_vm0, %v16772_v1  ;;  %v8954_v22 = vadd.f32 %v8946_v62, %v8930_v30 }
 0x319   : > { %v8971_v46 = vmul.f32 %v8533_v12, %v14294_v44  ;;  %11687 = vmatprep.mubr.f32.mxu1 %v17304_v41  ;;  %v8955_v29 = vadd.f32 %v8947_v6, %v8931_v20  ;;  %v8602_v61 = vpop.f32.mrb[16].mxu0 }
 0x31a   : > { %v8978_v53 = vadd.f32 %v8970_v28, %v8954_v22  ;;  %v8988_v34 = vmul.f32 %v8602_v61, %v14306_v56  ;;  %v8604_v60 = vpop.f32.mrb[17].mxu0  ;;  %12918 = vmatmul.mubr.msk.f32.gmra.mrb[122].mxu0 %vm664_vm0, %v13405_v18 }
 0x31b   : > { %v8691_v1 = vpop.f32.mrb[16].mxu1  ;;  %v8979_v7 = vadd.f32 %v8971_v46, %v8955_v29  ;;  %v8989_v30 = vmul.f32 %v8604_v60, %v17340_v14  ;;  %11604 = vmatprep.mubr.f32.mxu0 %v17304_v41 }
 0x31c   : > { %v9012_v62 = vmul.f32 %v8691_v1, %v17378_v39  ;;  %v8693_v0 = vpop.f32.mrb[17].mxu1  ;;  %12922 = vmatmul.mubr.msk.f32.gmra.mrb[122].mxu1 %vm664_vm0, %v13405_v18  ;;  %v8996_v20 = vadd.f32 %v8988_v34, %v8972_v43  ;;  %v17618_v18 = vld [vmem:[#allocation47_spill] sm:$0xff]  ;;  %v17619_v34 = vld [vmem:[#allocation48_spill] sm:$0xff] }
 0x31d   : > { %v9013_v28 = vmul.f32 %v8693_v0, %v14342_v33  ;;  %11693 = vmatprep.mubr.f32.mxu1 %v17304_v41  ;;  %v8997_v21 = vadd.f32 %v8989_v30, %v8973_v25  ;;  %v8608_v6 = vpop.f32.mrb[18].mxu0 }
 0x31e   : > { %v9020_v12 = vadd.f32 %v9012_v62, %v8996_v20  ;;  %v8990_v22 = vmul.f32 %v8608_v6, %v14356_v52  ;;  %v8610_v46 = vpop.f32.mrb[19].mxu0  ;;  %12919 = vmatmul.mubr.msk.f32.gmra.mrb[124].mxu0 %vm664_vm0, %v16734_v4  ;;  %v17620_v6 = vld [vmem:[#allocation49_spill] sm:$0xff] }
 0x31f   : > { %v8697_v29 = vpop.f32.mrb[18].mxu1  ;;  %v9021_v61 = vadd.f32 %v9013_v28, %v8997_v21  ;;  %v8991_v60 = vmul.f32 %v8610_v46, %v17412_v40  ;;  %11610 = vmatprep.mubr.f32.mxu0 %v17304_v41  ;;  %v17622_v40 = vld [vmem:[#allocation51_spill] sm:$0xff] }
 0x320   : > { %v9014_v1 = vmul.f32 %v8697_v29, %v17618_v18  ;;  %v8699_v43 = vpop.f32.mrb[19].mxu1  ;;  %12923 = vmatmul.mubr.msk.f32.gmra.mrb[124].mxu1 %vm664_vm0, %v16734_v4  ;;  %v8998_v25 = vadd.f32 %v8990_v22, %v8974_v27  ;;  %v17621_v18 = vld [vmem:[#allocation50_spill] sm:$0xff] }
 0x321   : > { %v9015_v30 = vmul.f32 %v8699_v43, %v17619_v34  ;;  %11699 = vmatprep.mubr.f32.mxu1 %v17304_v41  ;;  %v8999_v62 = vadd.f32 %v8991_v60, %v8975_v32  ;;  %v8614_v0 = vpop.f32.mrb[20].mxu0 }
 0x322   : > { %v9022_v20 = vadd.f32 %v9014_v1, %v8998_v25  ;;  %v8992_v28 = vmul.f32 %v8614_v0, %v17620_v6  ;;  %v8616_v21 = vpop.f32.mrb[21].mxu0  ;;  %12920 = vmatmul.mubr.msk.f32.gmra.mrb[126].mxu0 %vm664_vm0, %v16757_v9 }
 0x323   : > { %v8703_v46 = vpop.f32.mrb[20].mxu1  ;;  %v9023_v29 = vadd.f32 %v9015_v30, %v8999_v62  ;;  %v8993_v4 = vmul.f32 %v8616_v21, %v17621_v18 }
 0x324   : > { %v9016_v52 = vmul.f32 %v8703_v46, %v17622_v40  ;;  %v8705_v27 = vpop.f32.mrb[21].mxu1  ;;  %12924 = vmatmul.mubr.msk.f32.gmra.mrb[126].mxu1 %vm664_vm0, %v16757_v9  ;;  %v9000_v41 = vadd.f32 %v8992_v28, %v8976_v35 }
 0x325   : > { %v9017_v32 = vmul.f32 %v8705_v27, %v14427_v49  ;;  %v9001_v22 = vadd.f32 %v8993_v4, %v8977_v5  ;;  %v8620_v60 = vpop.f32.mrb[22].mxu0 }
 0x326   : > { %v9024_v1 = vadd.f32 %v9016_v52, %v9000_v41  ;;  %v8994_v43 = vmul.f32 %v8620_v60, %v14437_v2  ;;  %v8622_v25 = vpop.f32.mrb[23].mxu0 }
 0x327   : > { %v8709_v0 = vpop.f32.mrb[22].mxu1  ;;  %v9025_v6 = vadd.f32 %v9017_v32, %v9001_v22  ;;  %v8995_v30 = vmul.f32 %v8622_v25, %v14464_v50 }
 0x328   : > { %v9018_v62 = vmul.f32 %v8709_v0, %v14492_v11  ;;  %v8711_v21 = vpop.f32.mrb[23].mxu1  ;;  %v9002_v46 = vadd.f32 %v8994_v43, %v8978_v53 }
 0x329   : > { %v9019_v40 = vmul.f32 %v8711_v21, %v14497_v13  ;;  %v9003_v9 = vadd.f32 %v8995_v30, %v8979_v7  ;;  %v8780_v35 = vpop.f32.mrb[24].mxu0 }
 0x32a   : > { %v9026_v28 = vadd.f32 %v9018_v62, %v9002_v46  ;;  %v9036_v5 = vmul.f32 %v8780_v35, %v14524_v31  ;;  %v8782_v4 = vpop.f32.mrb[25].mxu0 }
 0x32b   : > { %v8869_v52 = vpop.f32.mrb[24].mxu1  ;;  %v9027_v27 = vadd.f32 %v9019_v40, %v9003_v9  ;;  %v9037_v41 = vmul.f32 %v8782_v4, %v14540_v36 }
 0x32c   : > { %v9060_v32 = vmul.f32 %v8869_v52, %v14554_v24  ;;  %v8871_v22 = vpop.f32.mrb[25].mxu1  ;;  %v9044_v60 = vadd.f32 %v9036_v5, %v9020_v12 }
 0x32d   : > { %v9061_v53 = vmul.f32 %v8871_v22, %v14571_v59  ;;  %v9045_v43 = vadd.f32 %v9037_v41, %v9021_v61  ;;  %v8786_v25 = vpop.f32.mrb[26].mxu0 }
 0x32e   : > { %v9068_v7 = vadd.f32 %v9060_v32, %v9044_v60  ;;  %v9038_v0 = vmul.f32 %v8786_v25, %v14577_v8  ;;  %v8788_v30 = vpop.f32.mrb[27].mxu0 }
 0x32f   : > { %v8875_v62 = vpop.f32.mrb[26].mxu1  ;;  %v9069_v21 = vadd.f32 %v9061_v53, %v9045_v43  ;;  %v9039_v40 = vmul.f32 %v8788_v30, %v14605_v17 }
 0x330   : > { %v9062_v46 = vmul.f32 %v8875_v62, %v14607_v45  ;;  %v8877_v9 = vpop.f32.mrb[27].mxu1  ;;  %12709 = vst [vmem:[%s14678_s10 + $0x200] sm:$0xff] %v9068_v7  ;;  %v9046_v35 = vadd.f32 %v9038_v0, %v9022_v20 }
 0x331   : > { %v9063_v12 = vmul.f32 %v8877_v9, %v14642_v26  ;;  %12710 = vst [vmem:[%s14678_s10 + $0x208] sm:$0xff] %v9069_v21  ;;  %v9047_v61 = vadd.f32 %v9039_v40, %v9023_v29  ;;  %v8792_v5 = vpop.f32.mrb[28].mxu0 }
 0x332   : > { %v9070_v4 = vadd.f32 %v9062_v46, %v9046_v35  ;;  %v9040_v52 = vmul.f32 %v8792_v5, %v14661_v38  ;;  %v8794_v41 = vpop.f32.mrb[29].mxu0 }
 0x333   : > { %v8881_v32 = vpop.f32.mrb[28].mxu1  ;;  %v9071_v22 = vadd.f32 %v9063_v12, %v9047_v61  ;;  %v9041_v60 = vmul.f32 %v8794_v41, %v14663_v23 }
 0x334   : > { %v9064_v53 = vmul.f32 %v8881_v32, %v14668_v3  ;;  %v8883_v43 = vpop.f32.mrb[29].mxu1  ;;  %12711 = vst [vmem:[%s14678_s10 + $0x210] sm:$0xff] %v9070_v4  ;;  %v9048_v20 = vadd.f32 %v9040_v52, %v9024_v1 }
 0x335   : > { %v9065_v25 = vmul.f32 %v8883_v43, %v14684_v54  ;;  %12712 = vst [vmem:[%s14678_s10 + $0x218] sm:$0xff] %v9071_v22  ;;  %v9049_v29 = vadd.f32 %v9041_v60, %v9025_v6  ;;  %v8798_v7 = vpop.f32.mrb[30].mxu0  ;;  %v17623_v60 = vld [vmem:[#allocation10_spill] sm:$0xff] }
 0x336   : > { %v9072_v0 = vadd.f32 %v9064_v53, %v9048_v20  ;;  %v9042_v30 = vmul.f32 %v8798_v7, %v17519_v37  ;;  %v8800_v62 = vpop.f32.mrb[31].mxu0  ;;  %v17624_v20 = vld [vmem:[#allocation11_spill] sm:$0xff] }
 0x337   : > { %v8887_v21 = vpop.f32.mrb[30].mxu1  ;;  %v9073_v40 = vadd.f32 %v9065_v25, %v9049_v29  ;;  %v9043_v46 = vmul.f32 %v8800_v62, %v17588_v51 }
 0x338   : > { %v9066_v9 = vmul.f32 %v8887_v21, %v17589_v47  ;;  %v8889_v35 = vpop.f32.mrb[31].mxu1  ;;  %12713 = vst [vmem:[%s14678_s10 + $0x220] sm:$0xff] %v9072_v0  ;;  %v9050_v1 = vadd.f32 %v9042_v30, %v9026_v28  ;;  %v17626_v21 = vld [vmem:[#allocation13_spill] sm:$0xff]  ;;  %v17641_v47 = vld [vmem:[#allocation28_spill] sm:$0xff] }
 0x339   : > { %v9067_v12 = vmul.f32 %v8889_v35, %v17590_v58  ;;  %12714 = vst [vmem:[%s14678_s10 + $0x228] sm:$0xff] %v9073_v40  ;;  %v9051_v6 = vadd.f32 %v9043_v46, %v9027_v27  ;;  %v9184_v61 = vpop.f32.mrb[32].mxu0  ;;  %v17625_v27 = vld [vmem:[#allocation12_spill] sm:$0xff]  ;;  %v17627_v46 = vld [vmem:[#allocation14_spill] sm:$0xff]  ;;  %v17640_v58 = vld [vmem:[#allocation27_spill] sm:$0xff] }
 0x33a   : > { %v9074_v5 = vadd.f32 %v9066_v9, %v9050_v1  ;;  %v9838_v4 = vmul.f32 %v9184_v61, %v17591_v10  ;;  %v9186_v41 = vpop.f32.mrb[33].mxu0  ;;  %v17628_v1 = vld [vmem:[#allocation15_spill] sm:$0xff] }
 0x33b   : > { %v9273_v52 = vpop.f32.mrb[32].mxu1  ;;  %v9075_v32 = vadd.f32 %v9067_v12, %v9051_v6  ;;  %v9839_v53 = vmul.f32 %v9186_v41, %v17623_v60 }
 0x33c   : > { %v9854_v22 = vmul.f32 %v9273_v52, %v17592_v55  ;;  %v9275_v43 = vpop.f32.mrb[33].mxu1  ;;  %12715 = vst [vmem:[%s14678_s10 + $0x230] sm:$0xff] %v9074_v5  ;;  %v17629_v52 = vld [vmem:[#allocation16_spill] sm:$0xff] }
 0x33d   : > { %v9855_v25 = vmul.f32 %v9275_v43, %v17624_v20  ;;  %12716 = vst [vmem:[%s14678_s10 + $0x238] sm:$0xff] %v9075_v32  ;;  %v9190_v29 = vpop.f32.mrb[34].mxu0  ;;  %v17631_v43 = vld [vmem:[#allocation17_spill] sm:$0xff] }
 0x33e   : > { %v9862_v28 = vadd.f32 %v9854_v22, %v9838_v4  ;;  %v9840_v0 = vmul.f32 %v9190_v29, %v17625_v27  ;;  %v9192_v62 = vpop.f32.mrb[35].mxu0  ;;  %v17630_v22 = vld [vmem:[#allocation18_spill] sm:$0xff]  ;;  %v17632_v27 = vld [vmem:[#allocation19_spill] sm:$0xff] }
 0x33f   : > { %v9863_v7 = vadd.f32 %v9855_v25, %v9839_v53  ;;  %v9279_v30 = vpop.f32.mrb[34].mxu1  ;;  %v9841_v9 = vmul.f32 %v9192_v62, %v17627_v46  ;;  %v17633_v46 = vld [vmem:[#allocation20_spill] sm:$0xff] }
 0x340   : > { %v9856_v40 = vmul.f32 %v9279_v30, %v17626_v21  ;;  %v9281_v35 = vpop.f32.mrb[35].mxu1 }
 0x341   : > { %v9857_v12 = vmul.f32 %v9281_v35, %v17628_v1  ;;  %v9196_v61 = vpop.f32.mrb[36].mxu0  ;;  %v17636_v1 = vld [vmem:[#allocation24_spill] sm:$0xff] }
 0x342   : > { %v9864_v6 = vadd.f32 %v9856_v40, %v9840_v0  ;;  %v9842_v41 = vmul.f32 %v9196_v61, %v17629_v52  ;;  %v9198_v4 = vpop.f32.mrb[37].mxu0  ;;  %v17634_v40 = vld [vmem:[#allocation21_spill] sm:$0xff] }
 0x343   : > { %v9865_v5 = vadd.f32 %v9857_v12, %v9841_v9  ;;  %v9285_v32 = vpop.f32.mrb[36].mxu1  ;;  %v9843_v25 = vmul.f32 %v9198_v4, %v17631_v43  ;;  %v17635_v12 = vld [vmem:[#allocation22_spill] sm:$0xff]  ;;  %v17637_v43 = vld [vmem:[#allocation23_spill] sm:$0xff] }
 0x344   : > { %v9858_v53 = vmul.f32 %v9285_v32, %v17630_v22  ;;  %v9287_v29 = vpop.f32.mrb[37].mxu1 }
 0x345   : > { %v9859_v20 = vmul.f32 %v9287_v29, %v17632_v27  ;;  %v9202_v21 = vpop.f32.mrb[38].mxu0 }
 0x346   : > { %v9866_v30 = vadd.f32 %v9858_v53, %v9842_v41  ;;  %v9844_v60 = vmul.f32 %v9202_v21, %v17633_v46  ;;  %v9204_v0 = vpop.f32.mrb[39].mxu0  ;;  %v17638_v53 = vld [vmem:[#allocation25_spill] sm:$0xff] }
 0x347   : > { %v9867_v62 = vadd.f32 %v9859_v20, %v9843_v25  ;;  %v9291_v35 = vpop.f32.mrb[38].mxu1  ;;  %v9845_v61 = vmul.f32 %v9204_v0, %v17635_v12  ;;  %v17639_v25 = vld [vmem:[#allocation26_spill] sm:$0xff] }
 0x348   : > { %v9860_v9 = vmul.f32 %v9291_v35, %v17634_v40  ;;  %v9293_v52 = vpop.f32.mrb[39].mxu1 }
 0x349   : > { %v9861_v55 = vmul.f32 %v9293_v52, %v17636_v1  ;;  %v9362_v22 = vpop.f32.mrb[40].mxu0 }
 0x34a   : > { %v9868_v32 = vadd.f32 %v9860_v9, %v9844_v60  ;;  %v9878_v10 = vmul.f32 %v9362_v22, %v17637_v43  ;;  %v9364_v29 = vpop.f32.mrb[41].mxu0  ;;  %v17643_v43 = vld [vmem:[#allocation30_spill] sm:$0xff] }
 0x34b   : > { %v9869_v4 = vadd.f32 %v9861_v55, %v9845_v61  ;;  %v9451_v41 = vpop.f32.mrb[40].mxu1  ;;  %v9879_v20 = vmul.f32 %v9364_v29, %v17638_v53  ;;  %v17642_v61 = vld [vmem:[#allocation29_spill] sm:$0xff] }
 0x34c   : > { %v9902_v21 = vmul.f32 %v9451_v41, %v17639_v25  ;;  %v9453_v46 = vpop.f32.mrb[41].mxu1  ;;  %v9886_v27 = vadd.f32 %v9878_v10, %v9862_v28 }
 0x34d   : > { %v9903_v35 = vmul.f32 %v9453_v46, %v17640_v58  ;;  %v9887_v40 = vadd.f32 %v9879_v20, %v9863_v7  ;;  %v9368_v0 = vpop.f32.mrb[42].mxu0 }
 0x34e   : > { %v9910_v12 = vadd.f32 %v9902_v21, %v9886_v27  ;;  %v9880_v52 = vmul.f32 %v9368_v0, %v17641_v47  ;;  %v9370_v60 = vpop.f32.mrb[43].mxu0  ;;  %v17644_v0 = vld [vmem:[#allocation36_spill] sm:$0xff] }
 0x34f   : > { %v9457_v9 = vpop.f32.mrb[42].mxu1  ;;  %v9911_v55 = vadd.f32 %v9903_v35, %v9887_v40  ;;  %v9881_v22 = vmul.f32 %v9370_v60, %v17642_v61 }
 0x350   : > { %v9904_v1 = vmul.f32 %v9457_v9, %v17643_v43  ;;  %v9459_v51 = vpop.f32.mrb[43].mxu1  ;;  %v9888_v29 = vadd.f32 %v9880_v52, %v9864_v6 }
 0x351   : > { %v9905_v41 = vmul.f32 %v9459_v51, %v17614_v16  ;;  %v9889_v25 = vadd.f32 %v9881_v22, %v9865_v5  ;;  %v9374_v10 = vpop.f32.mrb[44].mxu0 }
 0x352   : > { %v9912_v28 = vadd.f32 %v9904_v1, %v9888_v29  ;;  %v9882_v7 = vmul.f32 %v9374_v10, %v17615_v48  ;;  %v9376_v46 = vpop.f32.mrb[45].mxu0 }
 0x353   : > { %v9463_v27 = vpop.f32.mrb[44].mxu1  ;;  %v9913_v20 = vadd.f32 %v9905_v41, %v9889_v25  ;;  %v9883_v21 = vmul.f32 %v9376_v46, %v17616_v57 }
 0x354   : > { %v9906_v40 = vmul.f32 %v9463_v27, %v17644_v0  ;;  %v9465_v35 = vpop.f32.mrb[45].mxu1  ;;  %v9890_v60 = vadd.f32 %v9882_v7, %v9866_v30 }
 0x355   : > { %v9907_v9 = vmul.f32 %v9465_v35, %v17376_v19  ;;  %v9891_v43 = vadd.f32 %v9883_v21, %v9867_v62  ;;  %v9380_v6 = vpop.f32.mrb[46].mxu0 }
 0x356   : > { %v9914_v52 = vadd.f32 %v9906_v40, %v9890_v60  ;;  %v9884_v51 = vmul.f32 %v9380_v6, %v17377_v15  ;;  %v9382_v5 = vpop.f32.mrb[47].mxu0 }
 0x357   : > { %v9469_v1 = vpop.f32.mrb[46].mxu1  ;;  %v9915_v22 = vadd.f32 %v9907_v9, %v9891_v43  ;;  %v9885_v29 = vmul.f32 %v9382_v5, %v17332_v63 }
 0x358   : > { %v9908_v25 = vmul.f32 %v9469_v1, %v17333_v42  ;;  %v9471_v41 = vpop.f32.mrb[47].mxu1  ;;  %v9892_v10 = vadd.f32 %v9884_v51, %v9868_v32 }
 0x359   : > { %v9909_v46 = vmul.f32 %v9471_v41, %v14294_v44  ;;  %v9893_v27 = vadd.f32 %v9885_v29, %v9869_v4  ;;  %v9540_v30 = vpop.f32.mrb[48].mxu0  ;;  %v17645_v41 = vld [vmem:[#allocation45_spill] sm:$0xff]  ;;  %v17647_v44 = vld [vmem:[#allocation47_spill] sm:$0xff] }
 0x35a   : > { %v9916_v7 = vadd.f32 %v9908_v25, %v9892_v10  ;;  %v9926_v62 = vmul.f32 %v9540_v30, %v14306_v56  ;;  %v9542_v21 = vpop.f32.mrb[49].mxu0  ;;  %v17646_v30 = vld [vmem:[#allocation46_spill] sm:$0xff] }
 0x35b   : > { %v9629_v40 = vpop.f32.mrb[48].mxu1  ;;  %v9917_v35 = vadd.f32 %v9909_v46, %v9893_v27  ;;  %v9927_v60 = vmul.f32 %v9542_v21, %v17340_v14 }
 0x35c   : > { %v9950_v43 = vmul.f32 %v9629_v40, %v17378_v39  ;;  %v9631_v9 = vpop.f32.mrb[49].mxu1  ;;  %v9934_v6 = vadd.f32 %v9926_v62, %v9910_v12 }
 0x35d   : > { %v9951_v5 = vmul.f32 %v9631_v9, %v14342_v33  ;;  %v9935_v1 = vadd.f32 %v9927_v60, %v9911_v55  ;;  %v9546_v32 = vpop.f32.mrb[50].mxu0  ;;  %v17648_v9 = vld [vmem:[#allocation49_spill] sm:$0xff] }
 0x35e   : > { %v9958_v51 = vadd.f32 %v9950_v43, %v9934_v6  ;;  %v9928_v4 = vmul.f32 %v9546_v32, %v17645_v41  ;;  %v9548_v29 = vpop.f32.mrb[51].mxu0  ;;  %v17649_v41 = vld [vmem:[#allocation51_spill] sm:$0xff] }
 0x35f   : > { %v9635_v25 = vpop.f32.mrb[50].mxu1  ;;  %v9959_v10 = vadd.f32 %v9951_v5, %v9935_v1  ;;  %v9929_v56 = vmul.f32 %v9548_v29, %v17646_v30 }
 0x360   : > { %v9952_v46 = vmul.f32 %v9635_v25, %v17647_v44  ;;  %v9637_v27 = vpop.f32.mrb[51].mxu1  ;;  %v9936_v21 = vadd.f32 %v9928_v4, %v9912_v28 }
 0x361   : > { %v9953_v40 = vmul.f32 %v9637_v27, %v17619_v34  ;;  %v9937_v39 = vadd.f32 %v9929_v56, %v9913_v20  ;;  %v9552_v12 = vpop.f32.mrb[52].mxu0 }
 0x362   : > { %v9960_v62 = vadd.f32 %v9952_v46, %v9936_v21  ;;  %v9930_v55 = vmul.f32 %v9552_v12, %v17648_v9  ;;  %v9554_v60 = vpop.f32.mrb[53].mxu0 }
 0x363   : > { %v9641_v43 = vpop.f32.mrb[52].mxu1  ;;  %v9961_v6 = vadd.f32 %v9953_v40, %v9937_v39  ;;  %v9931_v32 = vmul.f32 %v9554_v60, %v17621_v18 }
 0x364   : > { %v9954_v5 = vmul.f32 %v9641_v43, %v17649_v41  ;;  %v9643_v1 = vpop.f32.mrb[53].mxu1  ;;  %v9938_v29 = vadd.f32 %v9930_v55, %v9914_v52 }
 0x365   : > { %v9955_v25 = vmul.f32 %v9643_v1, %v14427_v49  ;;  %v9939_v44 = vadd.f32 %v9931_v32, %v9915_v22  ;;  %v9558_v28 = vpop.f32.mrb[54].mxu0 }
 0x366   : > { %v9962_v4 = vadd.f32 %v9954_v5, %v9938_v29  ;;  %v9932_v56 = vmul.f32 %v9558_v28, %v14437_v2  ;;  %v9560_v20 = vpop.f32.mrb[55].mxu0 }
 0x367   : > { %v9647_v46 = vpop.f32.mrb[54].mxu1  ;;  %v9963_v27 = vadd.f32 %v9955_v25, %v9939_v44  ;;  %v9933_v21 = vmul.f32 %v9560_v20, %v14464_v50 }
 0x368   : > { %v9956_v39 = vmul.f32 %v9647_v46, %v14492_v11  ;;  %v9649_v40 = vpop.f32.mrb[55].mxu1  ;;  %v9940_v12 = vadd.f32 %v9932_v56, %v9916_v7 }
 0x369   : > { %v9957_v60 = vmul.f32 %v9649_v40, %v14497_v13  ;;  %v9941_v43 = vadd.f32 %v9933_v21, %v9917_v35  ;;  %v9718_v52 = vpop.f32.mrb[56].mxu0 }
 0x36a   : > { %v9964_v55 = vadd.f32 %v9956_v39, %v9940_v12  ;;  %v9974_v22 = vmul.f32 %v9718_v52, %v14524_v31  ;;  %v9720_v32 = vpop.f32.mrb[57].mxu0 }
 0x36b   : > { %v9807_v5 = vpop.f32.mrb[56].mxu1  ;;  %v9965_v1 = vadd.f32 %v9957_v60, %v9941_v43  ;;  %v9975_v29 = vmul.f32 %v9720_v32, %v14540_v36 }
 0x36c   : > { %v9998_v44 = vmul.f32 %v9807_v5, %v14554_v24  ;;  %v9809_v25 = vpop.f32.mrb[57].mxu1  ;;  %v9982_v28 = vadd.f32 %v9974_v22, %v9958_v51 }
 0x36d   : > { %v9999_v7 = vmul.f32 %v9809_v25, %v14571_v59  ;;  %v9983_v56 = vadd.f32 %v9975_v29, %v9959_v10  ;;  %v9724_v20 = vpop.f32.mrb[58].mxu0 }
 0x36e   : > { %v10006_v35 = vadd.f32 %v9998_v44, %v9982_v28  ;;  %v9976_v46 = vmul.f32 %v9724_v20, %v14577_v8  ;;  %v9726_v21 = vpop.f32.mrb[59].mxu0 }
 0x36f   : > { %v9813_v39 = vpop.f32.mrb[58].mxu1  ;;  %v10007_v40 = vadd.f32 %v9999_v7, %v9983_v56  ;;  %v9977_v12 = vmul.f32 %v9726_v21, %v14605_v17 }
 0x370   : > { %v10000_v60 = vmul.f32 %v9813_v39, %v14607_v45  ;;  %v9815_v43 = vpop.f32.mrb[59].mxu1  ;;  %12781 = vst [vmem:[%s14678_s10 + $0x240] sm:$0xff] %v10006_v35  ;;  %v9984_v52 = vadd.f32 %v9976_v46, %v9960_v62 }
 0x371   : > { %v10001_v51 = vmul.f32 %v9815_v43, %v14642_v26  ;;  %12782 = vst [vmem:[%s14678_s10 + $0x248] sm:$0xff] %v10007_v40  ;;  %v9985_v10 = vadd.f32 %v9977_v12, %v9961_v6  ;;  %v9730_v22 = vpop.f32.mrb[60].mxu0 }
 0x372   : > { %v10008_v32 = vadd.f32 %v10000_v60, %v9984_v52  ;;  %v9978_v5 = vmul.f32 %v9730_v22, %v14661_v38  ;;  %v9732_v29 = vpop.f32.mrb[61].mxu0  ;;  %v17650_v60 = vld [vmem:[#allocation34_spill] sm:$0xff]  ;;  %v17651_v52 = vld [vmem:[#allocation7_spill] sm:$0xff] }
 0x373   : > { %v9819_v44 = vpop.f32.mrb[60].mxu1  ;;  %v10009_v25 = vadd.f32 %v10001_v51, %v9985_v10  ;;  %v9979_v28 = vmul.f32 %v9732_v29, %v14663_v23  ;;  %v17652_v22 = vld [vmem:[#allocation43_spill] sm:$0xff] }
 0x374   : > { %v10002_v7 = vmul.f32 %v9819_v44, %v14668_v3  ;;  %v9821_v56 = vpop.f32.mrb[61].mxu1  ;;  %12783 = vst [vmem:[%s14678_s10 + $0x250] sm:$0xff] %v10008_v32  ;;  %v9986_v62 = vadd.f32 %v9978_v5, %v9962_v4  ;;  %v17653_v44 = vld [vmem:[#allocation8_spill] sm:$0xff] }
 0x375   : > { %v10003_v20 = vmul.f32 %v9821_v56, %v14684_v54  ;;  %12784 = vst [vmem:[%s14678_s10 + $0x258] sm:$0xff] %v10009_v25  ;;  %v9987_v6 = vadd.f32 %v9979_v28, %v9963_v27  ;;  %v9736_v35 = vpop.f32.mrb[62].mxu0 }
 0x376   : > { %v10010_v46 = vadd.f32 %v10002_v7, %v9986_v62  ;;  %v9980_v21 = vmul.f32 %v9736_v35, %v17519_v37  ;;  %v9738_v39 = vpop.f32.mrb[63].mxu0  ;;  %v17654_v62 = vld [vmem:[#allocation9_spill] sm:$0xff] }
 0x377   : > { %v9825_v40 = vpop.f32.mrb[62].mxu1  ;;  %v10011_v12 = vadd.f32 %v10003_v20, %v9987_v6  ;;  %v9981_v43 = vmul.f32 %v9738_v39, %v17650_v60  ;;  %v17655_v6 = vld [vmem:[#allocation10_spill] sm:$0xff] }
 0x378   : > { %v10004_v51 = vmul.f32 %v9825_v40, %v17651_v52  ;;  %v9827_v10 = vpop.f32.mrb[63].mxu1  ;;  %12785 = vst [vmem:[%s14678_s10 + $0x260] sm:$0xff] %v10010_v46  ;;  %v9988_v4 = vadd.f32 %v9980_v21, %v9964_v55  ;;  %v17656_v46 = vld [vmem:[#allocation11_spill] sm:$0xff] }
 0x379   : > { %v10005_v32 = vmul.f32 %v9827_v10, %v17652_v22  ;;  %12786 = vst [vmem:[%s14678_s10 + $0x268] sm:$0xff] %v10011_v12  ;;  %v9989_v27 = vadd.f32 %v9981_v43, %v9965_v1  ;;  %v10122_v5 = vpop.f32.mrb[64].mxu0  ;;  %v17657_v1 = vld [vmem:[#allocation12_spill] sm:$0xff] }
 0x37a   : > { %v10012_v29 = vadd.f32 %v10004_v51, %v9988_v4  ;;  %v10776_v25 = vmul.f32 %v10122_v5, %v17653_v44  ;;  %v10124_v7 = vpop.f32.mrb[65].mxu0  ;;  %v17658_v4 = vld [vmem:[#allocation13_spill] sm:$0xff]  ;;  %v17659_v44 = vld [vmem:[#allocation14_spill] sm:$0xff]  ;;  %v17661_v22 = vld [vmem:[#allocation16_spill] sm:$0xff] }
 0x37b   : > { %v10211_v28 = vpop.f32.mrb[64].mxu1  ;;  %v10013_v56 = vadd.f32 %v10005_v32, %v9989_v27  ;;  %v10777_v35 = vmul.f32 %v10124_v7, %v17655_v6 }
 0x37c   : > { %v10792_v20 = vmul.f32 %v10211_v28, %v17654_v62  ;;  %v10213_v39 = vpop.f32.mrb[65].mxu1  ;;  %12787 = vst [vmem:[%s14678_s10 + $0x270] sm:$0xff] %v10012_v29  ;;  %v17660_v28 = vld [vmem:[#allocation15_spill] sm:$0xff] }
 0x37d   : > { %v10793_v40 = vmul.f32 %v10213_v39, %v17656_v46  ;;  %12788 = vst [vmem:[%s14678_s10 + $0x278] sm:$0xff] %v10013_v56  ;;  %v10128_v21 = vpop.f32.mrb[66].mxu0  ;;  %v17664_v46 = vld [vmem:[#allocation19_spill] sm:$0xff] }
 0x37e   : > { %v10800_v55 = vadd.f32 %v10792_v20, %v10776_v25  ;;  %v10778_v43 = vmul.f32 %v10128_v21, %v17657_v1  ;;  %v10130_v10 = vpop.f32.mrb[67].mxu0  ;;  %v17662_v20 = vld [vmem:[#allocation18_spill] sm:$0xff] }
 0x37f   : > { %v10801_v12 = vadd.f32 %v10793_v40, %v10777_v35  ;;  %v10217_v51 = vpop.f32.mrb[66].mxu1  ;;  %v10779_v32 = vmul.f32 %v10130_v10, %v17659_v44  ;;  %v17663_v40 = vld [vmem:[#allocation17_spill] sm:$0xff]  ;;  %v17665_v44 = vld [vmem:[#allocation20_spill] sm:$0xff] }
 0x380   : > { %v10794_v5 = vmul.f32 %v10217_v51, %v17658_v4  ;;  %v10219_v27 = vpop.f32.mrb[67].mxu1 }
 0x381   : > { %v10795_v62 = vmul.f32 %v10219_v27, %v17660_v28  ;;  %v10134_v6 = vpop.f32.mrb[68].mxu0  ;;  %v17668_v28 = vld [vmem:[#allocation24_spill] sm:$0xff] }
 0x382   : > { %v10802_v7 = vadd.f32 %v10794_v5, %v10778_v43  ;;  %v10780_v39 = vmul.f32 %v10134_v6, %v17661_v22  ;;  %v10136_v25 = vpop.f32.mrb[69].mxu0  ;;  %v17666_v5 = vld [vmem:[#allocation21_spill] sm:$0xff] }
 0x383   : > { %v10803_v29 = vadd.f32 %v10795_v62, %v10779_v32  ;;  %v10223_v56 = vpop.f32.mrb[68].mxu1  ;;  %v10781_v21 = vmul.f32 %v10136_v25, %v17663_v40  ;;  %v17667_v32 = vld [vmem:[#allocation22_spill] sm:$0xff]  ;;  %v17669_v40 = vld [vmem:[#allocation23_spill] sm:$0xff] }
 0x384   : > { %v10796_v35 = vmul.f32 %v10223_v56, %v17662_v20  ;;  %v10225_v1 = vpop.f32.mrb[69].mxu1 }
 0x385   : > { %v10797_v52 = vmul.f32 %v10225_v1, %v17664_v46  ;;  %v10140_v4 = vpop.f32.mrb[70].mxu0 }
 0x386   : > { %v10804_v51 = vadd.f32 %v10796_v35, %v10780_v39  ;;  %v10782_v60 = vmul.f32 %v10140_v4, %v17665_v44  ;;  %v10142_v43 = vpop.f32.mrb[71].mxu0  ;;  %v17670_v35 = vld [vmem:[#allocation26_spill] sm:$0xff] }
 0x387   : > { %v10805_v10 = vadd.f32 %v10797_v52, %v10781_v21  ;;  %v10229_v27 = vpop.f32.mrb[70].mxu1  ;;  %v10783_v6 = vmul.f32 %v10142_v43, %v17667_v32 }
 0x388   : > { %v10798_v62 = vmul.f32 %v10229_v27, %v17666_v5  ;;  %v10231_v22 = vpop.f32.mrb[71].mxu1 }
 0x389   : > { %v10799_v37 = vmul.f32 %v10231_v22, %v17668_v28  ;;  %v10300_v20 = vpop.f32.mrb[72].mxu0 }
 0x38a   : > { %v10806_v56 = vadd.f32 %v10798_v62, %v10782_v60  ;;  %v10816_v54 = vmul.f32 %v10300_v20, %v17669_v40  ;;  %v10302_v1 = vpop.f32.mrb[73].mxu0 }
 0x38b   : > { %v10807_v25 = vadd.f32 %v10799_v37, %v10783_v6  ;;  %v10389_v39 = vpop.f32.mrb[72].mxu1  ;;  %v10817_v52 = vmul.f32 %v10302_v1, %v17638_v53  ;;  %v17671_v6 = vld [vmem:[#allocation30_spill] sm:$0xff] }
 0x38c   : > { %v10840_v4 = vmul.f32 %v10389_v39, %v17670_v35  ;;  %v10391_v21 = vpop.f32.mrb[73].mxu1  ;;  %v10824_v44 = vadd.f32 %v10816_v54, %v10800_v55 }
 0x38d   : > { %v10841_v27 = vmul.f32 %v10391_v21, %v17640_v58  ;;  %v10825_v5 = vadd.f32 %v10817_v52, %v10801_v12  ;;  %v10306_v43 = vpop.f32.mrb[74].mxu0 }
 0x38e   : > { %v10848_v32 = vadd.f32 %v10840_v4, %v10824_v44  ;;  %v10818_v22 = vmul.f32 %v10306_v43, %v17641_v47  ;;  %v10308_v60 = vpop.f32.mrb[75].mxu0 }
 0x38f   : > { %v10395_v62 = vpop.f32.mrb[74].mxu1  ;;  %v10849_v37 = vadd.f32 %v10841_v27, %v10825_v5  ;;  %v10819_v20 = vmul.f32 %v10308_v60, %v17642_v61 }
 0x390   : > { %v10842_v40 = vmul.f32 %v10395_v62, %v17671_v6  ;;  %v10397_v28 = vpop.f32.mrb[75].mxu1  ;;  %v10826_v1 = vadd.f32 %v10818_v22, %v10802_v7 }
 0x391   : > { %v10843_v39 = vmul.f32 %v10397_v28, %v17614_v16  ;;  %v10827_v35 = vadd.f32 %v10819_v20, %v10803_v29  ;;  %v10312_v54 = vpop.f32.mrb[76].mxu0 }
 0x392   : > { %v10850_v55 = vadd.f32 %v10842_v40, %v10826_v1  ;;  %v10820_v12 = vmul.f32 %v10312_v54, %v17615_v48  ;;  %v10314_v52 = vpop.f32.mrb[77].mxu0 }
 0x393   : > { %v10401_v44 = vpop.f32.mrb[76].mxu1  ;;  %v10851_v4 = vadd.f32 %v10843_v39, %v10827_v35  ;;  %v10821_v21 = vmul.f32 %v10314_v52, %v17616_v57  ;;  %v17672_v52 = vld [vmem:[#allocation41_spill] sm:$0xff] }
 0x394   : > { %v10844_v5 = vmul.f32 %v10401_v44, %v17644_v0  ;;  %v10403_v27 = vpop.f32.mrb[77].mxu1  ;;  %v10828_v43 = vadd.f32 %v10820_v12, %v10804_v51 }
 0x395   : > { %v10845_v60 = vmul.f32 %v10403_v27, %v17376_v19  ;;  %v10829_v62 = vadd.f32 %v10821_v21, %v10805_v10  ;;  %v10318_v7 = vpop.f32.mrb[78].mxu0  ;;  %v17673_v27 = vld [vmem:[#allocation42_spill] sm:$0xff] }
 0x396   : > { %v10852_v22 = vadd.f32 %v10844_v5, %v10828_v43  ;;  %v10822_v28 = vmul.f32 %v10318_v7, %v17377_v15  ;;  %v10320_v29 = vpop.f32.mrb[79].mxu0  ;;  %v17674_v15 = vld [vmem:[#allocation44_spill] sm:$0xff] }
 0x397   : > { %v10407_v40 = vpop.f32.mrb[78].mxu1  ;;  %v10853_v20 = vadd.f32 %v10845_v60, %v10829_v62  ;;  %v10823_v1 = vmul.f32 %v10320_v29, %v17332_v63 }
 0x398   : > { %v10846_v35 = vmul.f32 %v10407_v40, %v17333_v42  ;;  %v10409_v39 = vpop.f32.mrb[79].mxu1  ;;  %v10830_v54 = vadd.f32 %v10822_v28, %v10806_v56 }
 0x399   : > { %v10847_v44 = vmul.f32 %v10409_v39, %v17672_v52  ;;  %v10831_v0 = vadd.f32 %v10823_v1, %v10807_v25  ;;  %v10478_v51 = vpop.f32.mrb[80].mxu0  ;;  %v17675_v39 = vld [vmem:[#allocation45_spill] sm:$0xff] }
 0x39a   : > { %v10854_v12 = vadd.f32 %v10846_v35, %v10830_v54  ;;  %v10864_v10 = vmul.f32 %v10478_v51, %v17673_v27  ;;  %v10480_v21 = vpop.f32.mrb[81].mxu0  ;;  %v17676_v27 = vld [vmem:[#allocation47_spill] sm:$0xff] }
 0x39b   : > { %v10567_v5 = vpop.f32.mrb[80].mxu1  ;;  %v10855_v43 = vadd.f32 %v10847_v44, %v10831_v0  ;;  %v10865_v7 = vmul.f32 %v10480_v21, %v17340_v14 }
 0x39c   : > { %v10888_v60 = vmul.f32 %v10567_v5, %v17674_v15  ;;  %v10569_v62 = vpop.f32.mrb[81].mxu1  ;;  %v10872_v29 = vadd.f32 %v10864_v10, %v10848_v32 }
 0x39d   : > { %v10889_v40 = vmul.f32 %v10569_v62, %v14342_v33  ;;  %v10873_v42 = vadd.f32 %v10865_v7, %v10849_v37  ;;  %v10484_v56 = vpop.f32.mrb[82].mxu0 }
 0x39e   : > { %v10896_v28 = vadd.f32 %v10888_v60, %v10872_v29  ;;  %v10866_v25 = vmul.f32 %v10484_v56, %v17675_v39  ;;  %v10486_v1 = vpop.f32.mrb[83].mxu0 }
 0x39f   : > { %v10573_v35 = vpop.f32.mrb[82].mxu1  ;;  %v10897_v54 = vadd.f32 %v10889_v40, %v10873_v42  ;;  %v10867_v51 = vmul.f32 %v10486_v1, %v17646_v30 }
 0x3a0   : > { %v10890_v0 = vmul.f32 %v10573_v35, %v17676_v27  ;;  %v10575_v44 = vpop.f32.mrb[83].mxu1  ;;  %v10874_v21 = vadd.f32 %v10866_v25, %v10850_v55 }
 0x3a1   : > { %v10891_v5 = vmul.f32 %v10575_v44, %v17619_v34  ;;  %v10875_v15 = vadd.f32 %v10867_v51, %v10851_v4  ;;  %v10490_v32 = vpop.f32.mrb[84].mxu0 }
 0x3a2   : > { %v10898_v10 = vadd.f32 %v10890_v0, %v10874_v21  ;;  %v10868_v37 = vmul.f32 %v10490_v32, %v17648_v9  ;;  %v10492_v7 = vpop.f32.mrb[85].mxu0 }
 0x3a3   : > { %v10579_v60 = vpop.f32.mrb[84].mxu1  ;;  %v10899_v62 = vadd.f32 %v10891_v5, %v10875_v15  ;;  %v10869_v29 = vmul.f32 %v10492_v7, %v17621_v18 }
 0x3a4   : > { %v10892_v42 = vmul.f32 %v10579_v60, %v17649_v41  ;;  %v10581_v40 = vpop.f32.mrb[85].mxu1  ;;  %v10876_v56 = vadd.f32 %v10868_v37, %v10852_v22 }
 0x3a5   : > { %v10893_v1 = vmul.f32 %v10581_v40, %v14427_v49  ;;  %v10877_v35 = vadd.f32 %v10869_v29, %v10853_v20  ;;  %v10496_v55 = vpop.f32.mrb[86].mxu0 }
 0x3a6   : > { %v10900_v25 = vadd.f32 %v10892_v42, %v10876_v56  ;;  %v10870_v4 = vmul.f32 %v10496_v55, %v14437_v2  ;;  %v10498_v51 = vpop.f32.mrb[87].mxu0 }
 0x3a7   : > { %v10585_v0 = vpop.f32.mrb[86].mxu1  ;;  %v10901_v44 = vadd.f32 %v10893_v1, %v10877_v35  ;;  %v10871_v21 = vmul.f32 %v10498_v51, %v14464_v50 }
 0x3a8   : > { %v10894_v15 = vmul.f32 %v10585_v0, %v14492_v11  ;;  %v10587_v5 = vpop.f32.mrb[87].mxu1  ;;  %v10878_v32 = vadd.f32 %v10870_v4, %v10854_v12 }
 0x3a9   : > { %v10895_v7 = vmul.f32 %v10587_v5, %v14497_v13  ;;  %v10879_v60 = vadd.f32 %v10871_v21, %v10855_v43  ;;  %v10656_v22 = vpop.f32.mrb[88].mxu0 }
 0x3aa   : > { %v10902_v37 = vadd.f32 %v10894_v15, %v10878_v32  ;;  %v10912_v20 = vmul.f32 %v10656_v22, %v14524_v31  ;;  %v10658_v29 = vpop.f32.mrb[89].mxu0 }
 0x3ab   : > { %v10745_v42 = vpop.f32.mrb[88].mxu1  ;;  %v10903_v40 = vadd.f32 %v10895_v7, %v10879_v60  ;;  %v10913_v56 = vmul.f32 %v10658_v29, %v14540_v36 }
 0x3ac   : > { %v10936_v1 = vmul.f32 %v10745_v42, %v14554_v24  ;;  %v10747_v35 = vpop.f32.mrb[89].mxu1  ;;  %v10920_v55 = vadd.f32 %v10912_v20, %v10896_v28 }
 0x3ad   : > { %v10937_v12 = vmul.f32 %v10747_v35, %v14571_v59  ;;  %v10921_v4 = vadd.f32 %v10913_v56, %v10897_v54  ;;  %v10662_v51 = vpop.f32.mrb[90].mxu0 }
 0x3ae   : > { %v10944_v43 = vadd.f32 %v10936_v1, %v10920_v55  ;;  %v10914_v0 = vmul.f32 %v10662_v51, %v14577_v8  ;;  %v10664_v21 = vpop.f32.mrb[91].mxu0  ;;  %v17677_v51 = vld [vmem:[#allocation39_spill] sm:$0xff] }
 0x3af   : > { %v10751_v15 = vpop.f32.mrb[90].mxu1  ;;  %v10945_v5 = vadd.f32 %v10937_v12, %v10921_v4  ;;  %v10915_v32 = vmul.f32 %v10664_v21, %v14605_v17 }
 0x3b0   : > { %v10938_v7 = vmul.f32 %v10751_v15, %v14607_v45  ;;  %v10753_v60 = vpop.f32.mrb[91].mxu1  ;;  %12853 = vst [vmem:[%s14678_s10 + $0x280] sm:$0xff] %v10944_v43  ;;  %v10922_v22 = vadd.f32 %v10914_v0, %v10898_v10  ;;  %v17678_v15 = vld [vmem:[#allocation35_spill] sm:$0xff] }
 0x3b1   : > { %v10939_v28 = vmul.f32 %v10753_v60, %v14642_v26  ;;  %12854 = vst [vmem:[%s14678_s10 + $0x288] sm:$0xff] %v10945_v5  ;;  %v10923_v54 = vadd.f32 %v10915_v32, %v10899_v62  ;;  %v10668_v20 = vpop.f32.mrb[92].mxu0 }
 0x3b2   : > { %v10946_v29 = vadd.f32 %v10938_v7, %v10922_v22  ;;  %v10916_v42 = vmul.f32 %v10668_v20, %v14661_v38  ;;  %v10670_v56 = vpop.f32.mrb[93].mxu0  ;;  %v17679_v22 = vld [vmem:[#allocation34_spill] sm:$0xff] }
 0x3b3   : > { %v10757_v1 = vpop.f32.mrb[92].mxu1  ;;  %v10947_v35 = vadd.f32 %v10939_v28, %v10923_v54  ;;  %v10917_v55 = vmul.f32 %v10670_v56, %v14663_v23  ;;  %v17680_v54 = vld [vmem:[#allocation7_spill] sm:$0xff] }
 0x3b4   : > { %v10940_v12 = vmul.f32 %v10757_v1, %v14668_v3  ;;  %v10759_v4 = vpop.f32.mrb[93].mxu1  ;;  %12855 = vst [vmem:[%s14678_s10 + $0x290] sm:$0xff] %v10946_v29  ;;  %v10924_v10 = vadd.f32 %v10916_v42, %v10900_v25  ;;  %v17681_v29 = vld [vmem:[#allocation43_spill] sm:$0xff] }
 0x3b5   : > { %v10941_v43 = vmul.f32 %v10759_v4, %v17677_v51  ;;  %12856 = vst [vmem:[%s14678_s10 + $0x298] sm:$0xff] %v10947_v35  ;;  %v10925_v62 = vadd.f32 %v10917_v55, %v10901_v44  ;;  %v10674_v0 = vpop.f32.mrb[94].mxu0  ;;  %v17682_v55 = vld [vmem:[#allocation8_spill] sm:$0xff] }
 0x3b6   : > { %v10948_v21 = vadd.f32 %v10940_v12, %v10924_v10  ;;  %v10918_v5 = vmul.f32 %v10674_v0, %v17678_v15  ;;  %v10676_v32 = vpop.f32.mrb[95].mxu0 }
 0x3b7   : > { %v10763_v7 = vpop.f32.mrb[94].mxu1  ;;  %v10949_v60 = vadd.f32 %v10941_v43, %v10925_v62  ;;  %v10919_v28 = vmul.f32 %v10676_v32, %v17679_v22  ;;  %v17683_v62 = vld [vmem:[#allocation9_spill] sm:$0xff]  ;;  %v17684_v32 = vld [vmem:[#allocation10_spill] sm:$0xff] }
 0x3b8   : > { %v10942_v20 = vmul.f32 %v10763_v7, %v17680_v54  ;;  %v10765_v56 = vpop.f32.mrb[95].mxu1  ;;  %12857 = vst [vmem:[%s14678_s10 + $0x2a0] sm:$0xff] %v10948_v21  ;;  %v10926_v25 = vadd.f32 %v10918_v5, %v10902_v37  ;;  %v17685_v21 = vld [vmem:[#allocation11_spill] sm:$0xff] }
 0x3b9   : > { %v10943_v42 = vmul.f32 %v10765_v56, %v17681_v29  ;;  %12858 = vst [vmem:[%s14678_s10 + $0x2a8] sm:$0xff] %v10949_v60  ;;  %v10927_v44 = vadd.f32 %v10919_v28, %v10903_v40  ;;  %v11060_v1 = vpop.f32.mrb[96].mxu0  ;;  %v17686_v40 = vld [vmem:[#allocation12_spill] sm:$0xff] }
 0x3ba   : > { %v10950_v35 = vadd.f32 %v10942_v20, %v10926_v25  ;;  %v11714_v12 = vmul.f32 %v11060_v1, %v17682_v55  ;;  %v11062_v10 = vpop.f32.mrb[97].mxu0  ;;  %v17687_v25 = vld [vmem:[#allocation13_spill] sm:$0xff]  ;;  %v17688_v55 = vld [vmem:[#allocation14_spill] sm:$0xff]  ;;  %v17690_v29 = vld [vmem:[#allocation16_spill] sm:$0xff] }
 0x3bb   : > { %v11149_v4 = vpop.f32.mrb[96].mxu1  ;;  %v10951_v43 = vadd.f32 %v10943_v42, %v10927_v44  ;;  %v11715_v7 = vmul.f32 %v11062_v10, %v17684_v32 }
 0x3bc   : > { %v11730_v0 = vmul.f32 %v11149_v4, %v17683_v62  ;;  %v11151_v54 = vpop.f32.mrb[97].mxu1  ;;  %12859 = vst [vmem:[%s14678_s10 + $0x2b0] sm:$0xff] %v10950_v35  ;;  %v17689_v4 = vld [vmem:[#allocation15_spill] sm:$0xff] }
 0x3bd   : > { %v11731_v22 = vmul.f32 %v11151_v54, %v17685_v21  ;;  %12860 = vst [vmem:[%s14678_s10 + $0x2b8] sm:$0xff] %v10951_v43  ;;  %v11066_v5 = vpop.f32.mrb[98].mxu0 }
 0x3be   : > { %v11738_v37 = vadd.f32 %v11730_v0, %v11714_v12  ;;  %v11716_v28 = vmul.f32 %v11066_v5, %v17686_v40  ;;  %v11068_v56 = vpop.f32.mrb[99].mxu0  ;;  %v17691_v0 = vld [vmem:[#allocation18_spill] sm:$0xff] }
 0x3bf   : > { %v11739_v60 = vadd.f32 %v11731_v22, %v11715_v7  ;;  %v11155_v20 = vpop.f32.mrb[98].mxu1  ;;  %v11717_v42 = vmul.f32 %v11068_v56, %v17688_v55  ;;  %v17692_v7 = vld [vmem:[#allocation17_spill] sm:$0xff]  ;;  %v17693_v55 = vld [vmem:[#allocation20_spill] sm:$0xff] }
 0x3c0   : > { %v11732_v1 = vmul.f32 %v11155_v20, %v17687_v25  ;;  %v11157_v44 = vpop.f32.mrb[99].mxu1 }
 0x3c1   : > { %v11733_v62 = vmul.f32 %v11157_v44, %v17689_v4  ;;  %v11072_v32 = vpop.f32.mrb[100].mxu0  ;;  %v17695_v4 = vld [vmem:[#allocation22_spill] sm:$0xff] }
 0x3c2   : > { %v11740_v10 = vadd.f32 %v11732_v1, %v11716_v28  ;;  %v11718_v54 = vmul.f32 %v11072_v32, %v17690_v29  ;;  %v11074_v12 = vpop.f32.mrb[101].mxu0  ;;  %v17694_v1 = vld [vmem:[#allocation21_spill] sm:$0xff]  ;;  %v17696_v32 = vld [vmem:[#allocation24_spill] sm:$0xff] }
 0x3c3   : > { %v11741_v35 = vadd.f32 %v11733_v62, %v11717_v42  ;;  %v11161_v43 = vpop.f32.mrb[100].mxu1  ;;  %v11719_v21 = vmul.f32 %v11074_v12, %v17692_v7  ;;  %v17697_v7 = vld [vmem:[#allocation23_spill] sm:$0xff] }
 0x3c4   : > { %v11734_v22 = vmul.f32 %v11161_v43, %v17691_v0  ;;  %v11163_v5 = vpop.f32.mrb[101].mxu1 }
 0x3c5   : > { %v11735_v40 = vmul.f32 %v11163_v5, %v17664_v46  ;;  %v11078_v25 = vpop.f32.mrb[102].mxu0 }
 0x3c6   : > { %v11742_v20 = vadd.f32 %v11734_v22, %v11718_v54  ;;  %v11720_v15 = vmul.f32 %v11078_v25, %v17693_v55  ;;  %v11080_v28 = vpop.f32.mrb[103].mxu0 }
 0x3c7   : > { %v11743_v56 = vadd.f32 %v11735_v40, %v11719_v21  ;;  %v11167_v44 = vpop.f32.mrb[102].mxu1  ;;  %v11721_v29 = vmul.f32 %v11080_v28, %v17695_v4  ;;  %v17698_v21 = vld [vmem:[#allocation26_spill] sm:$0xff] }
 0x3c8   : > { %v11736_v42 = vmul.f32 %v11167_v44, %v17694_v1  ;;  %v11169_v62 = vpop.f32.mrb[103].mxu1 }
 0x3c9   : > { %v11737_v51 = vmul.f32 %v11169_v62, %v17696_v32  ;;  %v11238_v0 = vpop.f32.mrb[104].mxu0 }
 0x3ca   : > { %v11744_v43 = vadd.f32 %v11736_v42, %v11720_v15  ;;  %v11754_v3 = vmul.f32 %v11238_v0, %v17697_v7  ;;  %v11240_v46 = vpop.f32.mrb[105].mxu0 }
 0x3cb   : > { %v11745_v12 = vadd.f32 %v11737_v51, %v11721_v29  ;;  %v11327_v54 = vpop.f32.mrb[104].mxu1  ;;  %v11755_v22 = vmul.f32 %v11240_v46, %v17638_v53 }
 0x3cc   : > { %v11778_v5 = vmul.f32 %v11327_v54, %v17698_v21  ;;  %v11329_v40 = vpop.f32.mrb[105].mxu1  ;;  %v11762_v25 = vadd.f32 %v11754_v3, %v11738_v37 }
 0x3cd   : > { %v11779_v55 = vmul.f32 %v11329_v40, %v17640_v58  ;;  %v11763_v44 = vadd.f32 %v11755_v22, %v11739_v60  ;;  %v11244_v28 = vpop.f32.mrb[106].mxu0  ;;  %v17699_v22 = vld [vmem:[#allocation36_spill] sm:$0xff] }
 0x3ce   : > { %v11786_v1 = vadd.f32 %v11778_v5, %v11762_v25  ;;  %v11756_v4 = vmul.f32 %v11244_v28, %v17641_v47  ;;  %v11246_v15 = vpop.f32.mrb[107].mxu0 }
 0x3cf   : > { %v11333_v42 = vpop.f32.mrb[106].mxu1  ;;  %v11787_v51 = vadd.f32 %v11779_v55, %v11763_v44  ;;  %v11757_v29 = vmul.f32 %v11246_v15, %v17642_v61 }
 0x3d0   : > { %v11780_v62 = vmul.f32 %v11333_v42, %v17671_v6  ;;  %v11335_v32 = vpop.f32.mrb[107].mxu1  ;;  %v11764_v53 = vadd.f32 %v11756_v4, %v11740_v10  ;;  %v17701_v4 = vld [vmem:[#allocation40_spill] sm:$0xff] }
 0x3d1   : > { %v11781_v0 = vmul.f32 %v11335_v32, %v17614_v16  ;;  %v11765_v7 = vadd.f32 %v11757_v29, %v11741_v35  ;;  %v11250_v3 = vpop.f32.mrb[108].mxu0  ;;  %v17700_v16 = vld [vmem:[#allocation38_spill] sm:$0xff] }
 0x3d2   : > { %v11788_v37 = vadd.f32 %v11780_v62, %v11764_v53  ;;  %v11758_v58 = vmul.f32 %v11250_v3, %v17615_v48  ;;  %v11252_v60 = vpop.f32.mrb[109].mxu0 }
 0x3d3   : > { %v11339_v46 = vpop.f32.mrb[108].mxu1  ;;  %v11789_v54 = vadd.f32 %v11781_v0, %v11765_v7  ;;  %v11759_v47 = vmul.f32 %v11252_v60, %v17616_v57 }
 0x3d4   : > { %v11782_v21 = vmul.f32 %v11339_v46, %v17699_v22  ;;  %v11341_v5 = vpop.f32.mrb[109].mxu1  ;;  %v11766_v61 = vadd.f32 %v11758_v58, %v11742_v20  ;;  %v17703_v58 = vld [vmem:[#allocation44_spill] sm:$0xff] }
 0x3d5   : > { %v11783_v6 = vmul.f32 %v11341_v5, %v17376_v19  ;;  %v11767_v40 = vadd.f32 %v11759_v47, %v11743_v56  ;;  %v11256_v10 = vpop.f32.mrb[110].mxu0  ;;  %v17702_v19 = vld [vmem:[#allocation42_spill] sm:$0xff] }
 0x3d6   : > { %v11790_v25 = vadd.f32 %v11782_v21, %v11766_v61  ;;  %v11760_v35 = vmul.f32 %v11256_v10, %v17700_v16  ;;  %v11258_v55 = vpop.f32.mrb[111].mxu0 }
 0x3d7   : > { %v11345_v44 = vpop.f32.mrb[110].mxu1  ;;  %v11791_v28 = vadd.f32 %v11783_v6, %v11767_v40  ;;  %v11761_v48 = vmul.f32 %v11258_v55, %v17332_v63 }
 0x3d8   : > { %v11784_v15 = vmul.f32 %v11345_v44, %v17701_v4  ;;  %v11347_v42 = vpop.f32.mrb[111].mxu1  ;;  %v11768_v57 = vadd.f32 %v11760_v35, %v11744_v43 }
 0x3d9   : > { %v11785_v29 = vmul.f32 %v11347_v42, %v17672_v52  ;;  %v11769_v62 = vadd.f32 %v11761_v48, %v11745_v12  ;;  %v11416_v20 = vpop.f32.mrb[112].mxu0 }
 0x3da   : > { %v11792_v32 = vadd.f32 %v11784_v15, %v11768_v57  ;;  %v11802_v56 = vmul.f32 %v11416_v20, %v17702_v19  ;;  %v11418_v53 = vpop.f32.mrb[113].mxu0 }
 0x3db   : > { %v11505_v0 = vpop.f32.mrb[112].mxu1  ;;  %v11793_v7 = vadd.f32 %v11785_v29, %v11769_v62  ;;  %v11803_v3 = vmul.f32 %v11418_v53, %v17340_v14 }
 0x3dc   : > { %v11826_v60 = vmul.f32 %v11505_v0, %v17703_v58  ;;  %v11507_v46 = vpop.f32.mrb[113].mxu1  ;;  %v11810_v63 = vadd.f32 %v11802_v56, %v11786_v1 }
 0x3dd   : > { %v11827_v47 = vmul.f32 %v11507_v46, %v14342_v33  ;;  %v11811_v22 = vadd.f32 %v11803_v3, %v11787_v51  ;;  %v11422_v43 = vpop.f32.mrb[114].mxu0 }
 0x3de   : > { %v11834_v21 = vadd.f32 %v11826_v60, %v11810_v63  ;;  %v11804_v52 = vmul.f32 %v11422_v43, %v17675_v39  ;;  %v11424_v12 = vpop.f32.mrb[115].mxu0 }
 0x3df   : > { %v11511_v5 = vpop.f32.mrb[114].mxu1  ;;  %v11835_v61 = vadd.f32 %v11827_v47, %v11811_v22  ;;  %v11805_v6 = vmul.f32 %v11424_v12, %v17646_v30 }
 0x3e0   : > { %v11828_v40 = vmul.f32 %v11511_v5, %v17676_v27  ;;  %v11513_v10 = vpop.f32.mrb[115].mxu1  ;;  %v11812_v14 = vadd.f32 %v11804_v52, %v11788_v37 }
 0x3e1   : > { %v11829_v16 = vmul.f32 %v11513_v10, %v17619_v34  ;;  %v11813_v35 = vadd.f32 %v11805_v6, %v11789_v54  ;;  %v11428_v1 = vpop.f32.mrb[116].mxu0 }
 0x3e2   : > { %v11836_v55 = vadd.f32 %v11828_v40, %v11812_v14  ;;  %v11806_v33 = vmul.f32 %v11428_v1, %v17648_v9  ;;  %v11430_v51 = vpop.f32.mrb[117].mxu0 }
 0x3e3   : > { %v11517_v44 = vpop.f32.mrb[116].mxu1  ;;  %v11837_v48 = vadd.f32 %v11829_v16, %v11813_v35  ;;  %v11807_v39 = vmul.f32 %v11430_v51, %v17621_v18 }
 0x3e4   : > { %v11830_v4 = vmul.f32 %v11517_v44, %v17649_v41  ;;  %v11519_v15 = vpop.f32.mrb[117].mxu1  ;;  %v11814_v30 = vadd.f32 %v11806_v33, %v11790_v25 }
 0x3e5   : > { %v11831_v27 = vmul.f32 %v11519_v15, %v14427_v49  ;;  %v11815_v42 = vadd.f32 %v11807_v39, %v11791_v28  ;;  %v11434_v37 = vpop.f32.mrb[118].mxu0 }
 0x3e6   : > { %v11838_v57 = vadd.f32 %v11830_v4, %v11814_v30  ;;  %v11808_v34 = vmul.f32 %v11434_v37, %v14437_v2  ;;  %v11436_v54 = vpop.f32.mrb[119].mxu0  ;;  %v17708_v4 = vld [vmem:[#allocation7_spill] sm:$0xff] }
 0x3e7   : > { %v11523_v29 = vpop.f32.mrb[118].mxu1  ;;  %v11839_v62 = vadd.f32 %v11831_v27, %v11815_v42  ;;  %v11809_v9 = vmul.f32 %v11436_v54, %v14464_v50  ;;  %v17709_v42 = vld [vmem:[#allocation43_spill] sm:$0xff] }
 0x3e8   : > { %v11832_v20 = vmul.f32 %v11523_v29, %v14492_v11  ;;  %v11525_v19 = vpop.f32.mrb[119].mxu1  ;;  %v11816_v18 = vadd.f32 %v11808_v34, %v11792_v32 }
 0x3e9   : > { %v11833_v41 = vmul.f32 %v11525_v19, %v14497_v13  ;;  %v11817_v56 = vadd.f32 %v11809_v9, %v11793_v7  ;;  %v11594_v25 = vpop.f32.mrb[120].mxu0 }
 0x3ea   : > { %v11840_v53 = vadd.f32 %v11832_v20, %v11816_v18  ;;  %v11850_v49 = vmul.f32 %v11594_v25, %v14524_v31  ;;  %v11596_v28 = vpop.f32.mrb[121].mxu0 }
 0x3eb   : > { %v11683_v0 = vpop.f32.mrb[120].mxu1  ;;  %v11841_v3 = vadd.f32 %v11833_v41, %v11817_v56  ;;  %v11851_v2 = vmul.f32 %v11596_v28, %v14540_v36 }
 0x3ec   : > { %v11874_v58 = vmul.f32 %v11683_v0, %v14554_v24  ;;  %v11685_v50 = vpop.f32.mrb[121].mxu1  ;;  %v11858_v11 = vadd.f32 %v11850_v49, %v11834_v21 }
 0x3ed   : > { %v11875_v32 = vmul.f32 %v11685_v50, %v14571_v59  ;;  %v11859_v60 = vadd.f32 %v11851_v2, %v11835_v61  ;;  %v11600_v13 = vpop.f32.mrb[122].mxu0 }
 0x3ee   : > { %v11882_v7 = vadd.f32 %v11874_v58, %v11858_v11  ;;  %v11852_v46 = vmul.f32 %v11600_v13, %v14577_v8  ;;  %v11602_v63 = vpop.f32.mrb[123].mxu0 }
 0x3ef   : > { %v11689_v31 = vpop.f32.mrb[122].mxu1  ;;  %v11883_v47 = vadd.f32 %v11875_v32, %v11859_v60  ;;  %v11853_v22 = vmul.f32 %v11602_v63, %v14605_v17 }
 0x3f0   : > { %v11876_v43 = vmul.f32 %v11689_v31, %v14607_v45  ;;  %v11691_v36 = vpop.f32.mrb[123].mxu1  ;;  %12925 = vst [vmem:[%s14678_s10 + $0x2c0] sm:$0xff] %v11882_v7  ;;  %v11860_v24 = vadd.f32 %v11852_v46, %v11836_v55  ;;  %v17704_v45 = vld [vmem:[#allocation6_spill] sm:$0xff]  ;;  %v17706_v55 = vld [vmem:[#allocation35_spill] sm:$0xff] }
 0x3f1   : > { %v11877_v21 = vmul.f32 %v11691_v36, %v14642_v26  ;;  %12926 = vst [vmem:[%s14678_s10 + $0x2c8] sm:$0xff] %v11883_v47  ;;  %v11861_v59 = vadd.f32 %v11853_v22, %v11837_v48  ;;  %v11606_v52 = vpop.f32.mrb[124].mxu0  ;;  %v17705_v26 = vld [vmem:[#allocation39_spill] sm:$0xff]  ;;  %v17707_v48 = vld [vmem:[#allocation34_spill] sm:$0xff] }
 0x3f2   : > { %v11884_v12 = vadd.f32 %v11876_v43, %v11860_v24  ;;  %v11854_v8 = vmul.f32 %v11606_v52, %v14661_v38  ;;  %v11608_v5 = vpop.f32.mrb[125].mxu0 }
 0x3f3   : > { %v11695_v61 = vpop.f32.mrb[124].mxu1  ;;  %v11885_v6 = vadd.f32 %v11877_v21, %v11861_v59  ;;  %v11855_v17 = vmul.f32 %v11608_v5, %v14663_v23 }
 0x3f4   : > { %v11878_v40 = vmul.f32 %v11695_v61, %v17704_v45  ;;  %v11697_v10 = vpop.f32.mrb[125].mxu1  ;;  %12927 = vst [vmem:[%s14678_s10 + $0x2d0] sm:$0xff] %v11884_v12  ;;  %v11862_v14 = vadd.f32 %v11854_v8, %v11838_v57 }
 0x3f5   : > { %v11879_v16 = vmul.f32 %v11697_v10, %v17705_v26  ;;  %12928 = vst [vmem:[%s14678_s10 + $0x2d8] sm:$0xff] %v11885_v6  ;;  %v11863_v35 = vadd.f32 %v11855_v17, %v11839_v62  ;;  %v11612_v1 = vpop.f32.mrb[126].mxu0 }
 0x3f6   : > { %v11886_v38 = vadd.f32 %v11878_v40, %v11862_v14  ;;  %v11856_v33 = vmul.f32 %v11612_v1, %v17706_v55  ;;  %v11614_v51 = vpop.f32.mrb[127].mxu0 }
 0x3f7   : > { %v11701_v44 = vpop.f32.mrb[126].mxu1  ;;  %v11887_v23 = vadd.f32 %v11879_v16, %v11863_v35  ;;  %v11857_v39 = vmul.f32 %v11614_v51, %v17707_v48 }
 0x3f8   : > { %v11880_v15 = vmul.f32 %v11701_v44, %v17708_v4  ;;  %v11703_v30 = vpop.f32.mrb[127].mxu1  ;;  %12929 = vst [vmem:[%s14678_s10 + $0x2e0] sm:$0xff] %v11886_v38  ;;  %v11864_v27 = vadd.f32 %v11856_v33, %v11840_v53 }
 0x3f9   : > { %v11881_v37 = vmul.f32 %v11703_v30, %v17709_v42  ;;  %12930 = vst [vmem:[%s14678_s10 + $0x2e8] sm:$0xff] %v11887_v23  ;;  %v11865_v57 = vadd.f32 %v11857_v39, %v11841_v3 }
 0x3fa   : > { %v11888_v34 = vadd.f32 %v11880_v15, %v11864_v27 }
 0x3fb   : > { %v11889_v54 = vadd.f32 %v11881_v37, %v11865_v57 }
 0x3fc   : > { %12931 = vst [vmem:[%s14678_s10 + $0x2f0] sm:$0xff] %v11888_v34 }
 0x3fd   : > { %12932 = vst [vmem:[%s14678_s10 + $0x2f8] sm:$0xff] %v11889_v54 }
 0x3fe   : > { %13419 = shalt.err (!%p13416_p5)
}
 0x3ff   : > { %s13420_s8 = scalar_lea.hbm %s17103_s15, 12288  ;;  %s13424_s28 = scalar_lea.hbm %s17160_s3, 24576 }
 0x400   : > { %p13421_p6 = scmp.ne.s32.totalorder %s17103_s15, %s13420_s8  ;;  %p13425_p10 = scmp.lt.u32.totalorder %s17103_s15, %s17160_s3 }
 0x401   : > { %p13426_p11 = scmp.lt.u32.totalorder %s13424_s28, %s13420_s8  ;;  %p13428_p13 = scmp.lt.u32.totalorder %s13420_s8, %s17103_s15 }
 0x402   : > { %p13422_p7 = pnand %p13421_p6, %p13550_p4 }
 0x403   : > { %p13427_p12 = por %p13426_p11, %p13425_p10 }
 0x404   : > { %p13423_p9 = pneg %p13422_p7 }
 0x405   : > { %p13429_p0 = por %p13428_p13, %p13427_p12 }
 0x407   : > { %p13430_p1 = pnand %p13429_p0, %p13423_p9 }
 0x409   : > { %13433 = shalt.err (!%p13430_p1)
}
 0x40a   : > { %s13488_s4 = smov 256   ;;  %s13489_s5 = smov 16  }
 0x40b   : > { %13324 = dma.vmem_to_hbm [thread:$0]  (%p13550_p4), %s17105_s7, 12288, %s17103_s15, %s17111_s18, %s13488_s4, %s13488_s4, %s13489_s5  }
 0x40c PF: > { %p13330_p2 = scmp.ge.s32.totalorder %s13484_s17, 2  ;;  %s11933_s6 = sand.u32 1, %s13464_s12  }
 0x40d   : > { %s11934_s9 = scalar_lea.sflag [#allocation4], %s11933_s6 }
 0x40e   : > { %p13327_p3 = pnand %p13330_p2, %p13557_p8 }
 0x410   : > { %13459 = dma.done.wait (!%p13327_p3), %s11934_s9, 12288  }
 0x411   : > { %13461 = vsyncadd (!%p13327_p3), %s11934_s9, 4294955008  ;;  %s16_s17 = sadd.s32 1, %s13484_s17   ;;  %s17710_s12 = smov %s13468_s13 }
 0x412   : > { %p13_p5 = scmp.ge.s32.totalorder %s16_s17, 4   ;;  %s17711_s13 = smov %s13472_s14 }
 0x413   : > { %s17712_s14 = smov %s13563_s25  ;;  %s17713_s15 = smov %s13480_s16 }
 0x414   : > { %s17714_s16 = smov %s17716_s20  ;;  %15 = sbr.rel (!%p13_p5) target bundleno = 4 (0x4), region = 102 }
 0x41b   :  { %11939 = vsyncpa [#allocation4], 1 }
 0x41c   :  { %11941 = vsyncpa [#allocation4 + $0x1], 1 }

</bundles_post_ra>
